<compile_context>
chip_gen: v7x
topology: tpu7x:2x2x1
jax: 0.10.0
libtpu: 0.0.40
codegen_flags: <defaults>
</compile_context>

<pallas_src>
import functools

import jax
import jax.numpy as jnp
from jax import lax
from jax.experimental import pallas as pl
from jax.experimental.pallas import tpu as pltpu

_EPS = 1e-5  # PyTorch BatchNorm2d default


# --------------------------------------------------------------------------
# In-kernel helpers
# --------------------------------------------------------------------------
def _tap_patch(src_ref, ki, kj, ho, wo, s):
    """(bt*ho*wo, C) input patch for 3x3 tap (ki, kj) at stride s.

    `src_ref` is a zero-halo padded (bt, rows+2, cols+2, C) VMEM scratch. For
    s > 1 the subsampling is done with lane-preserving reshapes + static
    slices, which lower cleanly on all TPU generations.
    # TODO(synk): switch the s > 1 path to strided pl.ds(..., stride=s) loads
    # once verified on all target generations (drops several relayouts/tap).
    """
    bt = src_ref.shape[0]
    c = src_ref.shape[-1]
    if s == 1:
        return src_ref[:, ki:ki + ho, kj:kj + wo, :].reshape(bt * ho * wo, c)
    slab = src_ref[:, ki:ki + s * ho, kj:kj + s * wo, :]   # (bt, s*ho, s*wo, C)
    slab = slab.reshape(bt * ho, s, s * wo, c)[:, 0:1]     # every s-th row
    slab = slab.reshape(bt * ho, s * wo, c)
    slab = slab.reshape(bt * ho * wo, s, c)[:, 0:1, :]     # every s-th col
    return slab.reshape(bt * ho * wo, c)


def _zero_halo(ref):
    """Zero only the 1-pixel halo ring of a (bt, H+2, W+2, C) padded scratch.

    The interior is fully overwritten every grid step, so a full-buffer zero
    fill (two extra store sweeps per step) is unnecessary. The ring is zeroed
    every step so correctness does not depend on program_id==0 running on the
    same core (scratch is per-TensorCore under "parallel" semantics).
    """
    bt, hp, wp, c = ref.shape
    zrow = jnp.zeros((bt, 1, wp, c), ref.dtype)
    zcol = jnp.zeros((bt, hp, 1, c), ref.dtype)
    ref[:, 0:1, :, :] = zrow
    ref[:, hp - 1:hp, :, :] = zrow
    ref[:, :, 0:1, :] = zcol
    ref[:, :, wp - 1:wp, :] = zcol


def _im2col(src_ref, col_ref, ho, wo, s):
    """Stage the nine 3x3 taps into a (bt*ho*wo, 9*C) bf16 im2col buffer.

    Column order is tap-major / channel-minor, matching the (9*C, Cout)
    weight packing, so the conv becomes ONE deep MXU matmul with K = 9*C.
    """
    c = src_ref.shape[-1]
    for t in range(9):
        col_ref[:, t * c:(t + 1) * c] = _tap_patch(
            src_ref, t // 3, t % 3, ho, wo, s)


def _basic_block_kernel(*refs, stride, has_shortcut):
    if has_shortcut:
        (x_ref, w1_ref, b1_ref, w2_ref, b2_ref, ws_ref, bs_ref,
         out_ref, xpad_ref, hpad_ref, col1_ref, col2_ref) = refs
    else:
        (x_ref, w1_ref, b1_ref, w2_ref, b2_ref,
         out_ref, xpad_ref, hpad_ref, col1_ref, col2_ref) = refs
        ws_ref = bs_ref = None

    bt, hp, wp, _ = xpad_ref.shape
    h_in, w_in = hp - 2, wp - 2
    ho, wo = hpad_ref.shape[1] - 2, hpad_ref.shape[2] - 2
    cout = w1_ref.shape[-1]

    # Halo-ring-only zeroing (no full-scratch zero fill on the store slot).
    _zero_halo(xpad_ref)
    _zero_halo(hpad_ref)

    # Stage the input tile into the padded scratch interior: the halo lives
    # on-chip, no HBM-side jnp.pad copy.
    # TODO(synk): DMA straight from HBM into this interior (memory_space=ANY +
    # pltpu.make_async_copy with a 2-deep prefetch) to drop this VMEM->VMEM
    # copy and the redundant double-buffered x block.
    xpad_ref[:, 1:h_in + 1, 1:w_in + 1, :] = x_ref[...]

    # conv1 (3x3, stride) + folded BN1 + ReLU: im2col then ONE deep matmul
    # (K = 9*Cin), bf16 operands / f32 accumulation. The intermediate stays in
    # VMEM (bf16, padded) for conv2 and never touches HBM.
    _im2col(xpad_ref, col1_ref, ho, wo, stride)
    h = jnp.dot(col1_ref[...], w1_ref[...],
                preferred_element_type=jnp.float32) + b1_ref[...]
    h = jnp.maximum(h, 0.0)                       # f32 epilogue (v5e-safe)
    hpad_ref[:, 1:ho + 1, 1:wo + 1, :] = (
        h.reshape(bt, ho, wo, cout).astype(hpad_ref.dtype))

    # conv2 (3x3, stride 1) + folded BN2: im2col then one matmul (K = 9*Cout).
    _im2col(hpad_ref, col2_ref, ho, wo, 1)
    y = jnp.dot(col2_ref[...], w2_ref[...],
                preferred_element_type=jnp.float32) + b2_ref[...]

    # Shortcut: xpad[b, 1 + s*i, 1 + s*j] == x[b, s*i, s*j] (1x1, stride s).
    xs = _tap_patch(xpad_ref, 1, 1, ho, wo, stride)
    if has_shortcut:
        sc = jnp.dot(xs, ws_ref[...],
                     preferred_element_type=jnp.float32) + bs_ref[...]
    else:
        sc = xs.astype(jnp.float32)

    out = jnp.maximum(y + sc, 0.0)                # residual add + ReLU in f32
    # TODO(synk): lane-dense (bt, ho, wo*cout) output layout for Cout < 128
    # once the minor-dim-merging value reshape is verified to lower cleanly.
    out_ref[...] = out.reshape(bt, ho, wo, cout).astype(out_ref.dtype)


# --------------------------------------------------------------------------
# Wrapper
# --------------------------------------------------------------------------
def _physical_vmem_bytes():
    try:
        return int(pltpu.get_tpu_info().vmem_capacity_bytes)
    except Exception:
        return 64 * 1024 * 1024  # conservative fallback (v7x-sized)


def _vmem_limit_bytes(bt, h, w, cin, ho, wo, cout, out_itemsize):
    m = bt * ho * wo
    x_blk = bt * h * w * cin * 2                              # bf16 input block
    out_blk = bt * ho * wo * cout * out_itemsize
    weights = (9 * cin * cout + 9 * cout * cout + cin * cout) * 2 + 3 * cout * 4
    scratch = (bt * (h + 2) * (w + 2) * cin
               + bt * (ho + 2) * (wo + 2) * cout
               + m * 9 * cin + m * 9 * cout) * 2
    temps = 4 * m * cout * 4 + m * 9 * max(cin, cout) * 2
    need = 2 * x_blk + 2 * out_blk + 2 * weights + scratch + temps
    # Generation-aware ceiling: ~75% of physical VMEM (~96 MiB on v5e/v6e's
    # 128 MiB, ~48 MiB on v7x's 64 MiB per TensorCore).
    cap = (_physical_vmem_bytes() * 3) // 4
    # TODO(synk): halo-overlapped H-row tiling (extra parallel grid axis) for
    # activations too large to fit one batch-tile per grid step.
    return int(min(max(2 * need, 32 * 1024 * 1024), cap))


def _pick_batch_tile(n, h, w, cin, ho, wo, cout):
    """Smallest divisor of n lifting the matmul M dim (bt*ho*wo) to >= 256
    (fills MXU rows on small-spatial stages) within a modest scratch budget."""
    bt = 1
    for cand in range(1, n + 1):
        if n % cand:
            continue
        foot = cand * ((h + 2) * (w + 2) * cin + (ho + 2) * (wo + 2) * cout
                       + ho * wo * 9 * (cin + cout)) * 2
        if cand > 1 and foot > 8 * 1024 * 1024:
            break
        bt = cand
        if cand * ho * wo >= 256:
            break
    return bt


def basic_block_forward_nhwc(x_nhwc, params, *, stride=1, out_dtype=None,
                             batch_tile=None):
    """Fused BasicBlock forward. Input/output NHWC (preferred for chaining).

    Set out_dtype=jnp.bfloat16 when chaining blocks to halve HBM writeback.
    """
    n, h, w, cin = x_nhwc.shape
    cout = params["w1"].shape[-1]
    if params["w1"].shape[0] != 9 * cin:
        raise ValueError("w1 must be packed as (9*Cin, Cout)")
    has_shortcut = "ws" in params
    if not has_shortcut and (stride != 1 or cin != cout):
        raise ValueError("identity shortcut requires stride == 1 and Cin == Cout")
    if stride != 1 and (h % stride or w % stride):
        # TODO(synk): support spatial extents not divisible by the stride.
        raise ValueError("stride > 1 requires H, W divisible by the stride")
    ho = (h - 1) // stride + 1
    wo = (w - 1) // stride + 1
    out_dtype = x_nhwc.dtype if out_dtype is None else out_dtype
    bt = batch_tile or _pick_batch_tile(n, h, w, cin, ho, wo, cout)
    if n % bt:
        bt = 1
    m = bt * ho * wo

    x_bf = x_nhwc.astype(jnp.bfloat16)
    inputs = [x_bf, params["w1"], params["b1"], params["w2"], params["b2"]]
    # TODO(synk): single-buffer the grid-invariant weight/bias operands
    # (pipeline_mode=pl.Buffered(1)) to reclaim weight-duplication VMEM on v7x.
    in_specs = [
        pl.BlockSpec((bt, h, w, cin), lambda i: (i, 0, 0, 0)),
        pl.BlockSpec((9 * cin, cout), lambda i: (0, 0)),
        pl.BlockSpec((1, cout), lambda i: (0, 0)),
        pl.BlockSpec((9 * cout, cout), lambda i: (0, 0)),
        pl.BlockSpec((1, cout), lambda i: (0, 0)),
    ]
    if has_shortcut:
        inputs += [params["ws"], params["bs"]]
        in_specs += [pl.BlockSpec((cin, cout), lambda i: (0, 0)),
                     pl.BlockSpec((1, cout), lambda i: (0, 0))]

    grid_spec = pltpu.PrefetchScalarGridSpec(
        num_scalar_prefetch=0,
        grid=(n // bt,),
        in_specs=in_specs,
        out_specs=pl.BlockSpec((bt, ho, wo, cout), lambda i: (i, 0, 0, 0)),
        scratch_shapes=[pltpu.VMEM((bt, h + 2, w + 2, cin), jnp.bfloat16),
                        pltpu.VMEM((bt, ho + 2, wo + 2, cout), jnp.bfloat16),
                        pltpu.VMEM((m, 9 * cin), jnp.bfloat16),
                        pltpu.VMEM((m, 9 * cout), jnp.bfloat16)],
    )
    kernel = functools.partial(_basic_block_kernel, stride=stride,
                               has_shortcut=has_shortcut)
    return pl.pallas_call(
        kernel,
        out_shape=jax.ShapeDtypeStruct((n, ho, wo, cout), out_dtype),
        grid_spec=grid_spec,
        compiler_params=pltpu.CompilerParams(
            dimension_semantics=("parallel",),
            vmem_limit_bytes=_vmem_limit_bytes(
                bt, h, w, cin, ho, wo, cout, jnp.dtype(out_dtype).itemsize)),
    )(*inputs)


def basic_block_forward(x_nchw, params, *, stride=1):
    """PyTorch-style NCHW interface (transposes only at the block boundary)."""
    x = jnp.transpose(x_nchw, (0, 2, 3, 1))
    out = basic_block_forward_nhwc(x, params, stride=stride)
    return jnp.transpose(out, (0, 3, 1, 2))


# --------------------------------------------------------------------------
# Param prep: fold eval-mode BN into the conv weights, repack for the kernel.
# --------------------------------------------------------------------------
def _fold_bn(gamma, beta, mean, var):
    scale = gamma / jnp.sqrt(var + _EPS)
    return scale, beta - mean * scale


def make_basic_block_params(raw, compute_dtype=jnp.bfloat16):
    def pack3x3(w, scale):
        # (Cout, Cin, 3, 3) -> (9*Cin, Cout): tap-major / channel-minor K for
        # the im2col matmul, with the BN scale folded into the output channels.
        w = jnp.transpose(w, (2, 3, 1, 0)) * scale[None, None, None, :]
        kh, kw, ci, co = w.shape
        return w.reshape(kh * kw * ci, co).astype(compute_dtype)

    s1, b1 = _fold_bn(raw["g1"], raw["b1"], raw["m1"], raw["v1"])
    s2, b2 = _fold_bn(raw["g2"], raw["b2"], raw["m2"], raw["v2"])
    params = {"w1": pack3x3(raw["w1"], s1),
              "b1": b1.reshape(1, -1).astype(jnp.float32),
              "w2": pack3x3(raw["w2"], s2),
              "b2": b2.reshape(1, -1).astype(jnp.float32)}
    if "ws" in raw:
        ss, bs = _fold_bn(raw["gs"], raw["bs"], raw["ms"], raw["vs"])
        ws = jnp.transpose(raw["ws"][:, :, 0, 0], (1, 0)) * ss[None, :]
        params["ws"] = ws.astype(compute_dtype)
        params["bs"] = bs.reshape(1, -1).astype(jnp.float32)
    return params


# --------------------------------------------------------------------------
# References (correctness checks only)
# --------------------------------------------------------------------------
def _conv_ref(inp, w, s, pad):
    return lax.conv_general_dilated(
        inp, w, (s, s), ((pad, pad), (pad, pad)),
        dimension_numbers=("NCHW", "OIHW", "NCHW"))


def _ref_forward(x, raw, *, stride, has_shortcut):
    """Exact f32 PyTorch semantics."""
    def bn(t, g, b, m, v):
        g, b, m, v = (u[None, :, None, None] for u in (g, b, m, v))
        return (t - m) / jnp.sqrt(v + _EPS) * g + b

    h = jax.nn.relu(bn(_conv_ref(x, raw["w1"], stride, 1),
                       raw["g1"], raw["b1"], raw["m1"], raw["v1"]))
    h = bn(_conv_ref(h, raw["w2"], 1, 1),
           raw["g2"], raw["b2"], raw["m2"], raw["v2"])
    if has_shortcut:
        sc = bn(_conv_ref(x, raw["ws"], stride, 0),
                raw["gs"], raw["bs"], raw["ms"], raw["vs"])
    else:
        sc = x
    return jax.nn.relu(h + sc)


def _ref_forward_bf16(x, raw, *, stride, has_shortcut):
    """Reference mirroring the kernel numerics (bf16 inputs/weights, f32 acc)."""
    cd = jnp.bfloat16

    def fold(w, g, b, m, v):
        scale = g / jnp.sqrt(v + _EPS)
        return ((w * scale[:, None, None, None]).astype(cd).astype(jnp.float32),
                (b - m * scale)[None, :, None, None])

    xq = x.astype(cd).astype(jnp.float32)
    w1, b1 = fold(raw["w1"], raw["g1"], raw["b1"], raw["m1"], raw["v1"])
    w2, b2 = fold(raw["w2"], raw["g2"], raw["b2"], raw["m2"], raw["v2"])
    h = jax.nn.relu(_conv_ref(xq, w1, stride, 1) + b1)
    h = h.astype(cd).astype(jnp.float32)
    y = _conv_ref(h, w2, 1, 1) + b2
    if has_shortcut:
        ws, bs = fold(raw["ws"], raw["gs"], raw["bs"], raw["ms"], raw["vs"])
        sc = _conv_ref(xq, ws, stride, 0) + bs
    else:
        sc = xq
    return jax.nn.relu(y + sc)


# --------------------------------------------------------------------------
if __name__ == "__main__":
    def make_raw(key, cin, cout, with_shortcut):
        ks = jax.random.split(key, 6)

        def bn_stats(k, c):
            k0, k1, k2, k3 = jax.random.split(k, 4)
            return (0.5 + jax.random.uniform(k0, (c,), jnp.float32),   # gamma
                    0.1 * jax.random.normal(k1, (c,), jnp.float32),    # beta
                    0.1 * jax.random.normal(k2, (c,), jnp.float32),    # mean
                    0.5 + jax.random.uniform(k3, (c,), jnp.float32))   # var

        raw = {"w1": 0.1 * jax.random.normal(ks[0], (cout, cin, 3, 3), jnp.float32),
               "w2": 0.1 * jax.random.normal(ks[1], (cout, cout, 3, 3), jnp.float32)}
        raw["g1"], raw["b1"], raw["m1"], raw["v1"] = bn_stats(ks[2], cout)
        raw["g2"], raw["b2"], raw["m2"], raw["v2"] = bn_stats(ks[3], cout)
        if with_shortcut:
            raw["ws"] = 0.1 * jax.random.normal(ks[4], (cout, cin, 1, 1),
                                                jnp.float32)
            raw["gs"], raw["bs"], raw["ms"], raw["vs"] = bn_stats(ks[5], cout)
        return raw

    key = jax.random.PRNGKey(0)
    N, H, W = 2, 16, 16
    configs = [  # (Cin, Cout, stride)
        (4, 8, 1),   # projection shortcut (1x1 conv + BN), stride 1
        (8, 8, 1),   # identity shortcut
        (4, 8, 2),   # projection shortcut, stride 2 (exercises batch_tile=2)
    ]
    for idx, (cin, cout, stride) in enumerate(configs):
        kx, kp = jax.random.split(jax.random.fold_in(key, idx))
        x = jax.random.normal(kx, (N, cin, H, W), jnp.float32)
        has_sc = (stride != 1) or (cin != cout)
        raw = make_raw(kp, cin, cout, has_sc)
        params = make_basic_block_params(raw)

        out = jax.block_until_ready(basic_block_forward(x, params, stride=stride))

        ho = (H - 1) // stride + 1
        wo = (W - 1) // stride + 1
        assert out.shape == (N, cout, ho, wo), (out.shape, (N, cout, ho, wo))

        ref_mirror = _ref_forward_bf16(x, raw, stride=stride, has_shortcut=has_sc)
        assert jnp.allclose(out, ref_mirror, atol=5e-3, rtol=5e-3), (
            "mirrored-precision check failed", idx,
            float(jnp.max(jnp.abs(out - ref_mirror))))

        ref_f32 = _ref_forward(x, raw, stride=stride, has_shortcut=has_sc)
        assert jnp.allclose(out, ref_f32, atol=0.15, rtol=0.1), (
            "f32 semantics check failed", idx,
            float(jnp.max(jnp.abs(out - ref_f32))))

    print("KERNEL_OK")
</pallas_src>

<mosaic_0001>
module attributes {stable_mosaic.version = 11 : i64} {
  func.func @_basic_block_kernel(%arg0: i32, %arg1: memref<1x16x16x4xbf16, #tpu.memory_space<vmem>>, %arg2: memref<36x8xbf16, #tpu.memory_space<vmem>>, %arg3: memref<1x8xf32, #tpu.memory_space<vmem>>, %arg4: memref<72x8xbf16, #tpu.memory_space<vmem>>, %arg5: memref<1x8xf32, #tpu.memory_space<vmem>>, %arg6: memref<4x8xbf16, #tpu.memory_space<vmem>>, %arg7: memref<1x8xf32, #tpu.memory_space<vmem>>, %arg8: memref<1x16x16x8xf32, #tpu.memory_space<vmem>>, %arg9: memref<1x18x18x4xbf16, #tpu.memory_space<vmem>>, %arg10: memref<1x18x18x8xbf16, #tpu.memory_space<vmem>>, %arg11: memref<256x36xbf16, #tpu.memory_space<vmem>>, %arg12: memref<256x72xbf16, #tpu.memory_space<vmem>>) attributes {dimension_semantics = [#tpu.dimension_semantics<parallel>], iteration_bounds = array<i64: 2>, scalar_prefetch = 0 : i64, scratch_operands = 4 : i64, tpu.core_type = #tpu.core_type<tc>, window_params = [{transform_indices = @transform_0, window_bounds = array<i64: 1, 16, 16, 4>}, {pipeline_mode = #tpu.pipeline_mode<synchronous>, transform_indices = @transform_1, window_bounds = array<i64: 36, 8>}, {pipeline_mode = #tpu.pipeline_mode<synchronous>, transform_indices = @transform_2, window_bounds = array<i64: 1, 8>}, {pipeline_mode = #tpu.pipeline_mode<synchronous>, transform_indices = @transform_3, window_bounds = array<i64: 72, 8>}, {pipeline_mode = #tpu.pipeline_mode<synchronous>, transform_indices = @transform_4, window_bounds = array<i64: 1, 8>}, {pipeline_mode = #tpu.pipeline_mode<synchronous>, transform_indices = @transform_5, window_bounds = array<i64: 4, 8>}, {pipeline_mode = #tpu.pipeline_mode<synchronous>, transform_indices = @transform_6, window_bounds = array<i64: 1, 8>}, {transform_indices = @transform_7, window_bounds = array<i64: 1, 16, 16, 8>}]} {
    %cst = arith.constant 0.000000e+00 : bf16
    %0 = vector.broadcast %cst : bf16 to vector<1x1x18x4xbf16>
    %cst_0 = arith.constant 0.000000e+00 : bf16
    %1 = vector.broadcast %cst_0 : bf16 to vector<1x18x1x4xbf16>
    %c0 = arith.constant 0 : index
    %c0_1 = arith.constant 0 : index
    %c0_2 = arith.constant 0 : index
    %c0_3 = arith.constant 0 : index
    %2 = vector.load %arg9[%c0, %c0_1, %c0_2, %c0_3] : memref<1x18x18x4xbf16, #tpu.memory_space<vmem>>, vector<1x1x18x4xbf16>
    tpu.vector_store %arg9[%c0, %c0_1, %c0_2, %c0_3], %0 {strides = array<i32>} : memref<1x18x18x4xbf16, #tpu.memory_space<vmem>>, vector<1x1x18x4xbf16>,
    %c0_4 = arith.constant 0 : index
    %c17 = arith.constant 17 : index
    %c0_5 = arith.constant 0 : index
    %c0_6 = arith.constant 0 : index
    %3 = vector.load %arg9[%c0_4, %c17, %c0_5, %c0_6] : memref<1x18x18x4xbf16, #tpu.memory_space<vmem>>, vector<1x1x18x4xbf16>
    tpu.vector_store %arg9[%c0_4, %c17, %c0_5, %c0_6], %0 {strides = array<i32>} : memref<1x18x18x4xbf16, #tpu.memory_space<vmem>>, vector<1x1x18x4xbf16>,
    %c0_7 = arith.constant 0 : index
    %c0_8 = arith.constant 0 : index
    %c0_9 = arith.constant 0 : index
    %c0_10 = arith.constant 0 : index
    %4 = vector.load %arg9[%c0_7, %c0_8, %c0_9, %c0_10] : memref<1x18x18x4xbf16, #tpu.memory_space<vmem>>, vector<1x18x1x4xbf16>
    tpu.vector_store %arg9[%c0_7, %c0_8, %c0_9, %c0_10], %1 {strides = array<i32>} : memref<1x18x18x4xbf16, #tpu.memory_space<vmem>>, vector<1x18x1x4xbf16>,
    %c0_11 = arith.constant 0 : index
    %c0_12 = arith.constant 0 : index
    %c17_13 = arith.constant 17 : index
    %c0_14 = arith.constant 0 : index
    %5 = vector.load %arg9[%c0_11, %c0_12, %c17_13, %c0_14] : memref<1x18x18x4xbf16, #tpu.memory_space<vmem>>, vector<1x18x1x4xbf16>
    tpu.vector_store %arg9[%c0_11, %c0_12, %c17_13, %c0_14], %1 {strides = array<i32>} : memref<1x18x18x4xbf16, #tpu.memory_space<vmem>>, vector<1x18x1x4xbf16>,
    %cst_15 = arith.constant 0.000000e+00 : bf16
    %6 = vector.broadcast %cst_15 : bf16 to vector<1x1x18x8xbf16>
    %cst_16 = arith.constant 0.000000e+00 : bf16
    %7 = vector.broadcast %cst_16 : bf16 to vector<1x18x1x8xbf16>
    %c0_17 = arith.constant 0 : index
    %c0_18 = arith.constant 0 : index
    %c0_19 = arith.constant 0 : index
    %c0_20 = arith.constant 0 : index
    %8 = vector.load %arg10[%c0_17, %c0_18, %c0_19, %c0_20] : memref<1x18x18x8xbf16, #tpu.memory_space<vmem>>, vector<1x1x18x8xbf16>
    tpu.vector_store %arg10[%c0_17, %c0_18, %c0_19, %c0_20], %6 {strides = array<i32>} : memref<1x18x18x8xbf16, #tpu.memory_space<vmem>>, vector<1x1x18x8xbf16>,
    %c0_21 = arith.constant 0 : index
    %c17_22 = arith.constant 17 : index
    %c0_23 = arith.constant 0 : index
    %c0_24 = arith.constant 0 : index
    %9 = vector.load %arg10[%c0_21, %c17_22, %c0_23, %c0_24] : memref<1x18x18x8xbf16, #tpu.memory_space<vmem>>, vector<1x1x18x8xbf16>
    tpu.vector_store %arg10[%c0_21, %c17_22, %c0_23, %c0_24], %6 {strides = array<i32>} : memref<1x18x18x8xbf16, #tpu.memory_space<vmem>>, vector<1x1x18x8xbf16>,
    %c0_25 = arith.constant 0 : index
    %c0_26 = arith.constant 0 : index
    %c0_27 = arith.constant 0 : index
    %c0_28 = arith.constant 0 : index
    %10 = vector.load %arg10[%c0_25, %c0_26, %c0_27, %c0_28] : memref<1x18x18x8xbf16, #tpu.memory_space<vmem>>, vector<1x18x1x8xbf16>
    tpu.vector_store %arg10[%c0_25, %c0_26, %c0_27, %c0_28], %7 {strides = array<i32>} : memref<1x18x18x8xbf16, #tpu.memory_space<vmem>>, vector<1x18x1x8xbf16>,
    %c0_29 = arith.constant 0 : index
    %c0_30 = arith.constant 0 : index
    %c17_31 = arith.constant 17 : index
    %c0_32 = arith.constant 0 : index
    %11 = vector.load %arg10[%c0_29, %c0_30, %c17_31, %c0_32] : memref<1x18x18x8xbf16, #tpu.memory_space<vmem>>, vector<1x18x1x8xbf16>
    tpu.vector_store %arg10[%c0_29, %c0_30, %c17_31, %c0_32], %7 {strides = array<i32>} : memref<1x18x18x8xbf16, #tpu.memory_space<vmem>>, vector<1x18x1x8xbf16>,
    %c0_33 = arith.constant 0 : index
    %c0_34 = arith.constant 0 : index
    %c0_35 = arith.constant 0 : index
    %c0_36 = arith.constant 0 : index
    %12 = vector.load %arg1[%c0_33, %c0_34, %c0_35, %c0_36] : memref<1x16x16x4xbf16, #tpu.memory_space<vmem>>, vector<1x16x16x4xbf16>
    %c0_37 = arith.constant 0 : index
    %c1 = arith.constant 1 : index
    %c1_38 = arith.constant 1 : index
    %c0_39 = arith.constant 0 : index
    %13 = vector.load %arg9[%c0_37, %c1, %c1_38, %c0_39] : memref<1x18x18x4xbf16, #tpu.memory_space<vmem>>, vector<1x16x16x4xbf16>
    tpu.vector_store %arg9[%c0_37, %c1, %c1_38, %c0_39], %12 {strides = array<i32>} : memref<1x18x18x4xbf16, #tpu.memory_space<vmem>>, vector<1x16x16x4xbf16>,
    %c0_40 = arith.constant 0 : index
    %c0_41 = arith.constant 0 : index
    %c0_42 = arith.constant 0 : index
    %c0_43 = arith.constant 0 : index
    %14 = vector.load %arg9[%c0_40, %c0_41, %c0_42, %c0_43] : memref<1x18x18x4xbf16, #tpu.memory_space<vmem>>, vector<1x16x16x4xbf16>
    %15 = vector.shape_cast %14 : vector<1x16x16x4xbf16> to vector<256x4xbf16>
    %c0_44 = arith.constant 0 : index
    %c0_45 = arith.constant 0 : index
    %16 = vector.load %arg11[%c0_44, %c0_45] : memref<256x36xbf16, #tpu.memory_space<vmem>>, vector<256x4xbf16>
    tpu.vector_store %arg11[%c0_44, %c0_45], %15 {strides = array<i32>} : memref<256x36xbf16, #tpu.memory_space<vmem>>, vector<256x4xbf16>,
    %c0_46 = arith.constant 0 : index
    %c0_47 = arith.constant 0 : index
    %c1_48 = arith.constant 1 : index
    %c0_49 = arith.constant 0 : index
    %17 = vector.load %arg9[%c0_46, %c0_47, %c1_48, %c0_49] : memref<1x18x18x4xbf16, #tpu.memory_space<vmem>>, vector<1x16x16x4xbf16>
    %18 = vector.shape_cast %17 : vector<1x16x16x4xbf16> to vector<256x4xbf16>
    %c0_50 = arith.constant 0 : index
    %c4 = arith.constant 4 : index
    %19 = vector.load %arg11[%c0_50, %c4] : memref<256x36xbf16, #tpu.memory_space<vmem>>, vector<256x4xbf16>
    tpu.vector_store %arg11[%c0_50, %c4], %18 {strides = array<i32>} : memref<256x36xbf16, #tpu.memory_space<vmem>>, vector<256x4xbf16>,
    %c0_51 = arith.constant 0 : index
    %c0_52 = arith.constant 0 : index
    %c2 = arith.constant 2 : index
    %c0_53 = arith.constant 0 : index
    %20 = vector.load %arg9[%c0_51, %c0_52, %c2, %c0_53] : memref<1x18x18x4xbf16, #tpu.memory_space<vmem>>, vector<1x16x16x4xbf16>
    %21 = vector.shape_cast %20 : vector<1x16x16x4xbf16> to vector<256x4xbf16>
    %c0_54 = arith.constant 0 : index
    %c8 = arith.constant 8 : index
    %22 = vector.load %arg11[%c0_54, %c8] : memref<256x36xbf16, #tpu.memory_space<vmem>>, vector<256x4xbf16>
    tpu.vector_store %arg11[%c0_54, %c8], %21 {strides = array<i32>} : memref<256x36xbf16, #tpu.memory_space<vmem>>, vector<256x4xbf16>,
    %c0_55 = arith.constant 0 : index
    %c1_56 = arith.constant 1 : index
    %c0_57 = arith.constant 0 : index
    %c0_58 = arith.constant 0 : index
    %23 = vector.load %arg9[%c0_55, %c1_56, %c0_57, %c0_58] : memref<1x18x18x4xbf16, #tpu.memory_space<vmem>>, vector<1x16x16x4xbf16>
    %24 = vector.shape_cast %23 : vector<1x16x16x4xbf16> to vector<256x4xbf16>
    %c0_59 = arith.constant 0 : index
    %c12 = arith.constant 12 : index
    %25 = vector.load %arg11[%c0_59, %c12] : memref<256x36xbf16, #tpu.memory_space<vmem>>, vector<256x4xbf16>
    tpu.vector_store %arg11[%c0_59, %c12], %24 {strides = array<i32>} : memref<256x36xbf16, #tpu.memory_space<vmem>>, vector<256x4xbf16>,
    %c0_60 = arith.constant 0 : index
    %c1_61 = arith.constant 1 : index
    %c1_62 = arith.constant 1 : index
    %c0_63 = arith.constant 0 : index
    %26 = vector.load %arg9[%c0_60, %c1_61, %c1_62, %c0_63] : memref<1x18x18x4xbf16, #tpu.memory_space<vmem>>, vector<1x16x16x4xbf16>
    %27 = vector.shape_cast %26 : vector<1x16x16x4xbf16> to vector<256x4xbf16>
    %c0_64 = arith.constant 0 : index
    %c16 = arith.constant 16 : index
    %28 = vector.load %arg11[%c0_64, %c16] : memref<256x36xbf16, #tpu.memory_space<vmem>>, vector<256x4xbf16>
    tpu.vector_store %arg11[%c0_64, %c16], %27 {strides = array<i32>} : memref<256x36xbf16, #tpu.memory_space<vmem>>, vector<256x4xbf16>,
    %c0_65 = arith.constant 0 : index
    %c1_66 = arith.constant 1 : index
    %c2_67 = arith.constant 2 : index
    %c0_68 = arith.constant 0 : index
    %29 = vector.load %arg9[%c0_65, %c1_66, %c2_67, %c0_68] : memref<1x18x18x4xbf16, #tpu.memory_space<vmem>>, vector<1x16x16x4xbf16>
    %30 = vector.shape_cast %29 : vector<1x16x16x4xbf16> to vector<256x4xbf16>
    %c0_69 = arith.constant 0 : index
    %c20 = arith.constant 20 : index
    %31 = vector.load %arg11[%c0_69, %c20] : memref<256x36xbf16, #tpu.memory_space<vmem>>, vector<256x4xbf16>
    tpu.vector_store %arg11[%c0_69, %c20], %30 {strides = array<i32>} : memref<256x36xbf16, #tpu.memory_space<vmem>>, vector<256x4xbf16>,
    %c0_70 = arith.constant 0 : index
    %c2_71 = arith.constant 2 : index
    %c0_72 = arith.constant 0 : index
    %c0_73 = arith.constant 0 : index
    %32 = vector.load %arg9[%c0_70, %c2_71, %c0_72, %c0_73] : memref<1x18x18x4xbf16, #tpu.memory_space<vmem>>, vector<1x16x16x4xbf16>
    %33 = vector.shape_cast %32 : vector<1x16x16x4xbf16> to vector<256x4xbf16>
    %c0_74 = arith.constant 0 : index
    %c24 = arith.constant 24 : index
    %34 = vector.load %arg11[%c0_74, %c24] : memref<256x36xbf16, #tpu.memory_space<vmem>>, vector<256x4xbf16>
    tpu.vector_store %arg11[%c0_74, %c24], %33 {strides = array<i32>} : memref<256x36xbf16, #tpu.memory_space<vmem>>, vector<256x4xbf16>,
    %c0_75 = arith.constant 0 : index
    %c2_76 = arith.constant 2 : index
    %c1_77 = arith.constant 1 : index
    %c0_78 = arith.constant 0 : index
    %35 = vector.load %arg9[%c0_75, %c2_76, %c1_77, %c0_78] : memref<1x18x18x4xbf16, #tpu.memory_space<vmem>>, vector<1x16x16x4xbf16>
    %36 = vector.shape_cast %35 : vector<1x16x16x4xbf16> to vector<256x4xbf16>
    %c0_79 = arith.constant 0 : index
    %c28 = arith.constant 28 : index
    %37 = vector.load %arg11[%c0_79, %c28] : memref<256x36xbf16, #tpu.memory_space<vmem>>, vector<256x4xbf16>
    tpu.vector_store %arg11[%c0_79, %c28], %36 {strides = array<i32>} : memref<256x36xbf16, #tpu.memory_space<vmem>>, vector<256x4xbf16>,
    %c0_80 = arith.constant 0 : index
    %c2_81 = arith.constant 2 : index
    %c2_82 = arith.constant 2 : index
    %c0_83 = arith.constant 0 : index
    %38 = vector.load %arg9[%c0_80, %c2_81, %c2_82, %c0_83] : memref<1x18x18x4xbf16, #tpu.memory_space<vmem>>, vector<1x16x16x4xbf16>
    %39 = vector.shape_cast %38 : vector<1x16x16x4xbf16> to vector<256x4xbf16>
    %c0_84 = arith.constant 0 : index
    %c32 = arith.constant 32 : index
    %40 = vector.load %arg11[%c0_84, %c32] : memref<256x36xbf16, #tpu.memory_space<vmem>>, vector<256x4xbf16>
    tpu.vector_store %arg11[%c0_84, %c32], %39 {strides = array<i32>} : memref<256x36xbf16, #tpu.memory_space<vmem>>, vector<256x4xbf16>,
    %c0_85 = arith.constant 0 : index
    %c0_86 = arith.constant 0 : index
    %41 = vector.load %arg11[%c0_85, %c0_86] : memref<256x36xbf16, #tpu.memory_space<vmem>>, vector<256x36xbf16>
    %c0_87 = arith.constant 0 : index
    %c0_88 = arith.constant 0 : index
    %42 = vector.load %arg2[%c0_87, %c0_88] : memref<36x8xbf16, #tpu.memory_space<vmem>>, vector<36x8xbf16>
    %cst_89 = arith.constant dense<0.000000e+00> : vector<256x8xf32>
    %43 = tpu.matmul %41, %42, %cst_89 {dimension_numbers = #tpu.dot_dimension_numbers<[1], [0], [0], [1], [0, 0, 1, 1], [], []>} : vector<256x36xbf16>, vector<36x8xbf16>, vector<256x8xf32> -> vector<256x8xf32>
    %c0_90 = arith.constant 0 : index
    %c0_91 = arith.constant 0 : index
    %44 = vector.load %arg3[%c0_90, %c0_91] : memref<1x8xf32, #tpu.memory_space<vmem>>, vector<1x8xf32>
    %45 = vector.broadcast %44 : vector<1x8xf32> to vector<256x8xf32>
    %46 = arith.addf %43, %45 : vector<256x8xf32>
    %cst_92 = arith.constant 0.000000e+00 : f32
    %47 = vector.broadcast %cst_92 : f32 to vector<256x8xf32>
    %48 = arith.maximumf %46, %47 : vector<256x8xf32>
    %49 = vector.shape_cast %48 : vector<256x8xf32> to vector<1x16x16x8xf32>
    %50 = arith.truncf %49 : vector<1x16x16x8xf32> to vector<1x16x16x8xbf16>
    %c0_93 = arith.constant 0 : index
    %c1_94 = arith.constant 1 : index
    %c1_95 = arith.constant 1 : index
    %c0_96 = arith.constant 0 : index
    %51 = vector.load %arg10[%c0_93, %c1_94, %c1_95, %c0_96] : memref<1x18x18x8xbf16, #tpu.memory_space<vmem>>, vector<1x16x16x8xbf16>
    tpu.vector_store %arg10[%c0_93, %c1_94, %c1_95, %c0_96], %50 {strides = array<i32>} : memref<1x18x18x8xbf16, #tpu.memory_space<vmem>>, vector<1x16x16x8xbf16>,
    %c0_97 = arith.constant 0 : index
    %c0_98 = arith.constant 0 : index
    %c0_99 = arith.constant 0 : index
    %c0_100 = arith.constant 0 : index
    %52 = vector.load %arg10[%c0_97, %c0_98, %c0_99, %c0_100] : memref<1x18x18x8xbf16, #tpu.memory_space<vmem>>, vector<1x16x16x8xbf16>
    %53 = vector.shape_cast %52 : vector<1x16x16x8xbf16> to vector<256x8xbf16>
    %c0_101 = arith.constant 0 : index
    %c0_102 = arith.constant 0 : index
    %54 = vector.load %arg12[%c0_101, %c0_102] : memref<256x72xbf16, #tpu.memory_space<vmem>>, vector<256x8xbf16>
    tpu.vector_store %arg12[%c0_101, %c0_102], %53 {strides = array<i32>} : memref<256x72xbf16, #tpu.memory_space<vmem>>, vector<256x8xbf16>,
    %c0_103 = arith.constant 0 : index
    %c0_104 = arith.constant 0 : index
    %c1_105 = arith.constant 1 : index
    %c0_106 = arith.constant 0 : index
    %55 = vector.load %arg10[%c0_103, %c0_104, %c1_105, %c0_106] : memref<1x18x18x8xbf16, #tpu.memory_space<vmem>>, vector<1x16x16x8xbf16>
    %56 = vector.shape_cast %55 : vector<1x16x16x8xbf16> to vector<256x8xbf16>
    %c0_107 = arith.constant 0 : index
    %c8_108 = arith.constant 8 : index
    %57 = vector.load %arg12[%c0_107, %c8_108] : memref<256x72xbf16, #tpu.memory_space<vmem>>, vector<256x8xbf16>
    tpu.vector_store %arg12[%c0_107, %c8_108], %56 {strides = array<i32>} : memref<256x72xbf16, #tpu.memory_space<vmem>>, vector<256x8xbf16>,
    %c0_109 = arith.constant 0 : index
    %c0_110 = arith.constant 0 : index
    %c2_111 = arith.constant 2 : index
    %c0_112 = arith.constant 0 : index
    %58 = vector.load %arg10[%c0_109, %c0_110, %c2_111, %c0_112] : memref<1x18x18x8xbf16, #tpu.memory_space<vmem>>, vector<1x16x16x8xbf16>
    %59 = vector.shape_cast %58 : vector<1x16x16x8xbf16> to vector<256x8xbf16>
    %c0_113 = arith.constant 0 : index
    %c16_114 = arith.constant 16 : index
    %60 = vector.load %arg12[%c0_113, %c16_114] : memref<256x72xbf16, #tpu.memory_space<vmem>>, vector<256x8xbf16>
    tpu.vector_store %arg12[%c0_113, %c16_114], %59 {strides = array<i32>} : memref<256x72xbf16, #tpu.memory_space<vmem>>, vector<256x8xbf16>,
    %c0_115 = arith.constant 0 : index
    %c1_116 = arith.constant 1 : index
    %c0_117 = arith.constant 0 : index
    %c0_118 = arith.constant 0 : index
    %61 = vector.load %arg10[%c0_115, %c1_116, %c0_117, %c0_118] : memref<1x18x18x8xbf16, #tpu.memory_space<vmem>>, vector<1x16x16x8xbf16>
    %62 = vector.shape_cast %61 : vector<1x16x16x8xbf16> to vector<256x8xbf16>
    %c0_119 = arith.constant 0 : index
    %c24_120 = arith.constant 24 : index
    %63 = vector.load %arg12[%c0_119, %c24_120] : memref<256x72xbf16, #tpu.memory_space<vmem>>, vector<256x8xbf16>
    tpu.vector_store %arg12[%c0_119, %c24_120], %62 {strides = array<i32>} : memref<256x72xbf16, #tpu.memory_space<vmem>>, vector<256x8xbf16>,
    %c0_121 = arith.constant 0 : index
    %c1_122 = arith.constant 1 : index
    %c1_123 = arith.constant 1 : index
    %c0_124 = arith.constant 0 : index
    %64 = vector.load %arg10[%c0_121, %c1_122, %c1_123, %c0_124] : memref<1x18x18x8xbf16, #tpu.memory_space<vmem>>, vector<1x16x16x8xbf16>
    %65 = vector.shape_cast %64 : vector<1x16x16x8xbf16> to vector<256x8xbf16>
    %c0_125 = arith.constant 0 : index
    %c32_126 = arith.constant 32 : index
    %66 = vector.load %arg12[%c0_125, %c32_126] : memref<256x72xbf16, #tpu.memory_space<vmem>>, vector<256x8xbf16>
    tpu.vector_store %arg12[%c0_125, %c32_126], %65 {strides = array<i32>} : memref<256x72xbf16, #tpu.memory_space<vmem>>, vector<256x8xbf16>,
    %c0_127 = arith.constant 0 : index
    %c1_128 = arith.constant 1 : index
    %c2_129 = arith.constant 2 : index
    %c0_130 = arith.constant 0 : index
    %67 = vector.load %arg10[%c0_127, %c1_128, %c2_129, %c0_130] : memref<1x18x18x8xbf16, #tpu.memory_space<vmem>>, vector<1x16x16x8xbf16>
    %68 = vector.shape_cast %67 : vector<1x16x16x8xbf16> to vector<256x8xbf16>
    %c0_131 = arith.constant 0 : index
    %c40 = arith.constant 40 : index
    %69 = vector.load %arg12[%c0_131, %c40] : memref<256x72xbf16, #tpu.memory_space<vmem>>, vector<256x8xbf16>
    tpu.vector_store %arg12[%c0_131, %c40], %68 {strides = array<i32>} : memref<256x72xbf16, #tpu.memory_space<vmem>>, vector<256x8xbf16>,
    %c0_132 = arith.constant 0 : index
    %c2_133 = arith.constant 2 : index
    %c0_134 = arith.constant 0 : index
    %c0_135 = arith.constant 0 : index
    %70 = vector.load %arg10[%c0_132, %c2_133, %c0_134, %c0_135] : memref<1x18x18x8xbf16, #tpu.memory_space<vmem>>, vector<1x16x16x8xbf16>
    %71 = vector.shape_cast %70 : vector<1x16x16x8xbf16> to vector<256x8xbf16>
    %c0_136 = arith.constant 0 : index
    %c48 = arith.constant 48 : index
    %72 = vector.load %arg12[%c0_136, %c48] : memref<256x72xbf16, #tpu.memory_space<vmem>>, vector<256x8xbf16>
    tpu.vector_store %arg12[%c0_136, %c48], %71 {strides = array<i32>} : memref<256x72xbf16, #tpu.memory_space<vmem>>, vector<256x8xbf16>,
    %c0_137 = arith.constant 0 : index
    %c2_138 = arith.constant 2 : index
    %c1_139 = arith.constant 1 : index
    %c0_140 = arith.constant 0 : index
    %73 = vector.load %arg10[%c0_137, %c2_138, %c1_139, %c0_140] : memref<1x18x18x8xbf16, #tpu.memory_space<vmem>>, vector<1x16x16x8xbf16>
    %74 = vector.shape_cast %73 : vector<1x16x16x8xbf16> to vector<256x8xbf16>
    %c0_141 = arith.constant 0 : index
    %c56 = arith.constant 56 : index
    %75 = vector.load %arg12[%c0_141, %c56] : memref<256x72xbf16, #tpu.memory_space<vmem>>, vector<256x8xbf16>
    tpu.vector_store %arg12[%c0_141, %c56], %74 {strides = array<i32>} : memref<256x72xbf16, #tpu.memory_space<vmem>>, vector<256x8xbf16>,
    %c0_142 = arith.constant 0 : index
    %c2_143 = arith.constant 2 : index
    %c2_144 = arith.constant 2 : index
    %c0_145 = arith.constant 0 : index
    %76 = vector.load %arg10[%c0_142, %c2_143, %c2_144, %c0_145] : memref<1x18x18x8xbf16, #tpu.memory_space<vmem>>, vector<1x16x16x8xbf16>
    %77 = vector.shape_cast %76 : vector<1x16x16x8xbf16> to vector<256x8xbf16>
    %c0_146 = arith.constant 0 : index
    %c64 = arith.constant 64 : index
    %78 = vector.load %arg12[%c0_146, %c64] : memref<256x72xbf16, #tpu.memory_space<vmem>>, vector<256x8xbf16>
    tpu.vector_store %arg12[%c0_146, %c64], %77 {strides = array<i32>} : memref<256x72xbf16, #tpu.memory_space<vmem>>, vector<256x8xbf16>,
    %c0_147 = arith.constant 0 : index
    %c0_148 = arith.constant 0 : index
    %79 = vector.load %arg12[%c0_147, %c0_148] : memref<256x72xbf16, #tpu.memory_space<vmem>>, vector<256x72xbf16>
    %c0_149 = arith.constant 0 : index
    %c0_150 = arith.constant 0 : index
    %80 = vector.load %arg4[%c0_149, %c0_150] : memref<72x8xbf16, #tpu.memory_space<vmem>>, vector<72x8xbf16>
    %cst_151 = arith.constant dense<0.000000e+00> : vector<256x8xf32>
    %81 = tpu.matmul %79, %80, %cst_151 {dimension_numbers = #tpu.dot_dimension_numbers<[1], [0], [0], [1], [0, 0, 1, 1], [], []>} : vector<256x72xbf16>, vector<72x8xbf16>, vector<256x8xf32> -> vector<256x8xf32>
    %c0_152 = arith.constant 0 : index
    %c0_153 = arith.constant 0 : index
    %82 = vector.load %arg5[%c0_152, %c0_153] : memref<1x8xf32, #tpu.memory_space<vmem>>, vector<1x8xf32>
    %83 = vector.broadcast %82 : vector<1x8xf32> to vector<256x8xf32>
    %84 = arith.addf %81, %83 : vector<256x8xf32>
    %c0_154 = arith.constant 0 : index
    %c1_155 = arith.constant 1 : index
    %c1_156 = arith.constant 1 : index
    %c0_157 = arith.constant 0 : index
    %85 = vector.load %arg9[%c0_154, %c1_155, %c1_156, %c0_157] : memref<1x18x18x4xbf16, #tpu.memory_space<vmem>>, vector<1x16x16x4xbf16>
    %86 = vector.shape_cast %85 : vector<1x16x16x4xbf16> to vector<256x4xbf16>
    %c0_158 = arith.constant 0 : index
    %c0_159 = arith.constant 0 : index
    %87 = vector.load %arg6[%c0_158, %c0_159] : memref<4x8xbf16, #tpu.memory_space<vmem>>, vector<4x8xbf16>
    %cst_160 = arith.constant dense<0.000000e+00> : vector<256x8xf32>
    %88 = tpu.matmul %86, %87, %cst_160 {dimension_numbers = #tpu.dot_dimension_numbers<[1], [0], [0], [1], [0, 0, 1, 1], [], []>} : vector<256x4xbf16>, vector<4x8xbf16>, vector<256x8xf32> -> vector<256x8xf32>
    %c0_161 = arith.constant 0 : index
    %c0_162 = arith.constant 0 : index
    %89 = vector.load %arg7[%c0_161, %c0_162] : memref<1x8xf32, #tpu.memory_space<vmem>>, vector<1x8xf32>
    %90 = vector.broadcast %89 : vector<1x8xf32> to vector<256x8xf32>
    %91 = arith.addf %88, %90 : vector<256x8xf32>
    %92 = arith.addf %84, %91 : vector<256x8xf32>
    %cst_163 = arith.constant 0.000000e+00 : f32
    %93 = vector.broadcast %cst_163 : f32 to vector<256x8xf32>
    %94 = arith.maximumf %92, %93 : vector<256x8xf32>
    %95 = vector.shape_cast %94 : vector<256x8xf32> to vector<1x16x16x8xf32>
    %c0_164 = arith.constant 0 : index
    %c0_165 = arith.constant 0 : index
    %c0_166 = arith.constant 0 : index
    %c0_167 = arith.constant 0 : index
    %96 = vector.load %arg8[%c0_164, %c0_165, %c0_166, %c0_167] : memref<1x16x16x8xf32, #tpu.memory_space<vmem>>, vector<1x16x16x8xf32>
    tpu.vector_store %arg8[%c0_164, %c0_165, %c0_166, %c0_167], %95 {strides = array<i32>} : memref<1x16x16x8xf32, #tpu.memory_space<vmem>>, vector<1x16x16x8xf32>,
    return
  }
  func.func @transform_0(%arg0: i32) -> (i32, i32, i32, i32) {
    %c0_i32 = arith.constant 0 : i32
    %c0_i32_0 = arith.constant 0 : i32
    %c0_i32_1 = arith.constant 0 : i32
    %c0_i32_2 = arith.constant 0 : i32
    return %arg0, %c0_i32, %c0_i32_0, %c0_i32_1 : i32, i32, i32, i32
  }
  func.func @transform_1(%arg0: i32) -> (i32, i32) {
    %c0_i32 = arith.constant 0 : i32
    %c0_i32_0 = arith.constant 0 : i32
    %c0_i32_1 = arith.constant 0 : i32
    return %c0_i32, %c0_i32_0 : i32, i32
  }
  func.func @transform_2(%arg0: i32) -> (i32, i32) {
    %c0_i32 = arith.constant 0 : i32
    %c0_i32_0 = arith.constant 0 : i32
    %c0_i32_1 = arith.constant 0 : i32
    return %c0_i32, %c0_i32_0 : i32, i32
  }
  func.func @transform_3(%arg0: i32) -> (i32, i32) {
    %c0_i32 = arith.constant 0 : i32
    %c0_i32_0 = arith.constant 0 : i32
    %c0_i32_1 = arith.constant 0 : i32
    return %c0_i32, %c0_i32_0 : i32, i32
  }
  func.func @transform_4(%arg0: i32) -> (i32, i32) {
    %c0_i32 = arith.constant 0 : i32
    %c0_i32_0 = arith.constant 0 : i32
    %c0_i32_1 = arith.constant 0 : i32
    return %c0_i32, %c0_i32_0 : i32, i32
  }
  func.func @transform_5(%arg0: i32) -> (i32, i32) {
    %c0_i32 = arith.constant 0 : i32
    %c0_i32_0 = arith.constant 0 : i32
    %c0_i32_1 = arith.constant 0 : i32
    return %c0_i32, %c0_i32_0 : i32, i32
  }
  func.func @transform_6(%arg0: i32) -> (i32, i32) {
    %c0_i32 = arith.constant 0 : i32
    %c0_i32_0 = arith.constant 0 : i32
    %c0_i32_1 = arith.constant 0 : i32
    return %c0_i32, %c0_i32_0 : i32, i32
  }
  func.func @transform_7(%arg0: i32) -> (i32, i32, i32, i32) {
    %c0_i32 = arith.constant 0 : i32
    %c0_i32_0 = arith.constant 0 : i32
    %c0_i32_1 = arith.constant 0 : i32
    %c0_i32_2 = arith.constant 0 : i32
    return %arg0, %c0_i32, %c0_i32_0, %c0_i32_1 : i32, i32, i32, i32
  }
}

</mosaic_0001>

<bundles_post_ra>
// kernel: tpu_custom_call.1
= control target key start
LH: loop header
LB: loop body
LE: loop exit
PB: predicated region body
PF: predicated region fallthrough
CT: control target
= control target key end

     0   :  { %s10142_s24 = smov 0   ;;  %s13336_s0 = inlined_call_operand.vmem [shape: bf16[2,16,16,4], index: 0, kind: input, shape index: {}]   ;;  %s13337_s1 = inlined_call_operand.vmem [shape: bf16[36,8], index: 1, kind: input, shape index: {}]   ;;  %s13338_s2 = inlined_call_operand.vmem [shape: f32[1,8], index: 2, kind: input, shape index: {}]   ;;  %s13339_s3 = inlined_call_operand.vmem [shape: bf16[72,8], index: 3, kind: input, shape index: {}]   ;;  %s13340_s4 = inlined_call_operand.vmem [shape: f32[1,8], index: 4, kind: input, shape index: {}]   ;;  %s13341_s5 = inlined_call_operand.vmem [shape: bf16[4,8], index: 5, kind: input, shape index: {}]   ;;  %s13342_s6 = inlined_call_operand.vmem [shape: f32[1,8], index: 6, kind: input, shape index: {}]   ;;  %s13343_s7 = inlined_call_operand.vmem [shape: f32[2,16,16,8], index: 7, kind: output, shape index: {}]  }
   0x1 LB: > { %s9137_s25 = sadd.s32 4294967295, %s10087_s24   ;;  %p9141_p0 = scmp.ge.s32.totalorder %s10087_s24, 1  ;;  %s10087_s24 = sphi %s10142_s24, %s17_s24  }
   0x2   : > { %p237_p1 = scmp.lt.s32.totalorder %s10087_s24, 3 }
   0x4   : > { %p238_p2 = pnand %p9141_p0, %p237_p1 }
   0x6   : > { %241 = sbr.rel (%p238_p2) target bundleno = 1234 (0x4d2), region = 48 }
   0xd   : > { %p269_p3 = scmp.lt.s32.totalorder %s9137_s25, 1  ;;  %vm280_vm0 = vcmask 27648   ;;  %vm283_vm1 = vcmask 24576   ;;  %vm13346_vm2 = vsmask.f32 256  ;;  %vm13345_vm3 = vcmask 57344  }
   0xe   : > { %vm10152_vm4 = vmand %vm283_vm1, %vm13346_vm2  ;;  %v295_v1 = vld [vmem:[#allocation2 + $0xc] sm:$0x1]  ;;  %vm13344_vm5 = vsmask.f32 7938  ;;  %v10089_v3 = vmov 0   ;;  %vm1780_vm9 = vcmask 1042432  }
   0xf   : > { %s13503_s25 = smov (!%p269_p3, %s9137_s25), 1  ;;  %v296_v2 = vsel %vm10152_vm4, 0, %v295_v1  ;;  %281 = vst.msk [vmem:[#allocation2] sm:$0xf] %vm280_vm0, %v10089_v3  ;;  %282 = vst.msk [vmem:[#allocation2 + $0x4] sm:$0xf] %vm280_vm0, %v10089_v3 }
  0x10   : > { %297 = vst [vmem:[#allocation2 + $0xc] sm:$0x1] %v296_v2  ;;  %284 = vst.msk [vmem:[#allocation2 + $0x8] sm:$0x1] %vm283_vm1, %v10089_v3  ;;  %v298_v4 = vld [vmem:[#allocation2 + $0x18] sm:$0x1] }
  0x11   : > { %286 = vst.msk [vmem:[#allocation2 + $0xcc] sm:$0xf] %vm280_vm0, %v10089_v3  ;;  %287 = vst.msk [vmem:[#allocation2 + $0xd0] sm:$0xf] %vm280_vm0, %v10089_v3  ;;  %s9639_s26 = sshll.u32 %s13503_s25, 7  ;;  %v299_v5 = vsel %vm10152_vm4, 0, %v298_v4 }
  0x12   : > { %288 = vst.msk [vmem:[#allocation2 + $0xd4] sm:$0x1] %vm283_vm1, %v10089_v3  ;;  %s10182_s29 = scalar_lea.vmem %s13336_s0, %s9639_s26  ;;  %vm10186_vm6 = vmand %vm283_vm1, %vm13344_vm5  ;;  %vm554_vm7 = vsmask.f32 4368  ;;  %v301_v7 = vld [vmem:[#allocation2 + $0x24] sm:$0x1] }
  0x13   : > { %406 = vst.msk [vmem:[#allocation3 + $0x8] sm:$0x1] %vm13345_vm3, %v10089_v3  ;;  %410 = vst.msk [vmem:[#allocation3 + $0xd4] sm:$0x1] %vm13345_vm3, %v10089_v3  ;;  %v351_v8 = vld [vmem:[#allocation2 + $0x14] sm:$0x1] }
  0x14   : > { %300 = vst [vmem:[#allocation2 + $0x18] sm:$0x1] %v299_v5  ;;  %v522_v9 = vld [vmem:[%s10182_s29] sm:$0xf]  ;;  %v523_v10 = vld [vmem:[%s10182_s29 + $0x4] sm:$0xf]  ;;  %vm10199_vm8 = vmor %vm13346_vm2, %vm554_vm7 }
  0x15   : > { %v302_v11 = vsel %vm10152_vm4, 0, %v301_v7  ;;  %v352_v12 = vsel %vm10186_vm6, 0, %v351_v8  ;;  %v557_v13 = vshrl.u32 %v522_v9, 16  ;;  %v560_v14 = vshll.u32 %v522_v9, 16  ;;  %v524_v17 = vld [vmem:[%s10182_s29 + $0x8] sm:$0xf]  ;;  %vm10206_vm11 = vmand %vm280_vm0, %vm13344_vm5 }
  0x16   : > { %v565_v15 = vshrl.u32 %v523_v10, 16  ;;  %v568_v16 = vshll.u32 %v523_v10, 16  ;;  %303 = vst [vmem:[#allocation2 + $0x24] sm:$0x1] %v302_v11  ;;  %353 = vst [vmem:[#allocation2 + $0x14] sm:$0x1] %v352_v12 }
  0x17   : > { %vm1781_vm10 = vcmask 1046532   ;;  %v525_v19 = vld [vmem:[%s10182_s29 + $0xc] sm:$0xf]  ;;  %v574_v20 = vshrl.u32 %v524_v17, 16  ;;  %v559_v21 = vrot.slane %v557_v13, 7  ;;  %v577_v24 = vshll.u32 %v524_v17, 16 }
  0x18   : > { %v567_v22 = vrot.slane %v565_v15, 7  ;;  %v582_v25 = vshrl.u32 %v525_v19, 16  ;;  %v879_v26 = vld [vmem:[#allocation2 + $0xc] sm:$0xf]  ;;  %v348_v27 = vld [vmem:[#allocation2 + $0x8] sm:$0x1]  ;;  %vm10238_vm14 = vmor %vm1780_vm9, %vm1781_vm10 }
  0x19   : > { %v10210_v28 = vld [vmem:[#allocation2] sm:$0xe]  ;;  %v562_v29 = vor.u32 %v560_v14, %v559_v21  ;;  %v563_v30 = vrot.slane %v559_v21, 4  ;;  %v10212_v32 = vld [vmem:[#allocation2 + $0x4] sm:$0xf]  ;;  %v585_v33 = vshll.u32 %v525_v19, 16 }
  0x1a   : > { %v570_v31 = vor.u32 %v568_v16, %v567_v22  ;;  %v292_v34 = vld [vmem:[#allocation2] sm:$0x1]  ;;  %v526_v35 = vld [vmem:[%s10182_s29 + $0x10] sm:$0xf]  ;;  %v572_v36 = vrot.slane %v567_v22, 4  ;;  %v349_v37 = vsel %vm10186_vm6, 0, %v348_v27 }
  0x1b   : > { %v1785_v38 = vrot.slane %v10212_v32, 5  ;;  %v576_v39 = vrot.slane %v574_v20, 7  ;;  %v527_v40 = vld [vmem:[%s10182_s29 + $0x14] sm:$0xf]  ;;  %v880_v42 = vsel %vm10206_vm11, %v562_v29, %v879_v26  ;;  %350 = vst [vmem:[#allocation2 + $0x8] sm:$0x1] %v349_v37 }
  0x1c   : > { %v571_v41 = vsel %vm10199_vm8, %v563_v30, %v570_v31  ;;  %v10223_v43 = vrot.slane %v582_v25, 7  ;;  %v886_v44 = vld [vmem:[#allocation2 + $0x18] sm:$0xf]  ;;  %v293_v45 = vsel %vm10152_vm4, 0, %v292_v34  ;;  %v1137_v46 = vld [vmem:[#allocation2 + $0x4] sm:$0xf] }
  0x1d   : > { %881 = vst [vmem:[#allocation2 + $0xc] sm:$0xf] %v880_v42  ;;  %882 = vst.msk [vmem:[#allocation2 + $0x10] sm:$0xf] %vm280_vm0, %v571_v41  ;;  %v9178_v47 = vrot.slane %v10210_v28, 9  ;;  %v1787_v48 = vrot.slane %v1785_v38, 4  ;;  %v579_v49 = vor.u32 %v577_v24, %v576_v39 }
  0x1e   : > { %v580_v50 = vrot.slane %v576_v39, 4  ;;  %294 = vst [vmem:[#allocation2] sm:$0x1] %v293_v45  ;;  %v587_v51 = vor.u32 %v585_v33, %v10223_v43  ;;  %v1197_v52 = vshll.u32 %v1137_v46, 16  ;;  %v1201_v53 = vshrl.u32 %v1137_v46, 16  ;;  %s10090_s30 = smov 12  }
  0x1f   : > { %v883_v54 = vld [vmem:[#allocation2 + $0x14] sm:$0x1]  ;;  %v354_v55 = vld [vmem:[#allocation2 + $0x20] sm:$0x1]  ;;  %v887_v56 = vsel %vm10206_vm11, %v579_v49, %v886_v44  ;;  %vm1184_vm12 = vsmask.f32 3328  ;;  %v1786_v24 = vsel %vm10238_vm14, %v9178_v47, %v1785_v38 }
  0x20   : > { %vm1185_vm13 = vsmask.f32 7440  ;;  %v591_v57 = vshrl.u32 %v526_v35, 16  ;;  %v594_v58 = vshll.u32 %v526_v35, 16  ;;  %v599_v59 = vshrl.u32 %v527_v40, 16  ;;  %s10091_s8 = smov 8  }
  0x21   : > { %v357_v60 = vld [vmem:[#allocation2 + $0x2c] sm:$0x1]  ;;  %v588_v61 = vsel %vm10199_vm8, %v580_v50, %v587_v51  ;;  %888 = vst [vmem:[#allocation2 + $0x18] sm:$0xf] %v887_v56  ;;  %v10234_v62 = vrot.slane %v1197_v52, 5  ;;  %v1203_v63 = vrot.slane %v1201_v53, 4  ;;  %v884_v8 = vsel %vm10152_vm4, %v572_v36, %v883_v54  ;;  %vm10274_vm15 = vmor %vm1184_vm12, %vm1185_vm13 }
  0x22   : > { %v602_v1 = vshll.u32 %v527_v40, 16  ;;  %v304_v2 = vld [vmem:[#allocation2 + $0x30] sm:$0x1]  ;;  %889 = vst.msk [vmem:[#allocation2 + $0x1c] sm:$0xf] %vm280_vm0, %v588_v61  ;;  %v593_v5 = vrot.slane %v591_v57, 7 }
  0x23   : > { %v10243_v7 = vrot.slane %v599_v59, 7  ;;  %v355_v9 = vsel %vm10186_vm6, 0, %v354_v55  ;;  %v1204_v10 = vor.u32 %v1203_v63, %v10234_v62  ;;  %v893_v11 = vld [vmem:[#allocation2 + $0x24] sm:$0xf]  ;;  %885 = vst [vmem:[#allocation2 + $0x14] sm:$0x1] %v884_v8 }
  0x24   : > { %356 = vst [vmem:[#allocation2 + $0x20] sm:$0x1] %v355_v9  ;;  %v358_v12 = vsel %vm10186_vm6, 0, %v357_v60  ;;  %v305_v13 = vsel %vm10152_vm4, 0, %v304_v2  ;;  %v10255_v14 = vld [vmem:[%s10182_s29 + $0x18] sm:$0xf]  ;;  %v596_v19 = vor.u32 %v594_v58, %v593_v5 }
  0x25   : > { %v1686_v15 = vld [vmem:[#allocation2 + $0x8] sm:$0x1]  ;;  %v589_v16 = vrot.slane %v10223_v43, 4  ;;  %v597_v20 = vrot.slane %v593_v5, 4  ;;  %v604_v21 = vor.u32 %v602_v1, %v10243_v7  ;;  %359 = vst [vmem:[#allocation2 + $0x2c] sm:$0x1] %v358_v12 }
  0x26   : > { %v1138_v17 = vld [vmem:[#allocation2 + $0x8] sm:$0x1]  ;;  %306 = vst [vmem:[#allocation2 + $0x30] sm:$0x1] %v305_v13  ;;  %v9975_v22 = vld [vmem:[#allocation2 + $0xc] sm:$0xff]   ;;  %v1788_v25 = vrot.slane %v1686_v15, 5  ;;  %v894_v29 = vsel %vm10206_vm11, %v596_v19, %v893_v11 }
  0x27   : > { %v1136_v26 = vld [vmem:[#allocation2] sm:$0xf]  ;;  %v1207_v27 = vshll.u32 %v1138_v17, 16  ;;  %v605_v28 = vsel %vm10199_vm8, %v597_v20, %v604_v21  ;;  %v2730_v30 = vld [vmem:[#allocation2 + $0xc] sm:$0xe]  ;;  %v608_v31 = vshrl.u32 %v10255_v14, 16  ;;  %2120 = vrot.lane.b32.xlu0 %v9975_v22, %s10090_s30 }
  0x28   : > { %v1789_v32 = vsel %vm10238_vm14, %v1787_v48, %v1788_v25  ;;  %v1188_v33 = vshrl.u32 %v1136_v26, 16  ;;  %v1191_v34 = vshll.u32 %v1136_v26, 16  ;;  %v1205_v35 = vrot.slane %v1204_v10, 4  ;;  %895 = vst [vmem:[#allocation2 + $0x24] sm:$0xf] %v894_v29  ;;  %s10092_s9 = smov 24  }
  0x29   : > { %896 = vst.msk [vmem:[#allocation2 + $0x28] sm:$0xf] %vm280_vm0, %v605_v28  ;;  %v2731_v36 = vld [vmem:[#allocation2 + $0x10] sm:$0xf]  ;;  %v9194_v37 = vcombine.low %v1786_v24, %v1789_v32  ;;  %v9242_v38 = vrot.slane %v2730_v30, 9  ;;  %v9976_v40 = vld [vmem:[#allocation2 + $0x18] sm:$0xff]  }
  0x2a   : > { %v2828_v39 = vrot.slane %v2731_v36, 5  ;;  %v1190_v41 = vrot.slane %v1188_v33, 4  ;;  %v9977_v42 = vld [vmem:[#allocation2 + $0x18] sm:$0xff]   ;;  %v1193_v43 = vrot.slane %v1191_v34, 5  ;;  %v1209_v44 = vrot.slane %v1207_v27, 5  ;;  %s10093_s10 = smov 4  }
  0x2b   : > { %1943 = vrot.lane.b32.xlu1 %v9194_v37, %s10091_s8  ;;  %v2732_v45 = vld [vmem:[#allocation2 + $0x14] sm:$0x1]  ;;  %3164 = vrot.lane.b32.xlu0 %v9976_v40, %s10092_s9  ;;  %v606_v48 = vrot.slane %v10243_v7, 4  ;;  %v1687_v50 = vld [vmem:[#allocation2 + $0xc] sm:$0xe]  ;;  %v10287_v1 = vrot.slane %v608_v31, 7 }
  0x2c   : > { %v2830_v46 = vrot.slane %v2828_v39, 4  ;;  %v2831_v49 = vrot.slane %v2732_v45, 5  ;;  %v1688_v51 = vld [vmem:[#allocation2 + $0x10] sm:$0xf]  ;;  %v1194_v52 = vor.u32 %v1193_v43, %v1190_v41  ;;  %v10281_v53 = vsel %vm10238_vm14, %v9242_v38, %v2828_v39  ;;  %v1689_v54 = vld [vmem:[#allocation2 + $0x14] sm:$0x1] }
  0x2d   : > { %v9179_v55 = vrot.slane %v1687_v50, 9  ;;  %v1792_v56 = vrot.slane %v1688_v51, 5  ;;  %v890_v57 = vld [vmem:[#allocation2 + $0x20] sm:$0x1]  ;;  %v1795_v59 = vrot.slane %v1689_v54, 5  ;;  %v1210_v5 = vsel %vm10274_vm15, %v1205_v35, %v1209_v44  ;;  %s10094_s11 = smov 20  }
  0x2e   : > { %v2832_v58 = vsel %vm10238_vm14, %v2830_v46, %v2831_v49  ;;  %v891_v60 = vsel %vm10152_vm4, %v589_v16, %v890_v57  ;;  %v3774_v61 = vld [vmem:[#allocation2 + $0x18] sm:$0xe]  ;;  %v3775_v63 = vld [vmem:[#allocation2 + $0x1c] sm:$0xf]  ;;  %v1195_v2 = vrot.slane %v1194_v52, 4  ;;  %v611_v12 = vshll.u32 %v10255_v14, 16 }
  0x2f   : > { %2122 = vrot.lane.b32.xlu1 %v9977_v42, %s10090_s30  ;;  %892 = vst [vmem:[#allocation2 + $0x20] sm:$0x1] %v891_v60  ;;  %v1793_v8 = vsel %vm10238_vm14, %v9179_v55, %v1792_v56  ;;  %v1794_v9 = vrot.slane %v1792_v56, 4  ;;  %v3872_v10 = vrot.slane %v3775_v63, 5  ;;  %v2733_v11 = vld [vmem:[#allocation2 + $0x18] sm:$0xe]  ;;  %v9258_v15 = vcombine.low %v10281_v53, %v2832_v58 }
  0x30   : > { %v9978_v7 = vld [vmem:[#allocation2 + $0x24] sm:$0xff]   ;;  %v1200_v13 = vsel %vm10274_vm15, %v1195_v2, %v10234_v62  ;;  %v9306_v16 = vrot.slane %v3774_v61, 9  ;;  %v2734_v17 = vld [vmem:[#allocation2 + $0x1c] sm:$0xf]  ;;  %v9243_v19 = vrot.slane %v2733_v11, 9  ;;  %v614_v27 = vrot.slane %v10287_v1, 4 }
  0x31   : > { %v897_v20 = vld [vmem:[#allocation2 + $0x2c] sm:$0x1]  ;;  %v9162_v21 = vcombine.low %v1200_v13, %v1210_v5  ;;  %v1796_v22 = vsel %vm10238_vm14, %v1794_v9, %v1795_v59  ;;  %v3874_v24 = vrot.slane %v3872_v10, 4  ;;  %v3777_v25 = vld [vmem:[#allocation2 + $0x24] sm:$0xe]  ;;  %v2835_v28 = vrot.slane %v2734_v17, 5 }
  0x32   : > { %v3778_v26 = vld [vmem:[#allocation2 + $0x28] sm:$0xf]  ;;  %v9195_v14 = vcombine.low %v1793_v8, %v1796_v22  ;;  %v898_v62 = vsel %vm10152_vm4, %v606_v48, %v897_v20  ;;  %v9307_v29 = vrot.slane %v3777_v25, 9  ;;  %v2188_v30 = vld [vmem:[#allocation2 + $0x18] sm:$0xf]  ;;  %v3873_v36 = vsel %vm10238_vm14, %v9306_v16, %v3872_v10  ;;  %s10095_s12 = smov 32  }
  0x33   : > { %3166 = vrot.lane.b32.xlu1 %v9978_v7, %s10092_s9  ;;  %v2189_v31 = vld [vmem:[#allocation2 + $0x1c] sm:$0xf]  ;;  %1619 = vrot.lane.b32.xlu0 %v9162_v21, %s10093_s10  ;;  %899 = vst [vmem:[#allocation2 + $0x2c] sm:$0x1] %v898_v62  ;;  %v3879_v32 = vrot.slane %v3778_v26, 5  ;;  %v2258_v33 = vshrl.u32 %v2188_v30, 16  ;;  %v10309_v41 = vor.u32 %v611_v12, %v10287_v1  ;;  %v2836_v44 = vsel %vm10238_vm14, %v9243_v19, %v2835_v28 }
  0x34   : > { %v2261_v34 = vshll.u32 %v2188_v30, 16  ;;  %v2267_v35 = vshll.u32 %v2189_v31, 16  ;;  %v2837_v37 = vrot.slane %v2835_v28, 4  ;;  %v2271_v38 = vshrl.u32 %v2189_v31, 16  ;;  %v1139_v39 = vld [vmem:[#allocation2 + $0xc] sm:$0xf] }
  0x35   : > { %v1140_v40 = vld [vmem:[#allocation2 + $0x10] sm:$0xf]  ;;  %v3880_v45 = vsel %vm10238_vm14, %v9307_v29, %v3879_v32  ;;  %v3881_v46 = vrot.slane %v3879_v32, 4  ;;  %v2260_v48 = vrot.slane %v2258_v33, 4  ;;  %v1212_v56 = vshrl.u32 %v1139_v39, 16  ;;  %s10096_s13 = smov 16  }
  0x36   : > { %v3776_v42 = vld [vmem:[#allocation2 + $0x20] sm:$0x1]  ;;  %v2263_v52 = vrot.slane %v2261_v34, 5  ;;  %v2269_v53 = vrot.slane %v2267_v35, 5  ;;  %v2273_v54 = vrot.slane %v2271_v38, 4  ;;  %v1215_v57 = vshll.u32 %v1139_v39, 16 }
  0x37   : > { %v2735_v43 = vld [vmem:[#allocation2 + $0x20] sm:$0x1]  ;;  %1945 = vrot.lane.b32.xlu1 %v9195_v14, %s10091_s8  ;;  %v3875_v49 = vrot.slane %v3776_v42, 5  ;;  %2986 = vrot.lane.b32.xlu0 %v9258_v15, %s10094_s11  ;;  %v1141_v61 = vld [vmem:[#allocation2 + $0x14] sm:$0x1]  ;;  %v1221_v63 = vshll.u32 %v1140_v40, 16 }
  0x38   : > { %v2838_v50 = vrot.slane %v2735_v43, 5  ;;  %v2190_v51 = vld [vmem:[#allocation2 + $0x20] sm:$0x1]  ;;  %v2264_v60 = vor.u32 %v2263_v52, %v2260_v48  ;;  %v2274_v7 = vor.u32 %v2273_v54, %v2269_v53  ;;  %v3232_v9 = vld [vmem:[#allocation2 + $0x24] sm:$0xf]  ;;  %v1214_v12 = vrot.slane %v1212_v56, 4 }
  0x39   : > { %v2277_v55 = vshll.u32 %v2190_v51, 16  ;;  %v3876_v58 = vsel %vm10238_vm14, %v3874_v24, %v3875_v49  ;;  %v1217_v13 = vrot.slane %v1215_v57, 5  ;;  %v1223_v15 = vrot.slane %v1221_v63, 5  ;;  %v3233_v24 = vld [vmem:[#allocation2 + $0x28] sm:$0xf]  ;;  %s10097_s14 = smov 28  }
  0x3a   : > { %v2839_v59 = vsel %vm10238_vm14, %v2837_v37, %v2838_v50  ;;  %v9322_v2 = vcombine.low %v3873_v36, %v3876_v58  ;;  %v3779_v10 = vld [vmem:[#allocation2 + $0x2c] sm:$0x1]  ;;  %v2265_v11 = vrot.slane %v2264_v60, 4  ;;  %v2275_v17 = vrot.slane %v2274_v7, 4  ;;  %v2187_v51 = vld [vmem:[#allocation2 + $0x14] sm:$0x1] }
  0x3b   : > { %v9259_v5 = vcombine.low %v2836_v44, %v2839_v59  ;;  %v2279_v8 = vrot.slane %v2277_v55, 5  ;;  %v3882_v16 = vrot.slane %v3779_v10, 5  ;;  %v1225_v19 = vshrl.u32 %v1140_v40, 16  ;;  %v3234_v30 = vld [vmem:[#allocation2 + $0x2c] sm:$0x1]  ;;  %s10098_s21 = smov 48  }
  0x3c   : > { %4030 = vrot.lane.b32.xlu0 %v9322_v2, %s10095_s12  ;;  %v1231_v20 = vshll.u32 %v1141_v61, 16  ;;  %v2270_v21 = vsel %vm10274_vm15, %v2265_v11, %v2269_v53  ;;  %v1218_v22 = vor.u32 %v1217_v13, %v1214_v12  ;;  %v3302_v25 = vshrl.u32 %v3232_v9, 16  ;;  %v2185_v31 = vld [vmem:[#allocation2 + $0xc] sm:$0xf]  ;;  %v2186_v40 = vld [vmem:[#allocation2 + $0x10] sm:$0xf] }
  0x3d   : > { %2988 = vrot.lane.b32.xlu1 %v9259_v5, %s10094_s11  ;;  %v3305_v26 = vshll.u32 %v3232_v9, 16  ;;  %v3883_v14 = vsel %vm10238_vm14, %v3881_v46, %v3882_v16  ;;  %v2280_v28 = vsel %vm10274_vm15, %v2275_v17, %v2279_v8  ;;  %v1227_v62 = vrot.slane %v1225_v19, 4  ;;  %v1142_v56 = vld [vmem:[#allocation2 + $0x18] sm:$0xf]  ;;  %v1143_v61 = vld [vmem:[#allocation2 + $0x1c] sm:$0xf] }
  0x3e   : > { %v1233_v29 = vrot.slane %v1231_v20, 5  ;;  %v9323_v32 = vcombine.low %v3880_v45, %v3883_v14  ;;  %v9227_v33 = vcombine.low %v2270_v21, %v2280_v28  ;;  %v1219_v34 = vrot.slane %v1218_v22, 4  ;;  %v1144_v8 = vld [vmem:[#allocation2 + $0x20] sm:$0x1]  ;;  %v3229_v13 = vld [vmem:[#allocation2 + $0x18] sm:$0xf] }
  0x3f   : > { %v3304_v35 = vrot.slane %v3302_v25, 4  ;;  %v1228_v36 = vor.u32 %v1227_v62, %v1223_v15  ;;  %v3307_v37 = vrot.slane %v3305_v26, 5  ;;  %v3311_v38 = vshll.u32 %v3233_v24, 16  ;;  %v3230_v25 = vld [vmem:[#allocation2 + $0x1c] sm:$0xf]  ;;  %s10099_s22 = smov 56  }
  0x40   : > { %v3315_v39 = vshrl.u32 %v3233_v24, 16  ;;  %4032 = vrot.lane.b32.xlu0 %v9323_v32, %s10095_s12  ;;  %v1224_v42 = vsel %vm10274_vm15, %v1219_v34, %v1223_v15  ;;  %v3321_v43 = vshll.u32 %v3234_v30, 16  ;;  %v2234_v44 = vshrl.u32 %v2185_v31, 16  ;;  %v3231_v32 = vld [vmem:[#allocation2 + $0x20] sm:$0x1]  ;;  %s10100_s23 = smov 64  }
  0x41   : > { %2667 = vrot.lane.b32.xlu1 %v9227_v33, %s10096_s13  ;;  %v2237_v46 = vshll.u32 %v2185_v31, 16  ;;  %v1229_v45 = vrot.slane %v1228_v36, 4  ;;  %v3308_v48 = vor.u32 %v3307_v37, %v3304_v35  ;;  %v3313_v49 = vrot.slane %v3311_v38, 5  ;;  %v1145_v38 = vld [vmem:[#allocation2 + $0x24] sm:$0xf]  ;;  %s10101_s28 = smov 40  }
  0x42   : > { %v3317_v50 = vrot.slane %v3315_v39, 4  ;;  %v3323_v52 = vrot.slane %v3321_v43, 5  ;;  %v2236_v53 = vrot.slane %v2234_v44, 4  ;;  %v2243_v55 = vshll.u32 %v2186_v40, 16  ;;  %v1146_v44 = vld [vmem:[#allocation2 + $0x28] sm:$0xf] }
  0x43   : > { %v2239_v54 = vrot.slane %v2237_v46, 5  ;;  %v1234_v57 = vsel %vm10274_vm15, %v1229_v45, %v1233_v29  ;;  %v3309_v58 = vrot.slane %v3308_v48, 4  ;;  %v2247_v60 = vshrl.u32 %v2186_v40, 16 }
  0x44   : > { %v3318_v59 = vor.u32 %v3317_v50, %v3313_v49  ;;  %v9163_v63 = vcombine.low %v1224_v42, %v1234_v57  ;;  %v2245_v5 = vrot.slane %v2243_v55, 5  ;;  %v2253_v7 = vshll.u32 %v2187_v51, 16 }
  0x45   : > { %v2240_v2 = vor.u32 %v2239_v54, %v2236_v53  ;;  %v3314_v9 = vsel %vm10274_vm15, %v3309_v58, %v3313_v49  ;;  %v2249_v11 = vrot.slane %v2247_v60, 4  ;;  %v1236_v12 = vshrl.u32 %v1142_v56, 16 }
  0x46   : > { %v3319_v10 = vrot.slane %v3318_v59, 4  ;;  %1621 = vrot.lane.b32.xlu0 %v9163_v63, %s10093_s10  ;;  %v2255_v16 = vrot.slane %v2253_v7, 5  ;;  %v1239_v17 = vshll.u32 %v1142_v56, 16  ;;  %v1245_v19 = vshll.u32 %v1143_v61, 16  ;;  %v1147_v56 = vld [vmem:[#allocation2 + $0x2c] sm:$0x1] }
  0x47   : > { %v2241_v15 = vrot.slane %v2240_v2, 4  ;;  %v2250_v21 = vor.u32 %v2249_v11, %v2245_v5  ;;  %v1238_v22 = vrot.slane %v1236_v12, 4  ;;  %v1249_v24 = vshrl.u32 %v1143_v61, 16  ;;  %v1690_v59 = vld [vmem:[#allocation2 + $0x18] sm:$0xe] }
  0x48   : > { %v3324_v20 = vsel %vm10274_vm15, %v3319_v10, %v3323_v52  ;;  %v1241_v28 = vrot.slane %v1239_v17, 5  ;;  %v1247_v62 = vrot.slane %v1245_v19, 5  ;;  %v1255_v31 = vshll.u32 %v1144_v8, 16  ;;  %v1692_v7 = vld [vmem:[#allocation2 + $0x20] sm:$0x1] }
  0x49   : > { %v9291_v26 = vcombine.low %v3314_v9, %v3324_v20  ;;  %v2246_v14 = vsel %vm10274_vm15, %v2241_v15, %v2245_v5  ;;  %v2251_v29 = vrot.slane %v2250_v21, 4  ;;  %v1251_v30 = vrot.slane %v1249_v24, 4  ;;  %v1691_v5 = vld [vmem:[#allocation2 + $0x1c] sm:$0xf]  ;;  %v1693_v12 = vld [vmem:[#allocation2 + $0x24] sm:$0xe] }
  0x4a   : > { %v3278_v33 = vshrl.u32 %v3229_v13, 16  ;;  %v1242_v34 = vor.u32 %v1241_v28, %v1238_v22  ;;  %v3281_v35 = vshll.u32 %v3229_v13, 16  ;;  %v3287_v36 = vshll.u32 %v3230_v25, 16  ;;  %v529_v19 = vld [vmem:[%s10182_s29 + $0x1c] sm:$0xf] }
  0x4b   : > { %3711 = vrot.lane.b32.xlu1 %v9291_v26, %s10097_s14  ;;  %v3291_v37 = vshrl.u32 %v3230_v25, 16  ;;  %v2256_v39 = vsel %vm10274_vm15, %v2251_v29, %v2255_v16  ;;  %v1252_v40 = vor.u32 %v1251_v30, %v1247_v62  ;;  %v1257_v42 = vrot.slane %v1255_v31, 5  ;;  %v1694_v25 = vld [vmem:[#allocation2 + $0x28] sm:$0xf]  ;;  %v1695_v26 = vld [vmem:[#allocation2 + $0x2c] sm:$0x1] }
  0x4c   : > { %v3280_v43 = vrot.slane %v3278_v33, 4  ;;  %v9226_v46 = vcombine.low %v2246_v14, %v2256_v39  ;;  %v1243_v45 = vrot.slane %v1242_v34, 4  ;;  %v3283_v48 = vrot.slane %v3281_v35, 5  ;;  %v900_v30 = vld [vmem:[#allocation2 + $0x30] sm:$0xf] }
  0x4d   : > { %v3289_v49 = vrot.slane %v3287_v36, 5  ;;  %v1253_v50 = vrot.slane %v1252_v40, 4  ;;  %v3293_v51 = vrot.slane %v3291_v37, 4  ;;  %v3297_v52 = vshll.u32 %v3231_v32, 16  ;;  %v2191_v35 = vld [vmem:[#allocation2 + $0x24] sm:$0xf] }
  0x4e   : > { %v1260_v53 = vshrl.u32 %v1145_v38, 16  ;;  %2665 = vrot.lane.b32.xlu0 %v9226_v46, %s10096_s13  ;;  %v1248_v54 = vsel %vm10274_vm15, %v1243_v45, %v1247_v62  ;;  %v3284_v55 = vor.u32 %v3283_v48, %v3280_v43  ;;  %v1263_v57 = vshll.u32 %v1145_v38, 16  ;;  %v2192_v40 = vld [vmem:[#allocation2 + $0x28] sm:$0xf]  ;;  %v2193_v45 = vld [vmem:[#allocation2 + $0x2c] sm:$0x1] }
  0x4f   : > { %v1269_v58 = vshll.u32 %v1146_v44, 16  ;;  %v1258_v60 = vsel %vm10274_vm15, %v1253_v50, %v1257_v42  ;;  %v3294_v61 = vor.u32 %v3293_v51, %v3289_v49  ;;  %v3299_v63 = vrot.slane %v3297_v52, 5  ;;  %v9979_v52 = vld [vmem:[#allocation2 + $0x24] sm:$0xff]  }
  0x50   : > { %v1262_v2 = vrot.slane %v1260_v53, 4  ;;  %v9164_v8 = vcombine.low %v1248_v54, %v1258_v60  ;;  %v3285_v9 = vrot.slane %v3284_v55, 4  ;;  %v1265_v10 = vrot.slane %v1263_v57, 5  ;;  %v360_v60 = vld [vmem:[#allocation2 + $0x38] sm:$0x1] }
  0x51   : > { %v1271_v11 = vrot.slane %v1269_v58, 5  ;;  %v3295_v13 = vrot.slane %v3294_v61, 4  ;;  %v1273_v15 = vshrl.u32 %v1146_v44, 16  ;;  %v1279_v16 = vshll.u32 %v1147_v56, 16  ;;  %v2736_v61 = vld [vmem:[#allocation2 + $0x24] sm:$0xe] }
  0x52   : > { %v9180_v17 = vrot.slane %v1690_v59, 9  ;;  %1623 = vrot.lane.b32.xlu1 %v9164_v8, %s10093_s10  ;;  %v3290_v20 = vsel %vm10274_vm15, %v3285_v9, %v3289_v49  ;;  %v1266_v21 = vor.u32 %v1265_v10, %v1262_v2  ;;  %v1799_v22 = vrot.slane %v1691_v5, 5  ;;  %v2737_v5 = vld [vmem:[#allocation2 + $0x28] sm:$0xf] }
  0x53   : > { %v1802_v24 = vrot.slane %v1692_v7, 5  ;;  %v3300_v14 = vsel %vm10274_vm15, %v3295_v13, %v3299_v63  ;;  %v1275_v28 = vrot.slane %v1273_v15, 4  ;;  %v1281_v62 = vrot.slane %v1279_v16, 5 }
  0x54   : > { %v9181_v29 = vrot.slane %v1693_v12, 9  ;;  %v9290_v31 = vcombine.low %v3290_v20, %v3300_v14  ;;  %v1267_v32 = vrot.slane %v1266_v21, 4  ;;  %v1800_v33 = vsel %vm10238_vm14, %v9180_v17, %v1799_v22  ;;  %v307_v17 = vld [vmem:[#allocation2 + $0x3c] sm:$0x1] }
  0x55   : > { %v1801_v34 = vrot.slane %v1799_v22, 4  ;;  %v1276_v36 = vor.u32 %v1275_v28, %v1271_v11  ;;  %v1806_v37 = vrot.slane %v1694_v25, 5  ;;  %v1809_v38 = vrot.slane %v1695_v26, 5 }
  0x56   : > { %v616_v39 = vshrl.u32 %v529_v19, 16  ;;  %3709 = vrot.lane.b32.xlu0 %v9290_v31, %s10097_s14  ;;  %v1272_v42 = vsel %vm10274_vm15, %v1267_v32, %v1271_v11  ;;  %v619_v44 = vshll.u32 %v529_v19, 16  ;;  %v901_v46 = vsel %vm10206_vm11, %v10309_v41, %v900_v30  ;;  %v2738_v11 = vld [vmem:[#allocation2 + $0x2c] sm:$0x1]  ;;  %v531_v32 = vld [vmem:[%s10182_s29 + $0x24] sm:$0xf] }
  0x57   : > { %v1803_v43 = vsel %vm10238_vm14, %v1801_v34, %v1802_v24  ;;  %v1277_v48 = vrot.slane %v1276_v36, 4  ;;  %v1807_v50 = vsel %vm10238_vm14, %v9181_v29, %v1806_v37  ;;  %v1808_v51 = vrot.slane %v1806_v37, 4  ;;  %902 = vst [vmem:[#allocation2 + $0x30] sm:$0xf] %v901_v46  ;;  %v530_v24 = vld [vmem:[%s10182_s29 + $0x20] sm:$0xf] }
  0x58   : > { %v9196_v49 = vcombine.low %v1800_v33, %v1803_v43  ;;  %v10368_v53 = vrot.slane %v616_v39, 7  ;;  %v2282_v54 = vshrl.u32 %v2191_v35, 16  ;;  %v2285_v55 = vshll.u32 %v2191_v35, 16 }
  0x59   : > { %v2291_v56 = vshll.u32 %v2192_v40, 16  ;;  %v1282_v57 = vsel %vm10274_vm15, %v1277_v48, %v1281_v62  ;;  %v1810_v41 = vsel %vm10238_vm14, %v1808_v51, %v1809_v38  ;;  %v2295_v58 = vshrl.u32 %v2192_v40, 16 }
  0x5a   : > { %v2301_v59 = vshll.u32 %v2193_v45, 16  ;;  %v9165_v63 = vcombine.low %v1272_v42, %v1282_v57  ;;  %1947 = vrot.lane.b32.xlu0 %v9196_v49, %s10091_s8  ;;  %v621_v2 = vor.u32 %v619_v44, %v10368_v53  ;;  %v2284_v7 = vrot.slane %v2282_v54, 4 }
  0x5b   : > { %v2287_v8 = vrot.slane %v2285_v55, 5  ;;  %v2293_v9 = vrot.slane %v2291_v56, 5  ;;  %v2297_v10 = vrot.slane %v2295_v58, 4  ;;  %v9197_v12 = vcombine.low %v1807_v50, %v1810_v41  ;;  %v363_v58 = vld [vmem:[#allocation2 + $0x44] sm:$0x1] }
  0x5c   : > { %1625 = vrot.lane.b32.xlu1 %v9165_v63, %s10093_s10  ;;  %v622_v13 = vsel %vm10199_vm8, %v614_v27, %v621_v2  ;;  %v361_v15 = vsel %vm10186_vm6, 0, %v360_v60  ;;  %v9244_v16 = vrot.slane %v2736_v61, 9  ;;  %v2303_v21 = vrot.slane %v2301_v59, 5 }
  0x5d   : > { %903 = vst.msk [vmem:[#allocation2 + $0x34] sm:$0xf] %vm280_vm0, %v622_v13  ;;  %v2288_v19 = vor.u32 %v2287_v8, %v2284_v7  ;;  %v2298_v20 = vor.u32 %v2297_v10, %v2293_v9  ;;  %362 = vst [vmem:[#allocation2 + $0x38] sm:$0x1] %v361_v15  ;;  %v2842_v22 = vrot.slane %v2737_v5, 5  ;;  %v2845_v25 = vrot.slane %v2738_v11, 5 }
  0x5e   : > { %2124 = vrot.lane.b32.xlu0 %v9979_v52, %s10090_s30  ;;  %v2194_v1 = vld [vmem:[#allocation2 + $0x30] sm:$0xf]  ;;  %v623_v62 = vrot.slane %v10368_v53, 4  ;;  %v308_v31 = vsel %vm10152_vm4, 0, %v307_v17  ;;  %v625_v39 = vshrl.u32 %v530_v24, 16  ;;  %v628_v40 = vshll.u32 %v530_v24, 16 }
  0x5f   : > { %v2289_v26 = vrot.slane %v2288_v19, 4  ;;  %v2299_v27 = vrot.slane %v2298_v20, 4  ;;  %v2306_v14 = vshrl.u32 %v2194_v1, 16  ;;  %v2309_v28 = vshll.u32 %v2194_v1, 16  ;;  %309 = vst [vmem:[#allocation2 + $0x3c] sm:$0x1] %v308_v31 }
  0x60   : > { %1949 = vrot.lane.b32.xlu1 %v9197_v12, %s10091_s8  ;;  %v2843_v29 = vsel %vm10238_vm14, %v9244_v16, %v2842_v22  ;;  %v2844_v30 = vrot.slane %v2842_v22, 4  ;;  %v2739_v42 = vld [vmem:[#allocation2 + $0x30] sm:$0xe]  ;;  %v633_v43 = vshrl.u32 %v531_v32, 16  ;;  %v627_v49 = vrot.slane %v625_v39, 7 }
  0x61   : > { %v2294_v33 = vsel %vm10274_vm15, %v2289_v26, %v2293_v9  ;;  %v2304_v34 = vsel %vm10274_vm15, %v2299_v27, %v2303_v21  ;;  %v2308_v35 = vrot.slane %v2306_v14, 4  ;;  %v2311_v36 = vrot.slane %v2309_v28, 5  ;;  %v3235_v44 = vld [vmem:[#allocation2 + $0x30] sm:$0xf] }
  0x62   : > { %v9228_v37 = vcombine.low %v2294_v33, %v2304_v34  ;;  %v2846_v38 = vsel %vm10238_vm14, %v2844_v30, %v2845_v25  ;;  %v636_v54 = vshll.u32 %v531_v32, 16  ;;  %v630_v41 = vor.u32 %v628_v40, %v627_v49  ;;  %v3780_v59 = vld [vmem:[#allocation2 + $0x30] sm:$0xe] }
  0x63   : > { %v9260_v48 = vcombine.low %v2843_v29, %v2846_v38  ;;  %v2312_v52 = vor.u32 %v2311_v36, %v2308_v35  ;;  %v631_v60 = vrot.slane %v627_v49, 4  ;;  %v10403_v61 = vrot.slane %v633_v43, 7  ;;  %v1148_v29 = vld [vmem:[#allocation2 + $0x30] sm:$0xf] }
  0x64   : > { %v9980_v46 = vld [vmem:[#allocation2 + $0x30] sm:$0xff]   ;;  %2669 = vrot.lane.b32.xlu0 %v9228_v37, %s10096_s13  ;;  %v904_v45 = vld [vmem:[#allocation2 + $0x38] sm:$0x1]  ;;  %v3326_v2 = vshrl.u32 %v3235_v44, 16  ;;  %v3329_v5 = vshll.u32 %v3235_v44, 16  ;;  %v9245_v9 = vrot.slane %v2739_v42, 9 }
  0x65   : > { %v905_v50 = vsel %vm10152_vm4, %v623_v62, %v904_v45  ;;  %v2195_v51 = vld [vmem:[#allocation2 + $0x34] sm:$0xf]  ;;  %2126 = vrot.lane.b32.xlu1 %v9980_v46, %s10090_s30  ;;  %v2313_v12 = vrot.slane %v2312_v52, 4  ;;  %v638_v13 = vor.u32 %v636_v54, %v10403_v61  ;;  %v364_v25 = vsel %vm10186_vm6, 0, %v363_v58 }
  0x66   : > { %v2740_v53 = vld [vmem:[#allocation2 + $0x34] sm:$0xf]  ;;  %906 = vst [vmem:[#allocation2 + $0x38] sm:$0x1] %v905_v50  ;;  %v2315_v55 = vshll.u32 %v2195_v51, 16  ;;  %v2319_v56 = vshrl.u32 %v2195_v51, 16 }
  0x67   : > { %v2849_v57 = vrot.slane %v2740_v53, 5  ;;  %v3236_v63 = vld [vmem:[#allocation2 + $0x34] sm:$0xf]  ;;  %v907_v11 = vld [vmem:[#allocation2 + $0x3c] sm:$0xf]  ;;  %v3328_v16 = vrot.slane %v3326_v2, 4  ;;  %v639_v24 = vsel %vm10199_vm8, %v631_v60, %v638_v13 }
  0x68   : > { %v2317_v7 = vrot.slane %v2315_v55, 5  ;;  %v2321_v8 = vrot.slane %v2319_v56, 4  ;;  %2990 = vrot.lane.b32.xlu0 %v9260_v48, %s10094_s11  ;;  %v9981_v10 = vld [vmem:[#allocation2 + $0x30] sm:$0xff]   ;;  %v908_v15 = vsel %vm10206_vm11, %v630_v41, %v907_v11  ;;  %v3331_v21 = vrot.slane %v3329_v5, 5  ;;  %910 = vst.msk [vmem:[#allocation2 + $0x40] sm:$0xf] %vm280_vm0, %v639_v24 }
  0x69   : > { %v3781_v17 = vld [vmem:[#allocation2 + $0x34] sm:$0xf]  ;;  %v2851_v20 = vrot.slane %v2849_v57, 4  ;;  %909 = vst [vmem:[#allocation2 + $0x3c] sm:$0xf] %v908_v15  ;;  %v3335_v22 = vshll.u32 %v3236_v63, 16  ;;  %v2850_v32 = vsel %vm10238_vm14, %v9245_v9, %v2849_v57 }
  0x6a   : > { %v2322_v19 = vor.u32 %v2321_v8, %v2317_v7  ;;  %v3339_v1 = vshrl.u32 %v3236_v63, 16  ;;  %v9308_v26 = vrot.slane %v3780_v59, 9  ;;  %v3332_v14 = vor.u32 %v3331_v21, %v3328_v16  ;;  %365 = vst [vmem:[#allocation2 + $0x44] sm:$0x1] %v364_v25  ;;  %v1149_v53 = vld [vmem:[#allocation2 + $0x34] sm:$0xf] }
  0x6b   : > { %v3337_v28 = vrot.slane %v3335_v22, 5  ;;  %v3886_v62 = vrot.slane %v3781_v17, 5  ;;  %v640_v39 = vrot.slane %v10403_v61, 4  ;;  %v2318_v44 = vsel %vm10274_vm15, %v2313_v12, %v2317_v7 }
  0x6c   : > { %v2323_v27 = vrot.slane %v2322_v19, 4  ;;  %3168 = vrot.lane.b32.xlu0 %v9981_v10, %s10092_s9  ;;  %v3333_v36 = vrot.slane %v3332_v14, 4  ;;  %v3341_v37 = vrot.slane %v3339_v1, 4  ;;  %v1284_v54 = vshrl.u32 %v1148_v29, 16 }
  0x6d   : > { %v2196_v30 = vld [vmem:[#allocation2 + $0x38] sm:$0x1]  ;;  %v3888_v42 = vrot.slane %v3886_v62, 4  ;;  %v3887_v52 = vsel %vm10238_vm14, %v9308_v26, %v3886_v62  ;;  %v1287_v16 = vshll.u32 %v1148_v29, 16  ;;  %v1297_v21 = vshrl.u32 %v1149_v53, 16 }
  0x6e   : > { %v2741_v31 = vld [vmem:[#allocation2 + $0x38] sm:$0x1]  ;;  %v2325_v34 = vshll.u32 %v2196_v30, 16  ;;  %v3342_v48 = vor.u32 %v3341_v37, %v3337_v28  ;;  %v3338_v49 = vsel %vm10274_vm15, %v3333_v36, %v3337_v28  ;;  %v1286_v2 = vrot.slane %v1284_v54, 4 }
  0x6f   : > { %v3237_v33 = vld [vmem:[#allocation2 + $0x38] sm:$0x1]  ;;  %v2852_v35 = vrot.slane %v2741_v31, 5  ;;  %v3239_v8 = vld [vmem:[#allocation2 + $0x40] sm:$0xf]  ;;  %v1299_v31 = vrot.slane %v1297_v21, 4 }
  0x70   : > { %v3782_v38 = vld [vmem:[#allocation2 + $0x38] sm:$0x1]  ;;  %v3345_v40 = vshll.u32 %v3237_v33, 16  ;;  %v2327_v46 = vrot.slane %v2325_v34, 5  ;;  %v3238_v51 = vld [vmem:[#allocation2 + $0x3c] sm:$0xf] }
  0x71   : > { %v3889_v43 = vrot.slane %v3782_v38, 5  ;;  %v2853_v45 = vsel %vm10238_vm14, %v2851_v20, %v2852_v35  ;;  %v3343_v56 = vrot.slane %v3342_v48, 4  ;;  %v3350_v57 = vshrl.u32 %v3238_v51, 16  ;;  %v1150_v58 = vld [vmem:[#allocation2 + $0x38] sm:$0x1]  ;;  %v9982_v28 = vld [vmem:[#allocation2 + $0x3c] sm:$0xff]  }
  0x72   : > { %v3347_v50 = vrot.slane %v3345_v40, 5  ;;  %v2328_v55 = vsel %vm10274_vm15, %v2323_v27, %v2327_v46  ;;  %v3353_v41 = vshll.u32 %v3238_v51, 16  ;;  %v9261_v60 = vcombine.low %v2850_v32, %v2853_v45  ;;  %v911_v61 = vld [vmem:[#allocation2 + $0x44] sm:$0x1]  ;;  %v3783_v11 = vld [vmem:[#allocation2 + $0x3c] sm:$0xe] }
  0x73   : > { %v9229_v59 = vcombine.low %v2318_v44, %v2328_v55  ;;  %v3890_v63 = vsel %vm10238_vm14, %v3888_v42, %v3889_v43  ;;  %v912_v7 = vsel %vm10152_vm4, %v640_v39, %v911_v61  ;;  %v3352_v9 = vrot.slane %v3350_v57, 4  ;;  %v3784_v17 = vld [vmem:[#allocation2 + $0x40] sm:$0xf]  ;;  %v1151_v24 = vld [vmem:[#allocation2 + $0x3c] sm:$0xf] }
  0x74   : > { %v3348_v5 = vsel %vm10274_vm15, %v3343_v56, %v3347_v50  ;;  %v3355_v10 = vrot.slane %v3353_v41, 5  ;;  %913 = vst [vmem:[#allocation2 + $0x44] sm:$0x1] %v912_v7  ;;  %v3359_v13 = vshll.u32 %v3239_v8, 16  ;;  %v3363_v15 = vshrl.u32 %v3239_v8, 16 }
  0x75   : > { %2671 = vrot.lane.b32.xlu1 %v9229_v59, %s10096_s13  ;;  %v9292_v12 = vcombine.low %v3338_v49, %v3348_v5  ;;  %v1293_v20 = vshll.u32 %v1149_v53, 16  ;;  %v1303_v22 = vshll.u32 %v1150_v58, 16  ;;  %v9324_v26 = vcombine.low %v3887_v52, %v3890_v63  ;;  %v1152_v14 = vld [vmem:[#allocation2 + $0x40] sm:$0xf]  ;;  %v1696_v44 = vld [vmem:[#allocation2 + $0x30] sm:$0xe] }
  0x76   : > { %v3356_v19 = vor.u32 %v3355_v10, %v3352_v9  ;;  %v3361_v1 = vrot.slane %v3359_v13, 5  ;;  %v3365_v25 = vrot.slane %v3363_v15, 4  ;;  %v1289_v27 = vrot.slane %v1287_v16, 5  ;;  %v1697_v52 = vld [vmem:[#allocation2 + $0x34] sm:$0xf] }
  0x77   : > { %3713 = vrot.lane.b32.xlu0 %v9292_v12, %s10097_s14  ;;  %v1295_v30 = vrot.slane %v1293_v20, 5  ;;  %v9309_v32 = vrot.slane %v3783_v11, 9  ;;  %v3893_v34 = vrot.slane %v3784_v17, 5  ;;  %v1308_v35 = vshrl.u32 %v1151_v24, 16  ;;  %v1698_v61 = vld [vmem:[#allocation2 + $0x38] sm:$0x1] }
  0x78   : > { %v3357_v62 = vrot.slane %v3356_v19, 4  ;;  %v3366_v29 = vor.u32 %v3365_v25, %v3361_v1  ;;  %v1290_v33 = vor.u32 %v1289_v27, %v1286_v2  ;;  %v1305_v37 = vrot.slane %v1303_v22, 5  ;;  %v1699_v8 = vld [vmem:[#allocation2 + $0x3c] sm:$0xe]  ;;  %v1700_v9 = vld [vmem:[#allocation2 + $0x40] sm:$0xf] }
  0x79   : > { %2992 = vrot.lane.b32.xlu1 %v9261_v60, %s10094_s11  ;;  %v1300_v36 = vor.u32 %v1299_v31, %v1295_v30  ;;  %v1311_v38 = vshll.u32 %v1151_v24, 16  ;;  %v1317_v39 = vshll.u32 %v1152_v14, 16  ;;  %v3895_v43 = vrot.slane %v3893_v34, 4  ;;  %v310_v10 = vld [vmem:[#allocation2 + $0x48] sm:$0x1] }
  0x7a   : > { %v3367_v40 = vrot.slane %v3366_v29, 4  ;;  %v1291_v42 = vrot.slane %v1290_v33, 4  ;;  %v3362_v45 = vsel %vm10274_vm15, %v3357_v62, %v3361_v1  ;;  %v3894_v50 = vsel %vm10238_vm14, %v9309_v32, %v3893_v34  ;;  %v532_v17 = vld [vmem:[%s10182_s29 + $0x28] sm:$0xf]  ;;  %v533_v19 = vld [vmem:[%s10182_s29 + $0x2c] sm:$0xf] }
  0x7b   : > { %4034 = vrot.lane.b32.xlu0 %v9324_v26, %s10095_s12  ;;  %v3240_v46 = vld [vmem:[#allocation2 + $0x44] sm:$0x1]  ;;  %v1301_v48 = vrot.slane %v1300_v36, 4  ;;  %v1310_v51 = vrot.slane %v1308_v35, 4  ;;  %v1313_v57 = vrot.slane %v1311_v38, 5  ;;  %v1319_v58 = vrot.slane %v1317_v39, 5 }
  0x7c   : > { %v3785_v49 = vld [vmem:[#allocation2 + $0x44] sm:$0x1]  ;;  %v3369_v53 = vshll.u32 %v3240_v46, 16  ;;  %v1296_v54 = vsel %vm10274_vm15, %v1291_v42, %v1295_v30  ;;  %v1321_v59 = vshrl.u32 %v1152_v14, 16  ;;  %v9182_v15 = vrot.slane %v1696_v44, 9  ;;  %v9983_v46 = vld [vmem:[#allocation2 + $0x3c] sm:$0xff]  }
  0x7d   : > { %3170 = vrot.lane.b32.xlu1 %v9982_v28, %s10092_s9  ;;  %v3896_v55 = vrot.slane %v3785_v49, 5  ;;  %v1153_v56 = vld [vmem:[#allocation2 + $0x44] sm:$0x1]  ;;  %v1306_v41 = vsel %vm10274_vm15, %v1301_v48, %v1305_v37  ;;  %v1314_v7 = vor.u32 %v1313_v57, %v1310_v51  ;;  %v1813_v22 = vrot.slane %v1697_v52, 5  ;;  %v2197_v35 = vld [vmem:[#allocation2 + $0x3c] sm:$0xf] }
  0x7e   : > { %v1327_v60 = vshll.u32 %v1153_v56, 16  ;;  %v3371_v63 = vrot.slane %v3369_v53, 5  ;;  %v9166_v2 = vcombine.low %v1296_v54, %v1306_v41  ;;  %v1323_v12 = vrot.slane %v1321_v59, 4  ;;  %v1701_v16 = vld [vmem:[#allocation2 + $0x44] sm:$0x1]  ;;  %v9999_v51 = vld [vmem:[%s13337_s1 + $0x8] sm:$0xff]  }
  0x7f   : > { %v3897_v5 = vsel %vm10238_vm14, %v3895_v43, %v3896_v55  ;;  %v1315_v21 = vrot.slane %v1314_v7, 4  ;;  %v1816_v24 = vrot.slane %v1698_v61, 5  ;;  %v9183_v26 = vrot.slane %v1699_v8, 9  ;;  %v9996_v14 = vld [vmem:[%s13337_s1] sm:$0xff]   ;;  %v366_v49 = vld [vmem:[#allocation2 + $0x50] sm:$0x1] }
  0x80   : > { %v9325_v11 = vcombine.low %v3894_v50, %v3897_v5  ;;  %v1329_v13 = vrot.slane %v1327_v60, 5  ;;  %v3372_v20 = vsel %vm10274_vm15, %v3367_v40, %v3371_v63  ;;  %v1324_v25 = vor.u32 %v1323_v12, %v1319_v58  ;;  %9730 = vmatprep.subr.bf16.mxu0 %v9996_v14  ;;  %v2198_v40 = vld [vmem:[#allocation2 + $0x40] sm:$0xf]  ;;  %v2199_v48 = vld [vmem:[#allocation2 + $0x44] sm:$0x1] }
  0x81   : > { %v9293_v1 = vcombine.low %v3362_v45, %v3372_v20  ;;  %v1820_v27 = vrot.slane %v1700_v9, 5  ;;  %v1320_v28 = vsel %vm10274_vm15, %v1315_v21, %v1319_v58  ;;  %v1814_v62 = vsel %vm10238_vm14, %v9182_v15, %v1813_v22  ;;  %9731 = vmatpush3.bf16.msra.mxu0 %v9996_v14  ;;  %v2742_v50 = vld [vmem:[#allocation2 + $0x3c] sm:$0xe]  ;;  %v2743_v55 = vld [vmem:[#allocation2 + $0x40] sm:$0xf] }
  0x82   : > { %4036 = vrot.lane.b32.xlu0 %v9325_v11, %s10095_s12  ;;  %v1815_v30 = vrot.slane %v1813_v22, 4  ;;  %v1823_v31 = vrot.slane %v1701_v16, 5  ;;  %v1325_v32 = vrot.slane %v1324_v25, 4  ;;  %v311_v34 = vsel %vm10152_vm4, 0, %v310_v10  ;;  %v2744_v56 = vld [vmem:[#allocation2 + $0x44] sm:$0x1]  ;;  %9732 = vmatprep.subr.bf16.mxu0 %v9999_v51 }
  0x83   : > { %3715 = vrot.lane.b32.xlu1 %v9293_v1, %s10097_s14  ;;  %v10464_v29 = vsel %vm10238_vm14, %v9183_v26, %v1820_v27  ;;  %v1822_v33 = vrot.slane %v1820_v27, 4  ;;  %312 = vst [vmem:[#allocation2 + $0x48] sm:$0x1] %v311_v34  ;;  %v642_v37 = vshrl.u32 %v532_v17, 16  ;;  %v645_v38 = vshll.u32 %v532_v17, 16 }
  0x84   : > { %v1817_v36 = vsel %vm10238_vm14, %v1815_v30, %v1816_v24  ;;  %v650_v39 = vshrl.u32 %v533_v19, 16  ;;  %v1330_v42 = vsel %vm10274_vm15, %v1325_v32, %v1329_v13  ;;  %v653_v45 = vshll.u32 %v533_v19, 16  ;;  %v313_v60 = vld [vmem:[#allocation2 + $0x54] sm:$0x1]  ;;  %v10482_v61 = vld [vmem:[%s10182_s29 + $0x30] sm:$0xf] }
  0x85   : > { %v9198_v43 = vcombine.low %v1814_v62, %v1817_v36  ;;  %v1824_v44 = vsel %vm10238_vm14, %v1822_v33, %v1823_v31  ;;  %v9167_v52 = vcombine.low %v1320_v28, %v1330_v42  ;;  %v644_v53 = vrot.slane %v642_v37, 7  ;;  %v535_v12 = vld [vmem:[%s10182_s29 + $0x34] sm:$0xf]  ;;  %9733 = vmatpush3.bf16.msra.mxu0 %v9999_v51  ;;  %v369_v19 = vld [vmem:[#allocation2 + $0x5c] sm:$0x1] }
  0x86   : > { %v10477_v54 = vrot.slane %v650_v39, 7  ;;  %v2330_v57 = vshrl.u32 %v2197_v35, 16  ;;  %v2333_v41 = vshll.u32 %v2197_v35, 16  ;;  %v2339_v58 = vshll.u32 %v2198_v40, 16  ;;  %v316_v28 = vld [vmem:[#allocation2 + $0x60] sm:$0x1] }
  0x87   : > { %1627 = vrot.lane.b32.xlu1 %v9166_v2, %s10093_s10  ;;  %1951 = vrot.lane.b32.xlu0 %v9198_v43, %s10091_s8  ;;  %v2343_v59 = vshrl.u32 %v2198_v40, 16  ;;  %v9199_v63 = vcombine.low %v10464_v29, %v1824_v44  ;;  %v647_v5 = vor.u32 %v645_v38, %v644_v53  ;;  %v648_v7 = vrot.slane %v644_v53, 4  ;;  %v10500_v62 = vld [vmem:[%s10182_s29 + $0x38] sm:$0xf] }
  0x88   : > { %v655_v8 = vor.u32 %v653_v45, %v10477_v54  ;;  %v2332_v9 = vrot.slane %v2330_v57, 4  ;;  %v2335_v10 = vrot.slane %v2333_v41, 5  ;;  %v2341_v2 = vrot.slane %v2339_v58, 5 }
  0x89   : > { %v2345_v11 = vrot.slane %v2343_v59, 4  ;;  %v2349_v15 = vshll.u32 %v2199_v48, 16  ;;  %v367_v16 = vsel %vm10186_vm6, 0, %v366_v49  ;;  %v9246_v17 = vrot.slane %v2742_v50, 9 }
  0x8a   : > { %v656_v13 = vsel %vm10199_vm8, %v648_v7, %v655_v8  ;;  %v914_v20 = vld [vmem:[#allocation2 + $0x48] sm:$0xf]  ;;  %v2336_v21 = vor.u32 %v2335_v10, %v2332_v9  ;;  %368 = vst [vmem:[#allocation2 + $0x50] sm:$0x1] %v367_v16  ;;  %v2856_v24 = vrot.slane %v2743_v55, 5  ;;  %v2859_v1 = vrot.slane %v2744_v56, 5 }
  0x8b   : > { %1629 = vrot.lane.b32.xlu1 %v9167_v52, %s10093_s10  ;;  %2128 = vrot.lane.b32.xlu0 %v9983_v46, %s10090_s30  ;;  %917 = vst.msk [vmem:[#allocation2 + $0x4c] sm:$0xf] %vm280_vm0, %v656_v13  ;;  %v2346_v22 = vor.u32 %v2345_v11, %v2341_v2  ;;  %v915_v25 = vsel %vm10206_vm11, %v647_v5, %v914_v20  ;;  %v2351_v26 = vrot.slane %v2349_v15, 5  ;;  %v314_v27 = vsel %vm10152_vm4, 0, %v313_v60 }
  0x8c   : > { %v659_v14 = vshrl.u32 %v10482_v61, 16  ;;  %v657_v30 = vrot.slane %v10477_v54, 4  ;;  %916 = vst [vmem:[#allocation2 + $0x48] sm:$0xf] %v915_v25  ;;  %v2337_v31 = vrot.slane %v2336_v21, 4  ;;  %v2858_v29 = vrot.slane %v2856_v24, 4 }
  0x8d   : > { %v2347_v32 = vrot.slane %v2346_v22, 4  ;;  %315 = vst [vmem:[#allocation2 + $0x54] sm:$0x1] %v314_v27  ;;  %v2857_v33 = vsel %vm10238_vm14, %v9246_v17, %v2856_v24  ;;  %v667_v35 = vshrl.u32 %v535_v12, 16  ;;  %v670_v36 = vshll.u32 %v535_v12, 16 }
  0x8e   : > { %v661_v34 = vrot.slane %v659_v14, 7  ;;  %v2342_v37 = vsel %vm10274_vm15, %v2337_v31, %v2341_v2  ;;  %v2860_v39 = vsel %vm10238_vm14, %v2858_v29, %v2859_v1  ;;  %v370_v40 = vsel %vm10186_vm6, 0, %v369_v19 }
  0x8f   : > { %1953 = vrot.lane.b32.xlu1 %v9199_v63, %s10091_s8  ;;  %v2352_v38 = vsel %vm10274_vm15, %v2347_v32, %v2351_v26  ;;  %v662_v43 = vshll.u32 %v10482_v61, 16  ;;  %371 = vst [vmem:[#allocation2 + $0x5c] sm:$0x1] %v370_v40  ;;  %v669_v46 = vrot.slane %v667_v35, 7  ;;  %v317_v45 = vsel %vm10152_vm4, 0, %v316_v28 }
  0x90   : > { %v9230_v42 = vcombine.low %v2342_v37, %v2352_v38  ;;  %v665_v44 = vrot.slane %v661_v34, 4  ;;  %v676_v48 = vshrl.u32 %v10500_v62, 16  ;;  %v9262_v51 = vcombine.low %v2857_v33, %v2860_v39  ;;  %318 = vst [vmem:[#allocation2 + $0x60] sm:$0x1] %v317_v45 }
  0x91   : > { %v918_v49 = vld [vmem:[#allocation2 + $0x50] sm:$0x1]  ;;  %v672_v56 = vor.u32 %v670_v36, %v669_v46  ;;  %v664_v59 = vor.u32 %v662_v43, %v661_v34  ;;  %v674_v11 = vrot.slane %v669_v46, 4  ;;  %vm13347_vm1 = vcmask 31744  }
  0x92   : > { %2673 = vrot.lane.b32.xlu0 %v9230_v42, %s10096_s13  ;;  %v2201_v50 = vld [vmem:[#allocation2 + $0x4c] sm:$0xf]  ;;  %v919_v52 = vsel %vm10152_vm4, %v657_v30, %v918_v49  ;;  %vm1667_vm7 = vcmask 64544   ;;  %vm1991_vm9 = vcmask 97344   ;;  %vm13349_vm10 = vcmask 130144  }
  0x93   : > { %v2363_v53 = vshll.u32 %v2201_v50, 16  ;;  %v2367_v54 = vshrl.u32 %v2201_v50, 16  ;;  %v2746_v55 = vld [vmem:[#allocation2 + $0x4c] sm:$0xf]  ;;  %920 = vst [vmem:[#allocation2 + $0x50] sm:$0x1] %v919_v52  ;;  %v673_v2 = vsel %vm10199_vm8, %v665_v44, %v672_v56 }
  0x94   : > { %v9984_v57 = vld [vmem:[#allocation2 + $0x48] sm:$0xff]   ;;  %v2863_v58 = vrot.slane %v2746_v55, 5  ;;  %v921_v16 = vld [vmem:[#allocation2 + $0x54] sm:$0xf]  ;;  %924 = vst.msk [vmem:[#allocation2 + $0x58] sm:$0xf] %vm280_vm0, %v673_v2 }
  0x95   : > { %v2200_v41 = vld [vmem:[#allocation2 + $0x48] sm:$0xf]  ;;  %v10521_v63 = vrot.slane %v2363_v53, 5  ;;  %v2369_v5 = vrot.slane %v2367_v54, 4  ;;  %2130 = vrot.lane.b32.xlu1 %v9984_v57, %s10090_s30  ;;  %v922_v19 = vsel %vm10206_vm11, %v664_v59, %v921_v16  ;;  %v3242_v20 = vld [vmem:[#allocation2 + $0x4c] sm:$0xf] }
  0x96   : > { %v2354_v60 = vshrl.u32 %v2200_v41, 16  ;;  %v2357_v61 = vshll.u32 %v2200_v41, 16  ;;  %v2745_v7 = vld [vmem:[#allocation2 + $0x48] sm:$0xe]  ;;  %2994 = vrot.lane.b32.xlu0 %v9262_v51, %s10094_s11  ;;  %v2865_v9 = vrot.slane %v2863_v58, 4  ;;  %v3383_v27 = vshll.u32 %v3242_v20, 16 }
  0x97   : > { %v9247_v8 = vrot.slane %v2745_v7, 9  ;;  %v9985_v10 = vld [vmem:[#allocation2 + $0x48] sm:$0xff]   ;;  %v2370_v15 = vor.u32 %v2369_v5, %v10521_v63  ;;  %v925_v24 = vld [vmem:[#allocation2 + $0x5c] sm:$0x1]  ;;  %923 = vst [vmem:[#allocation2 + $0x54] sm:$0xf] %v922_v19 }
  0x98   : > { %v2356_v12 = vrot.slane %v2354_v60, 4  ;;  %v2359_v13 = vrot.slane %v2357_v61, 5  ;;  %v3241_v17 = vld [vmem:[#allocation2 + $0x48] sm:$0xf]  ;;  %v3387_v14 = vshrl.u32 %v3242_v20, 16  ;;  %v926_v32 = vsel %vm10152_vm4, %v674_v11, %v925_v24 }
  0x99   : > { %v3374_v21 = vshrl.u32 %v3241_v17, 16  ;;  %v3377_v22 = vshll.u32 %v3241_v17, 16  ;;  %v10531_v1 = vpop.permute.xlu0 %2120  ;;  %v2371_v26 = vrot.slane %v2370_v15, 4  ;;  %v3786_v28 = vld [vmem:[#allocation2 + $0x48] sm:$0xe]  ;;  %v10538_v37 = vsel %vm10238_vm14, %v9247_v8, %v2863_v58 }
  0x9a   : > { %v2360_v25 = vor.u32 %v2359_v13, %v2356_v12  ;;  %3172 = vrot.lane.b32.xlu0 %v9985_v10, %s10092_s9  ;;  %v3787_v29 = vld [vmem:[#allocation2 + $0x4c] sm:$0xf]  ;;  %v9310_v33 = vrot.slane %v3786_v28, 9  ;;  %v2202_v34 = vld [vmem:[#allocation2 + $0x50] sm:$0x1]  ;;  %v3385_v38 = vrot.slane %v3383_v27, 5 }
  0x9b   : > { %v3376_v30 = vrot.slane %v3374_v21, 4  ;;  %v3379_v31 = vrot.slane %v3377_v22, 5  ;;  %v2747_v36 = vld [vmem:[#allocation2 + $0x50] sm:$0x1]  ;;  %927 = vst [vmem:[#allocation2 + $0x5c] sm:$0x1] %v926_v32 }
  0x9c   : > { %v2361_v35 = vrot.slane %v2360_v25, 4  ;;  %v2373_v39 = vshll.u32 %v2202_v34, 16  ;;  %v2866_v40 = vrot.slane %v2747_v36, 5  ;;  %v3243_v42 = vld [vmem:[#allocation2 + $0x50] sm:$0x1]  ;;  %v3389_v44 = vrot.slane %v3387_v14, 4 }
  0x9d   : > { %v3380_v43 = vor.u32 %v3379_v31, %v3376_v30  ;;  %v3393_v45 = vshll.u32 %v3243_v42, 16  ;;  %v3788_v49 = vld [vmem:[#allocation2 + $0x50] sm:$0x1]  ;;  %v3900_v50 = vrot.slane %v3787_v29, 5  ;;  %v679_v51 = vshll.u32 %v10500_v62, 16  ;;  %v10544_v52 = vpop.permute.xlu1 %1943  ;;  %v10548_v41 = vpop.permute.xlu0 %3164 }
  0x9e   : > { %v2366_v46 = vsel %vm10274_vm15, %v2361_v35, %v10521_v63  ;;  %v2375_v53 = vrot.slane %v2373_v39, 5  ;;  %v2867_v54 = vsel %vm10238_vm14, %v2865_v9, %v2866_v40  ;;  %v3390_v56 = vor.u32 %v3389_v44, %v3385_v38  ;;  %v3245_v57 = vld [vmem:[#allocation2 + $0x58] sm:$0xf]  ;;  %v1154_v63 = vld [vmem:[#allocation2 + $0x48] sm:$0xf] }
  0x9f   : > { %v3381_v55 = vrot.slane %v3380_v43, 4  ;;  %v9263_v58 = vcombine.low %v10538_v37, %v2867_v54  ;;  %v3395_v59 = vrot.slane %v3393_v45, 5  ;;  %v3407_v60 = vshll.u32 %v3245_v57, 16  ;;  %v3244_v10 = vld [vmem:[#allocation2 + $0x54] sm:$0xf] }
  0xa0   : > { %v3411_v61 = vshrl.u32 %v3245_v57, 16  ;;  %v2376_v5 = vsel %vm10274_vm15, %v2371_v26, %v2375_v53  ;;  %v3391_v8 = vrot.slane %v3390_v56, 4  ;;  %v3901_v9 = vsel %vm10238_vm14, %v9310_v33, %v3900_v50  ;;  %v1155_v15 = vld [vmem:[#allocation2 + $0x4c] sm:$0xf]  ;;  %v1156_v30 = vld [vmem:[#allocation2 + $0x50] sm:$0x1] }
  0xa1   : > { %v3386_v7 = vsel %vm10274_vm15, %v3381_v55, %v3385_v38  ;;  %v9231_v2 = vcombine.low %v2366_v46, %v2376_v5  ;;  %v3398_v11 = vshrl.u32 %v3244_v10, 16  ;;  %v3401_v12 = vshll.u32 %v3244_v10, 16  ;;  %v10560_v27 = vpop.permute.xlu1 %2122  ;;  %v3789_v29 = vld [vmem:[#allocation2 + $0x54] sm:$0xe]  ;;  %v3790_v38 = vld [vmem:[#allocation2 + $0x58] sm:$0xf] }
  0xa2   : > { %v3409_v13 = vrot.slane %v3407_v60, 5  ;;  %v3396_v16 = vsel %vm10274_vm15, %v3391_v8, %v3395_v59  ;;  %v3246_v17 = vld [vmem:[#allocation2 + $0x5c] sm:$0x1]  ;;  %v3413_v19 = vrot.slane %v3411_v61, 4  ;;  %v3902_v20 = vrot.slane %v3900_v50, 4  ;;  %v9986_v45 = vld [vmem:[#allocation2 + $0x54] sm:$0xff]  }
  0xa3   : > { %v3903_v21 = vrot.slane %v3788_v49, 5  ;;  %2675 = vrot.lane.b32.xlu1 %v9231_v2, %s10096_s13  ;;  %v9294_v22 = vcombine.low %v3386_v7, %v3396_v16  ;;  %v3400_v24 = vrot.slane %v3398_v11, 4  ;;  %v3403_v25 = vrot.slane %v3401_v12, 5  ;;  %v3791_v39 = vld [vmem:[#allocation2 + $0x5c] sm:$0x1] }
  0xa4   : > { %v3417_v26 = vshll.u32 %v3246_v17, 16  ;;  %v3414_v14 = vor.u32 %v3413_v19, %v3409_v13  ;;  %v1332_v31 = vshrl.u32 %v1154_v63, 16  ;;  %v1335_v32 = vshll.u32 %v1154_v63, 16  ;;  %v1157_v46 = vld [vmem:[#allocation2 + $0x54] sm:$0xf] }
  0xa5   : > { %v3904_v28 = vsel %vm10238_vm14, %v3902_v20, %v3903_v21  ;;  %v10564_v33 = vpop.permute.xlu0 %1619  ;;  %3717 = vrot.lane.b32.xlu0 %v9294_v22, %s10097_s14  ;;  %v3404_v34 = vor.u32 %v3403_v25, %v3400_v24  ;;  %v1341_v37 = vshll.u32 %v1155_v15, 16  ;;  %v1345_v44 = vshrl.u32 %v1155_v15, 16  ;;  %v1158_v60 = vld [vmem:[#allocation2 + $0x58] sm:$0xf]  ;;  %v1159_v61 = vld [vmem:[#allocation2 + $0x5c] sm:$0x1]  ;;  %v10573_v10 = vpop.permute.xlu1 %3166 }
  0xa6   : > { %v3419_v35 = vrot.slane %v3417_v26, 5  ;;  %v9326_v36 = vcombine.low %v3901_v9, %v3904_v28  ;;  %v3415_v40 = vrot.slane %v3414_v14, 4  ;;  %v1334_v42 = vrot.slane %v1332_v31, 4  ;;  %v1702_v8 = vld [vmem:[#allocation2 + $0x48] sm:$0xe] }
  0xa7   : > { %v1337_v43 = vrot.slane %v1335_v32, 5  ;;  %2996 = vrot.lane.b32.xlu1 %v9263_v58, %s10094_s11  ;;  %v3405_v49 = vrot.slane %v3404_v34, 4  ;;  %v1343_v50 = vrot.slane %v1341_v37, 5  ;;  %v1351_v53 = vshll.u32 %v1156_v30, 16  ;;  %v1703_v16 = vld [vmem:[#allocation2 + $0x4c] sm:$0xf] }
  0xa8   : > { %v9311_v54 = vrot.slane %v3789_v29, 9  ;;  %v3420_v55 = vsel %vm10274_vm15, %v3415_v40, %v3419_v35  ;;  %v1347_v57 = vrot.slane %v1345_v44, 4  ;;  %v3907_v59 = vrot.slane %v3790_v38, 5  ;;  %v1704_v17 = vld [vmem:[#allocation2 + $0x50] sm:$0x1] }
  0xa9   : > { %v1338_v56 = vor.u32 %v1337_v43, %v1334_v42  ;;  %v3410_v63 = vsel %vm10274_vm15, %v3405_v49, %v3409_v13  ;;  %4038 = vrot.lane.b32.xlu0 %v9326_v36, %s10095_s12  ;;  %v1353_v5 = vrot.slane %v1351_v53, 5  ;;  %v3910_v58 = vrot.slane %v3791_v39, 5  ;;  %v10575_v9 = vpop.permute.xlu0 %2986  ;;  %v1705_v22 = vld [vmem:[#allocation2 + $0x54] sm:$0xe]  ;;  %v1706_v24 = vld [vmem:[#allocation2 + $0x58] sm:$0xf] }
  0xaa   : > { %v1356_v7 = vshrl.u32 %v1157_v46, 16  ;;  %v9295_v2 = vcombine.low %v3410_v63, %v3420_v55  ;;  %v1348_v12 = vor.u32 %v1347_v57, %v1343_v50  ;;  %v3908_v15 = vsel %vm10238_vm14, %v9311_v54, %v3907_v59  ;;  %v1707_v34 = vld [vmem:[#allocation2 + $0x5c] sm:$0x1] }
  0xab   : > { %v1339_v11 = vrot.slane %v1338_v56, 4  ;;  %3174 = vrot.lane.b32.xlu1 %v9986_v45, %s10092_s9  ;;  %v3909_v13 = vrot.slane %v3907_v59, 4  ;;  %v1359_v20 = vshll.u32 %v1157_v46, 16  ;;  %v1365_v21 = vshll.u32 %v1158_v60, 16  ;;  %v537_v44 = vld [vmem:[%s10182_s29 + $0x3c] sm:$0xf]  ;;  %v10588_v46 = vpop.permute.xlu1 %1945 }
  0xac   : > { %v1358_v19 = vrot.slane %v1356_v7, 4  ;;  %v1349_v26 = vrot.slane %v1348_v12, 4  ;;  %v1369_v14 = vshrl.u32 %v1158_v60, 16  ;;  %v1375_v28 = vshll.u32 %v1159_v61, 16  ;;  %v2204_v12 = vld [vmem:[#allocation2 + $0x58] sm:$0xf] }
  0xad   : > { %v1344_v25 = vsel %vm10274_vm15, %v1339_v11, %v1343_v50  ;;  %v3911_v30 = vsel %vm10238_vm14, %v3909_v13, %v3910_v58  ;;  %v1361_v31 = vrot.slane %v1359_v20, 5  ;;  %v1367_v32 = vrot.slane %v1365_v21, 5  ;;  %v928_v58 = vld [vmem:[#allocation2 + $0x60] sm:$0xf]  ;;  %v372_v20 = vld [vmem:[#allocation2 + $0x68] sm:$0x1] }
  0xae   : > { %v9184_v29 = vrot.slane %v1702_v8, 9  ;;  %v1354_v35 = vsel %vm10274_vm15, %v1349_v26, %v1353_v5  ;;  %v9327_v36 = vcombine.low %v3908_v15, %v3911_v30  ;;  %v1371_v37 = vrot.slane %v1369_v14, 4  ;;  %v10590_v45 = vpop.permute.xlu0 %4030  ;;  %v319_v26 = vld [vmem:[#allocation2 + $0x6c] sm:$0x1]  ;;  %v538_v14 = vld [vmem:[%s10182_s29 + $0x40] sm:$0xf] }
  0xaf   : > { %v1377_v38 = vrot.slane %v1375_v28, 5  ;;  %3719 = vrot.lane.b32.xlu1 %v9295_v2, %s10097_s14  ;;  %v9168_v39 = vcombine.low %v1344_v25, %v1354_v35  ;;  %v1362_v40 = vor.u32 %v1361_v31, %v1358_v19  ;;  %v1827_v42 = vrot.slane %v1703_v16, 5  ;;  %v2205_v19 = vld [vmem:[#allocation2 + $0x5c] sm:$0x1]  ;;  %v2748_v25 = vld [vmem:[#allocation2 + $0x54] sm:$0xe]  ;;  %v10615_v28 = vpop.permute.xlu1 %2988 }
  0xb0   : > { %v1830_v43 = vrot.slane %v1704_v17, 5  ;;  %4040 = vrot.lane.b32.xlu0 %v9327_v36, %s10095_s12  ;;  %v1372_v49 = vor.u32 %v1371_v37, %v1367_v32  ;;  %v9185_v50 = vrot.slane %v1705_v22, 9  ;;  %v1834_v53 = vrot.slane %v1706_v24, 5  ;;  %v9987_v24 = vld [vmem:[#allocation2 + $0x54] sm:$0xff]  }
  0xb1   : > { %v1837_v54 = vrot.slane %v1707_v34, 5  ;;  %v1363_v55 = vrot.slane %v1362_v40, 4  ;;  %v1828_v56 = vsel %vm10238_vm14, %v9184_v29, %v1827_v42  ;;  %v1829_v57 = vrot.slane %v1827_v42, 4  ;;  %v2749_v35 = vld [vmem:[#allocation2 + $0x58] sm:$0xf] }
  0xb2   : > { %v678_v59 = vrot.slane %v676_v48, 7  ;;  %v1373_v60 = vrot.slane %v1372_v49, 4  ;;  %v1835_v61 = vsel %vm10238_vm14, %v9185_v50, %v1834_v53  ;;  %v1836_v63 = vrot.slane %v1834_v53, 4  ;;  %v2203_v48 = vld [vmem:[#allocation2 + $0x54] sm:$0xf]  ;;  %v10617_v30 = vpop.permute.xlu0 %4032 }
  0xb3   : > { %v684_v5 = vshrl.u32 %v537_v44, 16  ;;  %1631 = vrot.lane.b32.xlu1 %v9168_v39, %s10093_s10  ;;  %v1368_v7 = vsel %vm10274_vm15, %v1363_v55, %v1367_v32  ;;  %v1831_v8 = vsel %vm10238_vm14, %v1829_v57, %v1830_v43  ;;  %v687_v62 = vshll.u32 %v537_v44, 16  ;;  %v2750_v40 = vld [vmem:[#allocation2 + $0x5c] sm:$0x1]  ;;  %v10626_v42 = vld [vmem:[%s10182_s29 + $0x44] sm:$0xf] }
  0xb4   : > { %v681_v2 = vor.u32 %v679_v51, %v678_v59  ;;  %v682_v11 = vrot.slane %v678_v59, 4  ;;  %v1378_v15 = vsel %vm10274_vm15, %v1373_v60, %v1377_v38  ;;  %v9200_v16 = vcombine.low %v1828_v56, %v1831_v8  ;;  %v375_v53 = vld [vmem:[#allocation2 + $0x74] sm:$0x1]  ;;  %v10635_v8 = vpop.permute.xlu1 %2667 }
  0xb5   : > { %v1838_v17 = vsel %vm10238_vm14, %v1836_v63, %v1837_v54  ;;  %v10610_v13 = vrot.slane %v684_v5, 7  ;;  %v9169_v21 = vcombine.low %v1368_v7, %v1378_v15  ;;  %v2378_v32 = vshrl.u32 %v2203_v48, 16 }
  0xb6   : > { %v9201_v22 = vcombine.low %v1835_v61, %v1838_v17  ;;  %v929_v51 = vsel %vm10206_vm11, %v681_v2, %v928_v58  ;;  %1955 = vrot.lane.b32.xlu0 %v9200_v16, %s10091_s8  ;;  %v2381_v29 = vshll.u32 %v2203_v48, 16  ;;  %v2387_v34 = vshll.u32 %v2204_v12, 16 }
  0xb7   : > { %v691_v31 = vrot.slane %v10610_v13, 4  ;;  %930 = vst [vmem:[#allocation2 + $0x60] sm:$0xf] %v929_v51  ;;  %1633 = vrot.lane.b32.xlu1 %v9169_v21, %s10093_s10  ;;  %v689_v36 = vor.u32 %v687_v62, %v10610_v13  ;;  %v2391_v37 = vshrl.u32 %v2204_v12, 16  ;;  %v2397_v38 = vshll.u32 %v2205_v19, 16 }
  0xb8   : > { %v373_v39 = vsel %vm10186_vm6, 0, %v372_v20  ;;  %v2380_v43 = vrot.slane %v2378_v32, 4  ;;  %v2383_v44 = vrot.slane %v2381_v29, 5  ;;  %v2389_v49 = vrot.slane %v2387_v34, 5  ;;  %v10637_v2 = vpop.permute.xlu0 %1621 }
  0xb9   : > { %374 = vst [vmem:[#allocation2 + $0x68] sm:$0x1] %v373_v39  ;;  %v9248_v50 = vrot.slane %v2748_v25, 9  ;;  %v690_v54 = vsel %vm10199_vm8, %v682_v11, %v689_v36  ;;  %v2393_v55 = vrot.slane %v2391_v37, 4  ;;  %v2399_v56 = vrot.slane %v2397_v38, 5 }
  0xba   : > { %v2870_v57 = vrot.slane %v2749_v35, 5  ;;  %2132 = vrot.lane.b32.xlu0 %v9987_v24, %s10090_s30  ;;  %931 = vst.msk [vmem:[#allocation2 + $0x64] sm:$0xf] %vm280_vm0, %v690_v54  ;;  %v2384_v59 = vor.u32 %v2383_v44, %v2380_v43  ;;  %v2873_v60 = vrot.slane %v2750_v40, 5  ;;  %v320_v61 = vsel %vm10152_vm4, 0, %v319_v26 }
  0xbb   : > { %v693_v63 = vshrl.u32 %v538_v14, 16  ;;  %1957 = vrot.lane.b32.xlu1 %v9201_v22, %s10091_s8  ;;  %v2394_v5 = vor.u32 %v2393_v55, %v2389_v49  ;;  %321 = vst [vmem:[#allocation2 + $0x6c] sm:$0x1] %v320_v61  ;;  %v696_v7 = vshll.u32 %v538_v14, 16  ;;  %v701_v12 = vshrl.u32 %v10626_v42, 16  ;;  %v9991_v55 = vld [vmem:[#allocation2] sm:$0xff]  }
  0xbc   : > { %v2872_v58 = vrot.slane %v2870_v57, 4  ;;  %v2385_v11 = vrot.slane %v2384_v59, 4  ;;  %v704_v15 = vshll.u32 %v10626_v42, 16  ;;  %v2871_v13 = vsel %vm10238_vm14, %v9248_v50, %v2870_v57  ;;  %v9997_v57 = vld [vmem:[#allocation2 + $0x24] sm:$0xff]   ;;  %1120 = vst.msk [vmem:[#allocation4] sm:$0xff] %vm13347_vm1, %v9991_v55 }
  0xbd   : > { %v695_v48 = vrot.slane %v693_v63, 7  ;;  %v2395_v16 = vrot.slane %v2394_v5, 4  ;;  %v376_v19 = vsel %vm10186_vm6, 0, %v375_v53  ;;  %v703_v40 = vrot.slane %v701_v12, 7  ;;  %v10656_v42 = vpop.permute.xlu1 %3711  ;;  %1123 = vst.msk [vmem:[#allocation4 + $0x18] sm:$0xff] %vm13347_vm1, %v9997_v57 }
  0xbe   : > { %v2206_v17 = vld [vmem:[#allocation2 + $0x60] sm:$0xf]  ;;  %v2390_v20 = vsel %vm10274_vm15, %v2385_v11, %v2389_v49  ;;  %v2874_v24 = vsel %vm10238_vm14, %v2872_v58, %v2873_v60  ;;  %377 = vst [vmem:[#allocation2 + $0x74] sm:$0x1] %v376_v19  ;;  %v10004_v58 = vld [vmem:[#allocation2 + $0x30] sm:$0xff]   ;;  %1668 = vst.msk [vmem:[#allocation4] sm:$0xff] %vm1667_vm7, %v10564_v33 }
  0xbf   : > { %v2402_v21 = vshrl.u32 %v2206_v17, 16  ;;  %v2405_v22 = vshll.u32 %v2206_v17, 16  ;;  %v10649_v62 = vld [vmem:[#allocation2 + $0x60] sm:$0xe]  ;;  %v2400_v51 = vsel %vm10274_vm15, %v2395_v16, %v2399_v56  ;;  %v698_v14 = vor.u32 %v696_v7, %v695_v48  ;;  %v9995_v56 = vld [vmem:[#allocation2 + $0x18] sm:$0xff]   ;;  %1124 = vst.msk [vmem:[#allocation4 + $0x20] sm:$0xff] %vm13347_vm1, %v10004_v58 }
  0xc0   : > { %v932_v25 = vld [vmem:[#allocation2 + $0x68] sm:$0x1]  ;;  %v9249_v26 = vrot.slane %v10649_v62, 9  ;;  %v699_v32 = vrot.slane %v695_v48, 4  ;;  %v9232_v29 = vcombine.low %v2390_v20, %v2400_v51  ;;  %v3247_v37 = vld [vmem:[#allocation2 + $0x60] sm:$0xf]  ;;  %v10658_v43 = vpop.permute.xlu0 %2665  ;;  %v9264_v53 = vcombine.low %v2871_v13, %v2874_v24 }
  0xc1   : > { %v933_v34 = vsel %vm10152_vm4, %v691_v31, %v932_v25  ;;  %v2404_v35 = vrot.slane %v2402_v21, 4  ;;  %v2407_v36 = vrot.slane %v2405_v22, 5  ;;  %v9988_v38 = vld [vmem:[#allocation2 + $0x60] sm:$0xff]   ;;  %v9994_v31 = vld [vmem:[#allocation2 + $0xc] sm:$0xff]   ;;  %v706_v60 = vor.u32 %v704_v15, %v703_v40  ;;  %1122 = vst.msk [vmem:[#allocation4 + $0x10] sm:$0xff] %vm13347_vm1, %v9995_v56 }
  0xc2   : > { %934 = vst [vmem:[#allocation2 + $0x68] sm:$0x1] %v933_v34  ;;  %v2207_v39 = vld [vmem:[#allocation2 + $0x64] sm:$0xf]  ;;  %2677 = vrot.lane.b32.xlu0 %v9232_v29, %s10096_s13  ;;  %2134 = vrot.lane.b32.xlu1 %v9988_v38, %s10090_s30  ;;  %v708_v61 = vrot.slane %v703_v40, 4  ;;  %v3422_v5 = vshrl.u32 %v3247_v37, 16 }
  0xc3   : > { %v2408_v44 = vor.u32 %v2407_v36, %v2404_v35  ;;  %v2411_v49 = vshll.u32 %v2207_v39, 16  ;;  %v2415_v50 = vshrl.u32 %v2207_v39, 16  ;;  %v2752_v54 = vld [vmem:[#allocation2 + $0x64] sm:$0xf]  ;;  %v935_v63 = vld [vmem:[#allocation2 + $0x6c] sm:$0xf]  ;;  %v707_v19 = vsel %vm10199_vm8, %v699_v32, %v706_v60 }
  0xc4   : > { %v2877_v59 = vrot.slane %v2752_v54, 5  ;;  %v936_v12 = vsel %vm10206_vm11, %v698_v14, %v935_v63  ;;  %v3248_v16 = vld [vmem:[#allocation2 + $0x64] sm:$0xf]  ;;  %v10005_v17 = vld [vmem:[#allocation2 + $0x3c] sm:$0xff]   ;;  %938 = vst.msk [vmem:[#allocation2 + $0x70] sm:$0xf] %vm280_vm0, %v707_v19  ;;  %v1624_v29 = vpop.permute.xlu1 %1623 }
  0xc5   : > { %v10662_v7 = vrot.slane %v2408_v44, 4  ;;  %v10664_v11 = vrot.slane %v2411_v49, 5  ;;  %v2417_v48 = vrot.slane %v2415_v50, 4  ;;  %937 = vst [vmem:[#allocation2 + $0x6c] sm:$0xf] %v936_v12  ;;  %v9989_v21 = vld [vmem:[#allocation2 + $0x60] sm:$0xff]  }
  0xc6   : > { %v2879_v13 = vrot.slane %v2877_v59, 4  ;;  %v939_v15 = vld [vmem:[#allocation2 + $0x74] sm:$0x1]  ;;  %2998 = vrot.lane.b32.xlu0 %v9264_v53, %s10094_s11  ;;  %v3424_v22 = vrot.slane %v3422_v5, 4  ;;  %v3425_v24 = vshll.u32 %v3247_v37, 16  ;;  %v3431_v62 = vshll.u32 %v3248_v16, 16 }
  0xc7   : > { %v2418_v20 = vor.u32 %v2417_v48, %v10664_v11  ;;  %v3792_v51 = vld [vmem:[#allocation2 + $0x60] sm:$0xe]  ;;  %v3435_v25 = vshrl.u32 %v3248_v16, 16  ;;  %v940_v14 = vsel %vm10152_vm4, %v708_v61, %v939_v15  ;;  %v3793_v32 = vld [vmem:[#allocation2 + $0x64] sm:$0xf]  ;;  %v2414_v36 = vsel %vm10274_vm15, %v10662_v7, %v10664_v11  ;;  %1121 = vst.msk [vmem:[#allocation4 + $0x8] sm:$0xff] %vm13347_vm1, %v9994_v31 }
  0xc8   : > { %v10675_v34 = vpop.permute.xlu0 %3709  ;;  %v10683_v39 = vsel %vm10238_vm14, %v9249_v26, %v2877_v59  ;;  %v3427_v40 = vrot.slane %v3425_v24, 5  ;;  %941 = vst [vmem:[#allocation2 + $0x74] sm:$0x1] %v940_v14  ;;  %1125 = vst.msk [vmem:[#allocation4 + $0x28] sm:$0xff] %vm13347_vm1, %v10005_v17  ;;  %v3433_v53 = vrot.slane %v3431_v62, 5  ;;  %v9312_v31 = vrot.slane %v3792_v51, 9 }
  0xc9   : > { %v2208_v35 = vld [vmem:[#allocation2 + $0x68] sm:$0x1]  ;;  %v2419_v38 = vrot.slane %v2418_v20, 4  ;;  %v3437_v26 = vrot.slane %v3435_v25, 4  ;;  %1669 = vst.msk [vmem:[#allocation4 + $0x8] sm:$0xff] %vm1667_vm7, %v10637_v2  ;;  %1670 = vst.msk [vmem:[#allocation4 + $0x10] sm:$0xff] %vm1667_vm7, %v1624_v29 }
  0xca   : > { %v2753_v37 = vld [vmem:[#allocation2 + $0x68] sm:$0x1]  ;;  %v2421_v44 = vshll.u32 %v2208_v35, 16  ;;  %3176 = vrot.lane.b32.xlu0 %v9989_v21, %s10092_s9  ;;  %v3428_v54 = vor.u32 %v3427_v40, %v3424_v22  ;;  %1992 = vst.msk [vmem:[#allocation4] sm:$0xff] %vm1991_vm9, %v10544_v52  ;;  %v3914_v33 = vrot.slane %v3793_v32, 5  ;;  %1993 = vst.msk [vmem:[#allocation4 + $0x8] sm:$0xff] %vm1991_vm9, %v10588_v46 }
  0xcb   : > { %v2880_v49 = vrot.slane %v2753_v37, 5  ;;  %v3249_v50 = vld [vmem:[#allocation2 + $0x68] sm:$0x1]  ;;  %v3438_v59 = vor.u32 %v3437_v26, %v3433_v53  ;;  %v1160_v5 = vld [vmem:[#allocation2 + $0x60] sm:$0xf]  ;;  %vm2713_vm12 = vcmask 162944  }
  0xcc   : > { %v3441_v55 = vshll.u32 %v3249_v50, 16  ;;  %v2423_v56 = vrot.slane %v2421_v44, 5  ;;  %v1948_v2 = vpop.permute.xlu0 %1947  ;;  %v3429_v60 = vrot.slane %v3428_v54, 4  ;;  %v3250_v63 = vld [vmem:[#allocation2 + $0x6c] sm:$0xf]  ;;  %v3915_v52 = vsel %vm10238_vm14, %v9312_v31, %v3914_v33  ;;  %2170 = vst.msk [vmem:[#allocation4 + $0x8] sm:$0xff] %vm13349_vm10, %v10560_v27 }
  0xcd   : > { %v2881_v57 = vsel %vm10238_vm14, %v2879_v13, %v2880_v49  ;;  %1994 = vst.msk [vmem:[#allocation4 + $0x10] sm:$0xff] %vm1991_vm9, %v1948_v2  ;;  %v3439_v11 = vrot.slane %v3438_v59, 4  ;;  %v3251_v48 = vld [vmem:[#allocation2 + $0x70] sm:$0xf]  ;;  %v3446_v17 = vshrl.u32 %v3250_v63, 16  ;;  %v3449_v13 = vshll.u32 %v3250_v63, 16 }
  0xce   : > { %v3443_v61 = vrot.slane %v3441_v55, 5  ;;  %v2424_v58 = vsel %vm10274_vm15, %v2419_v38, %v2423_v56  ;;  %v9265_v7 = vcombine.low %v10683_v39, %v2881_v57  ;;  %v1626_v12 = vpop.permute.xlu1 %1625  ;;  %v3434_v46 = vsel %vm10274_vm15, %v3429_v60, %v3433_v53  ;;  %v3794_v19 = vld [vmem:[#allocation2 + $0x68] sm:$0x1]  ;;  %v1161_v15 = vld [vmem:[#allocation2 + $0x64] sm:$0xf]  ;;  %2169 = vst.msk [vmem:[#allocation4] sm:$0xff] %vm13349_vm10, %v10531_v1 }
  0xcf   : > { %v9233_v16 = vcombine.low %v2414_v36, %v2424_v58  ;;  %1671 = vst.msk [vmem:[#allocation4 + $0x18] sm:$0xff] %vm1667_vm7, %v1626_v12  ;;  %v3252_v21 = vld [vmem:[#allocation2 + $0x74] sm:$0x1]  ;;  %v3455_v22 = vshll.u32 %v3251_v48, 16  ;;  %v3459_v24 = vshrl.u32 %v3251_v48, 16  ;;  %v3916_v62 = vrot.slane %v3914_v33, 4 }
  0xd0   : > { %v3444_v20 = vsel %vm10274_vm15, %v3439_v11, %v3443_v61  ;;  %v3448_v25 = vrot.slane %v3446_v17, 4  ;;  %v3451_v14 = vrot.slane %v3449_v13, 5  ;;  %v3465_v32 = vshll.u32 %v3252_v21, 16  ;;  %v10715_v29 = vpop.permute.xlu0 %2124  ;;  %v1162_v37 = vld [vmem:[#allocation2 + $0x68] sm:$0x1]  ;;  %v9990_v33 = vld [vmem:[#allocation2 + $0x6c] sm:$0xff]  }
  0xd1   : > { %2679 = vrot.lane.b32.xlu1 %v9233_v16, %s10096_s13  ;;  %v9296_v51 = vcombine.low %v3434_v46, %v3444_v20  ;;  %v3457_v35 = vrot.slane %v3455_v22, 5  ;;  %v3461_v36 = vrot.slane %v3459_v24, 4  ;;  %v3917_v38 = vrot.slane %v3794_v19, 5  ;;  %v3795_v26 = vld [vmem:[#allocation2 + $0x6c] sm:$0xe]  ;;  %2171 = vst.msk [vmem:[#allocation4 + $0x10] sm:$0xff] %vm13349_vm10, %v10715_v29 }
  0xd2   : > { %v1380_v39 = vshrl.u32 %v1160_v5, 16  ;;  %v1950_v40 = vpop.permute.xlu1 %1949  ;;  %v3452_v44 = vor.u32 %v3451_v14, %v3448_v25  ;;  %v3467_v49 = vrot.slane %v3465_v32, 5  ;;  %v1383_v50 = vshll.u32 %v1160_v5, 16  ;;  %v3796_v57 = vld [vmem:[#allocation2 + $0x70] sm:$0xf]  ;;  %2715 = vst.msk [vmem:[#allocation4 + $0x8] sm:$0xff] %vm2713_vm12, %v10635_v8 }
  0xd3   : > { %3721 = vrot.lane.b32.xlu0 %v9296_v51, %s10097_s14  ;;  %v1389_v53 = vshll.u32 %v1161_v15, 16  ;;  %1995 = vst.msk [vmem:[#allocation4 + $0x18] sm:$0xff] %vm1991_vm9, %v1950_v40  ;;  %v3462_v54 = vor.u32 %v3461_v36, %v3457_v35  ;;  %v3918_v55 = vsel %vm10238_vm14, %v3916_v62, %v3917_v38  ;;  %v1393_v56 = vshrl.u32 %v1161_v15, 16  ;;  %v3797_v59 = vld [vmem:[#allocation2 + $0x74] sm:$0x1] }
  0xd4   : > { %v1382_v31 = vrot.slane %v1380_v39, 4  ;;  %v3453_v2 = vrot.slane %v3452_v44, 4  ;;  %v9328_v60 = vcombine.low %v3915_v52, %v3918_v55  ;;  %v1385_v61 = vrot.slane %v1383_v50, 5  ;;  %v1163_v5 = vld [vmem:[#allocation2 + $0x6c] sm:$0xf]  ;;  %2714 = vst.msk [vmem:[#allocation4] sm:$0xff] %vm2713_vm12, %v10658_v43 }
  0xd5   : > { %3000 = vrot.lane.b32.xlu1 %v9265_v7, %s10094_s11  ;;  %v1391_v63 = vrot.slane %v1389_v53, 5  ;;  %v3463_v58 = vrot.slane %v3462_v54, 4  ;;  %v1395_v11 = vrot.slane %v1393_v56, 4  ;;  %v1399_v48 = vshll.u32 %v1162_v37, 16  ;;  %v1164_v16 = vld [vmem:[#allocation2 + $0x70] sm:$0xf] }
  0xd6   : > { %v9313_v12 = vrot.slane %v3795_v26, 9  ;;  %v3458_v46 = vsel %vm10274_vm15, %v3453_v2, %v3457_v35  ;;  %v1386_v17 = vor.u32 %v1385_v61, %v1382_v31  ;;  %v3921_v13 = vrot.slane %v3796_v57, 5  ;;  %v10725_v7 = vpop.permute.xlu0 %2669  ;;  %v1165_v21 = vld [vmem:[#allocation2 + $0x74] sm:$0x1]  ;;  %v1708_v14 = vld [vmem:[#allocation2 + $0x60] sm:$0xe] }
  0xd7   : > { %4042 = vrot.lane.b32.xlu0 %v9328_v60, %s10095_s12  ;;  %v3924_v19 = vrot.slane %v3797_v59, 5  ;;  %v3468_v52 = vsel %vm10274_vm15, %v3463_v58, %v3467_v49  ;;  %v1396_v15 = vor.u32 %v1395_v11, %v1391_v63  ;;  %v1401_v20 = vrot.slane %v1399_v48, 5  ;;  %v1709_v37 = vld [vmem:[#allocation2 + $0x64] sm:$0xf]  ;;  %v322_v39 = vld [vmem:[#allocation2 + $0x78] sm:$0x1] }
  0xd8   : > { %v1404_v22 = vshrl.u32 %v1163_v5, 16  ;;  %v9297_v24 = vcombine.low %v3458_v46, %v3468_v52  ;;  %v1387_v62 = vrot.slane %v1386_v17, 4  ;;  %v3922_v51 = vsel %vm10238_vm14, %v9313_v12, %v3921_v13  ;;  %v1710_v53 = vld [vmem:[#allocation2 + $0x68] sm:$0x1]  ;;  %v1711_v26 = vld [vmem:[#allocation2 + $0x6c] sm:$0xe] }
  0xd9   : > { %3178 = vrot.lane.b32.xlu1 %v9990_v33, %s10092_s9  ;;  %v3923_v25 = vrot.slane %v3921_v13, 4  ;;  %v1397_v32 = vrot.slane %v1396_v15, 4  ;;  %v1407_v36 = vshll.u32 %v1163_v5, 16  ;;  %v1413_v38 = vshll.u32 %v1164_v16, 16  ;;  %v1712_v57 = vld [vmem:[#allocation2 + $0x70] sm:$0xf] }
  0xda   : > { %v1406_v35 = vrot.slane %v1404_v22, 4  ;;  %v1392_v40 = vsel %vm10274_vm15, %v1387_v62, %v1391_v63  ;;  %v1417_v49 = vshrl.u32 %v1164_v16, 16  ;;  %v1423_v50 = vshll.u32 %v1165_v21, 16  ;;  %v1713_v59 = vld [vmem:[#allocation2 + $0x74] sm:$0x1]  ;;  %v10740_v5 = vpop.permute.xlu0 %2990  ;;  %v10010_v22 = vld [vmem:[#allocation2 + $0x48] sm:$0xff]  }
  0xdb   : > { %v3925_v44 = vsel %vm10238_vm14, %v3923_v25, %v3924_v19  ;;  %v1402_v54 = vsel %vm10274_vm15, %v1397_v32, %v1401_v20  ;;  %v1409_v31 = vrot.slane %v1407_v36, 5  ;;  %v1415_v56 = vrot.slane %v1413_v38, 5  ;;  %v540_v63 = vld [vmem:[%s10182_s29 + $0x48] sm:$0xf]  ;;  %v541_v16 = vld [vmem:[%s10182_s29 + $0x4c] sm:$0xf] }
  0xdc   : > { %v9329_v55 = vcombine.low %v3922_v51, %v3925_v44  ;;  %v9170_v33 = vcombine.low %v1392_v40, %v1402_v54  ;;  %v1419_v2 = vrot.slane %v1417_v49, 4  ;;  %v1425_v60 = vrot.slane %v1423_v50, 5  ;;  %1126 = vst.msk [vmem:[#allocation4 + $0x30] sm:$0xff] %vm13347_vm1, %v10010_v22  ;;  %v9992_v44 = vld [vmem:[#allocation2 + $0x6c] sm:$0xff]   ;;  %v2756_v8 = vld [vmem:[#allocation2 + $0x74] sm:$0x1] }
  0xdd   : > { %3723 = vrot.lane.b32.xlu1 %v9297_v24, %s10097_s14  ;;  %v9186_v61 = vrot.slane %v1708_v14, 9  ;;  %v1410_v58 = vor.u32 %v1409_v31, %v1406_v35  ;;  %v1841_v11 = vrot.slane %v1709_v37, 5  ;;  %v1844_v48 = vrot.slane %v1710_v53, 5  ;;  %v2127_v14 = vpop.permute.xlu1 %2126  ;;  %v2209_v50 = vld [vmem:[#allocation2 + $0x6c] sm:$0xf]  ;;  %2716 = vst.msk [vmem:[#allocation4 + $0x10] sm:$0xff] %vm2713_vm12, %v10725_v7 }
  0xde   : > { %4044 = vrot.lane.b32.xlu0 %v9329_v55, %s10095_s12  ;;  %v9187_v12 = vrot.slane %v1711_v26, 9  ;;  %v1420_v46 = vor.u32 %v1419_v2, %v1415_v56  ;;  %v1848_v17 = vrot.slane %v1712_v57, 5  ;;  %v1851_v13 = vrot.slane %v1713_v59, 5  ;;  %v3169_v53 = vpop.permute.xlu0 %3168  ;;  %v2210_v31 = vld [vmem:[#allocation2 + $0x70] sm:$0xf]  ;;  %v10011_v59 = vld [vmem:[#allocation2 + $0x54] sm:$0xff]  }
  0xdf   : > { %v323_v19 = vsel %vm10152_vm4, 0, %v322_v39  ;;  %v1411_v52 = vrot.slane %v1410_v58, 4  ;;  %v1842_v15 = vsel %vm10238_vm14, %v9186_v61, %v1841_v11  ;;  %v1843_v20 = vrot.slane %v1841_v11, 4  ;;  %v378_v57 = vld [vmem:[#allocation2 + $0x80] sm:$0x1]  ;;  %2172 = vst.msk [vmem:[#allocation4 + $0x18] sm:$0xff] %vm13349_vm10, %v2127_v14 }
  0xe0   : > { %324 = vst [vmem:[#allocation2 + $0x78] sm:$0x1] %v323_v19  ;;  %v710_v21 = vshrl.u32 %v540_v63, 16  ;;  %v1421_v24 = vrot.slane %v1420_v46, 4  ;;  %v10751_v62 = vsel %vm10238_vm14, %v9187_v12, %v1848_v17  ;;  %v1850_v51 = vrot.slane %v1848_v17, 4  ;;  %1127 = vst.msk [vmem:[#allocation4 + $0x38] sm:$0xff] %vm13347_vm1, %v10011_v59 }
  0xe1   : > { %1635 = vrot.lane.b32.xlu1 %v9170_v33, %s10093_s10  ;;  %v713_v25 = vshll.u32 %v540_v63, 16  ;;  %v1416_v32 = vsel %vm10274_vm15, %v1411_v52, %v1415_v56  ;;  %v1845_v35 = vsel %vm10238_vm14, %v1843_v20, %v1844_v48  ;;  %v718_v38 = vshrl.u32 %v541_v16, 16  ;;  %v10762_v56 = vld [vmem:[#allocation2 + $0x74] sm:$0x1]  ;;  %v10767_v2 = vld [vmem:[#allocation2 + $0x6c] sm:$0xe] }
  0xe2   : > { %v712_v36 = vrot.slane %v710_v21, 7  ;;  %v1426_v37 = vsel %vm10274_vm15, %v1421_v24, %v1425_v60  ;;  %v9202_v39 = vcombine.low %v1842_v15, %v1845_v35  ;;  %v1852_v40 = vsel %vm10238_vm14, %v1850_v51, %v1851_v13  ;;  %v2755_v63 = vld [vmem:[#allocation2 + $0x70] sm:$0xf]  ;;  %v325_v58 = vld [vmem:[#allocation2 + $0x84] sm:$0x1] }
  0xe3   : > { %v721_v49 = vshll.u32 %v541_v16, 16  ;;  %v9171_v26 = vcombine.low %v1416_v32, %v1426_v37  ;;  %v10765_v33 = vrot.slane %v718_v38, 7  ;;  %vm13350_vm13 = vcmask 195744   ;;  %v10776_v11 = vld [vmem:[%s10182_s29 + $0x50] sm:$0xf] }
  0xe4   : > { %v715_v54 = vor.u32 %v713_v25, %v712_v36  ;;  %v716_v55 = vrot.slane %v712_v36, 4  ;;  %1959 = vrot.lane.b32.xlu0 %v9202_v39, %s10091_s8  ;;  %v9203_v60 = vcombine.low %v10751_v62, %v1852_v40  ;;  %vm3212_vm5 = vcmask 228544   ;;  %3036 = vst.msk [vmem:[#allocation4 + $0x8] sm:$0xff] %vm13350_vm13, %v10615_v28  ;;  %3035 = vst.msk [vmem:[#allocation4] sm:$0xff] %vm13350_vm13, %v10575_v9 }
  0xe5   : > { %1637 = vrot.lane.b32.xlu1 %v9171_v26, %s10093_s10  ;;  %vm3757_vm3 = vcmask 261344   ;;  %v2426_v61 = vshrl.u32 %v2209_v50, 16  ;;  %v723_v48 = vor.u32 %v721_v49, %v10765_v33  ;;  %vm4078_vm2 = vcmask 294144   ;;  %3037 = vst.msk [vmem:[#allocation4 + $0x10] sm:$0xff] %vm13350_vm13, %v10740_v5 }
  0xe6   : > { %v2429_v1 = vshll.u32 %v2209_v50, 16  ;;  %v2435_v12 = vshll.u32 %v2210_v31, 16  ;;  %v2439_v17 = vshrl.u32 %v2210_v31, 16  ;;  %v2445_v13 = vshll.u32 %v10762_v56, 16  ;;  %3214 = vst.msk [vmem:[#allocation4 + $0x8] sm:$0xff] %vm3212_vm5, %v10573_v10  ;;  %3213 = vst.msk [vmem:[#allocation4] sm:$0xff] %vm3212_vm5, %v10548_v41 }
  0xe7   : > { %v942_v27 = vld [vmem:[#allocation2 + $0x78] sm:$0xf]  ;;  %v2672_v29 = vpop.permute.xlu1 %2671  ;;  %v2428_v46 = vrot.slane %v2426_v61, 4  ;;  %v724_v43 = vsel %vm10199_vm8, %v716_v55, %v723_v48  ;;  %v379_v9 = vsel %vm10186_vm6, 0, %v378_v57  ;;  %3215 = vst.msk [vmem:[#allocation4 + $0x10] sm:$0xff] %vm3212_vm5, %v3169_v53  ;;  %v9250_v10 = vrot.slane %v10767_v2, 9 }
  0xe8   : > { %v943_v16 = vsel %vm10206_vm11, %v715_v54, %v942_v27  ;;  %2717 = vst.msk [vmem:[#allocation4 + $0x18] sm:$0xff] %vm2713_vm12, %v2672_v29  ;;  %2136 = vrot.lane.b32.xlu0 %v9992_v44, %s10090_s30  ;;  %v2431_v28 = vrot.slane %v2429_v1, 5  ;;  %v2437_v7 = vrot.slane %v2435_v12, 5  ;;  %v2441_v19 = vrot.slane %v2439_v17, 4  ;;  %380 = vst [vmem:[#allocation2 + $0x80] sm:$0x1] %v379_v9 }
  0xe9   : > { %944 = vst [vmem:[#allocation2 + $0x78] sm:$0xf] %v943_v16  ;;  %v3714_v5 = vpop.permute.xlu0 %3713  ;;  %1961 = vrot.lane.b32.xlu1 %v9203_v60, %s10091_s8  ;;  %945 = vst.msk [vmem:[#allocation2 + $0x7c] sm:$0xf] %vm280_vm0, %v724_v43  ;;  %v2884_v52 = vrot.slane %v2755_v63, 5  ;;  %v2887_v20 = vrot.slane %v2756_v8, 5 }
  0xea   : > { %3759 = vst.msk [vmem:[#allocation4 + $0x8] sm:$0xff] %vm3757_vm3, %v10656_v42  ;;  %3758 = vst.msk [vmem:[#allocation4] sm:$0xff] %vm3757_vm3, %v10675_v34  ;;  %v381_v41 = vld [vmem:[#allocation2 + $0x8c] sm:$0x1]  ;;  %v2432_v15 = vor.u32 %v2431_v28, %v2428_v46  ;;  %v326_v42 = vsel %vm10152_vm4, 0, %v325_v58  ;;  %v727_v21 = vshrl.u32 %v10776_v11, 16  ;;  %v2442_v24 = vor.u32 %v2441_v19, %v2437_v7 }
  0xeb   : > { %3760 = vst.msk [vmem:[#allocation4 + $0x10] sm:$0xff] %vm3757_vm3, %v3714_v5  ;;  %v10001_v34 = vld [vmem:[%s13337_s1 + $0x10] ss:$0 sps:$4 sm:$0x33]   ;;  %v2993_v22 = vpop.permute.xlu1 %2992  ;;  %v2447_v62 = vrot.slane %v2445_v13, 5  ;;  %v2886_v51 = vrot.slane %v2884_v52, 4  ;;  %v2885_v14 = vsel %vm10238_vm14, %v9250_v10, %v2884_v52 }
  0xec   : > { %4080 = vst.msk [vmem:[#allocation4 + $0x8] sm:$0xff] %vm4078_vm2, %v10617_v30  ;;  %4079 = vst.msk [vmem:[#allocation4] sm:$0xff] %vm4078_vm2, %v10590_v45  ;;  %v543_v30 = vld [vmem:[%s10182_s29 + $0x54] sm:$0xf]  ;;  %v725_v25 = vrot.slane %v10765_v33, 4  ;;  %v2433_v45 = vrot.slane %v2432_v15, 4 }
  0xed   : > { %327 = vst [vmem:[#allocation2 + $0x84] sm:$0x1] %v326_v42  ;;  %3038 = vst.msk [vmem:[#allocation4 + $0x18] sm:$0xff] %vm13350_vm13, %v2993_v22  ;;  %v730_v32 = vshll.u32 %v10776_v11, 16  ;;  %v4035_v35 = vpop.permute.xlu0 %4034  ;;  %v2443_v36 = vrot.slane %v2442_v24, 4  ;;  %v729_v38 = vrot.slane %v727_v21, 7  ;;  %v2888_v40 = vsel %vm10238_vm14, %v2886_v51, %v2887_v20 }
  0xee   : > { %vm13348_vm1 = vcmask 1041408   ;;  %v382_v37 = vsel %vm10186_vm6, 0, %v381_v41  ;;  %4081 = vst.msk [vmem:[#allocation4 + $0x10] sm:$0xff] %vm4078_vm2, %v4035_v35  ;;  %v2438_v39 = vsel %vm10274_vm15, %v2433_v45, %v2437_v7  ;;  %v735_v44 = vshrl.u32 %v543_v30, 16 }
  0xef   : > { %v738_v49 = vshll.u32 %v543_v30, 16  ;;  %9950 = vmatprep.subr.msk.bf16.mxu0 %vm13348_vm1, %v10001_v34  ;;  %383 = vst [vmem:[#allocation2 + $0x8c] sm:$0x1] %v382_v37  ;;  %v3171_v50 = vpop.permute.xlu1 %3170  ;;  %v2448_v53 = vsel %vm10274_vm15, %v2443_v36, %v2447_v62  ;;  %v946_v56 = vld [vmem:[#allocation2 + $0x80] sm:$0x1]  ;;  %v9266_v60 = vcombine.low %v2885_v14, %v2888_v40  ;;  %v732_v63 = vor.u32 %v730_v32, %v729_v38 }
  0xf0   : > { %v2212_v26 = vld [vmem:[#allocation2 + $0x78] sm:$0xf]  ;;  %3216 = vst.msk [vmem:[#allocation4 + $0x18] sm:$0xff] %vm3212_vm5, %v3171_v50  ;;  %v9234_v31 = vcombine.low %v2438_v39, %v2448_v53  ;;  %v947_v59 = vsel %vm10152_vm4, %v725_v25, %v946_v56  ;;  %v2213_v33 = vld [vmem:[#allocation2 + $0x7c] sm:$0xf]  ;;  %v733_v12 = vrot.slane %v729_v38, 4 }
  0xf1   : > { %v10843_v54 = vld [vmem:[#allocation2 + $0x78] sm:$0xe]  ;;  %v2450_v57 = vshrl.u32 %v2212_v26, 16  ;;  %v2453_v2 = vshll.u32 %v2212_v26, 16  ;;  %v2758_v61 = vld [vmem:[#allocation2 + $0x7c] sm:$0xf] }
  0xf2   : > { %v9993_v55 = vld [vmem:[#allocation2 + $0x78] sm:$0xff]   ;;  %2681 = vrot.lane.b32.xlu0 %v9234_v31, %s10096_s13  ;;  %948 = vst [vmem:[#allocation2 + $0x80] sm:$0x1] %v947_v59  ;;  %v2459_v11 = vshll.u32 %v2213_v33, 16  ;;  %v2463_v48 = vshrl.u32 %v2213_v33, 16  ;;  %v2891_v27 = vrot.slane %v2758_v61, 5 }
  0xf3   : > { %2138 = vrot.lane.b32.xlu1 %v9993_v55, %s10090_s30  ;;  %v2452_v58 = vrot.slane %v2450_v57, 4  ;;  %v2455_v1 = vrot.slane %v2453_v2, 5  ;;  %v737_v29 = vrot.slane %v735_v44, 7  ;;  %v4189_v16 = vsel %vm13348_vm1, %v10001_v34, 0  ;;  %v3253_v10 = vld [vmem:[#allocation2 + $0x78] sm:$0xf] }
  0xf4   : > { %v4037_v46 = vpop.permute.xlu0 %4036  ;;  %v10851_v17 = vrot.slane %v2459_v11, 5  ;;  %v2465_v13 = vrot.slane %v2463_v48, 4  ;;  %v9251_v8 = vrot.slane %v10843_v54, 9  ;;  %v2893_v43 = vrot.slane %v2891_v27, 4  ;;  %v949_v28 = vld [vmem:[#allocation2 + $0x84] sm:$0xf]  ;;  %9735 = vmatpush3.bf16.msra.mxu0 %v4189_v16 }
  0xf5   : > { %v2456_v7 = vor.u32 %v2455_v1, %v2452_v58  ;;  %v740_v9 = vor.u32 %v738_v49, %v737_v29  ;;  %v742_v5 = vrot.slane %v737_v29, 4  ;;  %v950_v19 = vsel %vm10206_vm11, %v732_v63, %v949_v28  ;;  %v3254_v52 = vld [vmem:[#allocation2 + $0x7c] sm:$0xf]  ;;  %v3716_v41 = vpop.permute.xlu1 %3715  ;;  %v3798_v25 = vld [vmem:[#allocation2 + $0x78] sm:$0xe] }
  0xf6   : > { %v2466_v15 = vor.u32 %v2465_v13, %v10851_v17  ;;  %3002 = vrot.lane.b32.xlu0 %v9266_v60, %s10094_s11  ;;  %v9998_v20 = vld [vmem:[#allocation2 + $0x78] sm:$0xff]   ;;  %951 = vst [vmem:[#allocation2 + $0x84] sm:$0xf] %v950_v19  ;;  %v3470_v42 = vshrl.u32 %v3253_v10, 16  ;;  %v3473_v21 = vshll.u32 %v3253_v10, 16  ;;  %v3479_v34 = vshll.u32 %v3254_v52, 16 }
  0xf7   : > { %v953_v22 = vld [vmem:[#allocation2 + $0x8c] sm:$0x1]  ;;  %3761 = vst.msk [vmem:[#allocation4 + $0x18] sm:$0xff] %vm3757_vm3, %v3716_v41  ;;  %v2457_v24 = vrot.slane %v2456_v7, 4  ;;  %v741_v62 = vsel %vm10199_vm8, %v733_v12, %v740_v9  ;;  %v3483_v51 = vshrl.u32 %v3254_v52, 16  ;;  %v10870_v40 = vsel %vm10238_vm14, %v9251_v8, %v2891_v27  ;;  %v4095_v19 = vld [vmem:[#allocation4] sm:$0xff] }
  0xf8   : > { %v954_v30 = vsel %vm10152_vm4, %v742_v5, %v953_v22  ;;  %4082 = vst.msk [vmem:[#allocation4 + $0x18] sm:$0xff] %vm4078_vm2, %v4037_v46  ;;  %v2467_v45 = vrot.slane %v2466_v15, 4  ;;  %v3472_v14 = vrot.slane %v3470_v42, 4  ;;  %v3475_v32 = vrot.slane %v3473_v21, 5  ;;  %v3799_v36 = vld [vmem:[#allocation2 + $0x7c] sm:$0xf] }
  0xf9   : > { %952 = vst.msk [vmem:[#allocation2 + $0x88] sm:$0xf] %vm280_vm0, %v741_v62  ;;  %v3481_v35 = vrot.slane %v3479_v34, 5  ;;  %955 = vst [vmem:[#allocation2 + $0x8c] sm:$0x1] %v954_v30  ;;  %v2462_v37 = vsel %vm10274_vm15, %v2457_v24, %v10851_v17  ;;  %v1628_v49 = vpop.permute.xlu1 %1627  ;;  %v1952_v50 = vpop.permute.xlu0 %1951  ;;  %v3485_v55 = vrot.slane %v3483_v51, 4 }
  0xfa   : > { %v2214_v38 = vld [vmem:[#allocation2 + $0x80] sm:$0x1]  ;;  %3180 = vrot.lane.b32.xlu0 %v9998_v20, %s10092_s9  ;;  %v3476_v54 = vor.u32 %v3475_v32, %v3472_v14  ;;  %1672 = vst.msk [vmem:[#allocation4 + $0x20] sm:$0xff] %vm1667_vm7, %v1628_v49  ;;  %v9314_v57 = vrot.slane %v3798_v25, 9  ;;  %v3928_v59 = vrot.slane %v3799_v36, 5  ;;  %vm4138_vm1 = vcmask 293888  }
  0xfb   : > { %v2759_v39 = vld [vmem:[#allocation2 + $0x80] sm:$0x1]  ;;  %v2469_v53 = vshll.u32 %v2214_v38, 16  ;;  %1996 = vst.msk [vmem:[#allocation4 + $0x20] sm:$0xff] %vm1991_vm9, %v1952_v50  ;;  %v3486_v63 = vor.u32 %v3485_v55, %v3481_v35  ;;  %v1166_v13 = vld [vmem:[#allocation2 + $0x78] sm:$0xf]  ;;  %9736 = vmatprep.mubr.msk.bf16.mxu0 %vm4138_vm1, %v4095_v19 }
  0xfc   : > { %v3255_v44 = vld [vmem:[#allocation2 + $0x80] sm:$0x1]  ;;  %v2894_v26 = vrot.slane %v2759_v39, 5  ;;  %v3477_v61 = vrot.slane %v3476_v54, 4  ;;  %v10879_v48 = vsel %vm10238_vm14, %v9314_v57, %v3928_v59  ;;  %v3930_v27 = vrot.slane %v3928_v59, 4  ;;  %v4096_v39 = vld [vmem:[#allocation4 + $0x8] sm:$0xff] }
  0xfd   : > { %v3800_v31 = vld [vmem:[#allocation2 + $0x80] sm:$0x1]  ;;  %v3489_v56 = vshll.u32 %v3255_v44, 16  ;;  %v2471_v2 = vrot.slane %v2469_v53, 5  ;;  %v3256_v11 = vld [vmem:[#allocation2 + $0x84] sm:$0xf]  ;;  %v1630_v1 = vpop.permute.xlu1 %1629  ;;  %v2129_v12 = vpop.permute.xlu0 %2128  ;;  %9737 = vmatmul.mubr.msk.bf16.vlgmr.msra.gmra.mrb[0].mxu0 %vm4138_vm1, %v4096_v39 }
  0xfe   : > { %v3931_v33 = vrot.slane %v3800_v31, 5  ;;  %v2895_v60 = vsel %vm10238_vm14, %v2893_v43, %v2894_v26  ;;  %v3482_v16 = vsel %vm10274_vm15, %v3477_v61, %v3481_v35  ;;  %v3487_v46 = vrot.slane %v3486_v63, 4  ;;  %v1167_v8 = vld [vmem:[#allocation2 + $0x7c] sm:$0xf]  ;;  %1673 = vst.msk [vmem:[#allocation4 + $0x28] sm:$0xff] %vm1667_vm7, %v1630_v1  ;;  %v4097_v42 = vld [vmem:[#allocation4 + $0x10] sm:$0xff] }
  0xff   : > { %v3491_v58 = vrot.slane %v3489_v56, 5  ;;  %v2472_v29 = vsel %vm10274_vm15, %v2467_v45, %v2471_v2  ;;  %v3494_v17 = vshrl.u32 %v3256_v11, 16  ;;  %2173 = vst.msk [vmem:[#allocation4 + $0x20] sm:$0xff] %vm13349_vm10, %v2129_v12  ;;  %v9267_v28 = vcombine.low %v10870_v40, %v2895_v60  ;;  %v1168_v62 = vld [vmem:[#allocation2 + $0x80] sm:$0x1]  ;;  %9740 = vmatprep.mubr.msk.bf16.mxu0 %vm4138_vm1, %v4097_v42  ;;  %v4098_v19 = vld [vmem:[#allocation4 + $0x18] sm:$0xff] }
 0x100   : > { %v9235_v43 = vcombine.low %v2462_v37, %v2472_v29  ;;  %v3257_v7 = vld [vmem:[#allocation2 + $0x88] sm:$0xf]  ;;  %v3497_v9 = vshll.u32 %v3256_v11, 16  ;;  %v3932_v5 = vsel %vm10238_vm14, %v3930_v27, %v3931_v33  ;;  %v3258_v52 = vld [vmem:[#allocation2 + $0x8c] sm:$0x1]  ;;  %v1428_v14 = vshrl.u32 %v1166_v13, 16 }
 0x101   : > { %v3492_v10 = vsel %vm10274_vm15, %v3487_v46, %v3491_v58  ;;  %v3496_v41 = vrot.slane %v3494_v17, 4  ;;  %v3503_v15 = vshll.u32 %v3257_v7, 16  ;;  %v3507_v20 = vshrl.u32 %v3257_v7, 16  ;;  %v3801_v51 = vld [vmem:[#allocation2 + $0x84] sm:$0xe]  ;;  %v1954_v30 = vpop.permute.xlu1 %1953 }
 0x102   : > { %2683 = vrot.lane.b32.xlu1 %v9235_v43, %s10096_s13  ;;  %v9298_v21 = vcombine.low %v3482_v16, %v3492_v10  ;;  %v3499_v34 = vrot.slane %v3497_v9, 5  ;;  %v3513_v22 = vshll.u32 %v3258_v52, 16  ;;  %v9330_v24 = vcombine.low %v10879_v48, %v3932_v5  ;;  %v1169_v32 = vld [vmem:[#allocation2 + $0x84] sm:$0xf]  ;;  %1997 = vst.msk [vmem:[#allocation4 + $0x28] sm:$0xff] %vm1991_vm9, %v1954_v30 }
 0x103   : > { %v3505_v25 = vrot.slane %v3503_v15, 5  ;;  %v3509_v45 = vrot.slane %v3507_v20, 4  ;;  %v1431_v38 = vshll.u32 %v1166_v13, 16  ;;  %v1437_v37 = vshll.u32 %v1167_v8, 16  ;;  %v3802_v40 = vld [vmem:[#allocation2 + $0x88] sm:$0xf] }
 0x104   : > { %3725 = vrot.lane.b32.xlu0 %v9298_v21, %s10097_s14  ;;  %v3500_v35 = vor.u32 %v3499_v34, %v3496_v41  ;;  %v3515_v36 = vrot.slane %v3513_v22, 5  ;;  %v1430_v49 = vrot.slane %v1428_v14, 4  ;;  %v1441_v50 = vshrl.u32 %v1167_v8, 16  ;;  %v3803_v26 = vld [vmem:[#allocation2 + $0x8c] sm:$0x1]  ;;  %v2674_v54 = vpop.permute.xlu0 %2673  ;;  %v10000_v55 = vld [vmem:[#allocation2 + $0x84] sm:$0xff]  }
 0x105   : > { %v3510_v44 = vor.u32 %v3509_v45, %v3505_v25  ;;  %v1447_v53 = vshll.u32 %v1168_v62, 16  ;;  %v1433_v56 = vrot.slane %v1431_v38, 5  ;;  %v1439_v57 = vrot.slane %v1437_v37, 5  ;;  %2718 = vst.msk [vmem:[#allocation4 + $0x20] sm:$0xff] %vm2713_vm12, %v2674_v54  ;;  %v1170_v48 = vld [vmem:[#allocation2 + $0x88] sm:$0xf]  ;;  %9741 = vmatmul.mubr.msk.bf16.gmra.mrb[4].mxu0 %vm4138_vm1, %v4098_v19 }
 0x106   : > { %3004 = vrot.lane.b32.xlu1 %v9267_v28, %s10094_s11  ;;  %v3501_v31 = vrot.slane %v3500_v35, 4  ;;  %v9315_v59 = vrot.slane %v3801_v51, 9  ;;  %v1443_v2 = vrot.slane %v1441_v50, 4  ;;  %v3935_v61 = vrot.slane %v3802_v40, 5  ;;  %v1171_v27 = vld [vmem:[#allocation2 + $0x8c] sm:$0x1] }
 0x107   : > { %v3511_v33 = vrot.slane %v3510_v44, 4  ;;  %v1449_v60 = vrot.slane %v1447_v53, 5  ;;  %v1434_v58 = vor.u32 %v1433_v56, %v1430_v49  ;;  %v3938_v11 = vrot.slane %v3803_v26, 5  ;;  %v1714_v12 = vld [vmem:[#allocation2 + $0x78] sm:$0xe]  ;;  %v2131_v13 = vpop.permute.xlu1 %2130  ;;  %v10016_v26 = vld [vmem:[#allocation2 + $0x60] sm:$0xff]  }
 0x108   : > { %v3506_v63 = vsel %vm10274_vm15, %v3501_v31, %v3505_v25  ;;  %4046 = vrot.lane.b32.xlu0 %v9330_v24, %s10095_s12  ;;  %v1452_v1 = vshrl.u32 %v1169_v32, 16  ;;  %v1444_v16 = vor.u32 %v1443_v2, %v1439_v57  ;;  %v3936_v46 = vsel %vm10238_vm14, %v9315_v59, %v3935_v61  ;;  %v2995_v8 = vpop.permute.xlu0 %2994  ;;  %v1715_v5 = vld [vmem:[#allocation2 + $0x7c] sm:$0xf]  ;;  %2174 = vst.msk [vmem:[#allocation4 + $0x28] sm:$0xff] %vm13349_vm10, %v2131_v13  ;;  %v1716_v20 = vld [vmem:[#allocation2 + $0x80] sm:$0x1] }
 0x109   : > { %v3516_v29 = vsel %vm10274_vm15, %v3511_v33, %v3515_v36  ;;  %v3937_v17 = vrot.slane %v3935_v61, 4  ;;  %v1435_v28 = vrot.slane %v1434_v58, 4  ;;  %v1455_v9 = vshll.u32 %v1169_v32, 16  ;;  %3039 = vst.msk [vmem:[#allocation4 + $0x20] sm:$0xff] %vm13350_vm13, %v2995_v8  ;;  %v1717_v24 = vld [vmem:[#allocation2 + $0x84] sm:$0xe] }
 0x10a   : > { %3182 = vrot.lane.b32.xlu1 %v10000_v55, %s10092_s9  ;;  %v9299_v43 = vcombine.low %v3506_v63, %v3516_v29  ;;  %v1454_v7 = vrot.slane %v1452_v1, 4  ;;  %v1445_v10 = vrot.slane %v1444_v16, 4  ;;  %v1461_v41 = vshll.u32 %v1170_v48, 16  ;;  %v1718_v62 = vld [vmem:[#allocation2 + $0x88] sm:$0xf]  ;;  %v10017_v1 = vld [vmem:[#allocation2 + $0x6c] sm:$0xff]  }
 0x10b   : > { %v3939_v52 = vsel %vm10238_vm14, %v3937_v17, %v3938_v11  ;;  %v1465_v15 = vshrl.u32 %v1170_v48, 16  ;;  %v1440_v42 = vsel %vm10274_vm15, %v1435_v28, %v1439_v57  ;;  %v1457_v34 = vrot.slane %v1455_v9, 5  ;;  %v1719_v14 = vld [vmem:[#allocation2 + $0x8c] sm:$0x1]  ;;  %v328_v39 = vld [vmem:[#allocation2 + $0x90] sm:$0x1] }
 0x10c   : > { %v9331_v21 = vcombine.low %v3936_v46, %v3939_v52  ;;  %v1471_v22 = vshll.u32 %v1171_v27, 16  ;;  %v1450_v51 = vsel %vm10274_vm15, %v1445_v10, %v1449_v60  ;;  %v1463_v30 = vrot.slane %v1461_v41, 5  ;;  %v3173_v32 = vpop.permute.xlu0 %3172  ;;  %v544_v53 = vld [vmem:[%s10182_s29 + $0x58] sm:$0xf]  ;;  %v545_v57 = vld [vmem:[%s10182_s29 + $0x5c] sm:$0xf] }
 0x10d   : > { %v1467_v25 = vrot.slane %v1465_v15, 4  ;;  %v9188_v45 = vrot.slane %v1714_v12, 9  ;;  %v9172_v35 = vcombine.low %v1440_v42, %v1450_v51  ;;  %v1458_v36 = vor.u32 %v1457_v34, %v1454_v7  ;;  %3217 = vst.msk [vmem:[#allocation4 + $0x20] sm:$0xff] %vm3212_vm5, %v3173_v32  ;;  %v2215_v61 = vld [vmem:[#allocation2 + $0x84] sm:$0xf] }
 0x10e   : > { %3727 = vrot.lane.b32.xlu1 %v9299_v43, %s10097_s14  ;;  %4048 = vrot.lane.b32.xlu0 %v9331_v21, %s10095_s12  ;;  %v1473_v38 = vrot.slane %v1471_v22, 5  ;;  %v1855_v37 = vrot.slane %v1715_v5, 5  ;;  %v1858_v44 = vrot.slane %v1716_v20, 5  ;;  %v9189_v49 = vrot.slane %v1717_v24, 9  ;;  %v2216_v27 = vld [vmem:[#allocation2 + $0x88] sm:$0xf] }
 0x10f   : > { %v1468_v40 = vor.u32 %v1467_v25, %v1463_v30  ;;  %v1862_v50 = vrot.slane %v1718_v62, 5  ;;  %v1459_v54 = vrot.slane %v1458_v36, 4  ;;  %v1865_v56 = vrot.slane %v1719_v14, 5  ;;  %v10002_v46 = vld [vmem:[#allocation2 + $0x84] sm:$0xff]   ;;  %v2217_v13 = vld [vmem:[#allocation2 + $0x8c] sm:$0x1] }
 0x110   : > { %v1856_v55 = vsel %vm10238_vm14, %v9188_v45, %v1855_v37  ;;  %v1857_v31 = vrot.slane %v1855_v37, 4  ;;  %v329_v60 = vsel %vm10152_vm4, 0, %v328_v39  ;;  %vm13376_vm10 = vcmask 31744   ;;  %v384_v8 = vld [vmem:[#allocation2 + $0x98] sm:$0x1] }
 0x111   : > { %v1469_v59 = vrot.slane %v1468_v40, 4  ;;  %v1863_v33 = vsel %vm10238_vm14, %v9189_v49, %v1862_v50  ;;  %v1864_v2 = vrot.slane %v1862_v50, 4  ;;  %1128 = vst.msk [vmem:[#allocation4 + $0x40] sm:$0xff] %vm13376_vm10, %v10016_v26  ;;  %v1464_v63 = vsel %vm10274_vm15, %v1459_v54, %v1463_v30  ;;  %330 = vst [vmem:[#allocation2 + $0x90] sm:$0x1] %v329_v60 }
 0x112   : > { %1639 = vrot.lane.b32.xlu1 %v9172_v35, %s10093_s10  ;;  %v1859_v58 = vsel %vm10238_vm14, %v1857_v31, %v1858_v44  ;;  %v744_v11 = vshrl.u32 %v544_v53, 16  ;;  %v747_v48 = vshll.u32 %v544_v53, 16  ;;  %v752_v17 = vshrl.u32 %v545_v57, 16  ;;  %v2760_v5 = vld [vmem:[#allocation2 + $0x84] sm:$0xe]  ;;  %1129 = vst.msk [vmem:[#allocation4 + $0x48] sm:$0xff] %vm13376_vm10, %v10017_v1 }
 0x113   : > { %v1474_v12 = vsel %vm10274_vm15, %v1469_v59, %v1473_v38  ;;  %v9204_v29 = vcombine.low %v1856_v55, %v1859_v58  ;;  %v1866_v16 = vsel %vm10238_vm14, %v1864_v2, %v1865_v56  ;;  %v755_v9 = vshll.u32 %v545_v57, 16  ;;  %v2761_v34 = vld [vmem:[#allocation2 + $0x88] sm:$0xf]  ;;  %v2762_v30 = vld [vmem:[#allocation2 + $0x8c] sm:$0x1] }
 0x114   : > { %v9173_v43 = vcombine.low %v1464_v63, %v1474_v12  ;;  %v9205_v28 = vcombine.low %v1863_v33, %v1866_v16  ;;  %v746_v7 = vrot.slane %v744_v11, 7  ;;  %v10941_v19 = vrot.slane %v752_v17, 7  ;;  %v331_v25 = vld [vmem:[#allocation2 + $0x9c] sm:$0x1]  ;;  %v10949_v36 = vld [vmem:[%s10182_s29 + $0x60] sm:$0xf] }
 0x115   : > { %1963 = vrot.lane.b32.xlu0 %v9204_v29, %s10091_s8  ;;  %v2474_v10 = vshrl.u32 %v2215_v61, 16  ;;  %v2477_v52 = vshll.u32 %v2215_v61, 16  ;;  %v2483_v41 = vshll.u32 %v2216_v27, 16  ;;  %v2487_v42 = vshrl.u32 %v2216_v27, 16  ;;  %v2676_v22 = vpop.permute.xlu1 %2675  ;;  %v547_v50 = vld [vmem:[%s10182_s29 + $0x64] sm:$0xf] }
 0x116   : > { %1641 = vrot.lane.b32.xlu1 %v9173_v43, %s10093_s10  ;;  %v749_v15 = vor.u32 %v747_v48, %v746_v7  ;;  %v750_v20 = vrot.slane %v746_v7, 4  ;;  %v2493_v21 = vshll.u32 %v2217_v13, 16  ;;  %v757_v24 = vor.u32 %v755_v9, %v10941_v19  ;;  %2719 = vst.msk [vmem:[#allocation4 + $0x28] sm:$0xff] %vm2713_vm12, %v2676_v22  ;;  %v387_v31 = vld [vmem:[#allocation2 + $0xa4] sm:$0x1] }
 0x117   : > { %v2476_v62 = vrot.slane %v2474_v10, 4  ;;  %v2479_v51 = vrot.slane %v2477_v52, 5  ;;  %v2485_v45 = vrot.slane %v2483_v41, 5  ;;  %v2489_v14 = vrot.slane %v2487_v42, 4  ;;  %v3718_v38 = vpop.permute.xlu0 %3717  ;;  %v334_v60 = vld [vmem:[#allocation2 + $0xa8] sm:$0x1] }
 0x118   : > { %v2495_v32 = vrot.slane %v2493_v21, 5  ;;  %v385_v35 = vsel %vm10186_vm6, 0, %v384_v8  ;;  %v758_v37 = vsel %vm10199_vm8, %v750_v20, %v757_v24  ;;  %v956_v39 = vld [vmem:[#allocation2 + $0x90] sm:$0xf]  ;;  %v9252_v44 = vrot.slane %v2760_v5, 9  ;;  %3762 = vst.msk [vmem:[#allocation4 + $0x20] sm:$0xff] %vm3757_vm3, %v3718_v38 }
 0x119   : > { %2140 = vrot.lane.b32.xlu0 %v10002_v46, %s10090_s30  ;;  %v2480_v40 = vor.u32 %v2479_v51, %v2476_v62  ;;  %386 = vst [vmem:[#allocation2 + $0x98] sm:$0x1] %v385_v35  ;;  %v2898_v49 = vrot.slane %v2761_v34, 5  ;;  %v957_v53 = vsel %vm10206_vm11, %v749_v15, %v956_v39  ;;  %959 = vst.msk [vmem:[#allocation2 + $0x94] sm:$0xf] %vm280_vm0, %v758_v37  ;;  %v2901_v54 = vrot.slane %v2762_v30, 5  ;;  %v2997_v56 = vpop.permute.xlu1 %2996 }
 0x11a   : > { %1965 = vrot.lane.b32.xlu1 %v9205_v28, %s10091_s8  ;;  %v2490_v26 = vor.u32 %v2489_v14, %v2485_v45  ;;  %v332_v55 = vsel %vm10152_vm4, 0, %v331_v25  ;;  %v759_v57 = vrot.slane %v10941_v19, 4  ;;  %958 = vst [vmem:[#allocation2 + $0x90] sm:$0xf] %v957_v53  ;;  %v761_v2 = vshrl.u32 %v10949_v36, 16  ;;  %3040 = vst.msk [vmem:[#allocation4 + $0x28] sm:$0xff] %vm13350_vm13, %v2997_v56 }
 0x11b   : > { %v2481_v59 = vrot.slane %v2480_v40, 4  ;;  %v2900_v33 = vrot.slane %v2898_v49, 4  ;;  %333 = vst [vmem:[#allocation2 + $0x9c] sm:$0x1] %v332_v55  ;;  %v2899_v63 = vsel %vm10238_vm14, %v9252_v44, %v2898_v49  ;;  %v769_v58 = vshrl.u32 %v547_v50, 16  ;;  %v4039_v48 = vpop.permute.xlu0 %4038  ;;  %v10020_v28 = vld [vmem:[#allocation2 + $0x78] sm:$0xff]   ;;  %vm13377_vm13 = vmmov %vm13376_vm10 }
 0x11c   : > { %v2491_v61 = vrot.slane %v2490_v26, 4  ;;  %v772_v11 = vshll.u32 %v547_v50, 16  ;;  %v763_v1 = vrot.slane %v761_v2, 7  ;;  %v764_v12 = vshll.u32 %v10949_v36, 16  ;;  %v10973_v16 = vld [vmem:[%s10182_s29 + $0x68] sm:$0xf] }
 0x11d   : > { %v2486_v27 = vsel %vm10274_vm15, %v2481_v59, %v2485_v45  ;;  %v388_v29 = vsel %vm10186_vm6, 0, %v387_v31  ;;  %4083 = vst.msk [vmem:[#allocation4 + $0x20] sm:$0xff] %vm4078_vm2, %v4039_v48  ;;  %v2902_v17 = vsel %vm10238_vm14, %v2900_v33, %v2901_v54  ;;  %v10980_v13 = vrot.slane %v769_v58, 7  ;;  %v3175_v8 = vpop.permute.xlu1 %3174  ;;  %v10021_v7 = vld [vmem:[#allocation2 + $0x84] sm:$0xff]  }
 0x11e   : > { %v2496_v46 = vsel %vm10274_vm15, %v2491_v61, %v2495_v32  ;;  %389 = vst [vmem:[#allocation2 + $0xa4] sm:$0x1] %v388_v29  ;;  %v335_v43 = vsel %vm10152_vm4, 0, %v334_v60  ;;  %v767_v5 = vrot.slane %v763_v1, 4  ;;  %3218 = vst.msk [vmem:[#allocation4 + $0x28] sm:$0xff] %vm3212_vm5, %v3175_v8  ;;  %v778_v41 = vshrl.u32 %v10973_v16, 16 }
 0x11f   : > { %v9236_v9 = vcombine.low %v2486_v27, %v2496_v46  ;;  %336 = vst [vmem:[#allocation2 + $0xa8] sm:$0x1] %v335_v43  ;;  %v774_v10 = vor.u32 %v772_v11, %v10980_v13  ;;  %v776_v52 = vrot.slane %v10980_v13, 4  ;;  %1130 = vst.msk [vmem:[#allocation4 + $0x50] sm:$0xff] %vm13376_vm10, %v10020_v28  ;;  %v9268_v42 = vcombine.low %v2899_v63, %v2902_v17 }
 0x120   : > { %v960_v19 = vld [vmem:[#allocation2 + $0x98] sm:$0x1]  ;;  %1131 = vst.msk [vmem:[#allocation4 + $0x58] sm:$0xff] %vm13377_vm13, %v10021_v7  ;;  %v2219_v20 = vld [vmem:[#allocation2 + $0x94] sm:$0xf]  ;;  %v766_v62 = vor.u32 %v764_v12, %v763_v1  ;;  %vm13378_vm13 = vcmask 130144  }
 0x121   : > { %2685 = vrot.lane.b32.xlu0 %v9236_v9, %s10096_s13  ;;  %v961_v15 = vsel %vm10152_vm4, %v759_v57, %v960_v19  ;;  %v2764_v21 = vld [vmem:[#allocation2 + $0x94] sm:$0xf]  ;;  %v2218_v22 = vld [vmem:[#allocation2 + $0x90] sm:$0xf]  ;;  %v2507_v24 = vshll.u32 %v2219_v20, 16  ;;  %v775_v51 = vsel %vm10199_vm8, %v767_v5, %v774_v10  ;;  %v3720_v30 = vpop.permute.xlu1 %3719  ;;  %v2511_v14 = vshrl.u32 %v2219_v20, 16 }
 0x122   : > { %v10003_v34 = vld [vmem:[#allocation2 + $0x90] sm:$0xff]   ;;  %962 = vst [vmem:[#allocation2 + $0x98] sm:$0x1] %v961_v15  ;;  %v2498_v25 = vshrl.u32 %v2218_v22, 16  ;;  %v2501_v45 = vshll.u32 %v2218_v22, 16  ;;  %v2905_v35 = vrot.slane %v2764_v21, 5  ;;  %v4041_v36 = vpop.permute.xlu0 %4040 }
 0x123   : > { %v2763_v32 = vld [vmem:[#allocation2 + $0x90] sm:$0xe]  ;;  %966 = vst.msk [vmem:[#allocation2 + $0xa0] sm:$0xf] %vm280_vm0, %v775_v51  ;;  %2142 = vrot.lane.b32.xlu1 %v10003_v34, %s10090_s30  ;;  %v10998_v38 = vrot.slane %v2507_v24, 5  ;;  %v2513_v44 = vrot.slane %v2511_v14, 4 }
 0x124   : > { %3763 = vst.msk [vmem:[#allocation4 + $0x28] sm:$0xff] %vm3757_vm3, %v3720_v30  ;;  %v9253_v37 = vrot.slane %v2763_v32, 9  ;;  %v2500_v39 = vrot.slane %v2498_v25, 4  ;;  %v2503_v40 = vrot.slane %v2501_v45, 5  ;;  %v2907_v49 = vrot.slane %v2905_v35, 4  ;;  %v10006_v50 = vld [vmem:[#allocation2 + $0x90] sm:$0xff]  }
 0x125   : > { %4084 = vst.msk [vmem:[#allocation4 + $0x28] sm:$0xff] %vm4078_vm2, %v4041_v36  ;;  %3006 = vrot.lane.b32.xlu0 %v9268_v42, %s10094_s11  ;;  %v4099_v53 = vld [vmem:[#allocation4 + $0x20] sm:$0xff]  ;;  %v963_v26 = vld [vmem:[#allocation2 + $0x9c] sm:$0xf]  ;;  %v1632_v31 = vpop.permute.xlu1 %1631  ;;  %v2514_v57 = vor.u32 %v2513_v44, %v10998_v38  ;;  %v967_v2 = vld [vmem:[#allocation2 + $0xa4] sm:$0x1] }
 0x126   : > { %v3259_v54 = vld [vmem:[#allocation2 + $0x90] sm:$0xf]  ;;  %v3260_v55 = vld [vmem:[#allocation2 + $0x94] sm:$0xf]  ;;  %9744 = vmatprep.mubr.msk.bf16.mxu0 %vm4138_vm1, %v4099_v53  ;;  %v2504_v56 = vor.u32 %v2503_v40, %v2500_v39  ;;  %v964_v59 = vsel %vm10206_vm11, %v766_v62, %v963_v26  ;;  %1674 = vst.msk [vmem:[#allocation4 + $0x30] sm:$0xff] %vm1667_vm7, %v1632_v31  ;;  %v968_v58 = vsel %vm10152_vm4, %v776_v52, %v967_v2  ;;  %v781_v62 = vshll.u32 %v10973_v16, 16 }
 0x127   : > { %v3518_v33 = vshrl.u32 %v3259_v54, 16  ;;  %965 = vst [vmem:[#allocation2 + $0x9c] sm:$0xf] %v964_v59  ;;  %v3521_v60 = vshll.u32 %v3259_v54, 16  ;;  %v3527_v61 = vshll.u32 %v3260_v55, 16  ;;  %v3531_v63 = vshrl.u32 %v3260_v55, 16 }
 0x128   : > { %v2505_v48 = vrot.slane %v2504_v56, 4  ;;  %v2515_v27 = vrot.slane %v2514_v57, 4  ;;  %969 = vst [vmem:[#allocation2 + $0xa4] sm:$0x1] %v968_v58  ;;  %v11011_v12 = vld [vmem:[%s10182_s29 + $0x6c] sm:$0xf]  ;;  %v1956_v29 = vpop.permute.xlu0 %1955  ;;  %v11015_v17 = vsel %vm10238_vm14, %v9253_v37, %v2905_v35 }
 0x129   : > { %v2220_v11 = vld [vmem:[#allocation2 + $0x98] sm:$0x1]  ;;  %3184 = vrot.lane.b32.xlu0 %v10006_v50, %s10092_s9  ;;  %v1634_v43 = vpop.permute.xlu1 %1633  ;;  %1998 = vst.msk [vmem:[#allocation4 + $0x30] sm:$0xff] %vm1991_vm9, %v1956_v29  ;;  %v3520_v7 = vrot.slane %v3518_v33, 4  ;;  %v3523_v9 = vrot.slane %v3521_v60, 5  ;;  %v3529_v5 = vrot.slane %v3527_v61, 5 }
 0x12a   : > { %v2765_v1 = vld [vmem:[#allocation2 + $0x98] sm:$0x1]  ;;  %v2517_v46 = vshll.u32 %v2220_v11, 16  ;;  %v2510_v28 = vsel %vm10274_vm15, %v2505_v48, %v10998_v38  ;;  %v3263_v19 = vld [vmem:[#allocation2 + $0xa0] sm:$0xf]  ;;  %1675 = vst.msk [vmem:[#allocation4 + $0x38] sm:$0xff] %vm1667_vm7, %v1634_v43 }
 0x12b   : > { %v2908_v13 = vrot.slane %v2765_v1, 5  ;;  %v3261_v8 = vld [vmem:[#allocation2 + $0x98] sm:$0x1]  ;;  %v3533_v20 = vrot.slane %v3531_v63, 4  ;;  %v3804_v21 = vld [vmem:[#allocation2 + $0x90] sm:$0xe]  ;;  %v3524_v34 = vor.u32 %v3523_v9, %v3520_v7 }
 0x12c   : > { %v4100_v10 = vld [vmem:[#allocation4 + $0x28] sm:$0xff]  ;;  %v2519_v52 = vrot.slane %v2517_v46, 5  ;;  %v3537_v42 = vshll.u32 %v3261_v8, 16  ;;  %v3551_v22 = vshll.u32 %v3263_v19, 16  ;;  %v3555_v24 = vshrl.u32 %v3263_v19, 16  ;;  %v2133_v51 = vpop.permute.xlu0 %2132  ;;  %v10022_v11 = vld [vmem:[#allocation2 + $0x90] sm:$0xff]  }
 0x12d   : > { %v2909_v15 = vsel %vm10238_vm14, %v2907_v49, %v2908_v13  ;;  %9745 = vmatmul.mubr.msk.bf16.gmra.mrb[8].mxu0 %vm4138_vm1, %v4100_v10  ;;  %v3534_v25 = vor.u32 %v3533_v20, %v3529_v5  ;;  %v3805_v14 = vld [vmem:[#allocation2 + $0x94] sm:$0xf]  ;;  %v3806_v32 = vld [vmem:[#allocation2 + $0x98] sm:$0x1]  ;;  %v786_v35 = vshrl.u32 %v11011_v12, 16  ;;  %v1958_v36 = vpop.permute.xlu1 %1957  ;;  %2175 = vst.msk [vmem:[#allocation4 + $0x30] sm:$0xff] %vm13378_vm13, %v2133_v51  ;;  %vm13379_vm13 = vmmov %vm13376_vm10 }
 0x12e   : > { %v2520_v30 = vsel %vm10274_vm15, %v2515_v27, %v2519_v52  ;;  %v3539_v45 = vrot.slane %v3537_v42, 5  ;;  %v9269_v37 = vcombine.low %v11015_v17, %v2909_v15  ;;  %v3525_v39 = vrot.slane %v3524_v34, 4  ;;  %v3262_v40 = vld [vmem:[#allocation2 + $0x9c] sm:$0xf]  ;;  %v1172_v49 = vld [vmem:[#allocation2 + $0x90] sm:$0xf] }
 0x12f   : > { %v9237_v38 = vcombine.low %v2510_v28, %v2520_v30  ;;  %v9316_v44 = vrot.slane %v3804_v21, 9  ;;  %1999 = vst.msk [vmem:[#allocation4 + $0x38] sm:$0xff] %vm1991_vm9, %v1958_v36  ;;  %v3535_v50 = vrot.slane %v3534_v25, 4  ;;  %v3264_v53 = vld [vmem:[#allocation2 + $0xa4] sm:$0x1]  ;;  %v3542_v26 = vshrl.u32 %v3262_v40, 16 }
 0x130   : > { %v3545_v54 = vshll.u32 %v3262_v40, 16  ;;  %v3553_v55 = vrot.slane %v3551_v22, 5  ;;  %v3530_v31 = vsel %vm10274_vm15, %v3525_v39, %v3529_v5  ;;  %v3557_v56 = vrot.slane %v3555_v24, 4  ;;  %v1173_v33 = vld [vmem:[#allocation2 + $0x94] sm:$0xf]  ;;  %v10007_v46 = vld [vmem:[#allocation2 + $0x9c] sm:$0xff]  }
 0x131   : > { %2687 = vrot.lane.b32.xlu1 %v9237_v38, %s10096_s13  ;;  %v3561_v57 = vshll.u32 %v3264_v53, 16  ;;  %v3942_v59 = vrot.slane %v3805_v14, 5  ;;  %v3540_v2 = vsel %vm10274_vm15, %v3535_v50, %v3539_v45  ;;  %v3544_v60 = vrot.slane %v3542_v26, 4  ;;  %v1174_v58 = vld [vmem:[#allocation2 + $0x98] sm:$0x1]  ;;  %1132 = vst.msk [vmem:[#allocation4 + $0x60] sm:$0xff] %vm13376_vm10, %v10022_v11 }
 0x132   : > { %v3547_v61 = vrot.slane %v3545_v54, 5  ;;  %v3945_v63 = vrot.slane %v3806_v32, 5  ;;  %v9300_v48 = vcombine.low %v3530_v31, %v3540_v2  ;;  %v3558_v27 = vor.u32 %v3557_v56, %v3553_v55  ;;  %v3808_v28 = vld [vmem:[#allocation2 + $0xa0] sm:$0xf]  ;;  %v3807_v52 = vld [vmem:[#allocation2 + $0x9c] sm:$0xe] }
 0x133   : > { %v3563_v1 = vrot.slane %v3561_v57, 5  ;;  %v3943_v29 = vsel %vm10238_vm14, %v9316_v44, %v3942_v59  ;;  %v3944_v13 = vrot.slane %v3942_v59, 4  ;;  %v1476_v8 = vshrl.u32 %v1172_v49, 16  ;;  %v10023_v7 = vld [vmem:[#allocation2 + $0x9c] sm:$0xff]   ;;  %v3809_v22 = vld [vmem:[#allocation2 + $0xa4] sm:$0x1] }
 0x134   : > { %v3548_v17 = vor.u32 %v3547_v61, %v3544_v60  ;;  %v1479_v43 = vshll.u32 %v1172_v49, 16  ;;  %3729 = vrot.lane.b32.xlu0 %v9300_v48, %s10097_s14  ;;  %v3559_v9 = vrot.slane %v3558_v27, 4  ;;  %v1485_v5 = vshll.u32 %v1173_v33, 16  ;;  %v2678_v15 = vpop.permute.xlu0 %2677  ;;  %v2135_v24 = vpop.permute.xlu1 %2134  ;;  %1133 = vst.msk [vmem:[#allocation4 + $0x68] sm:$0xff] %vm13379_vm13, %v10023_v7  ;;  %v1175_v14 = vld [vmem:[#allocation2 + $0x9c] sm:$0xf] }
 0x135   : > { %3008 = vrot.lane.b32.xlu1 %v9269_v37, %s10094_s11  ;;  %v1489_v19 = vshrl.u32 %v1173_v33, 16  ;;  %v1495_v10 = vshll.u32 %v1174_v58, 16  ;;  %v3946_v42 = vsel %vm10238_vm14, %v3944_v13, %v3945_v63  ;;  %v1478_v21 = vrot.slane %v1476_v8, 4  ;;  %2720 = vst.msk [vmem:[#allocation4 + $0x30] sm:$0xff] %vm2713_vm12, %v2678_v15  ;;  %v1176_v32 = vld [vmem:[#allocation2 + $0xa0] sm:$0xf] }
 0x136   : > { %v3549_v20 = vrot.slane %v3548_v17, 4  ;;  %v1481_v34 = vrot.slane %v1479_v43, 5  ;;  %v3564_v51 = vsel %vm10274_vm15, %v3559_v9, %v3563_v1  ;;  %v9332_v30 = vcombine.low %v3943_v29, %v3946_v42  ;;  %v1177_v40 = vld [vmem:[#allocation2 + $0xa4] sm:$0x1]  ;;  %v1720_v26 = vld [vmem:[#allocation2 + $0x90] sm:$0xe] }
 0x137   : > { %v1487_v25 = vrot.slane %v1485_v5, 5  ;;  %v1491_v45 = vrot.slane %v1489_v19, 4  ;;  %vm13380_vm10 = vcmask 130144   ;;  %v1497_v37 = vrot.slane %v1495_v10, 5  ;;  %v1721_v33 = vld [vmem:[#allocation2 + $0x94] sm:$0xf] }
 0x138   : > { %2176 = vst.msk [vmem:[#allocation4 + $0x38] sm:$0xff] %vm13380_vm10, %v2135_v24  ;;  %v3554_v36 = vsel %vm10274_vm15, %v3549_v20, %v3553_v55  ;;  %v1482_v38 = vor.u32 %v1481_v34, %v1478_v21  ;;  %v9317_v39 = vrot.slane %v3807_v52, 9  ;;  %4050 = vrot.lane.b32.xlu0 %v9332_v30, %s10095_s12  ;;  %v3949_v50 = vrot.slane %v3808_v28, 5  ;;  %v2999_v54 = vpop.permute.xlu0 %2998  ;;  %v1722_v63 = vld [vmem:[#allocation2 + $0x98] sm:$0x1] }
 0x139   : > { %3186 = vrot.lane.b32.xlu1 %v10007_v46, %s10092_s9  ;;  %v9301_v44 = vcombine.low %v3554_v36, %v3564_v51  ;;  %v1492_v49 = vor.u32 %v1491_v45, %v1487_v25  ;;  %v3952_v53 = vrot.slane %v3809_v22, 5  ;;  %v1500_v56 = vshrl.u32 %v1175_v14, 16  ;;  %v1723_v1 = vld [vmem:[#allocation2 + $0x9c] sm:$0xe]  ;;  %v1724_v8 = vld [vmem:[#allocation2 + $0xa0] sm:$0xf] }
 0x13a   : > { %v1483_v31 = vrot.slane %v1482_v38, 4  ;;  %v1503_v57 = vshll.u32 %v1175_v14, 16  ;;  %v1509_v59 = vshll.u32 %v1176_v32, 16  ;;  %vm13381_vm13 = vcmask 195744   ;;  %v1725_v43 = vld [vmem:[#allocation2 + $0xa4] sm:$0x1] }
 0x13b   : > { %3041 = vst.msk [vmem:[#allocation4 + $0x30] sm:$0xff] %vm13381_vm13, %v2999_v54  ;;  %v1493_v55 = vrot.slane %v1492_v49, 4  ;;  %v3950_v2 = vsel %vm10238_vm14, %v9317_v39, %v3949_v50  ;;  %v3951_v60 = vrot.slane %v3949_v50, 4  ;;  %v1513_v61 = vshrl.u32 %v1176_v32, 16  ;;  %v970_v24 = vld [vmem:[#allocation2 + $0xa8] sm:$0xf]  ;;  %vm13382_vm10 = vmmov %vm13381_vm13 }
 0x13c   : > { %v1488_v58 = vsel %vm10274_vm15, %v1483_v31, %v1487_v25  ;;  %v1502_v11 = vrot.slane %v1500_v56, 4  ;;  %v1505_v48 = vrot.slane %v1503_v57, 5  ;;  %v1511_v27 = vrot.slane %v1509_v59, 5  ;;  %v3177_v28 = vpop.permute.xlu0 %3176  ;;  %v2222_v49 = vld [vmem:[#allocation2 + $0xa0] sm:$0xf] }
 0x13d   : > { %3731 = vrot.lane.b32.xlu1 %v9301_v44, %s10097_s14  ;;  %v1498_v29 = vsel %vm10274_vm15, %v1493_v55, %v1497_v37  ;;  %v3953_v46 = vsel %vm10238_vm14, %v3951_v60, %v3952_v53  ;;  %v1515_v17 = vrot.slane %v1513_v61, 4  ;;  %v1519_v13 = vshll.u32 %v1177_v40, 16  ;;  %3219 = vst.msk [vmem:[#allocation4 + $0x30] sm:$0xff] %vm3212_vm5, %v3177_v28  ;;  %v2221_v37 = vld [vmem:[#allocation2 + $0x9c] sm:$0xf] }
 0x13e   : > { %v9174_v7 = vcombine.low %v1488_v58, %v1498_v29  ;;  %v9333_v9 = vcombine.low %v3950_v2, %v3953_v46  ;;  %v1506_v5 = vor.u32 %v1505_v48, %v1502_v11  ;;  %v9190_v19 = vrot.slane %v1720_v26, 9  ;;  %v390_v50 = vld [vmem:[#allocation2 + $0xb0] sm:$0x1]  ;;  %v2223_v56 = vld [vmem:[#allocation2 + $0xa4] sm:$0x1]  ;;  %v10008_v60 = vld [vmem:[#allocation2 + $0x9c] sm:$0xff]  }
 0x13f   : > { %v1516_v10 = vor.u32 %v1515_v17, %v1511_v27  ;;  %v1521_v52 = vrot.slane %v1519_v13, 5  ;;  %v1869_v15 = vrot.slane %v1721_v33, 5  ;;  %v1872_v20 = vrot.slane %v1722_v63, 5  ;;  %v337_v57 = vld [vmem:[#allocation2 + $0xb4] sm:$0x1] }
 0x140   : > { %4052 = vrot.lane.b32.xlu0 %v9333_v9, %s10095_s12  ;;  %v1507_v42 = vrot.slane %v1506_v5, 4  ;;  %v9191_v21 = vrot.slane %v1723_v1, 9  ;;  %v1876_v34 = vrot.slane %v1724_v8, 5  ;;  %v1879_v22 = vrot.slane %v1725_v43, 5  ;;  %v2766_v33 = vld [vmem:[#allocation2 + $0x9c] sm:$0xe] }
 0x141   : > { %1643 = vrot.lane.b32.xlu1 %v9174_v7, %s10093_s10  ;;  %v1517_v51 = vrot.slane %v1516_v10, 4  ;;  %v1870_v30 = vsel %vm10238_vm14, %v9190_v19, %v1869_v15  ;;  %v1871_v25 = vrot.slane %v1869_v15, 4  ;;  %v780_v45 = vrot.slane %v778_v41, 7  ;;  %v2767_v55 = vld [vmem:[#allocation2 + $0xa0] sm:$0xf] }
 0x142   : > { %v1512_v14 = vsel %vm10274_vm15, %v1507_v42, %v1511_v27  ;;  %v1877_v32 = vsel %vm10238_vm14, %v9191_v21, %v1876_v34  ;;  %v1878_v36 = vrot.slane %v1876_v34, 4  ;;  %v11076_v38 = vrot.slane %v786_v35, 7  ;;  %v2768_v11 = vld [vmem:[#allocation2 + $0xa4] sm:$0x1]  ;;  %v550_v29 = vld [vmem:[%s10182_s29 + $0x70] sm:$0xf] }
 0x143   : > { %v1522_v39 = vsel %vm10274_vm15, %v1517_v51, %v1521_v52  ;;  %v1873_v40 = vsel %vm10238_vm14, %v1871_v25, %v1872_v20  ;;  %v783_v41 = vor.u32 %v781_v62, %v780_v45  ;;  %v784_v44 = vrot.slane %v780_v45, 4  ;;  %v2680_v53 = vpop.permute.xlu1 %2679  ;;  %v11100_v28 = vld [vmem:[%s10182_s29 + $0x74] sm:$0xf]  ;;  %v393_v10 = vld [vmem:[#allocation2 + $0xbc] sm:$0x1] }
 0x144   : > { %v9175_v26 = vcombine.low %v1512_v14, %v1522_v39  ;;  %v9206_v54 = vcombine.low %v1870_v30, %v1873_v40  ;;  %v1880_v35 = vsel %vm10238_vm14, %v1878_v36, %v1879_v22  ;;  %v789_v31 = vshll.u32 %v11011_v12, 16  ;;  %2721 = vst.msk [vmem:[#allocation4 + $0x38] sm:$0xff] %vm2713_vm12, %v2680_v53 }
 0x145   : > { %v9207_v59 = vcombine.low %v1877_v32, %v1880_v35  ;;  %v971_v16 = vsel %vm10206_vm11, %v783_v41, %v970_v24  ;;  %v2522_v62 = vshrl.u32 %v2221_v37, 16  ;;  %v3722_v2 = vpop.permute.xlu0 %3721  ;;  %v2525_v61 = vshll.u32 %v2221_v37, 16 }
 0x146   : > { %1645 = vrot.lane.b32.xlu1 %v9175_v26, %s10093_s10  ;;  %1967 = vrot.lane.b32.xlu0 %v9206_v54, %s10091_s8  ;;  %v791_v12 = vor.u32 %v789_v31, %v11076_v38  ;;  %972 = vst [vmem:[#allocation2 + $0xa8] sm:$0xf] %v971_v16  ;;  %v2531_v63 = vshll.u32 %v2222_v49, 16  ;;  %v2535_v58 = vshrl.u32 %v2222_v49, 16  ;;  %3764 = vst.msk [vmem:[#allocation4 + $0x30] sm:$0xff] %vm3757_vm3, %v3722_v2  ;;  %v2541_v27 = vshll.u32 %v2223_v56, 16 }
 0x147   : > { %v2524_v48 = vrot.slane %v2522_v62, 4  ;;  %v391_v1 = vsel %vm10186_vm6, 0, %v390_v50  ;;  %v3001_v46 = vpop.permute.xlu1 %3000  ;;  %v2527_v13 = vrot.slane %v2525_v61, 5  ;;  %v9254_v7 = vrot.slane %v2766_v33, 9 }
 0x148   : > { %v792_v17 = vsel %vm10199_vm8, %v784_v44, %v791_v12  ;;  %v2533_v8 = vrot.slane %v2531_v63, 5  ;;  %v2537_v43 = vrot.slane %v2535_v58, 4  ;;  %392 = vst [vmem:[#allocation2 + $0xb0] sm:$0x1] %v391_v1  ;;  %3042 = vst.msk [vmem:[#allocation4 + $0x38] sm:$0xff] %vm13382_vm10, %v3001_v46  ;;  %v2912_v9 = vrot.slane %v2767_v55, 5 }
 0x149   : > { %973 = vst.msk [vmem:[#allocation2 + $0xac] sm:$0xf] %vm280_vm0, %v792_v17  ;;  %v2915_v5 = vrot.slane %v2768_v11, 5  ;;  %v338_v19 = vsel %vm10152_vm4, 0, %v337_v57  ;;  %v4043_v52 = vpop.permute.xlu0 %4042  ;;  %v2528_v15 = vor.u32 %v2527_v13, %v2524_v48  ;;  %v2543_v42 = vrot.slane %v2541_v27, 5 }
 0x14a   : > { %1969 = vrot.lane.b32.xlu1 %v9207_v59, %s10091_s8  ;;  %2144 = vrot.lane.b32.xlu0 %v10008_v60, %s10090_s30  ;;  %v2538_v20 = vor.u32 %v2537_v43, %v2533_v8  ;;  %339 = vst [vmem:[#allocation2 + $0xb4] sm:$0x1] %v338_v19  ;;  %v795_v21 = vshrl.u32 %v550_v29, 16  ;;  %4085 = vst.msk [vmem:[#allocation4 + $0x30] sm:$0xff] %vm4078_vm2, %v4043_v52  ;;  %v793_v34 = vrot.slane %v11076_v38, 4  ;;  %v2914_v22 = vrot.slane %v2912_v9, 4 }
 0x14b   : > { %v798_v24 = vshll.u32 %v550_v29, 16  ;;  %v3179_v51 = vpop.permute.xlu1 %3178  ;;  %v2529_v30 = vrot.slane %v2528_v15, 4  ;;  %v803_v45 = vshrl.u32 %v11100_v28, 16  ;;  %v394_v14 = vsel %vm10186_vm6, 0, %v393_v10 }
 0x14c   : > { %v2539_v25 = vrot.slane %v2538_v20, 4  ;;  %3220 = vst.msk [vmem:[#allocation4 + $0x38] sm:$0xff] %vm3212_vm5, %v3179_v51  ;;  %v2913_v36 = vsel %vm10238_vm14, %v9254_v7, %v2912_v9  ;;  %v2916_v37 = vsel %vm10238_vm14, %v2914_v22, %v2915_v5  ;;  %v797_v38 = vrot.slane %v795_v21, 7  ;;  %395 = vst [vmem:[#allocation2 + $0xbc] sm:$0x1] %v394_v14 }
 0x14d   : > { %v2224_v32 = vld [vmem:[#allocation2 + $0xa8] sm:$0xf]  ;;  %v806_v39 = vshll.u32 %v11100_v28, 16  ;;  %v2534_v40 = vsel %vm10274_vm15, %v2529_v30, %v2533_v8  ;;  %v9270_v16 = vcombine.low %v2913_v36, %v2916_v37  ;;  %v805_v58 = vrot.slane %v803_v45, 7 }
 0x14e   : > { %v2544_v41 = vsel %vm10274_vm15, %v2539_v25, %v2543_v42  ;;  %v2546_v44 = vshrl.u32 %v2224_v32, 16  ;;  %v2549_v49 = vshll.u32 %v2224_v32, 16  ;;  %v2769_v26 = vld [vmem:[#allocation2 + $0xa8] sm:$0xe]  ;;  %v800_v12 = vor.u32 %v798_v24, %v797_v38 }
 0x14f   : > { %v9238_v50 = vcombine.low %v2534_v40, %v2544_v41  ;;  %v974_v53 = vld [vmem:[#allocation2 + $0xb0] sm:$0x1]  ;;  %v11123_v54 = vld [vmem:[#allocation2 + $0xa8] sm:$0xf]  ;;  %v3724_v35 = vpop.permute.xlu1 %3723  ;;  %v801_v63 = vrot.slane %v797_v38, 4  ;;  %v9255_v13 = vrot.slane %v2769_v26, 9  ;;  %v808_v8 = vor.u32 %v806_v39, %v805_v58 }
 0x150   : > { %v10009_v31 = vld [vmem:[#allocation2 + $0xa8] sm:$0xff]   ;;  %v975_v56 = vsel %vm10152_vm4, %v793_v34, %v974_v53  ;;  %v2548_v59 = vrot.slane %v2546_v44, 4  ;;  %3765 = vst.msk [vmem:[#allocation4 + $0x38] sm:$0xff] %vm3757_vm3, %v3724_v35  ;;  %v4045_v62 = vpop.permute.xlu0 %4044  ;;  %v2551_v33 = vrot.slane %v2549_v49, 5  ;;  %v3566_v11 = vshrl.u32 %v11123_v54, 16 }
 0x151   : > { %v2225_v57 = vld [vmem:[#allocation2 + $0xac] sm:$0xf]  ;;  %2689 = vrot.lane.b32.xlu0 %v9238_v50, %s10096_s13  ;;  %976 = vst [vmem:[#allocation2 + $0xb0] sm:$0x1] %v975_v56  ;;  %4086 = vst.msk [vmem:[#allocation4 + $0x38] sm:$0xff] %vm4078_vm2, %v4045_v62  ;;  %2146 = vrot.lane.b32.xlu1 %v10009_v31, %s10090_s30  ;;  %v810_v43 = vrot.slane %v805_v58, 4  ;;  %v809_v15 = vsel %vm10199_vm8, %v801_v63, %v808_v8 }
 0x152   : > { %v2555_v55 = vshll.u32 %v2225_v57, 16  ;;  %v2559_v2 = vshrl.u32 %v2225_v57, 16  ;;  %v2770_v60 = vld [vmem:[#allocation2 + $0xac] sm:$0xf]  ;;  %v2552_v48 = vor.u32 %v2551_v33, %v2548_v59  ;;  %v977_v29 = vld [vmem:[#allocation2 + $0xb4] sm:$0xf] }
 0x153   : > { %v2919_v61 = vrot.slane %v2770_v60, 5  ;;  %v3266_v46 = vld [vmem:[#allocation2 + $0xac] sm:$0xf]  ;;  %v1636_v17 = vpop.permute.xlu1 %1635  ;;  %v981_v28 = vld [vmem:[#allocation2 + $0xbc] sm:$0x1]  ;;  %v978_v10 = vsel %vm10206_vm11, %v800_v12, %v977_v29  ;;  %v3569_v20 = vshll.u32 %v11123_v54, 16 }
 0x154   : > { %v11132_v27 = vrot.slane %v2555_v55, 5  ;;  %v2561_v1 = vrot.slane %v2559_v2, 4  ;;  %1676 = vst.msk [vmem:[#allocation4 + $0x40] sm:$0xff] %vm1667_vm7, %v1636_v17  ;;  %v2553_v7 = vrot.slane %v2552_v48, 4  ;;  %v10012_v19 = vld [vmem:[#allocation2 + $0xa8] sm:$0xff]   ;;  %v3575_v42 = vshll.u32 %v3266_v46, 16 }
 0x155   : > { %3010 = vrot.lane.b32.xlu0 %v9270_v16, %s10094_s11  ;;  %v2921_v5 = vrot.slane %v2919_v61, 4  ;;  %v3810_v52 = vld [vmem:[#allocation2 + $0xa8] sm:$0xe]  ;;  %979 = vst [vmem:[#allocation2 + $0xb4] sm:$0xf] %v978_v10  ;;  %v3579_v21 = vshrl.u32 %v3266_v46, 16  ;;  %v982_v30 = vsel %vm10152_vm4, %v810_v43, %v981_v28  ;;  %v11150_v36 = vsel %vm10238_vm14, %v9255_v13, %v2919_v61 }
 0x156   : > { %v2562_v9 = vor.u32 %v2561_v1, %v11132_v27  ;;  %v3811_v34 = vld [vmem:[#allocation2 + $0xac] sm:$0xf]  ;;  %v4101_v22 = vld [vmem:[#allocation4 + $0x30] sm:$0xff]  ;;  %980 = vst.msk [vmem:[#allocation2 + $0xb8] sm:$0xf] %vm280_vm0, %v809_v15  ;;  %v3568_v51 = vrot.slane %v3566_v11, 4  ;;  %v1960_v45 = vpop.permute.xlu0 %1959  ;;  %v2558_v35 = vsel %vm10274_vm15, %v2553_v7, %v11132_v27 }
 0x157   : > { %v11145_v25 = vld [vmem:[#allocation2 + $0xa8] sm:$0xf]  ;;  %9748 = vmatprep.mubr.msk.bf16.mxu0 %vm4138_vm1, %v4101_v22  ;;  %983 = vst [vmem:[#allocation2 + $0xbc] sm:$0x1] %v982_v30  ;;  %v1638_v38 = vpop.permute.xlu1 %1637  ;;  %2000 = vst.msk [vmem:[#allocation4 + $0x40] sm:$0xff] %vm1991_vm9, %v1960_v45  ;;  %v3571_v41 = vrot.slane %v3569_v20, 5 }
 0x158   : > { %v2563_v24 = vrot.slane %v2562_v9, 4  ;;  %v2226_v14 = vld [vmem:[#allocation2 + $0xb0] sm:$0x1]  ;;  %v3577_v44 = vrot.slane %v3575_v42, 5  ;;  %1677 = vst.msk [vmem:[#allocation4 + $0x48] sm:$0xff] %vm1667_vm7, %v1638_v38  ;;  %v3581_v50 = vrot.slane %v3579_v21, 4 }
 0x159   : > { %v2771_v32 = vld [vmem:[#allocation2 + $0xb0] sm:$0x1]  ;;  %v2565_v39 = vshll.u32 %v2226_v14, 16  ;;  %3188 = vrot.lane.b32.xlu0 %v10012_v19, %s10092_s9  ;;  %v9318_v26 = vrot.slane %v3810_v52, 9  ;;  %v3956_v54 = vrot.slane %v3811_v34, 5  ;;  %v3572_v57 = vor.u32 %v3571_v41, %v3568_v51  ;;  %v4102_v16 = vld [vmem:[#allocation4 + $0x38] sm:$0xff] }
 0x15a   : > { %v3267_v37 = vld [vmem:[#allocation2 + $0xb0] sm:$0x1]  ;;  %v2922_v40 = vrot.slane %v2771_v32, 5  ;;  %v2137_v59 = vpop.permute.xlu0 %2136  ;;  %v3582_v62 = vor.u32 %v3581_v50, %v3577_v44  ;;  %v1524_v2 = vshrl.u32 %v11145_v25, 16  ;;  %vm13383_vm13 = vcmask 130144   ;;  %9749 = vmatmul.mubr.msk.bf16.gmra.mrb[12].mxu0 %vm4138_vm1, %v4102_v16  ;;  %v10024_v22 = vld [vmem:[#allocation2 + $0xa8] sm:$0xff]  }
 0x15b   : > { %v3812_v49 = vld [vmem:[#allocation2 + $0xb0] sm:$0x1]  ;;  %v3585_v53 = vshll.u32 %v3267_v37, 16  ;;  %v2567_v31 = vrot.slane %v2565_v39, 5  ;;  %v1962_v60 = vpop.permute.xlu1 %1961  ;;  %2177 = vst.msk [vmem:[#allocation4 + $0x40] sm:$0xff] %vm13383_vm13, %v2137_v59  ;;  %v3573_v61 = vrot.slane %v3572_v57, 4  ;;  %v3957_v29 = vsel %vm10238_vm14, %v9318_v26, %v3956_v54 }
 0x15c   : > { %v2923_v56 = vsel %vm10238_vm14, %v2921_v5, %v2922_v40  ;;  %v3959_v55 = vrot.slane %v3812_v49, 5  ;;  %v3268_v63 = vld [vmem:[#allocation2 + $0xb4] sm:$0xf]  ;;  %v3958_v58 = vrot.slane %v3956_v54, 4  ;;  %2001 = vst.msk [vmem:[#allocation4 + $0x48] sm:$0xff] %vm1991_vm9, %v1962_v60  ;;  %v3583_v27 = vrot.slane %v3582_v62, 4 }
 0x15d   : > { %v3587_v33 = vrot.slane %v3585_v53, 5  ;;  %v2568_v12 = vsel %vm10274_vm15, %v2563_v24, %v2567_v31  ;;  %v9271_v48 = vcombine.low %v11150_v36, %v2923_v56  ;;  %v3269_v1 = vld [vmem:[#allocation2 + $0xb8] sm:$0xf]  ;;  %v1179_v46 = vld [vmem:[#allocation2 + $0xac] sm:$0xf]  ;;  %v3578_v17 = vsel %vm10274_vm15, %v3573_v61, %v3577_v44 }
 0x15e   : > { %v9239_v11 = vcombine.low %v2558_v35, %v2568_v12  ;;  %v3270_v13 = vld [vmem:[#allocation2 + $0xbc] sm:$0x1]  ;;  %v3590_v8 = vshrl.u32 %v3268_v63, 16  ;;  %v3593_v43 = vshll.u32 %v3268_v63, 16  ;;  %v3599_v28 = vshll.u32 %v3269_v1, 16  ;;  %v10025_v39 = vld [vmem:[#allocation2 + $0xb4] sm:$0xff]  }
 0x15f   : > { %v3588_v7 = vsel %vm10274_vm15, %v3583_v27, %v3587_v33  ;;  %v3603_v9 = vshrl.u32 %v3269_v1, 16  ;;  %v3609_v5 = vshll.u32 %v3270_v13, 16  ;;  %v3960_v19 = vsel %vm10238_vm14, %v3958_v58, %v3959_v55  ;;  %v1180_v10 = vld [vmem:[#allocation2 + $0xb0] sm:$0x1]  ;;  %v3813_v52 = vld [vmem:[#allocation2 + $0xb4] sm:$0xe] }
 0x160   : > { %2691 = vrot.lane.b32.xlu1 %v9239_v11, %s10096_s13  ;;  %v9302_v15 = vcombine.low %v3578_v17, %v3588_v7  ;;  %v3592_v20 = vrot.slane %v3590_v8, 4  ;;  %v3595_v42 = vrot.slane %v3593_v43, 5  ;;  %v3601_v21 = vrot.slane %v3599_v28, 5  ;;  %v3814_v34 = vld [vmem:[#allocation2 + $0xb8] sm:$0xf] }
 0x161   : > { %v3605_v24 = vrot.slane %v3603_v9, 4  ;;  %v3611_v51 = vrot.slane %v3609_v5, 5  ;;  %v9334_v30 = vcombine.low %v3957_v29, %v3960_v19  ;;  %v1526_v45 = vrot.slane %v1524_v2, 4  ;;  %v3815_v38 = vld [vmem:[#allocation2 + $0xbc] sm:$0x1]  ;;  %v10013_v40 = vld [vmem:[#allocation2 + $0xb4] sm:$0xff]  }
 0x162   : > { %3733 = vrot.lane.b32.xlu0 %v9302_v15, %s10097_s14  ;;  %v3596_v14 = vor.u32 %v3595_v42, %v3592_v20  ;;  %v1527_v32 = vshll.u32 %v11145_v25, 16  ;;  %v1533_v36 = vshll.u32 %v1179_v46, 16  ;;  %v1537_v37 = vshrl.u32 %v1179_v46, 16  ;;  %v1181_v53 = vld [vmem:[#allocation2 + $0xb4] sm:$0xf] }
 0x163   : > { %vm13384_vm10 = vcmask 31744   ;;  %v3606_v41 = vor.u32 %v3605_v24, %v3601_v21  ;;  %v1543_v44 = vshll.u32 %v1180_v10, 16  ;;  %v9319_v49 = vrot.slane %v3813_v52, 9  ;;  %v1182_v56 = vld [vmem:[#allocation2 + $0xb8] sm:$0xf] }
 0x164   : > { %1134 = vst.msk [vmem:[#allocation4 + $0x70] sm:$0xff] %vm13384_vm10, %v10024_v22  ;;  %3012 = vrot.lane.b32.xlu1 %v9271_v48, %s10094_s11  ;;  %v3963_v50 = vrot.slane %v3814_v34, 5  ;;  %v3597_v26 = vrot.slane %v3596_v14, 4  ;;  %v1529_v54 = vrot.slane %v1527_v32, 5  ;;  %v1535_v35 = vrot.slane %v1533_v36, 5  ;;  %v2682_v57 = vpop.permute.xlu0 %2681  ;;  %vm13385_vm13 = vmmov %vm13384_vm10 }
 0x165   : > { %v1539_v31 = vrot.slane %v1537_v37, 4  ;;  %v2139_v25 = vpop.permute.xlu1 %2138  ;;  %1135 = vst.msk [vmem:[#allocation4 + $0x78] sm:$0xff] %vm13385_vm13, %v10025_v39  ;;  %v3607_v59 = vrot.slane %v3606_v41, 4  ;;  %v1545_v16 = vrot.slane %v1543_v44, 5  ;;  %vm13386_vm10 = vcmask 130144  }
 0x166   : > { %v3964_v62 = vsel %vm10238_vm14, %v9319_v49, %v3963_v50  ;;  %v3965_v33 = vrot.slane %v3963_v50, 4  ;;  %2178 = vst.msk [vmem:[#allocation4 + $0x48] sm:$0xff] %vm13386_vm10, %v2139_v25  ;;  %v3602_v55 = vsel %vm10274_vm15, %v3597_v26, %v3601_v21  ;;  %4054 = vrot.lane.b32.xlu0 %v9334_v30, %s10095_s12  ;;  %v1530_v2 = vor.u32 %v1529_v54, %v1526_v45  ;;  %v1183_v61 = vld [vmem:[#allocation2 + $0xbc] sm:$0x1]  ;;  %v1726_v63 = vld [vmem:[#allocation2 + $0xa8] sm:$0xe] }
 0x167   : > { %2722 = vst.msk [vmem:[#allocation4 + $0x40] sm:$0xff] %vm2713_vm12, %v2682_v57  ;;  %v1540_v60 = vor.u32 %v1539_v31, %v1535_v35  ;;  %v3966_v12 = vrot.slane %v3815_v38, 5  ;;  %v3612_v58 = vsel %vm10274_vm15, %v3607_v59, %v3611_v51  ;;  %v1548_v11 = vshrl.u32 %v1181_v53, 16  ;;  %v1727_v13 = vld [vmem:[#allocation2 + $0xac] sm:$0xf] }
 0x168   : > { %3190 = vrot.lane.b32.xlu1 %v10013_v40, %s10092_s9  ;;  %v1551_v48 = vshll.u32 %v1181_v53, 16  ;;  %v1557_v27 = vshll.u32 %v1182_v56, 16  ;;  %v9303_v1 = vcombine.low %v3602_v55, %v3612_v58  ;;  %v1531_v29 = vrot.slane %v1530_v2, 4  ;;  %v1728_v8 = vld [vmem:[#allocation2 + $0xb0] sm:$0x1]  ;;  %v3003_v43 = vpop.permute.xlu0 %3002 }
 0x169   : > { %v1541_v46 = vrot.slane %v1540_v60, 4  ;;  %v3967_v17 = vsel %vm10238_vm14, %v3965_v33, %v3966_v12  ;;  %v1550_v7 = vrot.slane %v1548_v11, 4  ;;  %v1729_v19 = vld [vmem:[#allocation2 + $0xb4] sm:$0xe]  ;;  %v340_v10 = vld [vmem:[#allocation2 + $0xc0] sm:$0x1] }
 0x16a   : > { %v9335_v28 = vcombine.low %v3964_v62, %v3967_v17  ;;  %v1553_v9 = vrot.slane %v1551_v48, 5  ;;  %v1559_v5 = vrot.slane %v1557_v27, 5  ;;  %vm13387_vm13 = vcmask 195744   ;;  %v1730_v21 = vld [vmem:[#allocation2 + $0xb8] sm:$0xf] }
 0x16b   : > { %3043 = vst.msk [vmem:[#allocation4 + $0x40] sm:$0xff] %vm13387_vm13, %v3003_v43  ;;  %v1536_v52 = vsel %vm10274_vm15, %v1531_v29, %v1535_v35  ;;  %v1546_v15 = vsel %vm10274_vm15, %v1541_v46, %v1545_v16  ;;  %v1561_v20 = vshrl.u32 %v1182_v56, 16  ;;  %v1567_v42 = vshll.u32 %v1183_v61, 16  ;;  %v552_v34 = vld [vmem:[%s10182_s29 + $0x78] sm:$0xf]  ;;  %vm13388_vm10 = vmmov %vm13387_vm13 }
 0x16c   : > { %3735 = vrot.lane.b32.xlu1 %v9303_v1, %s10097_s14  ;;  %v9176_v22 = vcombine.low %v1536_v52, %v1546_v15  ;;  %4056 = vrot.lane.b32.xlu0 %v9335_v28, %s10095_s12  ;;  %v1554_v24 = vor.u32 %v1553_v9, %v1550_v7  ;;  %v9192_v51 = vrot.slane %v1726_v63, 9  ;;  %v1883_v30 = vrot.slane %v1727_v13, 5  ;;  %v1731_v45 = vld [vmem:[#allocation2 + $0xbc] sm:$0x1]  ;;  %v3181_v38 = vpop.permute.xlu0 %3180  ;;  %v2227_v35 = vld [vmem:[#allocation2 + $0xb4] sm:$0xf] }
 0x16d   : > { %v1563_v14 = vrot.slane %v1561_v20, 4  ;;  %v1569_v32 = vrot.slane %v1567_v42, 5  ;;  %v1886_v36 = vrot.slane %v1728_v8, 5  ;;  %v9193_v37 = vrot.slane %v1729_v19, 9  ;;  %v553_v49 = vld [vmem:[%s10182_s29 + $0x7c] sm:$0xf] }
 0x16e   : > { %v1555_v39 = vrot.slane %v1554_v24, 4  ;;  %v1884_v40 = vsel %vm10238_vm14, %v9192_v51, %v1883_v30  ;;  %v1885_v41 = vrot.slane %v1883_v30, 4  ;;  %v1890_v44 = vrot.slane %v1730_v21, 5  ;;  %3221 = vst.msk [vmem:[#allocation4 + $0x40] sm:$0xff] %vm3212_vm5, %v3181_v38  ;;  %v396_v57 = vld [vmem:[#allocation2 + $0xc8] sm:$0x1] }
 0x16f   : > { %v1564_v50 = vor.u32 %v1563_v14, %v1559_v5  ;;  %v1893_v53 = vrot.slane %v1731_v45, 5  ;;  %v341_v26 = vsel %vm10152_vm4, 0, %v340_v10  ;;  %v812_v54 = vshrl.u32 %v552_v34, 16  ;;  %v2228_v55 = vld [vmem:[#allocation2 + $0xb8] sm:$0xf] }
 0x170   : > { %1647 = vrot.lane.b32.xlu1 %v9176_v22, %s10093_s10  ;;  %v1560_v31 = vsel %vm10274_vm15, %v1555_v39, %v1559_v5  ;;  %v1887_v56 = vsel %vm10238_vm14, %v1885_v41, %v1886_v36  ;;  %v1892_v25 = vrot.slane %v1890_v44, 4  ;;  %342 = vst [vmem:[#allocation2 + $0xc0] sm:$0x1] %v341_v26  ;;  %v815_v33 = vshll.u32 %v552_v34, 16  ;;  %v2229_v61 = vld [vmem:[#allocation2 + $0xbc] sm:$0x1] }
 0x171   : > { %v1565_v59 = vrot.slane %v1564_v50, 4  ;;  %v9208_v16 = vcombine.low %v1884_v40, %v1887_v56  ;;  %v814_v62 = vrot.slane %v812_v54, 7  ;;  %v1891_v2 = vsel %vm10238_vm14, %v9193_v37, %v1890_v44  ;;  %v10014_v48 = vld [vmem:[#allocation2 + $0xb4] sm:$0xff]   ;;  %v343_v28 = vld [vmem:[#allocation2 + $0xcc] sm:$0x1] }
 0x172   : > { %v820_v60 = vshrl.u32 %v553_v49, 16  ;;  %v823_v12 = vshll.u32 %v553_v49, 16  ;;  %v2570_v63 = vshrl.u32 %v2227_v35, 16  ;;  %v1894_v11 = vsel %vm10238_vm14, %v1892_v25, %v1893_v53  ;;  %v2772_v29 = vld [vmem:[#allocation2 + $0xb4] sm:$0xe] }
 0x173   : > { %v1570_v58 = vsel %vm10274_vm15, %v1565_v59, %v1569_v32  ;;  %1971 = vrot.lane.b32.xlu0 %v9208_v16, %s10091_s8  ;;  %v817_v27 = vor.u32 %v815_v33, %v814_v62  ;;  %v818_v1 = vrot.slane %v814_v62, 4  ;;  %v2573_v8 = vshll.u32 %v2227_v35, 16  ;;  %v2773_v43 = vld [vmem:[#allocation2 + $0xb8] sm:$0xf]  ;;  %v399_v52 = vld [vmem:[#allocation2 + $0xd4] sm:$0x1] }
 0x174   : > { %v9177_v46 = vcombine.low %v1560_v31, %v1570_v58  ;;  %v11219_v17 = vrot.slane %v820_v60, 7  ;;  %v2572_v13 = vrot.slane %v2570_v63, 4  ;;  %v2684_v7 = vpop.permute.xlu1 %2683  ;;  %v2579_v9 = vshll.u32 %v2228_v55, 16  ;;  %v2774_v34 = vld [vmem:[#allocation2 + $0xbc] sm:$0x1] }
 0x175   : > { %v2583_v5 = vshrl.u32 %v2228_v55, 16  ;;  %v2589_v19 = vshll.u32 %v2229_v61, 16  ;;  %v397_v10 = vsel %vm10186_vm6, 0, %v396_v57  ;;  %2723 = vst.msk [vmem:[#allocation4 + $0x48] sm:$0xff] %vm2713_vm12, %v2684_v7  ;;  %v9209_v15 = vcombine.low %v1891_v2, %v1894_v11  ;;  %v3275_v22 = vld [vmem:[#allocation2 + $0xd0] sm:$0xf] }
 0x176   : > { %1649 = vrot.lane.b32.xlu1 %v9177_v46, %s10093_s10  ;;  %v825_v20 = vor.u32 %v823_v12, %v11219_v17  ;;  %v827_v42 = vrot.slane %v11219_v17, 4  ;;  %v2575_v21 = vrot.slane %v2573_v8, 5  ;;  %398 = vst [vmem:[#allocation2 + $0xc8] sm:$0x1] %v397_v10  ;;  %v3726_v24 = vpop.permute.xlu0 %3725  ;;  %v2581_v30 = vrot.slane %v2579_v9, 5 }
 0x177   : > { %2148 = vrot.lane.b32.xlu0 %v10014_v48, %s10090_s30  ;;  %v984_v51 = vld [vmem:[#allocation2 + $0xc0] sm:$0xf]  ;;  %v2585_v45 = vrot.slane %v2583_v5, 4  ;;  %v9256_v14 = vrot.slane %v2772_v29, 9  ;;  %v2926_v32 = vrot.slane %v2773_v43, 5  ;;  %3766 = vst.msk [vmem:[#allocation4 + $0x40] sm:$0xff] %vm3757_vm3, %v3726_v24 }
 0x178   : > { %v826_v36 = vsel %vm10199_vm8, %v818_v1, %v825_v20  ;;  %v985_v37 = vsel %vm10206_vm11, %v817_v27, %v984_v51  ;;  %v2576_v38 = vor.u32 %v2575_v21, %v2572_v13  ;;  %v2591_v39 = vrot.slane %v2589_v19, 5  ;;  %v3005_v40 = vpop.permute.xlu1 %3004  ;;  %v11245_v59 = vld [vmem:[#allocation2 + $0xd0] sm:$0xf] }
 0x179   : > { %986 = vst [vmem:[#allocation2 + $0xc0] sm:$0xf] %v985_v37  ;;  %987 = vst.msk [vmem:[#allocation2 + $0xc4] sm:$0xf] %vm280_vm0, %v826_v36  ;;  %v2586_v41 = vor.u32 %v2585_v45, %v2581_v30  ;;  %v2928_v44 = vrot.slane %v2926_v32, 4  ;;  %v2929_v49 = vrot.slane %v2774_v34, 5  ;;  %v2927_v33 = vsel %vm10238_vm14, %v9256_v14, %v2926_v32 }
 0x17a   : > { %v344_v50 = vsel %vm10152_vm4, 0, %v343_v28  ;;  %3044 = vst.msk [vmem:[#allocation4 + $0x48] sm:$0xff] %vm13388_vm10, %v3005_v40  ;;  %1973 = vrot.lane.b32.xlu1 %v9209_v15, %s10091_s8  ;;  %v2577_v53 = vrot.slane %v2576_v38, 4  ;;  %v400_v23 = vsel %vm10186_vm6, 0, %v399_v52  ;;  %v3647_v26 = vshll.u32 %v3275_v22, 16  ;;  %v4047_v35 = vpop.permute.xlu0 %4046 }
 0x17b   : > { %345 = vst [vmem:[#allocation2 + $0xcc] sm:$0x1] %v344_v50  ;;  %v3651_v54 = vshrl.u32 %v3275_v22, 16  ;;  %v2587_v31 = vrot.slane %v2586_v41, 4  ;;  %401 = vst [vmem:[#allocation2 + $0xd4] sm:$0x1] %v400_v23  ;;  %v2930_v55 = vsel %vm10238_vm14, %v2928_v44, %v2929_v49 }
 0x17c   : > { %4087 = vst.msk [vmem:[#allocation4 + $0x40] sm:$0xff] %vm4078_vm2, %v4047_v35  ;;  %v2582_v56 = vsel %vm10274_vm15, %v2577_v53, %v2581_v30  ;;  %v11243_v25 = vrot.slane %v3647_v26, 5  ;;  %v3183_v16 = vpop.permute.xlu1 %3182  ;;  %v3977_v61 = vrot.slane %v11245_v59, 5  ;;  %v9272_v58 = vcombine.low %v2927_v33, %v2930_v55 }
 0x17d   : > { %v3653_v57 = vrot.slane %v3651_v54, 4  ;;  %v2592_v6 = vsel %vm10274_vm15, %v2587_v31, %v2591_v39  ;;  %v988_v62 = vld [vmem:[#allocation2 + $0xc8] sm:$0x1]  ;;  %3222 = vst.msk [vmem:[#allocation4 + $0x48] sm:$0xff] %vm3212_vm5, %v3183_v16  ;;  %vm13389_vm0 = vcmask 130144   ;;  %vm13391_vm11 = vcmask 57344  }
 0x17e   : > { %v9240_v2 = vcombine.low %v2582_v56, %v2592_v6  ;;  %v989_v60 = vsel %vm10152_vm4, %v827_v42, %v988_v62  ;;  %vm13352_vm4 = vcmask 60416   ;;  %vm13390_vm6 = vsmask.f32 256 }
 0x17f   : > { %v3654_v12 = vor.u32 %v3653_v57, %v11243_v25  ;;  %990 = vst [vmem:[#allocation2 + $0xc8] sm:$0x1] %v989_v60  ;;  %403 = vst.msk [vmem:[#allocation3] sm:$0xf] %vm13352_vm4, %v10089_v3  ;;  %vm13394_vm10 = vsmask.f32 7938 }
 0x180   : > { %v10015_v63 = vld [vmem:[#allocation2 + $0xc0] sm:$0xff]   ;;  %2693 = vrot.lane.b32.xlu0 %v9240_v2, %s10096_s13  ;;  %v3728_v48 = vpop.permute.xlu1 %3727  ;;  %v4049_v27 = vpop.permute.xlu0 %4048  ;;  %404 = vst.msk [vmem:[#allocation3 + $0x4] sm:$0xf] %vm13352_vm4, %v10089_v3  ;;  %408 = vst.msk [vmem:[#allocation3 + $0xcc] sm:$0xf] %vm13352_vm4, %v10089_v3 }
 0x181   : > { %v11259_v11 = vrot.slane %v3654_v12, 4  ;;  %v2230_v1 = vld [vmem:[#allocation2 + $0xc0] sm:$0xf]  ;;  %v2231_v29 = vld [vmem:[#allocation2 + $0xc4] sm:$0xf]  ;;  %3767 = vst.msk [vmem:[#allocation4 + $0x48] sm:$0xff] %vm3757_vm3, %v3728_v48  ;;  %2150 = vrot.lane.b32.xlu1 %v10015_v63, %s10090_s30  ;;  %vm11298_vm13 = vmand %vm13391_vm11, %vm13390_vm6 }
 0x182   : > { %v2775_v46 = vld [vmem:[#allocation2 + $0xc0] sm:$0xe]  ;;  %v2594_v0 = vshrl.u32 %v2230_v1, 16  ;;  %v2597_v17 = vshll.u32 %v2230_v1, 16  ;;  %v2603_v13 = vshll.u32 %v2231_v29, 16  ;;  %v2607_v8 = vshrl.u32 %v2231_v29, 16 }
 0x183   : > { %v2776_v43 = vld [vmem:[#allocation2 + $0xc4] sm:$0xf]  ;;  %4088 = vst.msk [vmem:[#allocation4 + $0x48] sm:$0xff] %vm4078_vm2, %v4049_v27  ;;  %v9257_v28 = vrot.slane %v2775_v46, 9  ;;  %v3271_v42 = vld [vmem:[#allocation2 + $0xc0] sm:$0xf] }
 0x184   : > { %v2933_v7 = vrot.slane %v2776_v43, 5  ;;  %v2596_v9 = vrot.slane %v2594_v0, 4  ;;  %v2599_v5 = vrot.slane %v2597_v17, 5  ;;  %v2605_v19 = vrot.slane %v2603_v13, 5  ;;  %3014 = vrot.lane.b32.xlu0 %v9272_v58, %s10094_s11  ;;  %v10018_v52 = vld [vmem:[#allocation2 + $0xc0] sm:$0xff]   ;;  %v1640_v15 = vpop.permute.xlu1 %1639  ;;  %v4103_v21 = vld [vmem:[#allocation4 + $0x40] sm:$0xff] }
 0x185   : > { %v2609_v10 = vrot.slane %v2607_v8, 4  ;;  %1678 = vst.msk [vmem:[#allocation4 + $0x50] sm:$0xff] %vm1667_vm7, %v1640_v15  ;;  %v3272_v30 = vld [vmem:[#allocation2 + $0xc4] sm:$0xf]  ;;  %9752 = vmatprep.mubr.msk.bf16.mxu0 %vm4138_vm1, %v4103_v21  ;;  %v3614_v36 = vshrl.u32 %v3271_v42, 16  ;;  %v3617_v37 = vshll.u32 %v3271_v42, 16 }
 0x186   : > { %v2935_v20 = vrot.slane %v2933_v7, 4  ;;  %v2232_v34 = vld [vmem:[#allocation2 + $0xc8] sm:$0x1]  ;;  %v2600_v22 = vor.u32 %v2599_v5, %v2596_v9  ;;  %v3623_v41 = vshll.u32 %v3272_v30, 16  ;;  %v3627_v44 = vshrl.u32 %v3272_v30, 16 }
 0x187   : > { %v2610_v24 = vor.u32 %v2609_v10, %v2605_v19  ;;  %v2777_v51 = vld [vmem:[#allocation2 + $0xc8] sm:$0x1]  ;;  %v2613_v45 = vshll.u32 %v2232_v34, 16  ;;  %v1964_v38 = vpop.permute.xlu0 %1963  ;;  %v3274_v49 = vld [vmem:[#allocation2 + $0xcc] sm:$0xf]  ;;  %v2934_v23 = vsel %vm10238_vm14, %v9257_v28, %v2933_v7  ;;  %v3616_v26 = vrot.slane %v3614_v36, 4 }
 0x188   : > { %v2936_v14 = vrot.slane %v2777_v51, 5  ;;  %v3273_v32 = vld [vmem:[#allocation2 + $0xc8] sm:$0x1]  ;;  %v2601_v39 = vrot.slane %v2600_v22, 4  ;;  %3192 = vrot.lane.b32.xlu0 %v10018_v52, %s10092_s9  ;;  %v1642_v50 = vpop.permute.xlu1 %1641  ;;  %2002 = vst.msk [vmem:[#allocation4 + $0x50] sm:$0xff] %vm1991_vm9, %v1964_v38  ;;  %v3619_v54 = vrot.slane %v3617_v37, 5 }
 0x189   : > { %v2611_v40 = vrot.slane %v2610_v24, 4  ;;  %v2615_v53 = vrot.slane %v2613_v45, 5  ;;  %v3276_v35 = vld [vmem:[#allocation2 + $0xd4] sm:$0x1]  ;;  %1679 = vst.msk [vmem:[#allocation4 + $0x58] sm:$0xff] %vm1667_vm7, %v1642_v50  ;;  %v3625_v16 = vrot.slane %v3623_v41, 5 }
 0x18a   : > { %v4104_v31 = vld [vmem:[#allocation4 + $0x48] sm:$0xff]  ;;  %v2606_v56 = vsel %vm10274_vm15, %v2601_v39, %v2605_v19  ;;  %v2937_v57 = vsel %vm10238_vm14, %v2935_v20, %v2936_v14  ;;  %v3629_v6 = vrot.slane %v3627_v44, 4  ;;  %v3816_v62 = vld [vmem:[#allocation2 + $0xc0] sm:$0xe]  ;;  %v3620_v55 = vor.u32 %v3619_v54, %v3616_v26  ;;  %v3817_v12 = vld [vmem:[#allocation2 + $0xc4] sm:$0xf] }
 0x18b   : > { %9753 = vmatmul.mubr.msk.bf16.gmra.mrb[16].mxu0 %vm4138_vm1, %v4104_v31  ;;  %v2616_v33 = vsel %vm10274_vm15, %v2611_v40, %v2615_v53  ;;  %v3633_v2 = vshll.u32 %v3273_v32, 16  ;;  %v3638_v60 = vshrl.u32 %v3274_v49, 16  ;;  %v2141_v63 = vpop.permute.xlu0 %2140  ;;  %v3641_v27 = vshll.u32 %v3274_v49, 16  ;;  %v3818_v29 = vld [vmem:[#allocation2 + $0xc8] sm:$0x1]  ;;  %v10019_v24 = vld [vmem:[#allocation2 + $0xcc] sm:$0xff]  }
 0x18c   : > { %v9241_v58 = vcombine.low %v2606_v56, %v2616_v33  ;;  %v3630_v48 = vor.u32 %v3629_v6, %v3625_v16  ;;  %v3657_v1 = vshll.u32 %v3276_v35, 16  ;;  %v1966_v46 = vpop.permute.xlu1 %1965  ;;  %2179 = vst.msk [vmem:[#allocation4 + $0x50] sm:$0xff] %vm13389_vm0, %v2141_v63  ;;  %v3621_v0 = vrot.slane %v3620_v55, 4  ;;  %v3819_v43 = vld [vmem:[#allocation2 + $0xcc] sm:$0xe]  ;;  %vm13395_vm0 = vmmov %vm13391_vm11 }
 0x18d   : > { %v3635_v17 = vrot.slane %v3633_v2, 5  ;;  %v3640_v13 = vrot.slane %v3638_v60, 4  ;;  %v9320_v8 = vrot.slane %v3816_v62, 9  ;;  %2003 = vst.msk [vmem:[#allocation4 + $0x58] sm:$0xff] %vm1991_vm9, %v1966_v46  ;;  %v9273_v28 = vcombine.low %v2934_v23, %v2937_v57  ;;  %v3821_v19 = vld [vmem:[#allocation2 + $0xd4] sm:$0x1]  ;;  %vm11309_vm6 = vmand %vm13395_vm0, %vm13394_vm10 }
 0x18e   : > { %2695 = vrot.lane.b32.xlu1 %v9241_v58, %s10096_s13  ;;  %v3631_v7 = vrot.slane %v3630_v48, 4  ;;  %v3643_v9 = vrot.slane %v3641_v27, 5  ;;  %v3970_v5 = vrot.slane %v3817_v12, 5  ;;  %v3626_v10 = vsel %vm10274_vm15, %v3621_v0, %v3625_v16  ;;  %409 = vst.msk [vmem:[#allocation3 + $0xd0] sm:$0xf] %vm13352_vm4, %v10089_v3 }
 0x18f   : > { %v3659_v52 = vrot.slane %v3657_v1, 5  ;;  %v3973_v15 = vrot.slane %v3818_v29, 5  ;;  %v9321_v21 = vrot.slane %v3819_v43, 9  ;;  %v3979_v34 = vrot.slane %v3977_v61, 4  ;;  %v419_v32 = vld [vmem:[#allocation3 + $0x18] sm:$0x1] }
 0x190   : > { %v3636_v20 = vsel %vm10274_vm15, %v3631_v7, %v3635_v17  ;;  %v3644_v42 = vor.u32 %v3643_v9, %v3640_v13  ;;  %v3971_v30 = vsel %vm10238_vm14, %v9320_v8, %v3970_v5  ;;  %v3972_v45 = vrot.slane %v3970_v5, 4  ;;  %v416_v37 = vld [vmem:[#allocation3 + $0xc] sm:$0x1]  ;;  %v474_v39 = vld [vmem:[#allocation3 + $0x20] sm:$0x1] }
 0x191   : > { %v9304_v51 = vcombine.low %v3626_v10, %v3636_v20  ;;  %v3980_v14 = vrot.slane %v3821_v19, 5  ;;  %v420_v3 = vsel %vm11298_vm13, 0, %v419_v32  ;;  %v3660_v40 = vsel %vm10274_vm15, %v11259_v11, %v3659_v52  ;;  %v471_v53 = vld [vmem:[#allocation3 + $0x14] sm:$0x1]  ;;  %v468_v31 = vld [vmem:[#allocation3 + $0x8] sm:$0x1] }
 0x192   : > { %3016 = vrot.lane.b32.xlu1 %v9273_v28, %s10094_s11  ;;  %v3645_v36 = vrot.slane %v3644_v42, 4  ;;  %v3974_v41 = vsel %vm10238_vm14, %v3972_v45, %v3973_v15  ;;  %421 = vst [vmem:[#allocation3 + $0x18] sm:$0x1] %v420_v3  ;;  %v417_v49 = vsel %vm11298_vm13, 0, %v416_v37  ;;  %v475_v50 = vsel %vm11309_vm6, 0, %v474_v39 }
 0x193   : > { %3737 = vrot.lane.b32.xlu0 %v9304_v51, %s10097_s14  ;;  %v2686_v44 = vpop.permute.xlu0 %2685  ;;  %v519_v23 = vld [vmem:[#allocation3 + $0xd4] sm:$0x1]  ;;  %v9336_v54 = vcombine.low %v3971_v30, %v3974_v41  ;;  %418 = vst [vmem:[#allocation3 + $0xc] sm:$0x1] %v417_v49  ;;  %476 = vst [vmem:[#allocation3 + $0x20] sm:$0x1] %v475_v50  ;;  %v3978_v57 = vsel %vm10238_vm14, %v9321_v21, %v3977_v61  ;;  %v3981_v16 = vsel %vm10238_vm14, %v3979_v34, %v3980_v14 }
 0x194   : > { %v3650_v26 = vsel %vm10274_vm15, %v3645_v36, %v11243_v25  ;;  %2724 = vst.msk [vmem:[#allocation4 + $0x50] sm:$0xff] %vm2713_vm12, %v2686_v44  ;;  %v472_v11 = vsel %vm11309_vm6, 0, %v471_v53  ;;  %v520_v35 = vsel %vm11309_vm6, 0, %v519_v23  ;;  %v469_v56 = vsel %vm11309_vm6, 0, %v468_v31  ;;  %v464_v33 = vld [vmem:[#allocation3 + $0xcc] sm:$0x1] }
 0x195   : > { %473 = vst [vmem:[#allocation3 + $0x14] sm:$0x1] %v472_v11  ;;  %521 = vst [vmem:[#allocation3 + $0xd4] sm:$0x1] %v520_v35  ;;  %v9305_v25 = vcombine.low %v3650_v26, %v3660_v40  ;;  %v2143_v6 = vpop.permute.xlu1 %2142  ;;  %vm13398_vm11 = vcmask 130144   ;;  %vm13399_vm10 = vcmask 195744   ;;  %v9337_v12 = vcombine.low %v3978_v57, %v3981_v16 }
 0x196   : > { %3194 = vrot.lane.b32.xlu1 %v10019_v24, %s10092_s9  ;;  %470 = vst [vmem:[#allocation3 + $0x8] sm:$0x1] %v469_v56  ;;  %2180 = vst.msk [vmem:[#allocation4 + $0x58] sm:$0xff] %vm13398_vm11, %v2143_v6  ;;  %v7193_v55 = vld [vmem:[#allocation3 + $0xd0] sm:$0xf]  ;;  %v465_v59 = vsel %vm11298_vm13, 0, %v464_v33 }
 0x197   : > { %4058 = vrot.lane.b32.xlu0 %v9336_v54, %s10095_s12  ;;  %v3007_v62 = vpop.permute.xlu0 %3006  ;;  %v7565_v2 = vshll.u32 %v7193_v55, 16  ;;  %v7569_v60 = vshrl.u32 %v7193_v55, 16  ;;  %v413_v61 = vld [vmem:[#allocation3] sm:$0x1]  ;;  %466 = vst [vmem:[#allocation3 + $0xcc] sm:$0x1] %v465_v59  ;;  %vm13400_vm0 = vmmov %vm13399_vm10 }
 0x198   : > { %3045 = vst.msk [vmem:[#allocation4 + $0x50] sm:$0xff] %vm13399_vm10, %v3007_v62  ;;  %v414_v63 = vsel %vm11298_vm13, 0, %v413_v61  ;;  %v5061_v58 = vld [vmem:[#allocation3 + $0x4] sm:$0xf]  ;;  %v11350_v0 = vld [vmem:[#allocation3 + $0xcc] sm:$0xe]  ;;  %vm13401_vm10 = vmmov %vm13398_vm11 }
 0x199   : > { %v11348_v48 = vrot.slane %v7565_v2, 5  ;;  %v7571_v27 = vrot.slane %v7569_v60, 4  ;;  %415 = vst [vmem:[#allocation3] sm:$0x1] %v414_v63  ;;  %v5118_v1 = vshll.u32 %v5061_v58, 16  ;;  %v5122_v29 = vshrl.u32 %v5061_v58, 16 }
 0x19a   : > { %3739 = vrot.lane.b32.xlu1 %v9305_v25, %s10097_s14  ;;  %v7738_v9 = vld [vmem:[#allocation3 + $0xd0] sm:$0xf]  ;;  %v9565_v10 = vrot.slane %v11350_v0, 9  ;;  %v11361_v42 = vld [vmem:[#allocation3 + $0x4] sm:$0xf] }
 0x19b   : > { %v3185_v46 = vpop.permute.xlu0 %3184  ;;  %v7572_v13 = vor.u32 %v7571_v27, %v11348_v48  ;;  %v11354_v8 = vrot.slane %v5118_v1, 5  ;;  %v5124_v43 = vrot.slane %v5122_v29, 4  ;;  %v7895_v20 = vrot.slane %v7738_v9, 5  ;;  %v5605_v14 = vld [vmem:[#allocation3] sm:$0xe] }
 0x19c   : > { %3223 = vst.msk [vmem:[#allocation4 + $0x50] sm:$0xff] %vm3212_vm5, %v3185_v46  ;;  %v7194_v17 = vld [vmem:[#allocation3 + $0xd4] sm:$0x1]  ;;  %v5703_v50 = vrot.slane %v11361_v42, 5  ;;  %v425_v53 = vld [vmem:[#allocation3 + $0x30] sm:$0x1] }
 0x19d   : > { %v7575_v28 = vshll.u32 %v7194_v17, 16  ;;  %v5062_v7 = vld [vmem:[#allocation3 + $0x8] sm:$0x1]  ;;  %v11357_v5 = vrot.slane %v7572_v13, 4  ;;  %v5125_v19 = vor.u32 %v5124_v43, %v11354_v8  ;;  %v7739_v15 = vld [vmem:[#allocation3 + $0xd4] sm:$0x1]  ;;  %v7896_v46 = vsel %vm10238_vm14, %v9565_v10, %v7895_v20 }
 0x19e   : > { %4060 = vrot.lane.b32.xlu1 %v9337_v12, %s10095_s12  ;;  %v5128_v52 = vshll.u32 %v5062_v7, 16  ;;  %v10026_v21 = vld [vmem:[#allocation3 + $0xcc] sm:$0xff]   ;;  %v7898_v37 = vrot.slane %v7739_v15, 5  ;;  %v5607_v39 = vld [vmem:[#allocation3 + $0x8] sm:$0x1]  ;;  %v7897_v54 = vrot.slane %v7895_v20, 4 }
 0x19f   : > { %v7192_v34 = vld [vmem:[#allocation3 + $0xcc] sm:$0xf]  ;;  %v7577_v24 = vrot.slane %v7575_v28, 5  ;;  %v5126_v3 = vrot.slane %v5125_v19, 4  ;;  %v9422_v11 = vrot.slane %v5605_v14, 9  ;;  %v5705_v56 = vrot.slane %v5703_v50, 4 }
 0x1a0   : > { %v7556_v51 = vshrl.u32 %v7192_v34, 16  ;;  %v7559_v30 = vshll.u32 %v7192_v34, 16  ;;  %v5060_v45 = vld [vmem:[#allocation3] sm:$0xf]  ;;  %v5130_v49 = vrot.slane %v5128_v52, 5  ;;  %v5706_v25 = vrot.slane %v5607_v39, 5 }
 0x1a1   : > { %v5109_v32 = vshrl.u32 %v5060_v45, 16  ;;  %v5112_v36 = vshll.u32 %v5060_v45, 16  ;;  %v422_v35 = vld [vmem:[#allocation3 + $0x24] sm:$0x1]  ;;  %v480_v57 = vld [vmem:[#allocation3 + $0x38] sm:$0x1]  ;;  %v7578_v12 = vsel %vm10274_vm15, %v11357_v5, %v7577_v24  ;;  %v7899_v28 = vsel %vm10238_vm14, %v7897_v54, %v7898_v37 }
 0x1a2   : > { %7112 = vrot.lane.b32.xlu1 %v10026_v21, %s10098_s21  ;;  %v7558_v41 = vrot.slane %v7556_v51, 4  ;;  %v7561_v44 = vrot.slane %v7559_v30, 5  ;;  %v477_v16 = vld [vmem:[#allocation3 + $0x2c] sm:$0x1]  ;;  %v426_v62 = vsel %vm11298_vm13, 0, %v425_v53  ;;  %v423_v33 = vsel %vm11298_vm13, 0, %v422_v35 }
 0x1a3   : > { %v2688_v40 = vpop.permute.xlu1 %2687  ;;  %v5111_v23 = vrot.slane %v5109_v32, 4  ;;  %v5114_v26 = vrot.slane %v5112_v36, 5  ;;  %v481_v55 = vsel %vm11309_vm6, 0, %v480_v57  ;;  %v431_v59 = vld [vmem:[#allocation3 + $0x48] sm:$0x1]  ;;  %v478_v63 = vsel %vm11309_vm6, 0, %v477_v16 }
 0x1a4   : > { %2725 = vst.msk [vmem:[#allocation4 + $0x58] sm:$0xff] %vm2713_vm12, %v2688_v40  ;;  %v7562_v31 = vor.u32 %v7561_v44, %v7558_v41  ;;  %427 = vst [vmem:[#allocation3 + $0x30] sm:$0x1] %v426_v62  ;;  %v432_v58 = vsel %vm11298_vm13, 0, %v431_v59  ;;  %v428_v27 = vld [vmem:[#allocation3 + $0x3c] sm:$0x1]  ;;  %v5131_v29 = vsel %vm10274_vm15, %v5126_v3, %v5130_v49  ;;  %v5704_v10 = vsel %vm10238_vm14, %v9422_v11, %v5703_v50 }
 0x1a5   : > { %v5115_v6 = vor.u32 %v5114_v26, %v5111_v23  ;;  %424 = vst [vmem:[#allocation3 + $0x24] sm:$0x1] %v423_v33  ;;  %482 = vst [vmem:[#allocation3 + $0x38] sm:$0x1] %v481_v55  ;;  %v429_v0 = vsel %vm11298_vm13, 0, %v428_v27  ;;  %v9581_v42 = vcombine.low %v7896_v46, %v7899_v28 }
 0x1a6   : > { %v3730_v60 = vpop.permute.xlu0 %3729  ;;  %v7563_v61 = vrot.slane %v7562_v31, 4  ;;  %479 = vst [vmem:[#allocation3 + $0x2c] sm:$0x1] %v478_v63  ;;  %433 = vst [vmem:[#allocation3 + $0x48] sm:$0x1] %v432_v58 }
 0x1a7   : > { %v3009_v2 = vpop.permute.xlu1 %3008  ;;  %3768 = vst.msk [vmem:[#allocation4 + $0x50] sm:$0xff] %vm3757_vm3, %v3730_v60  ;;  %v5116_v1 = vrot.slane %v5115_v6, 4  ;;  %v486_v17 = vld [vmem:[#allocation3 + $0x50] sm:$0x1]  ;;  %v483_v13 = vld [vmem:[#allocation3 + $0x44] sm:$0x1] }
 0x1a8   : > { %3046 = vst.msk [vmem:[#allocation4 + $0x58] sm:$0xff] %vm13400_vm0, %v3009_v2  ;;  %v7568_v43 = vsel %vm10274_vm15, %v7563_v61, %v11348_v48  ;;  %430 = vst [vmem:[#allocation3 + $0x3c] sm:$0x1] %v429_v0  ;;  %v487_v7 = vsel %vm11309_vm6, 0, %v486_v17  ;;  %v484_v9 = vsel %vm11309_vm6, 0, %v483_v13  ;;  %v5707_v48 = vsel %vm10238_vm14, %v5705_v56, %v5706_v25 }
 0x1a9   : > { %v9549_v5 = vcombine.low %v7568_v43, %v7578_v12  ;;  %v5121_v19 = vsel %vm10274_vm15, %v5116_v1, %v11354_v8  ;;  %488 = vst [vmem:[#allocation3 + $0x50] sm:$0x1] %v487_v7  ;;  %485 = vst [vmem:[#allocation3 + $0x44] sm:$0x1] %v484_v9  ;;  %v9438_v8 = vcombine.low %v5704_v10, %v5707_v48  ;;  %v437_v3 = vld [vmem:[#allocation3 + $0x60] sm:$0x1] }
 0x1aa   : > { %v4051_v15 = vpop.permute.xlu0 %4050  ;;  %v9406_v20 = vcombine.low %v5121_v19, %v5131_v29  ;;  %v438_v37 = vsel %vm11298_vm13, 0, %v437_v3  ;;  %v434_v39 = vld [vmem:[#allocation3 + $0x54] sm:$0x1]  ;;  %v492_v41 = vld [vmem:[#allocation3 + $0x68] sm:$0x1] }
 0x1ab   : > { %v3187_v52 = vpop.permute.xlu1 %3186  ;;  %4089 = vst.msk [vmem:[#allocation4 + $0x50] sm:$0xff] %vm4078_vm2, %v4051_v15  ;;  %7657 = vrot.lane.b32.xlu1 %v9549_v5, %s10099_s22  ;;  %439 = vst [vmem:[#allocation3 + $0x60] sm:$0x1] %v438_v37  ;;  %v435_v40 = vsel %vm11298_vm13, 0, %v434_v39  ;;  %v489_v44 = vld [vmem:[#allocation3 + $0x5c] sm:$0x1] }
 0x1ac   : > { %3224 = vst.msk [vmem:[#allocation4 + $0x58] sm:$0xff] %vm3212_vm5, %v3187_v52  ;;  %5540 = vrot.lane.b32.xlu0 %v9406_v20, %s10091_s8  ;;  %436 = vst [vmem:[#allocation3 + $0x54] sm:$0x1] %v435_v40  ;;  %v493_v49 = vsel %vm11309_vm6, 0, %v492_v41  ;;  %v490_v50 = vsel %vm11309_vm6, 0, %v489_v44 }
 0x1ad   : > { %494 = vst [vmem:[#allocation3 + $0x68] sm:$0x1] %v493_v49  ;;  %491 = vst [vmem:[#allocation3 + $0x5c] sm:$0x1] %v490_v50  ;;  %v443_v11 = vld [vmem:[#allocation3 + $0x78] sm:$0x1] }
 0x1ae   : > { %v444_v35 = vsel %vm11298_vm13, 0, %v443_v11  ;;  %v11437_v57 = vld [vmem:[%s13338_s2] ss:$0 sm:$0xff]  ;;  %v4803_v3 = vld [vmem:[#allocation3 + $0xc] sm:$0xf] }
 0x1af   : > { %v3732_v21 = vpop.permute.xlu1 %3731  ;;  %7978 = vrot.lane.b32.xlu1 %v9581_v42, %s10100_s23  ;;  %445 = vst [vmem:[#allocation3 + $0x78] sm:$0x1] %v444_v35  ;;  %v4814_v49 = vld [vmem:[#allocation3 + $0x20] sm:$0x1]  ;;  %v4807_v35 = vld [vmem:[#allocation3 + $0x14] sm:$0x1] }
 0x1b0   : > { %3769 = vst.msk [vmem:[#allocation4 + $0x58] sm:$0xff] %vm3757_vm3, %v3732_v21  ;;  %5861 = vrot.lane.b32.xlu0 %v9438_v8, %s10096_s13 }
 0x1b2   : > { %v4053_v34 = vpop.permute.xlu0 %4052  ;;  %v4105_v51 = vld [vmem:[#allocation4 + $0x50] sm:$0xff] }
 0x1b3   : > { %v1644_v24 = vpop.permute.xlu1 %1643  ;;  %4090 = vst.msk [vmem:[#allocation4 + $0x58] sm:$0xff] %vm4078_vm2, %v4053_v34  ;;  %9756 = vmatprep.mubr.msk.bf16.mxu0 %vm4138_vm1, %v4105_v51  ;;  %v4810_v34 = vld [vmem:[#allocation3 + $0x18] sm:$0xf] }
 0x1b4   : > { %1680 = vst.msk [vmem:[#allocation4 + $0x60] sm:$0xff] %vm1667_vm7, %v1644_v24 }
 0x1b8   : > { %v1646_v30 = vpop.permute.xlu1 %1645  ;;  %v1968_v45 = vpop.permute.xlu0 %1967 }
 0x1b9   : > { %1681 = vst.msk [vmem:[#allocation4 + $0x68] sm:$0xff] %vm1667_vm7, %v1646_v30 }
 0x1ba   : > { %2004 = vst.msk [vmem:[#allocation4 + $0x60] sm:$0xff] %vm1991_vm9, %v1968_v45  ;;  %v4106_v14 = vld [vmem:[#allocation4 + $0x58] sm:$0xff] }
 0x1bb   : > { %9757 = vmatmul.mubr.msk.bf16.gmra.mrb[20].mxu0 %vm4138_vm1, %v4106_v14 }
 0x1bc   : > { %v1970_v32 = vpop.permute.xlu1 %1969  ;;  %v2145_v36 = vpop.permute.xlu0 %2144 }
 0x1bd   : > { %2005 = vst.msk [vmem:[#allocation4 + $0x68] sm:$0xff] %vm1991_vm9, %v1970_v32 }
 0x1be   : > { %2181 = vst.msk [vmem:[#allocation4 + $0x60] sm:$0xff] %vm13398_vm11, %v2145_v36  ;;  %vm13402_vm11 = vmmov %vm13400_vm0 }
 0x1c3   : > { %v2690_v53 = vpop.permute.xlu0 %2689  ;;  %v2147_v23 = vpop.permute.xlu1 %2146 }
 0x1c4   : > { %2726 = vst.msk [vmem:[#allocation4 + $0x60] sm:$0xff] %vm2713_vm12, %v2690_v53 }
 0x1c5   : > { %2182 = vst.msk [vmem:[#allocation4 + $0x68] sm:$0xff] %vm13401_vm10, %v2147_v23  ;;  %vm13403_vm10 = vsmask.f32 7938 }
 0x1c7   : > { %v3011_v26 = vpop.permute.xlu0 %3010 }
 0x1c8   : > { %3047 = vst.msk [vmem:[#allocation4 + $0x60] sm:$0xff] %vm13400_vm0, %v3011_v26  ;;  %vm11452_vm0 = vmand %vm13352_vm4, %vm13403_vm10  ;;  %vm13408_vm10 = vcmask 195744  }
 0x1cb   : > { %v3189_v54 = vpop.permute.xlu0 %3188 }
 0x1cc   : > { %3225 = vst.msk [vmem:[#allocation4 + $0x60] sm:$0xff] %vm3212_vm5, %v3189_v54 }
 0x1d0   : > { %v9738_v16 = vpop.f32.mrb[0].mxu0 }
 0x1d1   : > { %v4234_v62 = vadd.f32 %v9738_v16, %v11437_v57  ;;  %v4225_v33 = vpop.f32.mrb[1].mxu0 }
 0x1d2   : > { %v2692_v31 = vpop.permute.xlu1 %2691  ;;  %v4226_v59 = vadd.f32 %v11437_v57, %v4225_v33  ;;  %v9739_v2 = vpop.f32.mrb[2].mxu0 }
 0x1d3   : > { %2727 = vst.msk [vmem:[#allocation4 + $0x68] sm:$0xff] %vm2713_vm12, %v2692_v31  ;;  %v4354_v60 = vmax.f32 %v4234_v62, 0.0  ;;  %v4237_v61 = vadd.f32 %v9739_v2, %v11437_v57  ;;  %v4228_v12 = vpop.f32.mrb[3].mxu0 }
 0x1d4   : > { %v3734_v56 = vpop.permute.xlu0 %3733  ;;  %v4352_v63 = vmax.f32 %v4226_v59, 0.0  ;;  %v4229_v58 = vadd.f32 %v11437_v57, %v4228_v12 }
 0x1d5   : > { %3770 = vst.msk [vmem:[#allocation4 + $0x60] sm:$0xff] %vm3757_vm3, %v3734_v56  ;;  %v9643_v27 = vpack.c.bf16 %v4354_v60, %v4354_v60  ;;  %v4355_v1 = vmax.f32 %v4237_v61, 0.0 }
 0x1d6   : > { %v3013_v25 = vpop.permute.xlu1 %3012  ;;  %v9641_v0 = vpack.c.bf16 %v4352_v63, %v4352_v63  ;;  %v4353_v17 = vmax.f32 %v4229_v58, 0.0 }
 0x1d7   : > { %3048 = vst.msk [vmem:[#allocation4 + $0x68] sm:$0xff] %vm13402_vm11, %v3013_v25  ;;  %v4498_v13 = vshrl.u32 %v9643_v27, 16  ;;  %v9644_v43 = vpack.c.bf16 %v4355_v1, %v4355_v1  ;;  %v4501_v28 = vshll.u32 %v9643_v27, 16  ;;  %vm13406_vm11 = vcmask 130144  }
 0x1d8   : > { %v4055_v6 = vpop.permute.xlu0 %4054  ;;  %v4481_v7 = vshrl.u32 %v9641_v0, 16  ;;  %v4484_v9 = vshll.u32 %v9641_v0, 16  ;;  %v9642_v5 = vpack.c.bf16 %v4353_v17, %v4353_v17  ;;  %v9742_v19 = vpop.f32.mrb[4].mxu0 }
 0x1d9   : > { %4091 = vst.msk [vmem:[#allocation4 + $0x60] sm:$0xff] %vm4078_vm2, %v4055_v6  ;;  %v4500_v48 = vrot.slane %v4498_v13, 7  ;;  %v4506_v52 = vshrl.u32 %v9644_v43, 16  ;;  %v4509_v15 = vshll.u32 %v9644_v43, 16  ;;  %v4250_v20 = vadd.f32 %v9742_v19, %v11437_v57  ;;  %v4241_v42 = vpop.f32.mrb[5].mxu0 }
 0x1da   : > { %v3191_v55 = vpop.permute.xlu1 %3190  ;;  %v4483_v24 = vrot.slane %v4481_v7, 7  ;;  %v4489_v51 = vshrl.u32 %v9642_v5, 16  ;;  %v4492_v30 = vshll.u32 %v9642_v5, 16  ;;  %v4242_v45 = vadd.f32 %v11437_v57, %v4241_v42  ;;  %v9743_v14 = vpop.f32.mrb[6].mxu0  ;;  %v4817_v43 = vld [vmem:[#allocation3 + $0x24] sm:$0xf] }
 0x1db   : > { %3226 = vst.msk [vmem:[#allocation4 + $0x68] sm:$0xff] %vm3212_vm5, %v3191_v55  ;;  %v4503_v32 = vor.u32 %v4501_v28, %v4500_v48  ;;  %v4504_v36 = vrot.slane %v4500_v48, 4  ;;  %v4508_v37 = vrot.slane %v4506_v52, 7  ;;  %v4358_v39 = vmax.f32 %v4250_v20, 0.0  ;;  %v4244_v40 = vpop.f32.mrb[7].mxu0 }
 0x1dc   : > { %v4486_v41 = vor.u32 %v4484_v9, %v4483_v24  ;;  %v4487_v44 = vrot.slane %v4483_v24, 4  ;;  %v4491_v50 = vrot.slane %v4489_v51, 7  ;;  %v4356_v53 = vmax.f32 %v4242_v45, 0.0  ;;  %v440_v9 = vld [vmem:[#allocation3 + $0x6c] sm:$0x1] }
 0x1dd   : > { %v4811_v26 = vsel %vm11452_vm0, %v4503_v32, %v4810_v34  ;;  %v4511_v54 = vor.u32 %v4509_v15, %v4508_v37  ;;  %v4513_v11 = vrot.slane %v4508_v37, 4  ;;  %v9647_v31 = vpack.c.bf16 %v4358_v39, %v4358_v39  ;;  %v498_v52 = vld [vmem:[#allocation3 + $0x80] sm:$0x1]  ;;  %v4828_v37 = vld [vmem:[#allocation3 + $0x38] sm:$0x1] }
 0x1de   : > { %v3736_v29 = vpop.permute.xlu1 %3735  ;;  %v4057_v46 = vpop.permute.xlu0 %4056  ;;  %4812 = vst [vmem:[#allocation3 + $0x18] sm:$0xf] %v4811_v26  ;;  %v4804_v56 = vsel %vm11452_vm0, %v4486_v41, %v4803_v3  ;;  %v4494_v25 = vor.u32 %v4492_v30, %v4491_v50  ;;  %v4496_v16 = vrot.slane %v4491_v50, 4  ;;  %v9645_v6 = vpack.c.bf16 %v4356_v53, %v4356_v53  ;;  %v4821_v53 = vld [vmem:[#allocation3 + $0x2c] sm:$0x1] }
 0x1df   : > { %3771 = vst.msk [vmem:[#allocation4 + $0x68] sm:$0xff] %vm3757_vm3, %v3736_v29  ;;  %4805 = vst [vmem:[#allocation3 + $0xc] sm:$0xf] %v4804_v56  ;;  %v4512_v33 = vsel %vm10199_vm8, %v4504_v36, %v4511_v54  ;;  %v4815_v55 = vsel %vm11298_vm13, %v4513_v11, %v4814_v49  ;;  %v4532_v59 = vshrl.u32 %v9647_v31, 16  ;;  %v4535_v27 = vshll.u32 %v9647_v31, 16 }
 0x1e0   : > { %4092 = vst.msk [vmem:[#allocation4 + $0x68] sm:$0xff] %vm4078_vm2, %v4057_v46  ;;  %v4107_v10 = vld [vmem:[#allocation4 + $0x60] sm:$0xff]  ;;  %4816 = vst [vmem:[#allocation3 + $0x20] sm:$0x1] %v4815_v55  ;;  %v4495_v60 = vsel %vm10199_vm8, %v4487_v44, %v4494_v25  ;;  %v4808_v61 = vsel %vm11298_vm13, %v4496_v16, %v4807_v35  ;;  %v4515_v12 = vshrl.u32 %v9645_v6, 16  ;;  %v4253_v1 = vadd.f32 %v9743_v14, %v11437_v57 }
 0x1e1   : > { %9760 = vmatprep.mubr.msk.bf16.mxu0 %vm4138_vm1, %v4107_v10  ;;  %4813 = vst.msk [vmem:[#allocation3 + $0x1c] sm:$0xf] %vm13352_vm4, %v4512_v33  ;;  %4806 = vst.msk [vmem:[#allocation3 + $0x10] sm:$0xf] %vm13352_vm4, %v4495_v60  ;;  %v11475_v58 = vrot.slane %v4532_v59, 7  ;;  %v4245_v29 = vadd.f32 %v11437_v57, %v4244_v40  ;;  %v4518_v17 = vshll.u32 %v9645_v6, 16 }
 0x1e2   : > { %v1648_v8 = vpop.permute.xlu1 %1647  ;;  %4809 = vst [vmem:[#allocation3 + $0x14] sm:$0x1] %v4808_v61  ;;  %v4824_v46 = vld [vmem:[#allocation3 + $0x30] sm:$0xf]  ;;  %v11480_v0 = vrot.slane %v4515_v12, 7  ;;  %v4359_v28 = vmax.f32 %v4253_v1, 0.0 }
 0x1e3   : > { %1682 = vst.msk [vmem:[#allocation4 + $0x70] sm:$0xff] %vm1667_vm7, %v1648_v8  ;;  %v4537_v13 = vor.u32 %v4535_v27, %v11475_v58  ;;  %v4357_v7 = vmax.f32 %v4245_v29, 0.0  ;;  %v4538_v19 = vrot.slane %v11475_v58, 4  ;;  %v441_v48 = vsel %vm11298_vm13, 0, %v440_v9 }
 0x1e4   : > { %v4520_v10 = vor.u32 %v4518_v17, %v11480_v0  ;;  %v9648_v42 = vpack.c.bf16 %v4359_v28, %v4359_v28  ;;  %442 = vst [vmem:[#allocation3 + $0x6c] sm:$0x1] %v441_v48  ;;  %v4521_v34 = vrot.slane %v11480_v0, 4  ;;  %v499_v30 = vsel %vm11309_vm6, 0, %v498_v52 }
 0x1e5   : > { %v1972_v23 = vpop.permute.xlu0 %1971  ;;  %v4825_v15 = vsel %vm11452_vm0, %v4537_v13, %v4824_v46  ;;  %v6651_v20 = vld [vmem:[#allocation3 + $0x18] sm:$0xe]  ;;  %v9646_v8 = vpack.c.bf16 %v4357_v7, %v4357_v7  ;;  %500 = vst [vmem:[#allocation3 + $0x80] sm:$0x1] %v499_v30  ;;  %v10035_v46 = vld [vmem:[#allocation3] sm:$0xff]  }
 0x1e6   : > { %2006 = vst.msk [vmem:[#allocation4 + $0x70] sm:$0xff] %vm1991_vm9, %v1972_v23  ;;  %4826 = vst [vmem:[#allocation3 + $0x30] sm:$0xf] %v4825_v15  ;;  %v4818_v24 = vsel %vm11452_vm0, %v4520_v10, %v4817_v43  ;;  %v7692_v51 = vld [vmem:[#allocation3 + $0x18] sm:$0xe]  ;;  %v4540_v14 = vshrl.u32 %v9648_v42, 16 }
 0x1e7   : > { %v4108_v62 = vld [vmem:[#allocation4 + $0x68] sm:$0xff]  ;;  %4819 = vst [vmem:[#allocation3 + $0x24] sm:$0xf] %v4818_v24  ;;  %v9487_v36 = vrot.slane %v6651_v20, 9  ;;  %v4543_v3 = vshll.u32 %v9648_v42, 16  ;;  %v4523_v39 = vshrl.u32 %v9646_v8, 16 }
 0x1e8   : > { %v1650_v2 = vpop.permute.xlu1 %1649  ;;  %9761 = vmatmul.mubr.msk.bf16.gmra.mrb[24].mxu0 %vm4138_vm1, %v4108_v62  ;;  %v10027_v45 = vld [vmem:[#allocation3 + $0x18] sm:$0xff]   ;;  %v10029_v40 = vld [vmem:[#allocation3 + $0xc] sm:$0xff]   ;;  %v6653_v44 = vld [vmem:[#allocation3 + $0x20] sm:$0x1]  ;;  %v4542_v49 = vrot.slane %v4540_v14, 7  ;;  %v4526_v50 = vshll.u32 %v9646_v8, 16 }
 0x1e9   : > { %1683 = vst.msk [vmem:[#allocation4 + $0x78] sm:$0xff] %vm1667_vm7, %v1650_v2  ;;  %v2149_v63 = vpop.permute.xlu0 %2148  ;;  %vm5043_vm7 = vcmask 64512   ;;  %v10028_v32 = vld [vmem:[#allocation3 + $0x18] sm:$0xff]   ;;  %7082 = vrot.lane.b32.xlu0 %v10027_v45, %s10098_s21  ;;  %v6756_v54 = vrot.slane %v6653_v44, 5  ;;  %v4525_v11 = vrot.slane %v4523_v39, 7  ;;  %v9550_v31 = vrot.slane %v7692_v51, 9 }
 0x1ea   : > { %2183 = vst.msk [vmem:[#allocation4 + $0x70] sm:$0xff] %vm13406_vm11, %v2149_v63  ;;  %v6652_v41 = vld [vmem:[#allocation3 + $0x1c] sm:$0xf]  ;;  %6040 = vrot.lane.b32.xlu1 %v10028_v32, %s10092_s9  ;;  %v4545_v56 = vor.u32 %v4543_v3, %v4542_v49  ;;  %v4547_v25 = vrot.slane %v4542_v49, 4  ;;  %v7694_v16 = vld [vmem:[#allocation3 + $0x20] sm:$0x1] }
 0x1eb   : > { %v6753_v26 = vrot.slane %v6652_v41, 5  ;;  %v7693_v35 = vld [vmem:[#allocation3 + $0x1c] sm:$0xf]  ;;  %v5608_v62 = vld [vmem:[#allocation3 + $0xc] sm:$0xe]  ;;  %v4528_v59 = vor.u32 %v4526_v50, %v4525_v11  ;;  %v4530_v2 = vrot.slane %v4525_v11, 4 }
 0x1ec   : > { %v1974_v5 = vpop.permute.xlu1 %1973  ;;  %v7790_v6 = vrot.slane %v7693_v35, 5  ;;  %v5609_v60 = vld [vmem:[#allocation3 + $0x10] sm:$0xf]  ;;  %v5610_v61 = vld [vmem:[#allocation3 + $0x14] sm:$0x1]  ;;  %v4546_v63 = vsel %vm10199_vm8, %v4538_v19, %v4545_v56  ;;  %v4829_v58 = vsel %vm11298_vm13, %v4547_v25, %v4828_v37  ;;  %v7793_v28 = vrot.slane %v7694_v16, 5 }
 0x1ed   : > { %2007 = vst.msk [vmem:[#allocation4 + $0x78] sm:$0xff] %vm1991_vm9, %v1974_v5  ;;  %v6755_v55 = vrot.slane %v6753_v26, 4  ;;  %vm13407_vm9 = vmmov %vm13406_vm11  ;;  %6038 = vrot.lane.b32.xlu0 %v10029_v40, %s10092_s9  ;;  %v6754_v12 = vsel %vm10238_vm14, %v9487_v36, %v6753_v26  ;;  %v5611_v1 = vld [vmem:[#allocation3 + $0x18] sm:$0xe]  ;;  %v5612_v29 = vld [vmem:[#allocation3 + $0x1c] sm:$0xf]  ;;  %v4529_v13 = vsel %vm10199_vm8, %v4521_v34, %v4528_v59  ;;  %v4822_v43 = vsel %vm11298_vm13, %v4530_v2, %v4821_v53 }
 0x1ee   : > { %v7792_v27 = vrot.slane %v7790_v6, 4  ;;  %4827 = vst.msk [vmem:[#allocation3 + $0x34] sm:$0xf] %vm13352_vm4, %v4546_v63  ;;  %4830 = vst [vmem:[#allocation3 + $0x38] sm:$0x1] %v4829_v58  ;;  %v10039_v5 = vld [vmem:[#allocation3 + $0x18] sm:$0xff]   ;;  %v7791_v10 = vsel %vm10238_vm14, %v9550_v31, %v7790_v6 }
 0x1ef   : > { %v6757_v17 = vsel %vm10238_vm14, %v6755_v55, %v6756_v54  ;;  %v5613_v7 = vld [vmem:[#allocation3 + $0x20] sm:$0x1]  ;;  %v6648_v9 = vld [vmem:[#allocation3 + $0xc] sm:$0xe]  ;;  %4820 = vst.msk [vmem:[#allocation3 + $0x28] sm:$0xf] %vm13352_vm4, %v4529_v13 }
 0x1f0   : > { %v9503_v19 = vcombine.low %v6754_v12, %v6757_v17  ;;  %4823 = vst [vmem:[#allocation3 + $0x2c] sm:$0x1] %v4822_v43  ;;  %v9423_v48 = vrot.slane %v5608_v62, 9  ;;  %v5710_v52 = vrot.slane %v5609_v60, 5  ;;  %v6649_v15 = vld [vmem:[#allocation3 + $0x10] sm:$0xf]  ;;  %v7794_v42 = vsel %vm10238_vm14, %v7792_v27, %v7793_v28 }
 0x1f1   : > { %5044 = vst.msk [vmem:[#allocation5] sm:$0xff] %vm5043_vm7, %v10035_v46  ;;  %v10042_v20 = vld [vmem:[#allocation3 + $0xc] sm:$0xff]   ;;  %v5713_v8 = vrot.slane %v5610_v61, 5  ;;  %v9424_v34 = vrot.slane %v5611_v1, 9  ;;  %v5717_v24 = vrot.slane %v5612_v29, 5  ;;  %5046 = vst.msk [vmem:[#allocation5 + $0x10] sm:$0xff] %vm5043_vm7, %v10039_v5  ;;  %v9566_v30 = vcombine.low %v7791_v10, %v7794_v42 }
 0x1f2   : > { %v2694_v23 = vpop.permute.xlu0 %2693  ;;  %v6650_v51 = vld [vmem:[#allocation3 + $0x14] sm:$0x1]  ;;  %6906 = vrot.lane.b32.xlu1 %v9503_v19, %s10101_s28  ;;  %v5712_v45 = vrot.slane %v5710_v52, 4  ;;  %v5720_v14 = vrot.slane %v5613_v7, 5  ;;  %5045 = vst.msk [vmem:[#allocation5 + $0x8] sm:$0xff] %vm5043_vm7, %v10042_v20  ;;  %v5711_v36 = vsel %vm10238_vm14, %v9423_v48, %v5710_v52  ;;  %v9486_v37 = vrot.slane %v6648_v9, 9 }
 0x1f3   : > { %2728 = vst.msk [vmem:[#allocation4 + $0x70] sm:$0xff] %vm2713_vm12, %v2694_v23  ;;  %v2151_v33 = vpop.permute.xlu1 %2150  ;;  %v5719_v3 = vrot.slane %v5717_v24, 4  ;;  %v6746_v39 = vrot.slane %v6649_v15, 5  ;;  %v7147_v40 = vld [vmem:[#allocation3 + $0x18] sm:$0xf]  ;;  %7948 = vrot.lane.b32.xlu0 %v9566_v30, %s10100_s23  ;;  %v5718_v44 = vsel %vm10238_vm14, %v9424_v34, %v5717_v24  ;;  %v6749_v35 = vrot.slane %v6650_v51, 5 }
 0x1f4   : > { %2184 = vst.msk [vmem:[#allocation4 + $0x78] sm:$0xff] %vm13407_vm9, %v2151_v33  ;;  %v5714_v41 = vsel %vm10238_vm14, %v5712_v45, %v5713_v8  ;;  %v7148_v49 = vld [vmem:[#allocation3 + $0x1c] sm:$0xf]  ;;  %v7149_v50 = vld [vmem:[#allocation3 + $0x20] sm:$0x1]  ;;  %v7196_v53 = vshrl.u32 %v7147_v40, 16 }
 0x1f5   : > { %v7199_v23 = vshll.u32 %v7147_v40, 16  ;;  %v9439_v26 = vcombine.low %v5711_v36, %v5714_v41  ;;  %v5721_v54 = vsel %vm10238_vm14, %v5719_v3, %v5720_v14  ;;  %v6748_v11 = vrot.slane %v6746_v39, 4  ;;  %v6106_v31 = vld [vmem:[#allocation3 + $0x18] sm:$0xf]  ;;  %v6107_v56 = vld [vmem:[#allocation3 + $0x1c] sm:$0xf] }
 0x1f6   : > { %v3015_v0 = vpop.permute.xlu0 %3014  ;;  %v9440_v25 = vcombine.low %v5718_v44, %v5721_v54  ;;  %v6747_v16 = vsel %vm10238_vm14, %v9486_v37, %v6746_v39  ;;  %v7198_v6 = vrot.slane %v7196_v53, 4  ;;  %v10031_v33 = vld [vmem:[#allocation3 + $0x30] sm:$0xff]   ;;  %v7205_v59 = vshll.u32 %v7148_v49, 16  ;;  %v6108_v60 = vld [vmem:[#allocation3 + $0x20] sm:$0x1]  ;;  %v10049_v44 = vld [vmem:[#allocation3 + $0x24] sm:$0xff]  }
 0x1f7   : > { %3049 = vst.msk [vmem:[#allocation4 + $0x70] sm:$0xff] %vm13408_vm10, %v3015_v0  ;;  %5863 = vrot.lane.b32.xlu1 %v9439_v26, %s10096_s13  ;;  %v6750_v62 = vsel %vm10238_vm14, %v6748_v11, %v6749_v35  ;;  %v7201_v55 = vrot.slane %v7199_v23, 5  ;;  %v7209_v2 = vshrl.u32 %v7148_v49, 16  ;;  %v7215_v12 = vshll.u32 %v7149_v50, 16  ;;  %v10030_v19 = vld [vmem:[#allocation3 + $0x30] sm:$0xff]  }
 0x1f8   : > { %5865 = vrot.lane.b32.xlu0 %v9440_v25, %s10096_s13  ;;  %v9502_v61 = vcombine.low %v6747_v16, %v6750_v62  ;;  %v6176_v63 = vshrl.u32 %v6106_v31, 16  ;;  %v6179_v58 = vshll.u32 %v6106_v31, 16  ;;  %v7207_v46 = vrot.slane %v7205_v59, 5  ;;  %v6103_v51 = vld [vmem:[#allocation3 + $0xc] sm:$0xf]  ;;  %5047 = vst.msk [vmem:[#allocation5 + $0x18] sm:$0xff] %vm5043_vm7, %v10049_v44 }
 0x1f9   : > { %v7202_v29 = vor.u32 %v7201_v55, %v7198_v6  ;;  %v7211_v0 = vrot.slane %v7209_v2, 4  ;;  %v6185_v17 = vshll.u32 %v6107_v56, 16  ;;  %v7217_v43 = vrot.slane %v7215_v12, 5  ;;  %v6104_v59 = vld [vmem:[#allocation3 + $0x10] sm:$0xf] }
 0x1fa   : > { %v3193_v32 = vpop.permute.xlu0 %3192  ;;  %v6178_v28 = vrot.slane %v6176_v63, 4  ;;  %v6181_v7 = vrot.slane %v6179_v58, 5  ;;  %v6189_v9 = vshrl.u32 %v6107_v56, 16  ;;  %v6195_v15 = vshll.u32 %v6108_v60, 16 }
 0x1fb   : > { %3227 = vst.msk [vmem:[#allocation4 + $0x70] sm:$0xff] %vm3212_vm5, %v3193_v32  ;;  %6044 = vrot.lane.b32.xlu1 %v10031_v33, %s10092_s9  ;;  %v7203_v10 = vrot.slane %v7202_v29, 4  ;;  %v7212_v48 = vor.u32 %v7211_v0, %v7207_v46  ;;  %v6187_v52 = vrot.slane %v6185_v17, 5  ;;  %v6152_v23 = vshrl.u32 %v6103_v51, 16 }
 0x1fc   : > { %6904 = vrot.lane.b32.xlu0 %v9502_v61, %s10101_s28  ;;  %v6182_v20 = vor.u32 %v6181_v7, %v6178_v28  ;;  %v6191_v42 = vrot.slane %v6189_v9, 4  ;;  %v6197_v32 = vrot.slane %v6195_v15, 5  ;;  %v6155_v2 = vshll.u32 %v6103_v51, 16 }
 0x1fd   : > { %v7208_v45 = vsel %vm10274_vm15, %v7203_v10, %v7207_v46  ;;  %v7213_v14 = vrot.slane %v7212_v48, 4  ;;  %v6154_v6 = vrot.slane %v6152_v23, 4  ;;  %v6161_v28 = vshll.u32 %v6104_v59, 16  ;;  %v10032_v10 = vld [vmem:[#allocation3 + $0x24] sm:$0xff]  }
 0x1fe   : > { %v6183_v37 = vrot.slane %v6182_v20, 4  ;;  %v6192_v39 = vor.u32 %v6191_v42, %v6187_v52  ;;  %v6157_v46 = vrot.slane %v6155_v2, 5  ;;  %v6165_v7 = vshrl.u32 %v6104_v59, 16  ;;  %v5063_v59 = vld [vmem:[#allocation3 + $0xc] sm:$0xf] }
 0x1ff   : > { %v7218_v49 = vsel %vm10274_vm15, %v7213_v14, %v7217_v43  ;;  %v6163_v14 = vrot.slane %v6161_v28, 5  ;;  %v7695_v28 = vld [vmem:[#allocation3 + $0x24] sm:$0xe]  ;;  %vm6631_vm11 = vcmask 326912   ;;  %vm6952_vm9 = vcmask 392512  }
 0x200   : > { %v9746_v27 = vpop.f32.mrb[8].mxu0  ;;  %v2696_v1 = vpop.permute.xlu1 %2695  ;;  %7086 = vrot.lane.b32.xlu0 %v10030_v19, %s10098_s21  ;;  %v9534_v26 = vcombine.low %v7208_v45, %v7218_v49  ;;  %v6188_v54 = vsel %vm10274_vm15, %v6183_v37, %v6187_v52  ;;  %v6193_v11 = vrot.slane %v6192_v39, 4  ;;  %v4842_v19 = vld [vmem:[#allocation3 + $0x50] sm:$0x1]  ;;  %v6158_v45 = vor.u32 %v6157_v46, %v6154_v6  ;;  %v5068_v49 = vld [vmem:[#allocation3 + $0x20] sm:$0x1] }
 0x201   : > { %v4257_v13 = vpop.f32.mrb[9].mxu0  ;;  %2729 = vst.msk [vmem:[#allocation4 + $0x78] sm:$0xff] %vm2713_vm12, %v2696_v1  ;;  %v4266_v8 = vadd.f32 %v9746_v27, %v11437_v57  ;;  %vm13409_vm12 = vmmov %vm13408_vm10  ;;  %v4838_v27 = vld [vmem:[#allocation3 + $0x48] sm:$0xf]  ;;  %v6167_v44 = vrot.slane %v6165_v7, 4  ;;  %vm7130_vm10 = vcmask 458112  }
 0x202   : > { %v9747_v5 = vpop.f32.mrb[10].mxu0  ;;  %v4258_v34 = vadd.f32 %v11437_v57, %v4257_v13  ;;  %v4831_v13 = vld [vmem:[#allocation3 + $0x3c] sm:$0xf] }
 0x203   : > { %v4260_v24 = vpop.f32.mrb[11].mxu0  ;;  %v4269_v36 = vadd.f32 %v9747_v5, %v11437_v57  ;;  %v4362_v40 = vmax.f32 %v4266_v8, 0.0 }
 0x204   : > { %v3017_v30 = vpop.permute.xlu1 %3016  ;;  %v4360_v41 = vmax.f32 %v4258_v34, 0.0  ;;  %v4261_v53 = vadd.f32 %v11437_v57, %v4260_v24  ;;  %v6198_v57 = vsel %vm10274_vm15, %v6193_v11, %v6197_v32  ;;  %7627 = vrot.lane.b32.xlu0 %v9534_v26, %s10099_s22  ;;  %v10033_v34 = vld [vmem:[#allocation3 + $0x24] sm:$0xff]   ;;  %v6105_v24 = vld [vmem:[#allocation3 + $0x14] sm:$0x1]  ;;  %v5066_v32 = vld [vmem:[#allocation3 + $0x18] sm:$0xf] }
 0x205   : > { %3050 = vst.msk [vmem:[#allocation4 + $0x78] sm:$0xff] %vm13409_vm12, %v3017_v30  ;;  %v3738_v3 = vpop.permute.xlu0 %3737  ;;  %v4363_v50 = vmax.f32 %v4269_v36, 0.0  ;;  %v9651_v35 = vpack.c.bf16 %v4362_v40, %v4362_v40  ;;  %v9471_v60 = vcombine.low %v6188_v54, %v6198_v57  ;;  %v5067_v36 = vld [vmem:[#allocation3 + $0x1c] sm:$0xf]  ;;  %v6159_v26 = vrot.slane %v6158_v45, 4 }
 0x206   : > { %3772 = vst.msk [vmem:[#allocation4 + $0x70] sm:$0xff] %vm3757_vm3, %v3738_v3  ;;  %v9649_v56 = vpack.c.bf16 %v4360_v41, %v4360_v41  ;;  %v4361_v16 = vmax.f32 %v4261_v53, 0.0  ;;  %v4835_v41 = vld [vmem:[#allocation3 + $0x44] sm:$0x1]  ;;  %v6171_v54 = vshll.u32 %v6105_v24, 16  ;;  %vm7675_vm12 = vcmask 523712  }
 0x207   : > { %v9652_v25 = vpack.c.bf16 %v4363_v50, %v4363_v50  ;;  %v4566_v33 = vshrl.u32 %v9651_v35, 16  ;;  %v4569_v55 = vshll.u32 %v9651_v35, 16  ;;  %6585 = vrot.lane.b32.xlu1 %v9471_v60, %s10095_s12  ;;  %v7698_v11 = vld [vmem:[#allocation3 + $0x30] sm:$0xe]  ;;  %v6168_v35 = vor.u32 %v6167_v44, %v6163_v14 }
 0x208   : > { %v3195_v31 = vpop.permute.xlu1 %3194  ;;  %v4549_v61 = vshrl.u32 %v9649_v56, 16  ;;  %v4552_v12 = vshll.u32 %v9649_v56, 16  ;;  %v9650_v29 = vpack.c.bf16 %v4361_v16, %v4361_v16  ;;  %6042 = vrot.lane.b32.xlu0 %v10032_v10, %s10092_s9  ;;  %v5160_v56 = vshll.u32 %v5066_v32, 16  ;;  %v7699_v16 = vld [vmem:[#allocation3 + $0x34] sm:$0xf] }
 0x209   : > { %3228 = vst.msk [vmem:[#allocation4 + $0x78] sm:$0xff] %vm3212_vm5, %v3195_v31  ;;  %v4059_v62 = vpop.permute.xlu0 %4058  ;;  %v4574_v63 = vshrl.u32 %v9652_v25, 16  ;;  %v4568_v58 = vrot.slane %v4566_v33, 7  ;;  %v4577_v1 = vshll.u32 %v9652_v25, 16  ;;  %v5157_v31 = vshrl.u32 %v5066_v32, 16 }
 0x20a   : > { %4093 = vst.msk [vmem:[#allocation4 + $0x70] sm:$0xff] %vm4078_vm2, %v4059_v62  ;;  %v4551_v17 = vrot.slane %v4549_v61, 7  ;;  %v4557_v48 = vshrl.u32 %v9650_v29, 16  ;;  %v4560_v52 = vshll.u32 %v9650_v29, 16  ;;  %v5166_v25 = vshll.u32 %v5067_v36, 16 }
 0x20b   : > { %v4576_v43 = vrot.slane %v4574_v63, 7  ;;  %v4571_v9 = vor.u32 %v4569_v55, %v4568_v58  ;;  %v4572_v5 = vrot.slane %v4568_v58, 4  ;;  %7084 = vrot.lane.b32.xlu1 %v10033_v34, %s10098_s21  ;;  %v6164_v57 = vsel %vm10274_vm15, %v6159_v26, %v6163_v14  ;;  %v7700_v55 = vld [vmem:[#allocation3 + $0x38] sm:$0x1]  ;;  %v5064_v29 = vld [vmem:[#allocation3 + $0x10] sm:$0xf] }
 0x20c   : > { %v3740_v0 = vpop.permute.xlu1 %3739  ;;  %v4554_v15 = vor.u32 %v4552_v12, %v4551_v17  ;;  %v4555_v20 = vrot.slane %v4551_v17, 4  ;;  %v4559_v30 = vrot.slane %v4557_v48, 7  ;;  %v6173_v33 = vrot.slane %v6171_v54, 5  ;;  %v7696_v10 = vld [vmem:[#allocation3 + $0x28] sm:$0xf] }
 0x20d   : > { %3773 = vst.msk [vmem:[#allocation4 + $0x78] sm:$0xff] %vm3757_vm3, %v3740_v0  ;;  %v4579_v42 = vor.u32 %v4577_v1, %v4576_v43  ;;  %v4581_v8 = vrot.slane %v4576_v43, 4  ;;  %v4839_v51 = vsel %vm11452_vm0, %v4571_v9, %v4838_v27  ;;  %v6169_v2 = vrot.slane %v6168_v35, 4  ;;  %v7697_v48 = vld [vmem:[#allocation3 + $0x2c] sm:$0x1] }
 0x20e   : > { %4840 = vst [vmem:[#allocation3 + $0x48] sm:$0xf] %v4839_v51  ;;  %v4832_v37 = vsel %vm11452_vm0, %v4554_v15, %v4831_v13  ;;  %v4562_v53 = vor.u32 %v4560_v52, %v4559_v30  ;;  %v4564_v23 = vrot.slane %v4559_v30, 4  ;;  %v5159_v60 = vrot.slane %v5157_v31, 4  ;;  %v5065_v13 = vld [vmem:[#allocation3 + $0x14] sm:$0x1] }
 0x20f   : > { %v4580_v39 = vsel %vm10199_vm8, %v4572_v5, %v4579_v42  ;;  %v4843_v40 = vsel %vm11298_vm13, %v4581_v8, %v4842_v19  ;;  %4833 = vst [vmem:[#allocation3 + $0x3c] sm:$0xf] %v4832_v37  ;;  %v5162_v61 = vrot.slane %v5160_v56, 5  ;;  %v5168_v12 = vrot.slane %v5166_v25, 5  ;;  %v6657_v45 = vld [vmem:[#allocation3 + $0x30] sm:$0xe] }
 0x210   : > { %v4061_v3 = vpop.permute.xlu1 %4060  ;;  %4841 = vst.msk [vmem:[#allocation3 + $0x4c] sm:$0xf] %vm13352_vm4, %v4580_v39  ;;  %4844 = vst [vmem:[#allocation3 + $0x50] sm:$0x1] %v4843_v40  ;;  %v4563_v6 = vsel %vm10199_vm8, %v4555_v20, %v4562_v53  ;;  %v4836_v62 = vsel %vm11298_vm13, %v4564_v23, %v4835_v41  ;;  %v5170_v63 = vshrl.u32 %v5067_v36, 16  ;;  %v5176_v58 = vshll.u32 %v5068_v49, 16 }
 0x211   : > { %4094 = vst.msk [vmem:[#allocation4 + $0x78] sm:$0xff] %vm4078_vm2, %v4061_v3  ;;  %v4109_v50 = vld [vmem:[#allocation4 + $0x70] sm:$0xff]  ;;  %4837 = vst [vmem:[#allocation3 + $0x44] sm:$0x1] %v4836_v62  ;;  %v9552_v27 = vrot.slane %v7698_v11, 9  ;;  %v7804_v1 = vrot.slane %v7699_v16, 5  ;;  %v6174_v46 = vsel %vm10274_vm15, %v6169_v2, %v6173_v33  ;;  %v5163_v0 = vor.u32 %v5162_v61, %v5159_v60 }
 0x212   : > { %9764 = vmatprep.mubr.msk.bf16.mxu0 %vm4138_vm1, %v4109_v50  ;;  %4834 = vst.msk [vmem:[#allocation3 + $0x40] sm:$0xf] %vm13352_vm4, %v4563_v6  ;;  %v7807_v17 = vrot.slane %v7700_v55, 5  ;;  %v5133_v43 = vshrl.u32 %v5063_v59, 16  ;;  %v9470_v7 = vcombine.low %v6164_v57, %v6174_v46  ;;  %v5172_v9 = vrot.slane %v5170_v63, 4 }
 0x213   : > { %v5178_v5 = vrot.slane %v5176_v58, 5  ;;  %v7805_v19 = vsel %vm10238_vm14, %v9552_v27, %v7804_v1  ;;  %v5164_v15 = vrot.slane %v5163_v0, 4  ;;  %v7806_v20 = vrot.slane %v7804_v1, 4  ;;  %v6658_v37 = vld [vmem:[#allocation3 + $0x34] sm:$0xf] }
 0x214   : > { %v5135_v42 = vrot.slane %v5133_v43, 4  ;;  %v5136_v8 = vshll.u32 %v5063_v59, 16  ;;  %6583 = vrot.lane.b32.xlu0 %v9470_v7, %s10095_s12  ;;  %v5173_v34 = vor.u32 %v5172_v9, %v5168_v12  ;;  %v5142_v24 = vshll.u32 %v5064_v29, 16  ;;  %v6659_v26 = vld [vmem:[#allocation3 + $0x38] sm:$0x1] }
 0x215   : > { %v5146_v51 = vshrl.u32 %v5064_v29, 16  ;;  %v5152_v30 = vshll.u32 %v5065_v13, 16  ;;  %v5169_v14 = vsel %vm10274_vm15, %v5164_v15, %v5168_v12  ;;  %v7808_v32 = vsel %vm10238_vm14, %v7806_v20, %v7807_v17  ;;  %v6654_v56 = vld [vmem:[#allocation3 + $0x24] sm:$0xe]  ;;  %v6655_v25 = vld [vmem:[#allocation3 + $0x28] sm:$0xf] }
 0x216   : > { %v5138_v36 = vrot.slane %v5136_v8, 5  ;;  %v9551_v3 = vrot.slane %v7695_v28, 9  ;;  %v5174_v39 = vrot.slane %v5173_v34, 4  ;;  %v9568_v40 = vcombine.low %v7805_v19, %v7808_v32  ;;  %v6656_v33 = vld [vmem:[#allocation3 + $0x2c] sm:$0x1] }
 0x217   : > { %v5144_v41 = vrot.slane %v5142_v24, 5  ;;  %v5148_v44 = vrot.slane %v5146_v51, 4  ;;  %v5154_v50 = vrot.slane %v5152_v30, 5  ;;  %v7797_v53 = vrot.slane %v7696_v10, 5  ;;  %v5614_v55 = vld [vmem:[#allocation3 + $0x24] sm:$0xe] }
 0x218   : > { %v4110_v52 = vld [vmem:[#allocation4 + $0x78] sm:$0xff]  ;;  %v5139_v49 = vor.u32 %v5138_v36, %v5135_v42  ;;  %v7800_v23 = vrot.slane %v7697_v48, 5  ;;  %v5179_v54 = vsel %vm10274_vm15, %v5174_v39, %v5178_v5  ;;  %7952 = vrot.lane.b32.xlu0 %v9568_v40, %s10100_s23  ;;  %v9489_v35 = vrot.slane %v6657_v45, 9  ;;  %v5615_v12 = vld [vmem:[#allocation3 + $0x28] sm:$0xf] }
 0x219   : > { %9765 = vmatmul.mubr.msk.bf16.gmra.mrb[28].mxu0 %vm4138_vm1, %v4110_v52  ;;  %v5149_v11 = vor.u32 %v5148_v44, %v5144_v41  ;;  %v6767_v31 = vrot.slane %v6658_v37, 5  ;;  %v9408_v16 = vcombine.low %v5169_v14, %v5179_v54  ;;  %v7798_v62 = vsel %vm10238_vm14, %v9551_v3, %v7797_v53  ;;  %v5616_v29 = vld [vmem:[#allocation3 + $0x2c] sm:$0x1]  ;;  %v7153_v46 = vld [vmem:[#allocation3 + $0x30] sm:$0xf] }
 0x21a   : > { %v5140_v6 = vrot.slane %v5139_v49, 4  ;;  %v7799_v57 = vrot.slane %v7797_v53, 4  ;;  %v6770_v61 = vrot.slane %v6659_v26, 5  ;;  %v9488_v27 = vrot.slane %v6654_v56, 9  ;;  %v7154_v28 = vld [vmem:[#allocation3 + $0x34] sm:$0xf] }
 0x21b   : > { %v5150_v59 = vrot.slane %v5149_v11, 4  ;;  %v6768_v2 = vsel %vm10238_vm14, %v9489_v35, %v6767_v31  ;;  %v6769_v60 = vrot.slane %v6767_v31, 4  ;;  %5544 = vrot.lane.b32.xlu1 %v9408_v16, %s10091_s8  ;;  %v6760_v1 = vrot.slane %v6655_v25, 5  ;;  %v7155_v10 = vld [vmem:[#allocation3 + $0x38] sm:$0x1] }
 0x21c   : > { %v5145_v63 = vsel %vm10274_vm15, %v5140_v6, %v5144_v41  ;;  %v7801_v58 = vsel %vm10238_vm14, %v7799_v57, %v7800_v23  ;;  %v6763_v43 = vrot.slane %v6656_v33, 5  ;;  %v9425_v48 = vrot.slane %v5614_v55, 9  ;;  %v6112_v42 = vld [vmem:[#allocation3 + $0x30] sm:$0xf]  ;;  %v6113_v30 = vld [vmem:[#allocation3 + $0x34] sm:$0xf] }
 0x21d   : > { %v5155_v0 = vsel %vm10274_vm15, %v5150_v59, %v5154_v50  ;;  %v9567_v17 = vcombine.low %v7798_v62, %v7801_v58  ;;  %v6771_v13 = vsel %vm10238_vm14, %v6769_v60, %v6770_v61  ;;  %v6761_v5 = vsel %vm10238_vm14, %v9488_v27, %v6760_v1  ;;  %v6114_v3 = vld [vmem:[#allocation3 + $0x38] sm:$0x1]  ;;  %v6109_v37 = vld [vmem:[#allocation3 + $0x24] sm:$0xf]  ;;  %v6110_v49 = vld [vmem:[#allocation3 + $0x28] sm:$0xf] }
 0x21e   : > { %v9407_v7 = vcombine.low %v5145_v63, %v5155_v0  ;;  %v9505_v9 = vcombine.low %v6768_v2, %v6771_v13  ;;  %v6762_v19 = vrot.slane %v6760_v1, 4  ;;  %v5724_v52 = vrot.slane %v5615_v12, 5  ;;  %v6111_v62 = vld [vmem:[#allocation3 + $0x2c] sm:$0x1]  ;;  %v7150_v63 = vld [vmem:[#allocation3 + $0x24] sm:$0xf] }
 0x21f   : > { %7950 = vrot.lane.b32.xlu0 %v9567_v17, %s10100_s23  ;;  %v5727_v15 = vrot.slane %v5616_v29, 5  ;;  %v7244_v20 = vshrl.u32 %v7153_v46, 16  ;;  %v7247_v34 = vshll.u32 %v7153_v46, 16  ;;  %v7253_v24 = vshll.u32 %v7154_v28, 16  ;;  %v12434_v18 = vld [vmem:[#allocation3 + $0x48] sm:$0xf] }
 0x220   : > { %5542 = vrot.lane.b32.xlu1 %v9407_v7, %s10091_s8  ;;  %v6764_v8 = vsel %vm10238_vm14, %v6762_v19, %v6763_v43  ;;  %v7257_v51 = vshrl.u32 %v7154_v28, 16  ;;  %v5725_v14 = vsel %vm10238_vm14, %v9425_v48, %v5724_v52  ;;  %v5726_v32 = vrot.slane %v5724_v52, 4  ;;  %v7151_v43 = vld [vmem:[#allocation3 + $0x28] sm:$0xf]  ;;  %v7152_v52 = vld [vmem:[#allocation3 + $0x2c] sm:$0x1] }
 0x221   : > { %v9504_v45 = vcombine.low %v6761_v5, %v6764_v8  ;;  %v7246_v36 = vrot.slane %v7244_v20, 4  ;;  %v7249_v39 = vrot.slane %v7247_v34, 5  ;;  %v7255_v40 = vrot.slane %v7253_v24, 5 }
 0x222   : > { %v7259_v41 = vrot.slane %v7257_v51, 4  ;;  %v7263_v44 = vshll.u32 %v7155_v10, 16  ;;  %v5728_v50 = vsel %vm10238_vm14, %v5726_v32, %v5727_v15  ;;  %v6224_v53 = vshrl.u32 %v6112_v42, 16 }
 0x223   : > { %6908 = vrot.lane.b32.xlu0 %v9504_v45, %s10101_s28  ;;  %v6227_v23 = vshll.u32 %v6112_v42, 16  ;;  %v6233_v26 = vshll.u32 %v6113_v30, 16  ;;  %v9441_v54 = vcombine.low %v5725_v14, %v5728_v50  ;;  %v7250_v11 = vor.u32 %v7249_v39, %v7246_v36 }
 0x224   : > { %6910 = vrot.lane.b32.xlu1 %v9505_v9, %s10101_s28  ;;  %v7260_v35 = vor.u32 %v7259_v41, %v7255_v40  ;;  %v7265_v31 = vrot.slane %v7263_v44, 5  ;;  %v6226_v56 = vrot.slane %v6224_v53, 4  ;;  %v6237_v6 = vshrl.u32 %v6113_v30, 16  ;;  %v11636_v53 = vld [vmem:[%s13338_s2] ss:$0 sm:$0xff] }
 0x225   : > { %v6229_v25 = vrot.slane %v6227_v23, 5  ;;  %v6235_v16 = vrot.slane %v6233_v26, 5  ;;  %v7251_v57 = vrot.slane %v7250_v11, 4  ;;  %v6243_v55 = vshll.u32 %v6114_v3, 16  ;;  %v5069_v26 = vld [vmem:[#allocation3 + $0x24] sm:$0xf] }
 0x226   : > { %v7261_v33 = vrot.slane %v7260_v35, 4  ;;  %v6200_v59 = vshrl.u32 %v6109_v37, 16  ;;  %v6239_v60 = vrot.slane %v6237_v6, 4  ;;  %v6203_v61 = vshll.u32 %v6109_v37, 16  ;;  %v10034_v11 = vld [vmem:[#allocation3 + $0x3c] sm:$0xff]  }
 0x227   : > { %v6230_v2 = vor.u32 %v6229_v25, %v6226_v56  ;;  %v6209_v12 = vshll.u32 %v6110_v49, 16  ;;  %v7256_v58 = vsel %vm10274_vm15, %v7251_v57, %v7255_v40  ;;  %v6245_v1 = vrot.slane %v6243_v55, 5 }
 0x228   : > { %5867 = vrot.lane.b32.xlu1 %v9441_v54, %s10096_s13  ;;  %v7266_v27 = vsel %vm10274_vm15, %v7261_v33, %v7265_v31  ;;  %v6202_v29 = vrot.slane %v6200_v59, 4  ;;  %v6240_v17 = vor.u32 %v6239_v60, %v6235_v16  ;;  %v6205_v13 = vrot.slane %v6203_v61, 5 }
 0x229   : > { %v9536_v46 = vcombine.low %v7256_v58, %v7266_v27  ;;  %v6231_v0 = vrot.slane %v6230_v2, 4  ;;  %v6211_v28 = vrot.slane %v6209_v12, 5  ;;  %v6213_v7 = vshrl.u32 %v6110_v49, 16 }
 0x22a   : > { %v6219_v9 = vshll.u32 %v6111_v62, 16  ;;  %v7220_v5 = vshrl.u32 %v7150_v63, 16  ;;  %v6241_v10 = vrot.slane %v6240_v17, 4  ;;  %v6206_v48 = vor.u32 %v6205_v13, %v6202_v29  ;;  %v5070_v17 = vld [vmem:[#allocation3 + $0x28] sm:$0xf] }
 0x22b   : > { %7631 = vrot.lane.b32.xlu0 %v9536_v46, %s10099_s22  ;;  %v6236_v19 = vsel %vm10274_vm15, %v6231_v0, %v6235_v16  ;;  %v7223_v15 = vshll.u32 %v7150_v63, 16  ;;  %v6215_v42 = vrot.slane %v6213_v7, 4  ;;  %v7229_v24 = vshll.u32 %v7151_v43, 16 }
 0x22c   : > { %v6221_v8 = vrot.slane %v6219_v9, 5  ;;  %v7222_v34 = vrot.slane %v7220_v5, 4  ;;  %v6246_v30 = vsel %vm10274_vm15, %v6241_v10, %v6245_v1  ;;  %v6207_v45 = vrot.slane %v6206_v48, 4  ;;  %v4845_v10 = vld [vmem:[#allocation3 + $0x54] sm:$0xf] }
 0x22d   : > { %v9750_v20 = vpop.f32.mrb[12].mxu0  ;;  %v7225_v14 = vrot.slane %v7223_v15, 5  ;;  %v7233_v32 = vshrl.u32 %v7151_v43, 16  ;;  %v9473_v3 = vcombine.low %v6236_v19, %v6246_v30  ;;  %v6216_v37 = vor.u32 %v6215_v42, %v6211_v28 }
 0x22e   : > { %v4273_v51 = vpop.f32.mrb[13].mxu0  ;;  %v7231_v39 = vrot.slane %v7229_v24, 5  ;;  %v7239_v40 = vshll.u32 %v7152_v52, 16  ;;  %v6212_v44 = vsel %vm10274_vm15, %v6207_v45, %v6211_v28  ;;  %v4282_v23 = vadd.f32 %v11636_v53, %v9750_v20  ;;  %v4852_v28 = vld [vmem:[#allocation3 + $0x60] sm:$0xf] }
 0x22f   : > { %v9751_v36 = vpop.f32.mrb[14].mxu0  ;;  %v7226_v49 = vor.u32 %v7225_v14, %v7222_v34  ;;  %v7235_v50 = vrot.slane %v7233_v32, 4  ;;  %6589 = vrot.lane.b32.xlu1 %v9473_v3, %s10095_s12  ;;  %v6217_v54 = vrot.slane %v6216_v37, 4  ;;  %v4274_v31 = vadd.f32 %v11636_v53, %v4273_v51  ;;  %v4856_v52 = vld [vmem:[#allocation3 + $0x68] sm:$0x1] }
 0x230   : > { %v4276_v41 = vpop.f32.mrb[15].mxu0  ;;  %v7241_v35 = vrot.slane %v7239_v40, 5  ;;  %v4285_v56 = vadd.f32 %v11636_v53, %v9751_v36  ;;  %v4366_v6 = vmax.f32 %v4282_v23, 0.0  ;;  %v5181_v59 = vshrl.u32 %v5069_v26, 16  ;;  %v5071_v34 = vld [vmem:[#allocation3 + $0x2c] sm:$0x1] }
 0x231   : > { %v7227_v25 = vrot.slane %v7226_v49, 4  ;;  %v7236_v16 = vor.u32 %v7235_v50, %v7231_v39  ;;  %v4277_v62 = vadd.f32 %v11636_v53, %v4276_v41  ;;  %v6222_v57 = vsel %vm10274_vm15, %v6217_v54, %v6221_v8  ;;  %v7156_v36 = vld [vmem:[#allocation3 + $0x3c] sm:$0xf]  ;;  %v7157_v23 = vld [vmem:[#allocation3 + $0x40] sm:$0xf] }
 0x232   : > { %v4364_v33 = vmax.f32 %v4274_v31, 0.0  ;;  %v4367_v55 = vmax.f32 %v4285_v56, 0.0  ;;  %v9472_v2 = vcombine.low %v6212_v44, %v6222_v57  ;;  %v9655_v12 = vpack.c.bf16 %v4366_v6, %v4366_v6  ;;  %v5541_v56 = vpop.permute.xlu0 %5540 }
 0x233   : > { %v7232_v60 = vsel %vm10274_vm15, %v7227_v25, %v7231_v39  ;;  %v7237_v61 = vrot.slane %v7236_v16, 4  ;;  %7088 = vrot.lane.b32.xlu1 %v10034_v11, %s10098_s21  ;;  %v4365_v27 = vmax.f32 %v4277_v62, 0.0  ;;  %v5183_v1 = vrot.slane %v5181_v59, 4 }
 0x234   : > { %v9653_v63 = vpack.c.bf16 %v4364_v33, %v4364_v33  ;;  %v9656_v58 = vpack.c.bf16 %v4367_v55, %v4367_v55  ;;  %6587 = vrot.lane.b32.xlu0 %v9472_v2, %s10095_s12  ;;  %v4600_v46 = vshrl.u32 %v9655_v12, 16  ;;  %v4603_v0 = vshll.u32 %v9655_v12, 16  ;;  %v495_v2 = vld [vmem:[#allocation3 + $0x74] sm:$0x1] }
 0x235   : > { %v7242_v29 = vsel %vm10274_vm15, %v7237_v61, %v7241_v35  ;;  %v5184_v13 = vshll.u32 %v5069_v26, 16  ;;  %v9654_v15 = vpack.c.bf16 %v4365_v27, %v4365_v27  ;;  %v5190_v24 = vshll.u32 %v5070_v17, 16  ;;  %v4849_v35 = vld [vmem:[#allocation3 + $0x5c] sm:$0x1] }
 0x236   : > { %v9535_v43 = vcombine.low %v7232_v60, %v7242_v29  ;;  %v4583_v7 = vshrl.u32 %v9653_v63, 16  ;;  %v4586_v9 = vshll.u32 %v9653_v63, 16  ;;  %v4608_v5 = vshrl.u32 %v9656_v58, 16  ;;  %v7158_v63 = vld [vmem:[#allocation3 + $0x44] sm:$0x1] }
 0x237   : > { %v4602_v19 = vrot.slane %v4600_v46, 7  ;;  %v4611_v48 = vshll.u32 %v9656_v58, 16  ;;  %v5186_v20 = vrot.slane %v5184_v13, 5  ;;  %v5194_v51 = vshrl.u32 %v5070_v17, 16 }
 0x238   : > { %7629 = vrot.lane.b32.xlu1 %v9535_v43, %s10099_s22  ;;  %v4585_v42 = vrot.slane %v4583_v7, 7  ;;  %v4610_v8 = vrot.slane %v4608_v5, 7  ;;  %v4591_v14 = vshrl.u32 %v9654_v15, 16  ;;  %v4594_v32 = vshll.u32 %v9654_v15, 16  ;;  %v5862_v7 = vpop.permute.xlu0 %5861 }
 0x239   : > { %v4605_v30 = vor.u32 %v4603_v0, %v4602_v19  ;;  %v4606_v45 = vrot.slane %v4602_v19, 4  ;;  %v5187_v49 = vor.u32 %v5186_v20, %v5183_v1  ;;  %v5192_v50 = vrot.slane %v5190_v24, 5 }
 0x23a   : > { %v4588_v3 = vor.u32 %v4586_v9, %v4585_v42  ;;  %v4589_v37 = vrot.slane %v4585_v42, 4  ;;  %v4613_v39 = vor.u32 %v4611_v48, %v4610_v8  ;;  %v4615_v40 = vrot.slane %v4610_v8, 4  ;;  %v449_v8 = vld [vmem:[#allocation3 + $0x90] sm:$0x1] }
 0x23b   : > { %v4853_v41 = vsel %vm11452_vm0, %v4605_v30, %v4852_v28  ;;  %v4593_v44 = vrot.slane %v4591_v14, 7  ;;  %v5196_v31 = vrot.slane %v5194_v51, 4  ;;  %v5188_v6 = vrot.slane %v5187_v49, 4  ;;  %v452_v49 = vld [vmem:[#allocation3 + $0x9c] sm:$0x1] }
 0x23c   : > { %4854 = vst [vmem:[#allocation3 + $0x60] sm:$0xf] %v4853_v41  ;;  %v4846_v26 = vsel %vm11452_vm0, %v4588_v3, %v4845_v10  ;;  %v4614_v54 = vsel %vm10199_vm8, %v4606_v45, %v4613_v39  ;;  %v4857_v11 = vsel %vm11298_vm13, %v4615_v40, %v4856_v52  ;;  %v5200_v62 = vshll.u32 %v5071_v34, 16  ;;  %v501_v3 = vld [vmem:[#allocation3 + $0x8c] sm:$0x1] }
 0x23d   : > { %4847 = vst [vmem:[#allocation3 + $0x54] sm:$0xf] %v4846_v26  ;;  %4855 = vst.msk [vmem:[#allocation3 + $0x64] sm:$0xf] %vm13352_vm4, %v4614_v54  ;;  %v4596_v25 = vor.u32 %v4594_v32, %v4593_v44  ;;  %v4598_v16 = vrot.slane %v4593_v44, 4  ;;  %v5197_v57 = vor.u32 %v5196_v31, %v5192_v50  ;;  %v7268_v33 = vshrl.u32 %v7156_v36, 16 }
 0x23e   : > { %4858 = vst [vmem:[#allocation3 + $0x68] sm:$0x1] %v4857_v11  ;;  %v7271_v55 = vshll.u32 %v7156_v36, 16  ;;  %v7277_v59 = vshll.u32 %v7157_v23, 16  ;;  %v5193_v12 = vsel %vm10274_vm15, %v5188_v6, %v5192_v50  ;;  %v5202_v27 = vrot.slane %v5200_v62, 5  ;;  %v10045_v50 = vld [vmem:[%s13339_s3] sm:$0xff]  }
 0x23f   : > { %v4597_v60 = vsel %vm10199_vm8, %v4589_v37, %v4596_v25  ;;  %v4850_v61 = vsel %vm11298_vm13, %v4598_v16, %v4849_v35  ;;  %v5198_v58 = vrot.slane %v5197_v57, 4  ;;  %v7270_v1 = vrot.slane %v7268_v33, 4  ;;  %v446_v32 = vld [vmem:[#allocation3 + $0x84] sm:$0x1]  ;;  %v504_v36 = vld [vmem:[#allocation3 + $0x98] sm:$0x1]  ;;  %9768 = vmatprep.subr.bf16.mxu0 %v10045_v50  ;;  %9844 = vmatprep.subr.bf16.mxu1 %v10045_v50 }
 0x240   : > { %4848 = vst.msk [vmem:[#allocation3 + $0x58] sm:$0xf] %vm13352_vm4, %v4597_v60  ;;  %4851 = vst [vmem:[#allocation3 + $0x5c] sm:$0x1] %v4850_v61  ;;  %v7273_v29 = vrot.slane %v7271_v55, 5  ;;  %v7279_v46 = vrot.slane %v7277_v59, 5  ;;  %9769 = vmatpush3.bf16.msra.mxu0 %v10045_v50  ;;  %9849 = vmatpush3.bf16.msra.mxu1 %v10045_v50 }
 0x241   : > { %v7281_v0 = vshrl.u32 %v7157_v23, 16  ;;  %v496_v17 = vsel %vm11309_vm6, 0, %v495_v2  ;;  %vm5588_vm2 = vcmask 130112   ;;  %v5203_v13 = vsel %vm10274_vm15, %v5198_v58, %v5202_v27  ;;  %v455_v44 = vld [vmem:[#allocation3 + $0xa8] sm:$0x1]  ;;  %v10046_v35 = vld [vmem:[%s13339_s3 + $0x8] sm:$0xff]  }
 0x242   : > { %v7274_v43 = vor.u32 %v7273_v29, %v7270_v1  ;;  %v7287_v28 = vshll.u32 %v7158_v63, 16  ;;  %497 = vst [vmem:[#allocation3 + $0x74] sm:$0x1] %v496_v17  ;;  %5589 = vst.msk [vmem:[#allocation5] sm:$0xff] %vm5588_vm2, %v5541_v56  ;;  %vm13363_vm3 = vcmask 195712   ;;  %v9409_v9 = vcombine.low %v5193_v12, %v5203_v13  ;;  %9770 = vmatprep.subr.bf16.mxu0 %v10046_v35  ;;  %v10047_v33 = vld [vmem:[%s13339_s3 + $0x10] sm:$0xff]   ;;  %9845 = vmatprep.subr.bf16.mxu1 %v10046_v35 }
 0x243   : > { %v7283_v5 = vrot.slane %v7281_v0, 4  ;;  %v5629_v19 = vld [vmem:[#allocation3 + $0x60] sm:$0xe]  ;;  %5910 = vst.msk [vmem:[#allocation5] sm:$0xff] %vm13363_vm3, %v5862_v7  ;;  %v450_v41 = vsel %vm11298_vm13, 0, %v449_v8  ;;  %v447_v31 = vsel %vm11298_vm13, 0, %v446_v32  ;;  %v11721_v0 = vpop.permute.xlu1 %7112 }
 0x244   : > { %v7275_v10 = vrot.slane %v7274_v43, 4  ;;  %v5630_v48 = vld [vmem:[#allocation3 + $0x64] sm:$0xf]  ;;  %5546 = vrot.lane.b32.xlu1 %v9409_v9, %s10091_s8  ;;  %v7289_v42 = vrot.slane %v7287_v28, 5  ;;  %v9430_v51 = vrot.slane %v5629_v19, 9  ;;  %v505_v56 = vsel %vm11309_vm6, 0, %v504_v36  ;;  %9771 = vmatpush3.bf16.msra.mxu0 %v10046_v35 }
 0x245   : > { %v5631_v52 = vld [vmem:[#allocation3 + $0x68] sm:$0x1]  ;;  %v7284_v15 = vor.u32 %v7283_v5, %v7279_v46  ;;  %v5759_v20 = vrot.slane %v5630_v48, 5  ;;  %v10059_v34 = vld [vmem:[#allocation3 + $0x60] sm:$0xff]   ;;  %451 = vst [vmem:[#allocation3 + $0x90] sm:$0x1] %v450_v41  ;;  %9850 = vmatpush3.bf16.msra.mxu1 %v10046_v35  ;;  %9772 = vmatprep.subr.bf16.mxu0 %v10047_v33 }
 0x246   : > { %v5762_v45 = vrot.slane %v5631_v52, 5  ;;  %v7280_v14 = vsel %vm10274_vm15, %v7275_v10, %v7279_v46  ;;  %5052 = vst.msk [vmem:[#allocation5 + $0x40] sm:$0xff] %vm5043_vm7, %v10059_v34  ;;  %v510_v54 = vld [vmem:[#allocation3 + $0xb0] sm:$0x1]  ;;  %v507_v11 = vld [vmem:[#allocation3 + $0xa4] sm:$0x1]  ;;  %9846 = vmatprep.subr.bf16.mxu1 %v10047_v33 }
 0x247   : > { %v7285_v24 = vrot.slane %v7284_v15, 4  ;;  %v5761_v30 = vrot.slane %v5759_v20, 4  ;;  %v5760_v39 = vsel %vm10238_vm14, %v9430_v51, %v5759_v20  ;;  %v502_v25 = vsel %vm11309_vm6, 0, %v501_v3  ;;  %448 = vst [vmem:[#allocation3 + $0x84] sm:$0x1] %v447_v31  ;;  %v10048_v59 = vld [vmem:[%s13339_s3 + $0x18] sm:$0xff]   ;;  %v11727_v32 = vpop.permute.xlu1 %7657 }
 0x248   : > { %506 = vst [vmem:[#allocation3 + $0x98] sm:$0x1] %v505_v56  ;;  %503 = vst [vmem:[#allocation3 + $0x8c] sm:$0x1] %v502_v25  ;;  %v456_v16 = vsel %vm11298_vm13, 0, %v455_v44  ;;  %v453_v6 = vsel %vm11298_vm13, 0, %v452_v49  ;;  %9773 = vmatpush3.bf16.msra.mxu0 %v10047_v33 }
 0x249   : > { %v7290_v37 = vsel %vm10274_vm15, %v7285_v24, %v7289_v42  ;;  %v5763_v40 = vsel %vm10238_vm14, %v5761_v30, %v5762_v45  ;;  %457 = vst [vmem:[#allocation3 + $0xa8] sm:$0x1] %v456_v16  ;;  %v511_v62 = vsel %vm11309_vm6, 0, %v510_v54  ;;  %v508_v57 = vsel %vm11309_vm6, 0, %v507_v11  ;;  %454 = vst [vmem:[#allocation3 + $0x9c] sm:$0x1] %v453_v6  ;;  %9851 = vmatpush3.bf16.msra.mxu1 %v10047_v33 }
 0x24a   : > { %v9537_v23 = vcombine.low %v7280_v14, %v7290_v37  ;;  %v9446_v26 = vcombine.low %v5760_v39, %v5763_v40  ;;  %512 = vst [vmem:[#allocation3 + $0xb0] sm:$0x1] %v511_v62  ;;  %509 = vst [vmem:[#allocation3 + $0xa4] sm:$0x1] %v508_v57  ;;  %v461_v55 = vld [vmem:[#allocation3 + $0xc0] sm:$0x1]  ;;  %9774 = vmatprep.subr.bf16.mxu0 %v10048_v59  ;;  %9847 = vmatprep.subr.bf16.mxu1 %v10048_v59 }
 0x24b   : > { %v462_v2 = vsel %vm11298_vm13, 0, %v461_v55  ;;  %v10050_v60 = vld [vmem:[%s13339_s3 + $0x20] ss:$0 sps:$4 sm:$0xff]   ;;  %vm8121_vm5 = vcmask 1043456   ;;  %v5084_v29 = vld [vmem:[#allocation3 + $0x60] sm:$0xf] }
 0x24c   : > { %7633 = vrot.lane.b32.xlu1 %v9537_v23, %s10099_s22  ;;  %5877 = vrot.lane.b32.xlu0 %v9446_v26, %s10096_s13  ;;  %463 = vst [vmem:[#allocation3 + $0xc0] sm:$0x1] %v462_v2  ;;  %v8123_v58 = vsel %vm8121_vm5, %v10050_v60, 0  ;;  %13410 = vst [vmem:[#allocation6_spill] sm:$0xff] %v11721_v0  ;;  %v5085_v43 = vld [vmem:[#allocation3 + $0x64] sm:$0xf] }
 0x24d   : > { %9775 = vmatpush3.bf16.msra.mxu0 %v10048_v59  ;;  %9852 = vmatpush3.bf16.msra.mxu1 %v10048_v59  ;;  %v5301_v19 = vshrl.u32 %v5084_v29, 16  ;;  %v5310_v15 = vshll.u32 %v5085_v43, 16  ;;  %v5314_v8 = vshrl.u32 %v5085_v43, 16  ;;  %vm13362_vm1 = vcmask 261312   ;;  %13411 = vst [vmem:[#allocation7_spill] sm:$0xff] %v11727_v32 }
 0x24e   : > { %9951 = vmatprep.subr.msk.bf16.mxu0 %vm8121_vm5, %v10050_v60  ;;  %9952 = vmatprep.subr.msk.bf16.mxu1 %vm8121_vm5, %v10050_v60  ;;  %v5304_v51 = vshll.u32 %v5084_v29, 16  ;;  %v4866_v3 = vld [vmem:[#allocation3 + $0x78] sm:$0xf]  ;;  %v4859_v50 = vld [vmem:[#allocation3 + $0x6c] sm:$0xf]  ;;  %vm7996_vm5 = vcmask 589312  }
 0x24f   : > { %v5303_v36 = vrot.slane %v5301_v19, 4  ;;  %v11729_v44 = vrot.slane %v5310_v15, 5  ;;  %v5316_v54 = vrot.slane %v5314_v8, 4  ;;  %v4870_v35 = vld [vmem:[#allocation3 + $0x80] sm:$0x1] }
 0x250   : > { %v5306_v25 = vrot.slane %v5304_v51, 5  ;;  %v4863_v33 = vld [vmem:[#allocation3 + $0x74] sm:$0x1]  ;;  %v11751_v43 = vld [vmem:[#allocation3 + $0x3c] sm:$0xe] }
 0x251   : > { %9777 = vmatpush3.bf16.msra.mxu0 %v8123_v58  ;;  %9853 = vmatpush3.bf16.msra.mxu1 %v8123_v58  ;;  %v11740_v58 = vpop.permute.xlu1 %7978  ;;  %v11761_v15 = vld [vmem:[#allocation3 + $0x34] sm:$0xf] }
 0x252   : > { %13412 = vst [vmem:[#allocation8_spill] sm:$0xff] %v11740_v58 }
 0x25b   : > { %v11725_v52 = vpop.permute.xlu0 %7082 }
 0x25e   : > { %v9754_v61 = vpop.f32.mrb[16].mxu0 }
 0x25f   : > { %v4298_v12 = vadd.f32 %v11636_v53, %v9754_v61  ;;  %v4289_v63 = vpop.f32.mrb[17].mxu0  ;;  %v6039_v41 = vpop.permute.xlu0 %6038  ;;  %v5086_v61 = vld [vmem:[#allocation3 + $0x68] sm:$0x1] }
 0x260   : > { %v4290_v27 = vadd.f32 %v11636_v53, %v4289_v63  ;;  %v9755_v1 = vpop.f32.mrb[18].mxu0  ;;  %6087 = vst.msk [vmem:[#allocation5] sm:$0xff] %vm13362_vm1, %v6039_v41 }
 0x261   : > { %v4370_v46 = vmax.f32 %v4298_v12, 0.0  ;;  %v4301_v17 = vadd.f32 %v11636_v53, %v9755_v1  ;;  %v4292_v13 = vpop.f32.mrb[19].mxu0 }
 0x262   : > { %v4368_v28 = vmax.f32 %v4290_v27, 0.0  ;;  %v4293_v7 = vadd.f32 %v11636_v53, %v4292_v13  ;;  %v5317_v27 = vor.u32 %v5316_v54, %v11729_v44  ;;  %v5320_v13 = vshll.u32 %v5086_v61, 16 }
 0x263   : > { %v9659_v9 = vpack.c.bf16 %v4370_v46, %v4370_v46  ;;  %v4371_v5 = vmax.f32 %v4301_v17, 0.0  ;;  %v5307_v17 = vor.u32 %v5306_v25, %v5303_v36  ;;  %v13351_v54 = vrot.slane %v11761_v15, 5 }
 0x264   : > { %v9657_v10 = vpack.c.bf16 %v4368_v28, %v4368_v28  ;;  %v4369_v48 = vmax.f32 %v4293_v7, 0.0  ;;  %v11753_v28 = vld [vmem:[#allocation3 + $0x40] sm:$0xf]  ;;  %v5318_v7 = vrot.slane %v5317_v27, 4  ;;  %v5322_v8 = vrot.slane %v5320_v13, 5 }
 0x265   : > { %v4634_v20 = vshrl.u32 %v9659_v9, 16  ;;  %v9660_v42 = vpack.c.bf16 %v4371_v5, %v4371_v5  ;;  %v4637_v45 = vshll.u32 %v9659_v9, 16  ;;  %v11748_v46 = vpop.permute.xlu0 %7948  ;;  %v11755_v9 = vld [vmem:[#allocation3 + $0x44] sm:$0x1]  ;;  %v11757_v5 = vld [vmem:[#allocation3 + $0x30] sm:$0xf] }
 0x266   : > { %v4617_v34 = vshrl.u32 %v9657_v10, 16  ;;  %v9658_v24 = vpack.c.bf16 %v4369_v48, %v4369_v48  ;;  %v4620_v39 = vshll.u32 %v9657_v10, 16  ;;  %v5308_v10 = vrot.slane %v5307_v17, 4  ;;  %v458_v48 = vld [vmem:[#allocation3 + $0xb4] sm:$0x1] }
 0x267   : > { %v4636_v30 = vrot.slane %v4634_v20, 7  ;;  %v4642_v14 = vshrl.u32 %v9660_v42, 16  ;;  %v4645_v26 = vshll.u32 %v9660_v42, 16  ;;  %v11763_v20 = vld [vmem:[#allocation3 + $0x34] sm:$0xf]  ;;  %v11765_v42 = vpop.permute.xlu1 %6040  ;;  %v459_v51 = vsel %vm11298_vm13, 0, %v458_v48 }
 0x268   : > { %v4619_v37 = vrot.slane %v4617_v34, 7  ;;  %v4625_v40 = vshrl.u32 %v9658_v24, 16  ;;  %v4628_v56 = vshll.u32 %v9658_v24, 16  ;;  %460 = vst [vmem:[#allocation3 + $0xb4] sm:$0x1] %v459_v51  ;;  %v13353_v36 = vrot.slane %v11753_v28, 5 }
 0x269   : > { %v4639_v49 = vor.u32 %v4637_v45, %v4636_v30  ;;  %v4644_v23 = vrot.slane %v4642_v14, 7  ;;  %v4640_v16 = vrot.slane %v4636_v30, 4  ;;  %v5205_v30 = vshrl.u32 %v11757_v5, 16 }
 0x26a   : > { %v4622_v11 = vor.u32 %v4620_v39, %v4619_v37  ;;  %v4627_v31 = vrot.slane %v4625_v40, 7  ;;  %v4623_v55 = vrot.slane %v4619_v37, 4  ;;  %v11759_v19 = vpop.permute.xlu0 %5865  ;;  %v5323_v14 = vsel %vm10274_vm15, %v5318_v7, %v5322_v8 }
 0x26b   : > { %v4867_v6 = vsel %vm11452_vm0, %v4639_v49, %v4866_v3  ;;  %v4647_v62 = vor.u32 %v4645_v26, %v4644_v23  ;;  %v4649_v57 = vrot.slane %v4644_v23, 4  ;;  %v11774_v3 = vld [vmem:[#allocation3 + $0x3c] sm:$0xf]  ;;  %v5313_v39 = vsel %vm10274_vm15, %v5308_v10, %v11729_v44  ;;  %v11782_v23 = vpop.permute.xlu1 %6906 }
 0x26c   : > { %4868 = vst [vmem:[#allocation3 + $0x78] sm:$0xf] %v4867_v6  ;;  %v4860_v59 = vsel %vm11452_vm0, %v4622_v11, %v4859_v50  ;;  %v4630_v2 = vor.u32 %v4628_v56, %v4627_v31  ;;  %v4632_v60 = vrot.slane %v4627_v31, 4  ;;  %v5208_v11 = vshll.u32 %v11757_v5, 16  ;;  %v6116_v6 = vld [vmem:[#allocation3 + $0x40] sm:$0xf] }
 0x26d   : > { %4861 = vst [vmem:[#allocation3 + $0x6c] sm:$0xf] %v4860_v59  ;;  %v4648_v12 = vsel %vm10199_vm8, %v4640_v16, %v4647_v62  ;;  %v4871_v63 = vsel %vm11298_vm13, %v4649_v57, %v4870_v35  ;;  %v5214_v35 = vshll.u32 %v11763_v20, 16  ;;  %v9414_v44 = vcombine.low %v5313_v39, %v5323_v14 }
 0x26e   : > { %4869 = vst.msk [vmem:[#allocation3 + $0x7c] sm:$0xf] %vm13352_vm4, %v4648_v12  ;;  %4872 = vst [vmem:[#allocation3 + $0x80] sm:$0x1] %v4871_v63  ;;  %v4631_v1 = vsel %vm10199_vm8, %v4623_v55, %v4630_v2  ;;  %v4864_v29 = vsel %vm11298_vm13, %v4632_v60, %v4863_v33  ;;  %v11779_v40 = vpop.permute.xlu0 %6904  ;;  %v11789_v25 = vrot.slane %v5205_v30, 4  ;;  %v5218_v16 = vshrl.u32 %v11763_v20, 16 }
 0x26f   : > { %4862 = vst.msk [vmem:[#allocation3 + $0x70] sm:$0xf] %vm13352_vm4, %v4631_v1  ;;  %4865 = vst [vmem:[#allocation3 + $0x74] sm:$0x1] %v4864_v29  ;;  %v6248_v63 = vshrl.u32 %v11774_v3, 16  ;;  %v6251_v8 = vshll.u32 %v11774_v3, 16 }
 0x270   : > { %v6257_v39 = vshll.u32 %v6116_v6, 16  ;;  %v11813_v3 = vld [vmem:[#allocation3 + $0x38] sm:$0x1]  ;;  %vm8072_vm4 = vcmask 588800  }
 0x272   : > { %v11792_v12 = vpop.permute.xlu0 %7086 }
 0x273   : > { %v6675_v24 = vld [vmem:[#allocation3 + $0x78] sm:$0xe] }
 0x274   : > { %v9495_v62 = vrot.slane %v6675_v24, 9  ;;  %v5632_v2 = vld [vmem:[#allocation3 + $0x6c] sm:$0xe]  ;;  %v7716_v13 = vld [vmem:[#allocation3 + $0x78] sm:$0xe]  ;;  %v11803_v24 = vpop.permute.xlu1 %5863 }
 0x275   : > { %v10036_v45 = vld [vmem:[#allocation3 + $0x78] sm:$0xff]   ;;  %v6677_v49 = vld [vmem:[#allocation3 + $0x80] sm:$0x1]  ;;  %v9431_v30 = vrot.slane %v5632_v2, 9  ;;  %v11913_v34 = vld [vmem:[#allocation3 + $0x6c] sm:$0xf] }
 0x276   : > { %v10037_v37 = vld [vmem:[#allocation3 + $0x78] sm:$0xff]   ;;  %7098 = vrot.lane.b32.xlu0 %v10036_v45, %s10098_s21  ;;  %v5633_v31 = vld [vmem:[#allocation3 + $0x70] sm:$0xf]  ;;  %v5634_v56 = vld [vmem:[#allocation3 + $0x74] sm:$0x1]  ;;  %v6812_v33 = vrot.slane %v6677_v49, 5 }
 0x277   : > { %v6676_v41 = vld [vmem:[#allocation3 + $0x7c] sm:$0xf]  ;;  %6056 = vrot.lane.b32.xlu1 %v10037_v37, %s10092_s9  ;;  %v5766_v55 = vrot.slane %v5633_v31, 5  ;;  %v7718_v60 = vld [vmem:[#allocation3 + $0x80] sm:$0x1]  ;;  %v5769_v17 = vrot.slane %v5634_v56, 5 }
 0x278   : > { %v6809_v26 = vrot.slane %v6676_v41, 5  ;;  %v7717_v59 = vld [vmem:[#allocation3 + $0x7c] sm:$0xf]  ;;  %v7849_v48 = vrot.slane %v7718_v60, 5  ;;  %v11800_v20 = vld [vmem:[#allocation3 + $0x70] sm:$0xf] }
 0x279   : > { %v7846_v61 = vrot.slane %v7717_v59, 5  ;;  %v5768_v29 = vrot.slane %v5766_v55, 4  ;;  %v5636_v7 = vld [vmem:[#allocation3 + $0x7c] sm:$0xf]  ;;  %v10038_v51 = vld [vmem:[#allocation3 + $0x6c] sm:$0xff]   ;;  %v9558_v41 = vrot.slane %v7716_v13, 9  ;;  %v5767_v56 = vsel %vm10238_vm14, %v9431_v30, %v5766_v55 }
 0x27a   : > { %v6811_v57 = vrot.slane %v6809_v26, 4  ;;  %5556 = vrot.lane.b32.xlu0 %v9414_v44, %s10091_s8  ;;  %v6810_v27 = vsel %vm10238_vm14, %v9495_v62, %v6809_v26  ;;  %v5637_v14 = vld [vmem:[#allocation3 + $0x80] sm:$0x1]  ;;  %v5773_v37 = vrot.slane %v5636_v7, 5  ;;  %v6802_v26 = vrot.slane %v11800_v20, 5  ;;  %v11824_v7 = vpop.permute.xlu1 %6044 }
 0x27b   : > { %v7848_v10 = vrot.slane %v7846_v61, 4  ;;  %v5770_v45 = vsel %vm10238_vm14, %v5768_v29, %v5769_v17  ;;  %v11811_v44 = vld [vmem:[#allocation3 + $0x30] sm:$0xe]  ;;  %v6261_v31 = vshrl.u32 %v6116_v6, 16  ;;  %v5635_v62 = vld [vmem:[#allocation3 + $0x78] sm:$0xe]  ;;  %v7847_v60 = vsel %vm10238_vm14, %v9558_v41, %v7846_v61 }
 0x27c   : > { %v6813_v1 = vsel %vm10238_vm14, %v6811_v57, %v6812_v33  ;;  %v5775_v57 = vrot.slane %v5773_v37, 4  ;;  %v5210_v33 = vrot.slane %v5208_v11, 5  ;;  %v11818_v59 = vrot.slane %v5214_v35, 5  ;;  %v5074_v29 = vld [vmem:[#allocation3 + $0x38] sm:$0x1] }
 0x27d   : > { %v9511_v5 = vcombine.low %v6810_v27, %v6813_v1  ;;  %v7850_v49 = vsel %vm10238_vm14, %v7848_v10, %v7849_v48  ;;  %v9447_v2 = vcombine.low %v5767_v56, %v5770_v45  ;;  %v5776_v27 = vrot.slane %v5637_v14, 5  ;;  %v11822_v1 = vpop.permute.xlu0 %7627  ;;  %v6117_v6 = vld [vmem:[#allocation3 + $0x44] sm:$0x1]  ;;  %v6672_v30 = vld [vmem:[#allocation3 + $0x6c] sm:$0xe] }
 0x27e   : > { %6054 = vrot.lane.b32.xlu0 %v10038_v51, %s10092_s9  ;;  %v5220_v17 = vrot.slane %v5218_v16, 4  ;;  %v9574_v13 = vcombine.low %v7847_v60, %v7850_v49  ;;  %v6250_v55 = vrot.slane %v6248_v63, 4  ;;  %v6253_v10 = vrot.slane %v6251_v8, 5  ;;  %v5075_v51 = vld [vmem:[#allocation3 + $0x3c] sm:$0xf] }
 0x27f   : > { %6922 = vrot.lane.b32.xlu1 %v9511_v5, %s10101_s28  ;;  %v6674_v5 = vld [vmem:[#allocation3 + $0x74] sm:$0x1]  ;;  %v11826_v48 = vrot.slane %v6257_v39, 5  ;;  %v9432_v11 = vrot.slane %v5635_v62, 9  ;;  %v5777_v35 = vsel %vm10238_vm14, %v5775_v57, %v5776_v27  ;;  %v6804_v61 = vrot.slane %v6802_v26, 4 }
 0x280   : > { %v6263_v16 = vrot.slane %v6261_v31, 4  ;;  %v11836_v63 = vrot.slane %v13353_v36, 4  ;;  %v5224_v14 = vshll.u32 %v5074_v29, 16  ;;  %v6805_v41 = vrot.slane %v6674_v5, 5  ;;  %v7171_v49 = vld [vmem:[#allocation3 + $0x78] sm:$0xf] }
 0x281   : > { %13413 = vst [vmem:[#allocation9_spill] sm:$0xff] %v11826_v48  ;;  %v5774_v39 = vsel %vm10238_vm14, %v9432_v11, %v5773_v37  ;;  %v11844_v31 = vrot.slane %v13351_v54, 4  ;;  %v5211_v56 = vor.u32 %v5210_v33, %v11789_v25  ;;  %v5076_v62 = vld [vmem:[#allocation3 + $0x40] sm:$0xf]  ;;  %v5221_v60 = vor.u32 %v5220_v17, %v11818_v59  ;;  %v11850_v5 = vpop.permute.xlu0 %6042  ;;  %v11854_v25 = vpop.permute.xlu1 %6585 }
 0x282   : > { %7964 = vrot.lane.b32.xlu0 %v9574_v13, %s10100_s23  ;;  %v9448_v57 = vcombine.low %v5774_v39, %v5777_v35  ;;  %v6254_v27 = vor.u32 %v6253_v10, %v6250_v55  ;;  %v6267_v29 = vshll.u32 %v6117_v6, 16  ;;  %v9494_v13 = vrot.slane %v6672_v30, 9  ;;  %v11862_v39 = vld [vmem:[#allocation3 + $0x44] sm:$0x1] }
 0x283   : > { %5879 = vrot.lane.b32.xlu1 %v9447_v2, %s10096_s13  ;;  %v7172_v2 = vld [vmem:[#allocation3 + $0x7c] sm:$0xf]  ;;  %v6806_v37 = vsel %vm10238_vm14, %v6804_v61, %v6805_v41  ;;  %v6264_v11 = vor.u32 %v6263_v16, %v11826_v48  ;;  %v5229_v45 = vshrl.u32 %v5075_v51, 16  ;;  %v7388_v33 = vshrl.u32 %v7171_v49, 16  ;;  %13415 = vst [vmem:[#allocation11_spill] sm:$0xff] %v11862_v39 }
 0x284   : > { %v11856_v35 = vrot.slane %v5224_v14, 5  ;;  %v5232_v17 = vshll.u32 %v5075_v51, 16  ;;  %v5238_v55 = vshll.u32 %v5076_v62, 16  ;;  %v6803_v6 = vsel %vm10238_vm14, %v9494_v13, %v6802_v26  ;;  %v6130_v41 = vld [vmem:[#allocation3 + $0x78] sm:$0xf] }
 0x285   : > { %v7391_v10 = vshll.u32 %v7171_v49, 16  ;;  %v7397_v61 = vshll.u32 %v7172_v2, 16  ;;  %v7401_v30 = vshrl.u32 %v7172_v2, 16  ;;  %v9510_v16 = vcombine.low %v6803_v6, %v6806_v37  ;;  %v6131_v51 = vld [vmem:[#allocation3 + $0x7c] sm:$0xf] }
 0x286   : > { %5881 = vrot.lane.b32.xlu0 %v9448_v57, %s10096_s13  ;;  %13414 = vst [vmem:[#allocation10_spill] sm:$0xff] %v11856_v35  ;;  %v11864_v57 = vrot.slane %v5211_v56, 4  ;;  %v11866_v8 = vrot.slane %v5221_v60, 4  ;;  %v11868_v14 = vrot.slane %v6254_v27, 4  ;;  %v11870_v54 = vrot.slane %v6264_v11, 4  ;;  %v6584_v13 = vpop.permute.xlu0 %6583  ;;  %v11892_v11 = vpop.permute.xlu1 %7084 }
 0x287   : > { %v11872_v20 = vrot.slane %v6267_v29, 5  ;;  %v11874_v50 = vrot.slane %v5229_v45, 4  ;;  %v5242_v26 = vshrl.u32 %v5076_v62, 16  ;;  %v11877_v49 = vld [vmem:[#allocation3 + $0x80] sm:$0x1]  ;;  %v11879_v2 = vrot.slane %v7388_v33, 4 }
 0x288   : > { %13416 = vst [vmem:[#allocation12_spill] sm:$0xff] %v11864_v57  ;;  %13417 = vst [vmem:[#allocation13_spill] sm:$0xff] %v11866_v8  ;;  %v11881_v56 = vrot.slane %v5232_v17, 5  ;;  %v11883_v60 = vrot.slane %v5238_v55, 5  ;;  %v11886_v37 = vrot.slane %v7391_v10, 5  ;;  %v11888_v29 = vrot.slane %v7397_v61, 5 }
 0x289   : > { %13418 = vst [vmem:[#allocation14_spill] sm:$0xff] %v11868_v14  ;;  %13419 = vst [vmem:[#allocation15_spill] sm:$0xff] %v11870_v54  ;;  %v11890_v45 = vrot.slane %v7401_v30, 4  ;;  %v6368_v62 = vshrl.u32 %v6130_v41, 16  ;;  %v6377_v33 = vshll.u32 %v6131_v51, 16  ;;  %v6381_v6 = vshrl.u32 %v6131_v51, 16 }
 0x28a   : > { %13420 = vst [vmem:[#allocation16_spill] sm:$0xff] %v11872_v20  ;;  %13421 = vst [vmem:[#allocation17_spill] sm:$0xff] %v11874_v50  ;;  %6920 = vrot.lane.b32.xlu0 %v9510_v16, %s10101_s28  ;;  %v6128_v55 = vld [vmem:[#allocation3 + $0x70] sm:$0xf]  ;;  %v11898_v10 = vrot.slane %v5242_v26, 4  ;;  %v6371_v16 = vshll.u32 %v6130_v41, 16 }
 0x28b   : > { %13422 = vst [vmem:[#allocation18_spill] sm:$0xff] %v11881_v56  ;;  %13423 = vst [vmem:[#allocation19_spill] sm:$0xff] %v11883_v60  ;;  %v11902_v30 = vld [vmem:[#allocation3 + $0x80] sm:$0x1]  ;;  %v11911_v26 = vrot.slane %v6368_v62, 4  ;;  %v11918_v41 = vrot.slane %v6377_v33, 5 }
 0x28c   : > { %6632 = vst.msk [vmem:[#allocation5] sm:$0xff] %vm6631_vm11, %v6584_v13  ;;  %13424 = vst [vmem:[#allocation20_spill] sm:$0xff] %v11898_v10  ;;  %v11922_v17 = vld [vmem:[#allocation3 + $0x7c] sm:$0xf]  ;;  %v6357_v32 = vshrl.u32 %v6128_v55, 16  ;;  %v11927_v54 = vrot.slane %v6371_v16, 5 }
 0x28d   : > { %6953 = vst.msk [vmem:[#allocation5] sm:$0xff] %vm6952_vm9, %v11779_v40  ;;  %v5545_v39 = vpop.permute.xlu1 %5544  ;;  %v11930_v33 = vld [vmem:[#allocation3 + $0x78] sm:$0xf]  ;;  %v5362_v16 = vshrl.u32 %v11922_v17, 16  ;;  %v4873_v10 = vld [vmem:[#allocation3 + $0x84] sm:$0xf] }
 0x28e   : > { %v9758_v61 = vpop.f32.mrb[20].mxu0  ;;  %7131 = vst.msk [vmem:[#allocation5] sm:$0xff] %vm7130_vm10, %v11725_v52  ;;  %v4877_v57 = vld [vmem:[#allocation3 + $0x8c] sm:$0x1] }
 0x28f   : > { %v4314_v13 = vadd.f32 %v11636_v53, %v9758_v61  ;;  %v4305_v27 = vpop.f32.mrb[21].mxu0  ;;  %7676 = vst.msk [vmem:[#allocation5] sm:$0xff] %vm7675_vm12, %v11822_v1  ;;  %v11920_v61 = vrot.slane %v6381_v6, 4  ;;  %v6353_v1 = vshll.u32 %v6128_v55, 16  ;;  %v5358_v55 = vshll.u32 %v11922_v17, 16 }
 0x290   : > { %v4306_v52 = vadd.f32 %v11636_v53, %v4305_v27  ;;  %v9759_v36 = vpop.f32.mrb[22].mxu0  ;;  %7997 = vst.msk [vmem:[#allocation5] sm:$0xff] %vm7996_vm5, %v11748_v46  ;;  %v11948_v46 = vld [vmem:[#allocation3 + $0x6c] sm:$0xf] }
 0x291   : > { %v4374_v40 = vmax.f32 %v4314_v13, 0.0  ;;  %v4317_v51 = vadd.f32 %v11636_v53, %v9759_v36  ;;  %v4308_v62 = vpop.f32.mrb[23].mxu0  ;;  %5591 = vst.msk [vmem:[#allocation5 + $0x10] sm:$0xff] %vm5588_vm2, %v5545_v39  ;;  %v11933_v13 = vpop.permute.xlu0 %7952  ;;  %v11945_v39 = vrot.slane %v6357_v32, 4  ;;  %v11954_v36 = vrot.slane %v5358_v55, 5 }
 0x292   : > { %v4372_v0 = vmax.f32 %v4306_v52, 0.0  ;;  %v4309_v27 = vadd.f32 %v11636_v53, %v4308_v62  ;;  %v10075_v52 = vld [vmem:[#allocation3 + $0x30] sm:$0xff]   ;;  %5912 = vst.msk [vmem:[#allocation5 + $0x10] sm:$0xff] %vm13363_vm3, %v11759_v19  ;;  %v11941_v62 = vrot.slane %v6353_v1, 5  ;;  %v5543_v14 = vpop.permute.xlu1 %5542  ;;  %v5325_v17 = vshrl.u32 %v11948_v46, 16 }
 0x293   : > { %v9663_v6 = vpack.c.bf16 %v4374_v40, %v4374_v40  ;;  %v4375_v20 = vmax.f32 %v4317_v51, 0.0  ;;  %6089 = vst.msk [vmem:[#allocation5 + $0x10] sm:$0xff] %vm13362_vm1, %v11850_v5  ;;  %v5088_v55 = vld [vmem:[#allocation3 + $0x70] sm:$0xf] }
 0x294   : > { %v9661_v58 = vpack.c.bf16 %v4372_v0, %v4372_v0  ;;  %v4373_v53 = vmax.f32 %v4309_v27, 0.0  ;;  %5048 = vst.msk [vmem:[#allocation5 + $0x20] sm:$0xff] %vm5043_vm7, %v10075_v52  ;;  %v4880_v0 = vld [vmem:[#allocation3 + $0x90] sm:$0xf]  ;;  %v4884_v52 = vld [vmem:[#allocation3 + $0x98] sm:$0x1] }
 0x295   : > { %v4668_v40 = vshrl.u32 %v9663_v6, 16  ;;  %v9664_v51 = vpack.c.bf16 %v4375_v20, %v4375_v20  ;;  %v4671_v48 = vshll.u32 %v9663_v6, 16  ;;  %5590 = vst.msk [vmem:[#allocation5 + $0x8] sm:$0xff] %vm5588_vm2, %v5543_v14  ;;  %v11962_v14 = vpop.permute.xlu0 %7950 }
 0x296   : > { %v4651_v19 = vshrl.u32 %v9661_v58, 16  ;;  %v9662_v27 = vpack.c.bf16 %v4373_v53, %v4373_v53  ;;  %v4654_v56 = vshll.u32 %v9661_v58, 16  ;;  %5911 = vst.msk [vmem:[#allocation5 + $0x8] sm:$0xff] %vm13363_vm3, %v11803_v24  ;;  %v5328_v58 = vshll.u32 %v11948_v46, 16  ;;  %v11967_v24 = vpop.permute.xlu1 %6910 }
 0x297   : > { %v4670_v20 = vrot.slane %v4668_v40, 7  ;;  %v4676_v5 = vshrl.u32 %v9664_v51, 16  ;;  %v8013_v32 = vld [vmem:[#allocation5] sm:$0xff]  ;;  %v4679_v40 = vshll.u32 %v9664_v51, 16  ;;  %6088 = vst.msk [vmem:[#allocation5 + $0x8] sm:$0xff] %vm13362_vm1, %v11765_v42  ;;  %vm13425_vm1 = vcmask 60416  }
 0x298   : > { %v4653_v60 = vrot.slane %v4651_v19, 7  ;;  %v4659_v50 = vshrl.u32 %v9662_v27, 16  ;;  %9778 = vmatprep.mubr.msk.bf16.mxu0 %vm8072_vm4, %v8013_v32  ;;  %v4662_v8 = vshll.u32 %v9662_v27, 16  ;;  %6633 = vst.msk [vmem:[#allocation5 + $0x8] sm:$0xff] %vm6631_vm11, %v11854_v25  ;;  %v11969_v32 = vrot.slane %v5362_v16, 4  ;;  %vm13426_vm3 = vmmov %vm13425_vm1 }
 0x299   : > { %v4673_v53 = vor.u32 %v4671_v48, %v4670_v20  ;;  %v4678_v6 = vrot.slane %v4676_v5, 7  ;;  %v516_v48 = vld [vmem:[#allocation3 + $0xc8] sm:$0x1]  ;;  %v4674_v51 = vrot.slane %v4670_v20, 4  ;;  %6954 = vst.msk [vmem:[#allocation5 + $0x8] sm:$0xff] %vm6952_vm9, %v11782_v23  ;;  %v5334_v20 = vshll.u32 %v5088_v55, 16 }
 0x29a   : > { %v4656_v19 = vor.u32 %v4654_v56, %v4653_v60  ;;  %v4661_v1 = vrot.slane %v4659_v50, 7  ;;  %v513_v50 = vld [vmem:[#allocation3 + $0xbc] sm:$0x1]  ;;  %v4657_v56 = vrot.slane %v4653_v60, 4  ;;  %7132 = vst.msk [vmem:[#allocation5 + $0x8] sm:$0xff] %vm7130_vm10, %v11892_v11  ;;  %v517_v23 = vsel %vm11309_vm6, 0, %v516_v48  ;;  %v12005_v38 = vpop.permute.xlu1 %5867 }
 0x29b   : > { %v4881_v42 = vsel %vm11452_vm0, %v4673_v53, %v4880_v0  ;;  %v4681_v5 = vor.u32 %v4679_v40, %v4678_v6  ;;  %v4683_v35 = vrot.slane %v4678_v6, 4  ;;  %v5338_v11 = vshrl.u32 %v5088_v55, 16  ;;  %518 = vst [vmem:[#allocation3 + $0xc8] sm:$0x1] %v517_v23  ;;  %v12003_v55 = vpop.permute.xlu0 %6908 }
 0x29c   : > { %4882 = vst [vmem:[#allocation3 + $0x90] sm:$0xf] %v4881_v42  ;;  %v4874_v25 = vsel %vm11452_vm0, %v4656_v19, %v4873_v10  ;;  %v4664_v46 = vor.u32 %v4662_v8, %v4661_v1  ;;  %v4666_v16 = vrot.slane %v4661_v1, 4  ;;  %v514_v10 = vsel %vm11309_vm6, 0, %v513_v50  ;;  %v6129_v19 = vld [vmem:[#allocation3 + $0x74] sm:$0x1] }
 0x29d   : > { %4875 = vst [vmem:[#allocation3 + $0x84] sm:$0xf] %v4874_v25  ;;  %v4682_v0 = vsel %vm10199_vm8, %v4674_v51, %v4681_v5  ;;  %v4885_v27 = vsel %vm11298_vm13, %v4683_v35, %v4884_v52  ;;  %v13427_v35 = vor.u32 %v11886_v37, %v11879_v2  ;;  %v13428_v52 = vor.u32 %v11890_v45, %v11888_v29  ;;  %v5092_v25 = vld [vmem:[#allocation3 + $0x80] sm:$0x1] }
 0x29e   : > { %4883 = vst.msk [vmem:[#allocation3 + $0x94] sm:$0xf] %vm13425_vm1, %v4682_v0  ;;  %4886 = vst [vmem:[#allocation3 + $0x98] sm:$0x1] %v4885_v27  ;;  %v4665_v8 = vsel %vm10199_vm8, %v4657_v56, %v4664_v46  ;;  %v4878_v60 = vsel %vm11298_vm13, %v4666_v16, %v4877_v57  ;;  %v13429_v6 = vshll.u32 %v11877_v49, 16  ;;  %v6374_v57 = vor.u32 %v11927_v54, %v11911_v26 }
 0x29f   : > { %4876 = vst.msk [vmem:[#allocation3 + $0x88] sm:$0xf] %vm13426_vm3, %v4665_v8  ;;  %4879 = vst [vmem:[#allocation3 + $0x8c] sm:$0x1] %v4878_v60  ;;  %v7395_v1 = vrot.slane %v13427_v35, 4  ;;  %v7405_v53 = vrot.slane %v13428_v52, 4  ;;  %v13434_v54 = vor.u32 %v11920_v61, %v11918_v41  ;;  %v5365_v0 = vor.u32 %v11969_v32, %v11954_v36  ;;  %v12032_v52 = vpop.permute.xlu0 %7631 }
 0x2a0   : > { %v7409_v40 = vrot.slane %v13429_v6, 5  ;;  %515 = vst [vmem:[#allocation3 + $0xbc] sm:$0x1] %v514_v10  ;;  %v13430_v48 = vshrl.u32 %v11913_v34, 16  ;;  %v13431_v37 = vshll.u32 %v11913_v34, 16  ;;  %v13432_v45 = vshrl.u32 %v11930_v33, 16 }
 0x2a1   : > { %v13433_v49 = vshll.u32 %v11930_v33, 16  ;;  %v6385_v26 = vrot.slane %v13434_v54, 4  ;;  %v13435_v50 = vshll.u32 %v11902_v30, 16  ;;  %v5327_v46 = vrot.slane %v5325_v17, 4  ;;  %v5089_v27 = vld [vmem:[#allocation3 + $0x74] sm:$0x1] }
 0x2a2   : > { %v6346_v2 = vrot.slane %v13430_v48, 4  ;;  %v6349_v51 = vrot.slane %v13431_v37, 5  ;;  %v5351_v42 = vrot.slane %v13432_v45, 4  ;;  %v5330_v16 = vrot.slane %v5328_v58, 5  ;;  %v12026_v8 = vld [vmem:[#allocation3 + $0x48] sm:$0xf] }
 0x2a3   : > { %v5354_v5 = vrot.slane %v13433_v49, 5  ;;  %v6389_v56 = vrot.slane %v13435_v50, 5  ;;  %v6360_v34 = vor.u32 %v11945_v39, %v11941_v62  ;;  %v12024_v23 = vrot.slane %v5334_v20, 5  ;;  %v12034_v6 = vld [vmem:[#allocation3 + $0x4c] sm:$0xf] }
 0x2a4   : > { %v5340_v33 = vrot.slane %v5338_v11, 4  ;;  %v6375_v61 = vrot.slane %v6374_v57, 4  ;;  %v6363_v60 = vshll.u32 %v6129_v19, 16  ;;  %v7410_v30 = vsel %vm10274_vm15, %v7405_v53, %v7409_v40  ;;  %v12039_v40 = vpop.permute.xlu1 %6589 }
 0x2a5   : > { %v6350_v10 = vor.u32 %v6349_v51, %v6346_v2  ;;  %v5355_v17 = vor.u32 %v5354_v5, %v5351_v42  ;;  %v5368_v58 = vshll.u32 %v5092_v25, 16  ;;  %v10040_v35 = vld [vmem:[#allocation3 + $0x90] sm:$0xff]   ;;  %v6390_v39 = vsel %vm10274_vm15, %v6385_v26, %v6389_v56 }
 0x2a6   : > { %v5331_v32 = vor.u32 %v5330_v16, %v5327_v46  ;;  %v5344_v20 = vshll.u32 %v5089_v27, 16  ;;  %v10041_v11 = vld [vmem:[#allocation3 + $0x90] sm:$0xff]   ;;  %v7400_v57 = vsel %vm10274_vm15, %v7395_v1, %v11888_v29  ;;  %v6361_v19 = vrot.slane %v6360_v34, 4  ;;  %7102 = vrot.lane.b32.xlu0 %v10040_v35, %s10098_s21  ;;  %v7724_v34 = vld [vmem:[#allocation3 + $0x98] sm:$0x1] }
 0x2a7   : > { %v5366_v53 = vrot.slane %v5365_v0, 4  ;;  %v5341_v48 = vor.u32 %v5340_v33, %v12024_v23  ;;  %v9542_v2 = vcombine.low %v7400_v57, %v7410_v30  ;;  %v6380_v37 = vsel %vm10274_vm15, %v6375_v61, %v11918_v41  ;;  %v12046_v45 = vld [vmem:[#allocation3 + $0x94] sm:$0xf]  ;;  %6060 = vrot.lane.b32.xlu1 %v10041_v11, %s10092_s9  ;;  %v7722_v16 = vld [vmem:[#allocation3 + $0x90] sm:$0xe]  ;;  %v6588_v61 = vpop.permute.xlu0 %6587 }
 0x2a8   : > { %v6365_v51 = vrot.slane %v6363_v60, 5  ;;  %v7292_v42 = vshrl.u32 %v12026_v8, 16  ;;  %v9479_v29 = vcombine.low %v6380_v37, %v6390_v39  ;;  %v6351_v1 = vrot.slane %v6350_v10, 4  ;;  %v12055_v56 = vld [vmem:[#allocation3 + $0x94] sm:$0xf]  ;;  %v12062_v27 = vpop.permute.xlu1 %7088  ;;  %6634 = vst.msk [vmem:[#allocation5 + $0x10] sm:$0xff] %vm6631_vm11, %v6588_v61 }
 0x2a9   : > { %v5356_v49 = vrot.slane %v5355_v17, 4  ;;  %v5370_v5 = vrot.slane %v5368_v58, 5  ;;  %v7860_v54 = vrot.slane %v12046_v45, 5  ;;  %v12051_v26 = vrot.slane %v5331_v32, 4  ;;  %v5641_v60 = vld [vmem:[#allocation3 + $0x90] sm:$0xe] }
 0x2aa   : > { %v12053_v50 = vrot.slane %v5344_v20, 5  ;;  %v7295_v41 = vshll.u32 %v12026_v8, 16  ;;  %v6366_v25 = vsel %vm10274_vm15, %v6361_v19, %v6365_v51  ;;  %v5342_v0 = vrot.slane %v5341_v48, 4  ;;  %7643 = vrot.lane.b32.xlu0 %v9542_v2, %s10099_s22  ;;  %v12066_v30 = vld [vmem:[#allocation3 + $0x98] sm:$0x1]  ;;  %6955 = vst.msk [vmem:[#allocation5 + $0x10] sm:$0xff] %vm6952_vm9, %v12003_v55 }
 0x2ab   : > { %v5371_v46 = vsel %vm10274_vm15, %v5366_v53, %v5370_v5  ;;  %v7301_v33 = vshll.u32 %v12034_v6, 16  ;;  %v12068_v10 = vld [vmem:[#allocation3 + $0x94] sm:$0xf]  ;;  %v13436_v17 = vrot.slane %v11753_v28, 5  ;;  %v13437_v58 = vrot.slane %v11751_v43, 9  ;;  %6601 = vrot.lane.b32.xlu1 %v9479_v29, %s10095_s12  ;;  %v10043_v43 = vld [vmem:[#allocation3 + $0x84] sm:$0xff]  }
 0x2ac   : > { %v13438_v39 = vrot.slane %v11755_v9, 5  ;;  %v13439_v20 = vrot.slane %v11761_v15, 5  ;;  %v13440_v11 = vrot.slane %v11811_v44, 9  ;;  %v6356_v9 = vsel %vm10274_vm15, %v6351_v1, %v11941_v62  ;;  %v12102_v44 = vld [vmem:[#allocation3 + $0x90] sm:$0xe]  ;;  %v10044_v29 = vld [vmem:[#allocation3 + $0x84] sm:$0xff]   ;;  %v7630_v1 = vpop.permute.xlu1 %7629 }
 0x2ad   : > { %v12076_v35 = vsel %vm10238_vm14, %v13437_v58, %v13436_v17  ;;  %v5787_v15 = vrot.slane %v12055_v56, 5  ;;  %v12104_v57 = vld [vmem:[#allocation3 + $0x88] sm:$0xf]  ;;  %v13441_v19 = vrot.slane %v11813_v3, 5  ;;  %v9478_v62 = vcombine.low %v6356_v9, %v6366_v25  ;;  %v6683_v2 = vld [vmem:[#allocation3 + $0x98] sm:$0x1] }
 0x2ae   : > { %v12083_v32 = vsel %vm10238_vm14, %v11836_v63, %v13438_v39  ;;  %v12091_v28 = vsel %vm10238_vm14, %v13440_v11, %v13439_v20  ;;  %v5361_v63 = vsel %vm10274_vm15, %v5356_v49, %v11954_v36  ;;  %v7862_v36 = vrot.slane %v7860_v54, 4  ;;  %v12118_v51 = vld [vmem:[#allocation3 + $0x84] sm:$0xe]  ;;  %7133 = vst.msk [vmem:[#allocation5 + $0x10] sm:$0xff] %vm7130_vm10, %v11792_v12  ;;  %v12126_v5 = vld [vmem:[#allocation3 + $0x88] sm:$0xf]  ;;  %6058 = vrot.lane.b32.xlu0 %v10043_v43, %s10092_s9 }
 0x2af   : > { %v12111_v53 = vsel %vm10238_vm14, %v11844_v31, %v13441_v19  ;;  %v9416_v48 = vcombine.low %v5361_v63, %v5371_v46  ;;  %v6823_v37 = vrot.slane %v12068_v10, 5  ;;  %v9560_v3 = vrot.slane %v7722_v16, 9  ;;  %7678 = vst.msk [vmem:[#allocation5 + $0x10] sm:$0xff] %vm7675_vm12, %v12032_v52  ;;  %7677 = vst.msk [vmem:[#allocation5 + $0x8] sm:$0xff] %vm7675_vm12, %v7630_v1  ;;  %v7721_v12 = vld [vmem:[#allocation3 + $0x8c] sm:$0x1]  ;;  %7100 = vrot.lane.b32.xlu1 %v10044_v29, %s10098_s21 }
 0x2b0   : > { %v5347_v31 = vsel %vm10274_vm15, %v5342_v0, %v12053_v50  ;;  %v7853_v49 = vrot.slane %v12104_v57, 5  ;;  %v7305_v55 = vshrl.u32 %v12034_v6, 16  ;;  %v7863_v56 = vrot.slane %v7724_v34, 5  ;;  %7999 = vst.msk [vmem:[#allocation5 + $0x10] sm:$0xff] %vm7996_vm5, %v11933_v13  ;;  %7998 = vst.msk [vmem:[#allocation5 + $0x8] sm:$0xff] %vm7996_vm5, %v11962_v14  ;;  %v10077_v19 = vld [vmem:[#allocation3 + $0x48] sm:$0xff]  }
 0x2b1   : > { %v9434_v25 = vrot.slane %v5641_v60, 9  ;;  %v5790_v46 = vrot.slane %v12066_v30, 5  ;;  %v9497_v50 = vrot.slane %v12102_v44, 9  ;;  %v5789_v16 = vrot.slane %v5787_v15, 4  ;;  %v6679_v61 = vld [vmem:[#allocation3 + $0x88] sm:$0xf] }
 0x2b2   : > { %v6826_v0 = vrot.slane %v6683_v2, 5  ;;  %v9559_v52 = vrot.slane %v12118_v51, 9  ;;  %v5780_v34 = vrot.slane %v12126_v5, 5  ;;  %v7864_v60 = vsel %vm10238_vm14, %v7862_v36, %v7863_v56  ;;  %v7177_v17 = vld [vmem:[#allocation3 + $0x90] sm:$0xf]  ;;  %6599 = vrot.lane.b32.xlu0 %v9478_v62, %s10095_s12  ;;  %v10076_v29 = vld [vmem:[#allocation3 + $0x3c] sm:$0xff]  }
 0x2b3   : > { %v5337_v30 = vsel %vm10274_vm15, %v12051_v26, %v12024_v23  ;;  %v6825_v10 = vrot.slane %v6823_v37, 4  ;;  %v6816_v13 = vrot.slane %v6679_v61, 5  ;;  %v7178_v58 = vld [vmem:[#allocation3 + $0x94] sm:$0xf]  ;;  %v7861_v14 = vsel %vm10238_vm14, %v9560_v3, %v7860_v54  ;;  %v5638_v43 = vld [vmem:[#allocation3 + $0x84] sm:$0xe]  ;;  %5560 = vrot.lane.b32.xlu1 %v9416_v48, %s10091_s8 }
 0x2b4   : > { %v9415_v39 = vcombine.low %v5337_v30, %v5347_v31  ;;  %v7855_v20 = vrot.slane %v7853_v49, 4  ;;  %v7856_v11 = vrot.slane %v7721_v12, 5  ;;  %v5640_v9 = vld [vmem:[#allocation3 + $0x8c] sm:$0x1]  ;;  %v5788_v63 = vsel %vm10238_vm14, %v9434_v25, %v5787_v15  ;;  %v6678_v36 = vld [vmem:[#allocation3 + $0x84] sm:$0xe] }
 0x2b5   : > { %v5782_v23 = vrot.slane %v5780_v34, 4  ;;  %v6680_v26 = vld [vmem:[#allocation3 + $0x8c] sm:$0x1]  ;;  %v7436_v44 = vshrl.u32 %v7177_v17, 16  ;;  %v7439_v57 = vshll.u32 %v7177_v17, 16  ;;  %v9576_v45 = vcombine.low %v7861_v14, %v7864_v60  ;;  %5050 = vst.msk [vmem:[#allocation5 + $0x30] sm:$0xff] %vm5043_vm7, %v10077_v19 }
 0x2b6   : > { %v6818_v54 = vrot.slane %v6816_v13, 4  ;;  %v7445_v2 = vshll.u32 %v7178_v58, 16  ;;  %v7449_v51 = vshrl.u32 %v7178_v58, 16  ;;  %v5791_v3 = vsel %vm10238_vm14, %v5789_v16, %v5790_v46  ;;  %v7179_v31 = vld [vmem:[#allocation3 + $0x98] sm:$0x1]  ;;  %5049 = vst.msk [vmem:[#allocation5 + $0x28] sm:$0xff] %vm5043_vm7, %v10076_v29 }
 0x2b7   : > { %v5783_v62 = vrot.slane %v5640_v9, 5  ;;  %v7438_v1 = vrot.slane %v7436_v44, 4  ;;  %v7441_v15 = vrot.slane %v7439_v57, 5  ;;  %v6824_v5 = vsel %vm10238_vm14, %v9497_v50, %v6823_v37  ;;  %7968 = vrot.lane.b32.xlu0 %v9576_v45, %s10100_s23  ;;  %v8014_v37 = vld [vmem:[#allocation5 + $0x8] sm:$0xff]  ;;  %v6136_v50 = vld [vmem:[#allocation3 + $0x90] sm:$0xf]  ;;  %5558 = vrot.lane.b32.xlu1 %v9415_v39, %s10091_s8 }
 0x2b8   : > { %v6827_v48 = vsel %vm10238_vm14, %v6825_v10, %v6826_v0  ;;  %v7857_v56 = vsel %vm10238_vm14, %v7855_v20, %v7856_v11  ;;  %v6819_v25 = vrot.slane %v6680_v26, 5  ;;  %v7854_v46 = vsel %vm10238_vm14, %v9559_v52, %v7853_v49  ;;  %9779 = vmatmul.mubr.msk.bf16.vlgmr.msra.gmra.mrb[32].mxu0 %vm8072_vm4, %v8014_v37  ;;  %v8015_v60 = vld [vmem:[#allocation5 + $0x10] sm:$0xff]  ;;  %v6137_v52 = vld [vmem:[#allocation3 + $0x94] sm:$0xf]  ;;  %v6138_v11 = vld [vmem:[#allocation3 + $0x98] sm:$0x1] }
 0x2b9   : > { %v9433_v12 = vrot.slane %v5638_v43, 9  ;;  %v5784_v16 = vsel %vm10238_vm14, %v5782_v23, %v5783_v62  ;;  %v9496_v61 = vrot.slane %v6678_v36, 9  ;;  %v12177_v30 = vrot.slane %v7445_v2, 5  ;;  %9782 = vmatprep.mubr.msk.bf16.mxu0 %vm8072_vm4, %v8015_v60  ;;  %v6133_v26 = vld [vmem:[#allocation3 + $0x84] sm:$0xf] }
 0x2ba   : > { %v12174_v0 = vsel %vm10238_vm14, %v6818_v54, %v6819_v25  ;;  %v7451_v10 = vrot.slane %v7449_v51, 4  ;;  %v7455_v49 = vshll.u32 %v7179_v31, 16  ;;  %v9450_v17 = vcombine.low %v5788_v63, %v5791_v3  ;;  %v5547_v63 = vpop.permute.xlu1 %5546  ;;  %v12189_v54 = vld [vmem:[%s13338_s2] ss:$0 sm:$0xff] }
 0x2bb   : > { %v9513_v58 = vcombine.low %v6824_v5, %v6827_v48  ;;  %v9575_v14 = vcombine.low %v7854_v46, %v7857_v56  ;;  %v7442_v20 = vor.u32 %v7441_v15, %v7438_v1  ;;  %v5781_v39 = vsel %vm10238_vm14, %v9433_v12, %v5780_v34  ;;  %v9762_v44 = vpop.f32.mrb[24].mxu0  ;;  %5592 = vst.msk [vmem:[#allocation5 + $0x18] sm:$0xff] %vm5588_vm2, %v5547_v63  ;;  %v6134_v1 = vld [vmem:[#allocation3 + $0x88] sm:$0xf] }
 0x2bc   : > { %v6817_v43 = vsel %vm10238_vm14, %v9496_v61, %v6816_v13  ;;  %v6416_v9 = vshrl.u32 %v6136_v50, 16  ;;  %v6419_v23 = vshll.u32 %v6136_v50, 16  ;;  %5885 = vrot.lane.b32.xlu0 %v9450_v17, %s10096_s13  ;;  %v9449_v57 = vcombine.low %v5781_v39, %v5784_v16  ;;  %v4321_v13 = vpop.f32.mrb[25].mxu0  ;;  %v10063_v39 = vld [vmem:[#allocation3 + $0x78] sm:$0xff]  }
 0x2bd   : > { %v9512_v19 = vcombine.low %v6817_v43, %v12174_v0  ;;  %v6425_v45 = vshll.u32 %v6137_v52, 16  ;;  %v6429_v36 = vshrl.u32 %v6137_v52, 16  ;;  %v4330_v34 = vadd.f32 %v12189_v54, %v9762_v44  ;;  %6926 = vrot.lane.b32.xlu1 %v9513_v58, %s10101_s28  ;;  %v9763_v62 = vpop.f32.mrb[26].mxu0  ;;  %5054 = vst.msk [vmem:[#allocation5 + $0x50] sm:$0xff] %vm5043_vm7, %v10063_v39 }
 0x2be   : > { %v7452_v2 = vor.u32 %v7451_v10, %v12177_v30  ;;  %v12195_v51 = vrot.slane %v7455_v49, 5  ;;  %v6435_v29 = vshll.u32 %v6138_v11, 16  ;;  %v4322_v3 = vadd.f32 %v12189_v54, %v4321_v13  ;;  %v4324_v25 = vpop.f32.mrb[27].mxu0  ;;  %v4898_v13 = vld [vmem:[#allocation3 + $0xb0] sm:$0x1] }
 0x2bf   : > { %vm13442_vm6 = vcmask 195712   ;;  %v12200_v31 = vrot.slane %v7442_v20, 4  ;;  %v6392_v15 = vshrl.u32 %v6133_v26, 16  ;;  %v6395_v5 = vshll.u32 %v6133_v26, 16 }
 0x2c0   : > { %5913 = vst.msk [vmem:[#allocation5 + $0x18] sm:$0xff] %vm13442_vm6, %v12005_v38  ;;  %v4378_v48 = vmax.f32 %v4330_v34, 0.0  ;;  %v4333_v56 = vadd.f32 %v12189_v54, %v9763_v62  ;;  %vm13443_vm3 = vcmask 261312   ;;  %v12205_v46 = vrot.slane %v6416_v9, 4  ;;  %7966 = vrot.lane.b32.xlu0 %v9575_v14, %s10100_s23  ;;  %v7634_v14 = vpop.permute.xlu1 %7633  ;;  %vm13444_vm6 = vmmov %vm13425_vm1 }
 0x2c1   : > { %6090 = vst.msk [vmem:[#allocation5 + $0x18] sm:$0xff] %vm13443_vm3, %v11824_v7  ;;  %v12207_v12 = vrot.slane %v6419_v23, 5  ;;  %v4376_v16 = vmax.f32 %v4322_v3, 0.0  ;;  %v4325_v61 = vadd.f32 %v12189_v54, %v4324_v25  ;;  %v12213_v38 = vrot.slane %v6425_v45, 5  ;;  %5883 = vrot.lane.b32.xlu1 %v9449_v57, %s10096_s13  ;;  %v4887_v57 = vld [vmem:[#allocation3 + $0x9c] sm:$0xf] }
 0x2c2   : > { %6635 = vst.msk [vmem:[#allocation5 + $0x18] sm:$0xff] %vm6631_vm11, %v12039_v40  ;;  %v12215_v37 = vrot.slane %v6429_v36, 4  ;;  %v9667_v50 = vpack.c.bf16 %v4378_v48, %v4378_v48  ;;  %v4379_v0 = vmax.f32 %v4333_v56, 0.0  ;;  %v12220_v7 = vrot.slane %v7452_v2, 4  ;;  %v10064_v48 = vld [vmem:[#allocation3 + $0x6c] sm:$0xff]  }
 0x2c3   : > { %6956 = vst.msk [vmem:[#allocation5 + $0x18] sm:$0xff] %vm6952_vm9, %v11967_v24  ;;  %v6401_v60 = vshll.u32 %v6134_v1, 16  ;;  %v9665_v10 = vpack.c.bf16 %v4376_v16, %v4376_v16  ;;  %v4377_v49 = vmax.f32 %v4325_v61, 0.0  ;;  %v12224_v40 = vrot.slane %v6392_v15, 4  ;;  %v4894_v24 = vld [vmem:[#allocation3 + $0xa8] sm:$0xf] }
 0x2c4   : > { %7134 = vst.msk [vmem:[#allocation5 + $0x18] sm:$0xff] %vm7130_vm10, %v12062_v27  ;;  %v12226_v52 = vrot.slane %v6395_v5, 5  ;;  %v4702_v17 = vshrl.u32 %v9667_v50, 16  ;;  %v9668_v58 = vpack.c.bf16 %v4379_v0, %v4379_v0  ;;  %v12228_v20 = vrot.slane %v6435_v29, 5  ;;  %6924 = vrot.lane.b32.xlu0 %v9512_v19, %s10101_s28  ;;  %v5096_v29 = vld [vmem:[#allocation3 + $0x90] sm:$0xf] }
 0x2c5   : > { %v6405_v11 = vshrl.u32 %v6134_v1, 16  ;;  %v4685_v43 = vshrl.u32 %v9665_v10, 16  ;;  %v9666_v9 = vpack.c.bf16 %v4377_v49, %v4377_v49  ;;  %7679 = vst.msk [vmem:[#allocation5 + $0x18] sm:$0xff] %vm7675_vm12, %v7634_v14  ;;  %v6422_v27 = vor.u32 %v12207_v12, %v12205_v46  ;;  %v4891_v15 = vld [vmem:[#allocation3 + $0xa4] sm:$0x1] }
 0x2c6   : > { %v6432_v23 = vor.u32 %v12215_v37, %v12213_v38  ;;  %v4704_v26 = vrot.slane %v4702_v17, 7  ;;  %v4705_v44 = vshll.u32 %v9667_v50, 16  ;;  %v4710_v63 = vshrl.u32 %v9668_v58, 16  ;;  %v6135_v37 = vld [vmem:[#allocation3 + $0x8c] sm:$0x1]  ;;  %5053 = vst.msk [vmem:[#allocation5 + $0x48] sm:$0xff] %vm5043_vm7, %v10064_v48 }
 0x2c7   : > { %v12236_v45 = vrot.slane %v6401_v60, 5  ;;  %v4687_v36 = vrot.slane %v4685_v43, 7  ;;  %v4688_v34 = vshll.u32 %v9665_v10, 16  ;;  %v4693_v19 = vshrl.u32 %v9666_v9, 16  ;;  %v5097_v10 = vld [vmem:[#allocation3 + $0x94] sm:$0xf] }
 0x2c8   : > { %v6398_v2 = vor.u32 %v12226_v52, %v12224_v40  ;;  %v4707_v3 = vor.u32 %v4705_v44, %v4704_v26  ;;  %v4712_v62 = vrot.slane %v4710_v63, 7  ;;  %v4713_v1 = vshll.u32 %v9668_v58, 16  ;;  %v7174_v17 = vld [vmem:[#allocation3 + $0x84] sm:$0xf]  ;;  %v7175_v43 = vld [vmem:[#allocation3 + $0x88] sm:$0xf] }
 0x2c9   : > { %v6407_v5 = vrot.slane %v6405_v11, 4  ;;  %v4708_v56 = vrot.slane %v4704_v26, 4  ;;  %v4690_v25 = vor.u32 %v4688_v34, %v4687_v36  ;;  %v4695_v16 = vrot.slane %v4693_v19, 7 }
 0x2ca   : > { %v4696_v61 = vshll.u32 %v9666_v9, 16  ;;  %v4895_v50 = vsel %vm11452_vm0, %v4707_v3, %v4894_v24  ;;  %v4715_v0 = vor.u32 %v4713_v1, %v4712_v62  ;;  %v4717_v60 = vrot.slane %v4712_v62, 4  ;;  %v5098_v1 = vld [vmem:[#allocation3 + $0x98] sm:$0x1] }
 0x2cb   : > { %v5397_v49 = vshrl.u32 %v5096_v29, 16  ;;  %4896 = vst [vmem:[#allocation3 + $0xa8] sm:$0xf] %v4895_v50  ;;  %v4691_v58 = vrot.slane %v4687_v36, 4  ;;  %v4888_v14 = vsel %vm11452_vm0, %v4690_v25, %v4887_v57  ;;  %v4700_v39 = vrot.slane %v4695_v16, 4 }
 0x2cc   : > { %v4698_v11 = vor.u32 %v4696_v61, %v4695_v16  ;;  %4889 = vst [vmem:[#allocation3 + $0x9c] sm:$0xf] %v4888_v14  ;;  %v4716_v9 = vsel %vm10199_vm8, %v4708_v56, %v4715_v0  ;;  %v4899_v24 = vsel %vm11298_vm13, %v4717_v60, %v4898_v13  ;;  %v6408_v26 = vor.u32 %v6407_v5, %v12236_v45  ;;  %v5093_v14 = vld [vmem:[#allocation3 + $0x84] sm:$0xf] }
 0x2cd   : > { %v5399_v44 = vrot.slane %v5397_v49, 4  ;;  %4897 = vst.msk [vmem:[#allocation3 + $0xac] sm:$0xf] %vm13425_vm1, %v4716_v9  ;;  %4900 = vst [vmem:[#allocation3 + $0xb0] sm:$0x1] %v4899_v24  ;;  %v4892_v57 = vsel %vm11298_vm13, %v4700_v39, %v4891_v15  ;;  %v5400_v36 = vshll.u32 %v5096_v29, 16  ;;  %v7448_v40 = vsel %vm10274_vm15, %v12200_v31, %v12177_v30 }
 0x2ce   : > { %v4699_v63 = vsel %vm10199_vm8, %v4691_v58, %v4698_v11  ;;  %v5406_v34 = vshll.u32 %v5097_v10, 16  ;;  %4893 = vst [vmem:[#allocation3 + $0xa4] sm:$0x1] %v4892_v57  ;;  %v6411_v19 = vshll.u32 %v6135_v37, 16  ;;  %v5410_v3 = vshrl.u32 %v5097_v10, 16 }
 0x2cf   : > { %4890 = vst.msk [vmem:[#allocation3 + $0xa0] sm:$0xf] %vm13444_vm6, %v4699_v63  ;;  %v7412_v13 = vshrl.u32 %v7174_v17, 16  ;;  %v7415_v62 = vshll.u32 %v7174_v17, 16  ;;  %v5402_v5 = vrot.slane %v5400_v36, 5  ;;  %v7421_v56 = vshll.u32 %v7175_v43, 16 }
 0x2d0   : > { %v12257_v48 = vrot.slane %v5406_v34, 5  ;;  %v7425_v25 = vshrl.u32 %v7175_v43, 16  ;;  %v6433_v16 = vrot.slane %v6432_v23, 4  ;;  %v5412_v61 = vrot.slane %v5410_v3, 4  ;;  %v7176_v58 = vld [vmem:[#allocation3 + $0x8c] sm:$0x1] }
 0x2d1   : > { %v7414_v50 = vrot.slane %v7412_v13, 4  ;;  %v7417_v0 = vrot.slane %v7415_v62, 5  ;;  %v6423_v29 = vrot.slane %v6422_v27, 4  ;;  %v5403_v15 = vor.u32 %v5402_v5, %v5399_v44  ;;  %v13446_v63 = vld [vmem:[#allocation10_spill] sm:$0xff] }
 0x2d2   : > { %v12262_v60 = vrot.slane %v7421_v56, 5  ;;  %v7427_v37 = vrot.slane %v7425_v25, 4  ;;  %v6409_v10 = vrot.slane %v6408_v26, 4  ;;  %v5413_v49 = vor.u32 %v5412_v61, %v12257_v48  ;;  %v13445_v26 = vld [vmem:[#allocation12_spill] sm:$0xff]  ;;  %v4905_v27 = vld [vmem:[#allocation3 + $0xbc] sm:$0x1] }
 0x2d3   : > { %v5416_v17 = vshll.u32 %v5098_v1, 16  ;;  %v9569_v23 = vcombine.low %v12076_v35, %v12083_v32  ;;  %v7458_v11 = vsel %vm10274_vm15, %v12220_v7, %v12195_v51  ;;  %v6399_v46 = vrot.slane %v6398_v2, 4  ;;  %v12287_v2 = vld [vmem:[#allocation3 + $0xa8] sm:$0xe] }
 0x2d4   : > { %v6413_v12 = vrot.slane %v6411_v19, 5  ;;  %v10051_v39 = vld [vmem:[#allocation3 + $0xa8] sm:$0xff]   ;;  %v6438_v43 = vsel %vm10274_vm15, %v6433_v16, %v12228_v20  ;;  %v5414_v9 = vrot.slane %v5413_v49, 4  ;;  %v7418_v24 = vor.u32 %v7417_v0, %v7414_v50  ;;  %v13447_v20 = vld [vmem:[#allocation13_spill] sm:$0xff] }
 0x2d5   : > { %v10052_v7 = vld [vmem:[#allocation3 + $0xa8] sm:$0xff]   ;;  %v5404_v52 = vrot.slane %v5403_v15, 4  ;;  %v7428_v44 = vor.u32 %v7427_v37, %v12262_v60  ;;  %v5227_v57 = vsel %vm10274_vm15, %v13447_v20, %v13446_v63  ;;  %7106 = vrot.lane.b32.xlu0 %v10051_v39, %s10098_s21  ;;  %v9544_v36 = vcombine.low %v7448_v40, %v7458_v11  ;;  %v5649_v37 = vld [vmem:[#allocation3 + $0xb0] sm:$0x1] }
 0x2d6   : > { %v6428_v34 = vsel %vm10274_vm15, %v6423_v29, %v12213_v38  ;;  %v6414_v30 = vsel %vm10274_vm15, %v6409_v10, %v6413_v12  ;;  %v5418_v31 = vrot.slane %v5416_v17, 5  ;;  %v7729_v19 = vld [vmem:[#allocation3 + $0xac] sm:$0xf]  ;;  %6064 = vrot.lane.b32.xlu1 %v10052_v7, %s10092_s9  ;;  %v7431_v62 = vshll.u32 %v7176_v58, 16  ;;  %v5094_v1 = vld [vmem:[#allocation3 + $0x88] sm:$0xf] }
 0x2d7   : > { %v9481_v3 = vcombine.low %v6428_v34, %v6438_v43  ;;  %v7874_v13 = vrot.slane %v7729_v19, 5  ;;  %v5373_v5 = vshrl.u32 %v5093_v14, 16  ;;  %v6404_v56 = vsel %vm10274_vm15, %v6399_v46, %v12236_v45  ;;  %v5648_v61 = vld [vmem:[#allocation3 + $0xac] sm:$0xf]  ;;  %v7730_v29 = vld [vmem:[#allocation3 + $0xb0] sm:$0x1] }
 0x2d8   : > { %v5419_v25 = vsel %vm10274_vm15, %v5414_v9, %v5418_v31  ;;  %v9562_v38 = vrot.slane %v12287_v2, 9  ;;  %v7419_v16 = vrot.slane %v7418_v24, 4  ;;  %v9480_v50 = vcombine.low %v6404_v56, %v6414_v30  ;;  %v5095_v49 = vld [vmem:[#allocation3 + $0x8c] sm:$0x1]  ;;  %v7726_v46 = vld [vmem:[#allocation3 + $0xa0] sm:$0xf] }
 0x2d9   : > { %v5409_v0 = vsel %vm10274_vm15, %v5404_v52, %v12257_v48  ;;  %v7429_v15 = vrot.slane %v7428_v44, 4  ;;  %v5801_v10 = vrot.slane %v5648_v61, 5  ;;  %7647 = vrot.lane.b32.xlu0 %v9544_v36, %s10099_s22  ;;  %v7876_v45 = vrot.slane %v7874_v13, 4  ;;  %v5647_v43 = vld [vmem:[#allocation3 + $0xa8] sm:$0xe]  ;;  %v10053_v48 = vld [vmem:[#allocation3 + $0x9c] sm:$0xff]  }
 0x2da   : > { %v5375_v17 = vrot.slane %v5373_v5, 4  ;;  %v5376_v58 = vshll.u32 %v5093_v14, 16  ;;  %v5382_v11 = vshll.u32 %v5094_v1, 16  ;;  %6605 = vrot.lane.b32.xlu1 %v9481_v3, %s10095_s12  ;;  %v9418_v12 = vcombine.low %v5409_v0, %v5419_v25  ;;  %v7725_v44 = vld [vmem:[#allocation3 + $0x9c] sm:$0xe]  ;;  %v13463_v20 = vld [vmem:[#allocation16_spill] sm:$0xff] }
 0x2db   : > { %v7433_v39 = vrot.slane %v7431_v62, 5  ;;  %v5803_v9 = vrot.slane %v5801_v10, 4  ;;  %v5386_v24 = vshrl.u32 %v5094_v1, 16  ;;  %v7877_v7 = vrot.slane %v7730_v29, 5  ;;  %v10054_v14 = vld [vmem:[#allocation3 + $0x9c] sm:$0xff]  }
 0x2dc   : > { %v7424_v40 = vsel %vm10274_vm15, %v7419_v16, %v12262_v60  ;;  %v5378_v52 = vrot.slane %v5376_v58, 5  ;;  %v12315_v2 = vrot.slane %v5382_v11, 5  ;;  %v5804_v34 = vrot.slane %v5649_v37, 5  ;;  %v7727_v31 = vld [vmem:[#allocation3 + $0xa4] sm:$0x1] }
 0x2dd   : > { %v7434_v36 = vsel %vm10274_vm15, %v7429_v15, %v7433_v39  ;;  %v5388_v30 = vrot.slane %v5386_v24, 4  ;;  %v7867_v19 = vrot.slane %v7726_v46, 5  ;;  %6062 = vrot.lane.b32.xlu0 %v10053_v48, %s10092_s9  ;;  %v7878_v3 = vsel %vm10238_vm14, %v7876_v45, %v7877_v7  ;;  %v6688_v5 = vld [vmem:[#allocation3 + $0xac] sm:$0xf]  ;;  %v6685_v56 = vld [vmem:[#allocation3 + $0xa0] sm:$0xf] }
 0x2de   : > { %v9436_v62 = vrot.slane %v5647_v43, 9  ;;  %v5379_v1 = vor.u32 %v5378_v52, %v5375_v17  ;;  %v5392_v60 = vshll.u32 %v5095_v49, 16  ;;  %7104 = vrot.lane.b32.xlu1 %v10054_v14, %s10098_s21  ;;  %v12325_v25 = vsel %vm10238_vm14, %v5803_v9, %v5804_v34  ;;  %v6687_v29 = vld [vmem:[#allocation3 + $0xa8] sm:$0xe]  ;;  %v6689_v15 = vld [vmem:[#allocation3 + $0xb0] sm:$0x1] }
 0x2df   : > { %v5389_v16 = vor.u32 %v5388_v30, %v12315_v2  ;;  %v9561_v61 = vrot.slane %v7725_v44, 9  ;;  %v7869_v0 = vrot.slane %v7867_v19, 4  ;;  %v7875_v37 = vsel %vm10238_vm14, %v9562_v38, %v7874_v13  ;;  %v6684_v58 = vld [vmem:[#allocation3 + $0x9c] sm:$0xe]  ;;  %v6686_v11 = vld [vmem:[#allocation3 + $0xa4] sm:$0x1] }
 0x2e0   : > { %v9543_v45 = vcombine.low %v7424_v40, %v7434_v36  ;;  %v5380_v17 = vrot.slane %v5379_v1, 4  ;;  %v7870_v49 = vrot.slane %v7727_v31, 5  ;;  %v5802_v46 = vsel %vm10238_vm14, %v9436_v62, %v5801_v10  ;;  %v12332_v24 = vld [vmem:[#allocation3 + $0xa0] sm:$0xf]  ;;  %v10078_v48 = vld [vmem:[#allocation3 + $0x54] sm:$0xff]  }
 0x2e1   : > { %v5390_v39 = vrot.slane %v5389_v16, 4  ;;  %v6837_v43 = vrot.slane %v6688_v5, 5  ;;  %v6830_v9 = vrot.slane %v6685_v56, 5  ;;  %6603 = vrot.lane.b32.xlu0 %v9480_v50, %s10095_s12  ;;  %v9578_v7 = vcombine.low %v7875_v37, %v7878_v3  ;;  %v7183_v40 = vld [vmem:[#allocation3 + $0xa8] sm:$0xf]  ;;  %5051 = vst.msk [vmem:[#allocation5 + $0x38] sm:$0xff] %vm5043_vm7, %v10078_v48  ;;  %v12353_v56 = vpop.permute.xlu0 %5877 }
 0x2e2   : > { %v9452_v52 = vcombine.low %v5802_v46, %v12325_v25  ;;  %v5394_v13 = vrot.slane %v5392_v60, 5  ;;  %v12338_v38 = vsel %vm10238_vm14, %v9561_v61, %v7867_v19  ;;  %5564 = vrot.lane.b32.xlu1 %v9418_v12, %s10091_s8  ;;  %v12343_v10 = vsel %vm10238_vm14, %v7869_v0, %v7870_v49  ;;  %v7184_v34 = vld [vmem:[#allocation3 + $0xac] sm:$0xf]  ;;  %v5646_v19 = vld [vmem:[#allocation3 + $0xa4] sm:$0x1]  ;;  %v10069_v48 = vld [vmem:[#allocation3 + $0x90] sm:$0xff]  }
 0x2e3   : > { %v9499_v44 = vrot.slane %v6687_v29, 9  ;;  %v6840_v14 = vrot.slane %v6689_v15, 5  ;;  %v9498_v36 = vrot.slane %v6684_v58, 9  ;;  %v5385_v50 = vsel %vm10274_vm15, %v5380_v17, %v12315_v2  ;;  %v6142_v5 = vld [vmem:[#allocation3 + $0xa8] sm:$0xf]  ;;  %5056 = vst.msk [vmem:[#allocation5 + $0x60] sm:$0xff] %vm5043_vm7, %v10069_v48 }
 0x2e4   : > { %v5395_v30 = vsel %vm10274_vm15, %v5390_v39, %v5394_v13  ;;  %v6833_v31 = vrot.slane %v6686_v11, 5  ;;  %v5794_v12 = vrot.slane %v12332_v24, 5  ;;  %v6839_v3 = vrot.slane %v6837_v43, 4  ;;  %v5644_v61 = vld [vmem:[#allocation3 + $0x9c] sm:$0xe] }
 0x2e5   : > { %v6832_v62 = vrot.slane %v6830_v9, 4  ;;  %v7484_v1 = vshrl.u32 %v7183_v40, 16  ;;  %v7487_v60 = vshll.u32 %v7183_v40, 16  ;;  %7972 = vrot.lane.b32.xlu0 %v9578_v7, %s10100_s23  ;;  %v9577_v25 = vcombine.low %v12338_v38, %v12343_v10  ;;  %v7185_v0 = vld [vmem:[#allocation3 + $0xb0] sm:$0x1] }
 0x2e6   : > { %v6838_v2 = vsel %vm10238_vm14, %v9499_v44, %v6837_v43  ;;  %v12361_v16 = vsel %vm10238_vm14, %v9498_v36, %v6830_v9  ;;  %v7493_v29 = vshll.u32 %v7184_v34, 16  ;;  %v6143_v15 = vld [vmem:[#allocation3 + $0xac] sm:$0xf]  ;;  %7645 = vrot.lane.b32.xlu1 %v9543_v45, %s10099_s22  ;;  %v9417_v37 = vcombine.low %v5385_v50, %v5395_v30  ;;  %v6139_v11 = vld [vmem:[#allocation3 + $0x9c] sm:$0xf] }
 0x2e7   : > { %v5796_v17 = vrot.slane %v5794_v12, 4  ;;  %v7486_v49 = vrot.slane %v7484_v1, 4  ;;  %v7497_v58 = vshrl.u32 %v7184_v34, 16  ;;  %v7489_v46 = vrot.slane %v7487_v60, 5  ;;  %v6144_v45 = vld [vmem:[#allocation3 + $0xb0] sm:$0x1] }
 0x2e8   : > { %v12364_v39 = vrot.slane %v7493_v29, 5  ;;  %v6464_v24 = vshrl.u32 %v6142_v5, 16  ;;  %v6467_v43 = vshll.u32 %v6142_v5, 16  ;;  %v6841_v9 = vsel %vm10238_vm14, %v6839_v3, %v6840_v14  ;;  %v12371_v34 = vpop.permute.xlu0 %7098  ;;  %v10071_v1 = vld [vmem:[#allocation3 + $0x84] sm:$0xff]   ;;  %v5104_v51 = vld [vmem:[#allocation3 + $0xb0] sm:$0x1] }
 0x2e9   : > { %v6834_v7 = vsel %vm10238_vm14, %v6832_v62, %v6833_v31  ;;  %v5797_v13 = vrot.slane %v5646_v19, 5  ;;  %v7499_v38 = vrot.slane %v7497_v58, 4  ;;  %5889 = vrot.lane.b32.xlu0 %v9452_v52, %s10096_s13  ;;  %v6473_v44 = vshll.u32 %v6143_v15, 16  ;;  %v6140_v58 = vld [vmem:[#allocation3 + $0xa0] sm:$0xf]  ;;  %5055 = vst.msk [vmem:[#allocation5 + $0x58] sm:$0xff] %vm5043_vm7, %v10071_v1 }
 0x2ea   : > { %v6466_v40 = vrot.slane %v6464_v24, 4  ;;  %v6469_v10 = vrot.slane %v6467_v43, 5  ;;  %v6477_v36 = vshrl.u32 %v6143_v15, 16  ;;  %5562 = vrot.lane.b32.xlu1 %v9417_v37, %s10091_s8  ;;  %v9435_v50 = vrot.slane %v5644_v61, 9 }
 0x2eb   : > { %v7500_v14 = vor.u32 %v7499_v38, %v12364_v39  ;;  %v7503_v30 = vshll.u32 %v7185_v0, 16  ;;  %v6440_v31 = vshrl.u32 %v6139_v11, 16  ;;  %v9515_v19 = vcombine.low %v6838_v2, %v6841_v9  ;;  %v6141_v9 = vld [vmem:[#allocation3 + $0xa4] sm:$0x1] }
 0x2ec   : > { %v5798_v52 = vsel %vm10238_vm14, %v5796_v17, %v5797_v13  ;;  %v7490_v3 = vor.u32 %v7489_v46, %v7486_v49  ;;  %v6443_v62 = vshll.u32 %v6139_v11, 16  ;;  %v9514_v60 = vcombine.low %v12361_v16, %v6834_v7  ;;  %v9766_v37 = vpop.f32.mrb[28].mxu0  ;;  %v5557_v17 = vpop.permute.xlu0 %5556 }
 0x2ed   : > { %v12379_v5 = vrot.slane %v6473_v44, 5  ;;  %v6479_v29 = vrot.slane %v6477_v36, 4  ;;  %v6483_v15 = vshll.u32 %v6144_v45, 16  ;;  %7970 = vrot.lane.b32.xlu0 %v9577_v25, %s10100_s23  ;;  %v5795_v61 = vsel %vm10238_vm14, %v9435_v50, %v5794_v12  ;;  %v4337_v16 = vpop.f32.mrb[29].mxu0  ;;  %5597 = vst.msk [vmem:[#allocation5 + $0x40] sm:$0xff] %vm5588_vm2, %v5557_v17 }
 0x2ee   : > { %v6470_v2 = vor.u32 %v6469_v10, %v6466_v40  ;;  %v6442_v0 = vrot.slane %v6440_v31, 4  ;;  %v6445_v24 = vrot.slane %v6443_v62, 5  ;;  %v4346_v49 = vadd.f32 %v12189_v54, %v9766_v37  ;;  %6930 = vrot.lane.b32.xlu1 %v9515_v19, %s10101_s28  ;;  %v9767_v25 = vpop.f32.mrb[30].mxu0 }
 0x2ef   : > { %v9451_v11 = vcombine.low %v5795_v61, %v5798_v52  ;;  %v12387_v46 = vrot.slane %v7500_v14, 4  ;;  %v12389_v43 = vrot.slane %v7503_v30, 5  ;;  %v4338_v12 = vadd.f32 %v12189_v54, %v4337_v16  ;;  %v4340_v40 = vpop.f32.mrb[31].mxu0  ;;  %v4908_v16 = vld [vmem:[#allocation3 + $0xc0] sm:$0xf] }
 0x2f0   : > { %v12393_v48 = vrot.slane %v7490_v3, 4  ;;  %v6449_v7 = vshll.u32 %v6140_v58, 16  ;;  %v6453_v13 = vshrl.u32 %v6140_v58, 16  ;;  %vm13448_vm3 = vcmask 195712   ;;  %v6055_v31 = vpop.permute.xlu0 %6054 }
 0x2f1   : > { %5918 = vst.msk [vmem:[#allocation5 + $0x40] sm:$0xff] %vm13448_vm3, %v12353_v56  ;;  %v4382_v38 = vmax.f32 %v4346_v49, 0.0  ;;  %v4349_v45 = vadd.f32 %v12189_v54, %v9767_v25  ;;  %v6480_v10 = vor.u32 %v6479_v29, %v12379_v5  ;;  %v12399_v44 = vrot.slane %v6483_v15, 5  ;;  %6928 = vrot.lane.b32.xlu0 %v9514_v60, %s10101_s28  ;;  %v5102_v29 = vld [vmem:[#allocation3 + $0xa8] sm:$0xf] }
 0x2f2   : > { %v4380_v36 = vmax.f32 %v4338_v12, 0.0  ;;  %v4341_v50 = vadd.f32 %v12189_v54, %v4340_v40  ;;  %v12403_v14 = vrot.slane %v6470_v2, 4  ;;  %v6446_v30 = vor.u32 %v6445_v24, %v6442_v0  ;;  %5887 = vrot.lane.b32.xlu1 %v9451_v11, %s10096_s13 }
 0x2f3   : > { %v9671_v19 = vpack.c.bf16 %v4382_v38, %v4382_v38  ;;  %v4383_v52 = vmax.f32 %v4349_v45, 0.0  ;;  %v7506_v56 = vsel %vm10274_vm15, %v12387_v46, %v12389_v43  ;;  %v6459_v3 = vshll.u32 %v6141_v9, 16  ;;  %v5100_v43 = vld [vmem:[#allocation3 + $0xa0] sm:$0xf] }
 0x2f4   : > { %vm13449_vm1 = vcmask 261312   ;;  %v9669_v62 = vpack.c.bf16 %v4380_v36, %v4380_v36  ;;  %v4381_v54 = vmax.f32 %v4341_v50, 0.0  ;;  %v12411_v1 = vrot.slane %v6449_v7, 5  ;;  %v4901_v7 = vld [vmem:[#allocation3 + $0xb4] sm:$0xf] }
 0x2f5   : > { %6095 = vst.msk [vmem:[#allocation5 + $0x40] sm:$0xff] %vm13449_vm1, %v6055_v31  ;;  %v6455_v60 = vrot.slane %v6453_v13, 4  ;;  %v4736_v15 = vshrl.u32 %v9671_v19, 16  ;;  %v4739_v58 = vshll.u32 %v9671_v19, 16  ;;  %v9672_v37 = vpack.c.bf16 %v4383_v52, %v4383_v52  ;;  %v5103_v31 = vld [vmem:[#allocation3 + $0xac] sm:$0xf] }
 0x2f6   : > { %v12413_v61 = vrot.slane %v6480_v10, 4  ;;  %v4719_v2 = vshrl.u32 %v9669_v62, 16  ;;  %v4722_v0 = vshll.u32 %v9669_v62, 16  ;;  %v9670_v24 = vpack.c.bf16 %v4381_v54, %v4381_v54  ;;  %v4912_v52 = vld [vmem:[#allocation3 + $0xc8] sm:$0x1] }
 0x2f7   : > { %v12415_v17 = vrot.slane %v6446_v30, 4  ;;  %v4738_v49 = vrot.slane %v4736_v15, 7  ;;  %v4744_v11 = vshrl.u32 %v9672_v37, 16  ;;  %v4747_v12 = vshll.u32 %v9672_v37, 16 }
 0x2f8   : > { %v5445_v25 = vshrl.u32 %v5102_v29, 16  ;;  %v4721_v9 = vrot.slane %v4719_v2, 7  ;;  %v4727_v38 = vshrl.u32 %v9670_v24, 16  ;;  %v6456_v13 = vor.u32 %v6455_v60, %v12411_v1 }
 0x2f9   : > { %v12418_v45 = vrot.slane %v6459_v3, 5  ;;  %v4741_v40 = vor.u32 %v4739_v58, %v4738_v49  ;;  %v4742_v10 = vrot.slane %v4738_v49, 4  ;;  %v4746_v36 = vrot.slane %v4744_v11, 7 }
 0x2fa   : > { %v4730_v50 = vshll.u32 %v9670_v24, 16  ;;  %v4724_v19 = vor.u32 %v4722_v0, %v4721_v9  ;;  %v4725_v30 = vrot.slane %v4721_v9, 4  ;;  %v4729_v62 = vrot.slane %v4727_v38, 7  ;;  %v7180_v0 = vld [vmem:[#allocation3 + $0x9c] sm:$0xf] }
 0x2fb   : > { %v5447_v54 = vrot.slane %v5445_v25, 4  ;;  %v4909_v15 = vsel %vm11452_vm0, %v4741_v40, %v4908_v16  ;;  %v4749_v37 = vor.u32 %v4747_v12, %v4746_v36  ;;  %v4751_v2 = vrot.slane %v4746_v36, 4  ;;  %v7181_v9 = vld [vmem:[#allocation3 + $0xa0] sm:$0xf]  ;;  %v7182_v40 = vld [vmem:[#allocation3 + $0xa4] sm:$0x1] }
 0x2fc   : > { %v5448_v60 = vshll.u32 %v5102_v29, 16  ;;  %4910 = vst [vmem:[#allocation3 + $0xc0] sm:$0xf] %v4909_v15  ;;  %v4902_v3 = vsel %vm11452_vm0, %v4724_v19, %v4901_v7  ;;  %v4732_v58 = vor.u32 %v4730_v50, %v4729_v62  ;;  %v4734_v24 = vrot.slane %v4729_v62, 4  ;;  %vm13450_vm0 = vmmov %vm13444_vm6  ;;  %v5099_v19 = vld [vmem:[#allocation3 + $0x9c] sm:$0xf] }
 0x2fd   : > { %v5454_v49 = vshll.u32 %v5103_v31, 16  ;;  %4903 = vst [vmem:[#allocation3 + $0xb4] sm:$0xf] %v4902_v3  ;;  %v4750_v11 = vsel %vm10199_vm8, %v4742_v10, %v4749_v37  ;;  %v4913_v16 = vsel %vm11298_vm13, %v4751_v2, %v4912_v52  ;;  %v5458_v25 = vshrl.u32 %v5103_v31, 16 }
 0x2fe   : > { %v5450_v12 = vrot.slane %v5448_v60, 5  ;;  %4911 = vst.msk [vmem:[#allocation3 + $0xc4] sm:$0xf] %vm13444_vm6, %v4750_v11  ;;  %4914 = vst [vmem:[#allocation3 + $0xc8] sm:$0x1] %v4913_v16  ;;  %v4733_v21 = vsel %vm10199_vm8, %v4725_v30, %v4732_v58  ;;  %v4906_v29 = vsel %vm11298_vm13, %v4734_v24, %v4905_v27  ;;  %v5464_v38 = vshll.u32 %v5104_v51, 16 }
 0x2ff   : > { %v5456_v7 = vrot.slane %v5454_v49, 5  ;;  %4904 = vst.msk [vmem:[#allocation3 + $0xb8] sm:$0xf] %vm13450_vm0, %v4733_v21  ;;  %4907 = vst [vmem:[#allocation3 + $0xbc] sm:$0x1] %v4906_v29  ;;  %v5460_v36 = vrot.slane %v5458_v25, 4  ;;  %v13462_v63 = vcombine.low %v12091_v28, %v12111_v53 }
 0x300   : > { %v5451_v10 = vor.u32 %v5450_v12, %v5447_v54  ;;  %v7460_v50 = vshrl.u32 %v7180_v0, 16  ;;  %v7463_v31 = vshll.u32 %v7180_v0, 16  ;;  %v6457_v52 = vrot.slane %v6456_v13, 4  ;;  %v13451_v11 = vld [vmem:[#allocation17_spill] sm:$0xff]  ;;  %v13452_v0 = vld [vmem:[#allocation18_spill] sm:$0xff]  ;;  %vm13454_vm13 = vmmov %vm13448_vm3 }
 0x301   : > { %v5466_v62 = vrot.slane %v5464_v38, 5  ;;  %v7469_v15 = vshll.u32 %v7181_v9, 16  ;;  %v7473_v37 = vshrl.u32 %v7181_v9, 16  ;;  %v5461_v30 = vor.u32 %v5460_v36, %v5456_v7  ;;  %vm13457_vm3 = vmmov %vm13449_vm1 }
 0x302   : > { %v7462_v22 = vrot.slane %v7460_v50, 4  ;;  %v7465_v27 = vrot.slane %v7463_v31, 5  ;;  %v7479_v2 = vshll.u32 %v7182_v40, 16  ;;  %v5452_v51 = vrot.slane %v5451_v10, 4  ;;  %vm13461_vm1 = vmmov %vm13454_vm13 }
 0x303   : > { %v7471_v60 = vrot.slane %v7469_v15, 5  ;;  %v7475_v3 = vrot.slane %v7473_v37, 4  ;;  %v5421_v58 = vshrl.u32 %v5099_v19, 16  ;;  %v5462_v24 = vrot.slane %v5461_v30, 4  ;;  %v7734_v9 = vld [vmem:[#allocation3 + $0xc0] sm:$0xe]  ;;  %vm13465_vm6 = vmmov %vm13457_vm3 }
 0x304   : > { %v7466_v54 = vor.u32 %v7465_v27, %v7462_v22  ;;  %v5424_v49 = vshll.u32 %v5099_v19, 16  ;;  %v7496_v13 = vsel %vm10274_vm15, %v12393_v48, %v12364_v39  ;;  %v6486_v12 = vsel %vm10274_vm15, %v12413_v61, %v12399_v44  ;;  %vm13469_vm0 = vmmov %vm13461_vm1 }
 0x305   : > { %v6462_v25 = vsel %vm10274_vm15, %v6457_v52, %v12418_v45  ;;  %v7476_v21 = vor.u32 %v7475_v3, %v7471_v60  ;;  %v10055_v29 = vld [vmem:[#allocation3 + $0xc0] sm:$0xff]   ;;  %v9546_v38 = vcombine.low %v7496_v13, %v7506_v56  ;;  %v6476_v39 = vsel %vm10274_vm15, %v12403_v14, %v12379_v5  ;;  %v10072_v13 = vld [vmem:[#allocation3 + $0xa8] sm:$0xff]  }
 0x306   : > { %v6452_v48 = vsel %vm10274_vm15, %v12415_v17, %v12411_v1  ;;  %v6272_v44 = vshrl.u32 %v12434_v18, 16  ;;  %v10056_v61 = vld [vmem:[#allocation3 + $0xc0] sm:$0xff]   ;;  %v5467_v45 = vsel %vm10274_vm15, %v5462_v24, %v5466_v62  ;;  %v7467_v40 = vrot.slane %v7466_v54, 4  ;;  %7110 = vrot.lane.b32.xlu0 %v10055_v29, %s10098_s21  ;;  %v7736_v17 = vld [vmem:[#allocation3 + $0xc8] sm:$0x1]  ;;  %5058 = vst.msk [vmem:[#allocation5 + $0x70] sm:$0xff] %vm5043_vm7, %v10072_v13 }
 0x307   : > { %v7477_v10 = vrot.slane %v7476_v21, 4  ;;  %v7481_v46 = vrot.slane %v7479_v2, 5  ;;  %v5101_v56 = vld [vmem:[#allocation3 + $0xa4] sm:$0x1]  ;;  %v9483_v36 = vcombine.low %v6476_v39, %v6486_v12  ;;  %v12466_v5 = vcombine.low %v6452_v48, %v6462_v25  ;;  %6068 = vrot.lane.b32.xlu1 %v10056_v61, %s10092_s9  ;;  %v7731_v62 = vld [vmem:[#allocation3 + $0xb4] sm:$0xe]  ;;  %v12480_v39 = vpop.permute.xlu0 %7964 }
 0x308   : > { %v7735_v14 = vld [vmem:[#allocation3 + $0xc4] sm:$0xf]  ;;  %v9564_v50 = vrot.slane %v7734_v9, 9  ;;  %v5423_v31 = vrot.slane %v5421_v58, 4  ;;  %v5457_v1 = vsel %vm10274_vm15, %v5452_v51, %v5456_v7  ;;  %v5426_v15 = vrot.slane %v5424_v49, 5  ;;  %v10057_v12 = vld [vmem:[#allocation3 + $0xb4] sm:$0xff]  }
 0x309   : > { %v7888_v19 = vrot.slane %v7735_v14, 5  ;;  %v7482_v52 = vsel %vm10274_vm15, %v7477_v10, %v7481_v46  ;;  %v12473_v37 = vcombine.low %v5457_v1, %v5467_v45  ;;  %v7891_v30 = vrot.slane %v7736_v17, 5  ;;  %v7732_v27 = vld [vmem:[#allocation3 + $0xb8] sm:$0xf]  ;;  %v7733_v2 = vld [vmem:[#allocation3 + $0xbc] sm:$0x1]  ;;  %v12498_v1 = vpop.permute.xlu1 %6056 }
 0x30a   : > { %v7472_v22 = vsel %vm10274_vm15, %v7467_v40, %v7471_v60  ;;  %v9563_v3 = vrot.slane %v7731_v62, 9  ;;  %v7881_v7 = vrot.slane %v7732_v27, 5  ;;  %v7884_v51 = vrot.slane %v7733_v2, 5  ;;  %v6690_v54 = vld [vmem:[#allocation3 + $0xb4] sm:$0xe]  ;;  %7651 = vrot.lane.b32.xlu0 %v9546_v38, %s10099_s22  ;;  %v10073_v14 = vld [vmem:[#allocation3 + $0x9c] sm:$0xff]  }
 0x30b   : > { %v7890_v58 = vrot.slane %v7888_v19, 4  ;;  %v12477_v24 = vcombine.low %v7472_v22, %v7482_v52  ;;  %v5427_v49 = vor.u32 %v5426_v15, %v5423_v31  ;;  %v5430_v25 = vshll.u32 %v5100_v43, 16  ;;  %v6691_v29 = vld [vmem:[#allocation3 + $0xb8] sm:$0xf]  ;;  %6609 = vrot.lane.b32.xlu1 %v9483_v36, %s10095_s12  ;;  %v6692_v38 = vld [vmem:[#allocation3 + $0xbc] sm:$0x1] }
 0x30c   : > { %v5434_v9 = vshrl.u32 %v5100_v43, 16  ;;  %v5440_v21 = vshll.u32 %v5101_v56, 16  ;;  %v12485_v60 = vsel %vm10238_vm14, %v9564_v50, %v7888_v19  ;;  %v7883_v61 = vrot.slane %v7881_v7, 4  ;;  %v6693_v40 = vld [vmem:[#allocation3 + $0xc0] sm:$0xe]  ;;  %v10058_v50 = vld [vmem:[#allocation3 + $0xb4] sm:$0xff]  }
 0x30d   : > { %v12489_v48 = vsel %vm10238_vm14, %v7890_v58, %v7891_v30  ;;  %v9500_v45 = vrot.slane %v6690_v54, 9  ;;  %v12494_v10 = vsel %vm10238_vm14, %v9563_v3, %v7881_v7  ;;  %v5428_v46 = vrot.slane %v5427_v49, 4  ;;  %v6694_v36 = vld [vmem:[#allocation3 + $0xc4] sm:$0xf]  ;;  %v6695_v62 = vld [vmem:[#allocation3 + $0xc8] sm:$0x1] }
 0x30e   : > { %v5432_v43 = vrot.slane %v5430_v25, 5  ;;  %v5436_v56 = vrot.slane %v5434_v9, 4  ;;  %v9580_v31 = vcombine.low %v12485_v60, %v12489_v48  ;;  %v12502_v17 = vsel %vm10238_vm14, %v7883_v61, %v7884_v51  ;;  %6066 = vrot.lane.b32.xlu0 %v10057_v12, %s10092_s9  ;;  %v7189_v2 = vld [vmem:[#allocation3 + $0xc0] sm:$0xf]  ;;  %v7190_v3 = vld [vmem:[#allocation3 + $0xc4] sm:$0xf]  ;;  %v12511_v9 = vpop.permute.xlu0 %5881 }
 0x30f   : > { %v5442_v19 = vrot.slane %v5440_v21, 5  ;;  %v6844_v52 = vrot.slane %v6691_v29, 5  ;;  %v9579_v15 = vcombine.low %v12494_v10, %v12502_v17  ;;  %v6847_v22 = vrot.slane %v6692_v38, 5  ;;  %5057 = vst.msk [vmem:[#allocation5 + $0x68] sm:$0xff] %vm5043_vm7, %v10073_v14  ;;  %7108 = vrot.lane.b32.xlu1 %v10058_v50, %s10098_s21  ;;  %v12513_v21 = vpop.permute.xlu1 %6922  ;;  %v7191_v61 = vld [vmem:[#allocation3 + $0xc8] sm:$0x1] }
 0x310   : > { %v5437_v30 = vor.u32 %v5436_v56, %v5432_v43  ;;  %v9501_v27 = vrot.slane %v6693_v40, 9  ;;  %v5433_v58 = vsel %vm10274_vm15, %v5428_v46, %v5432_v43  ;;  %v6851_v51 = vrot.slane %v6694_v36, 5  ;;  %v5650_v40 = vld [vmem:[#allocation3 + $0xb4] sm:$0xe]  ;;  %v5651_v36 = vld [vmem:[#allocation3 + $0xb8] sm:$0xf] }
 0x311   : > { %v6846_v7 = vrot.slane %v6844_v52, 4  ;;  %v6854_v54 = vrot.slane %v6695_v62, 5  ;;  %v7532_v12 = vshrl.u32 %v7189_v2, 16  ;;  %v7535_v49 = vshll.u32 %v7189_v2, 16  ;;  %v6145_v14 = vld [vmem:[#allocation3 + $0xb4] sm:$0xf] }
 0x312   : > { %v5438_v13 = vrot.slane %v5437_v30, 4  ;;  %v7541_v25 = vshll.u32 %v7190_v3, 16  ;;  %v12517_v29 = vsel %vm10238_vm14, %v9500_v45, %v6844_v52  ;;  %v6853_v48 = vrot.slane %v6851_v51, 4  ;;  %6607 = vrot.lane.b32.xlu0 %v12466_v5, %s10095_s12  ;;  %v5652_v62 = vld [vmem:[#allocation3 + $0xbc] sm:$0x1] }
 0x313   : > { %v12521_v60 = vsel %vm10238_vm14, %v6846_v7, %v6847_v22  ;;  %v7545_v38 = vshrl.u32 %v7190_v3, 16  ;;  %v12529_v43 = vsel %vm10238_vm14, %v9501_v27, %v6851_v51  ;;  %v7534_v45 = vrot.slane %v7532_v12, 4  ;;  %5568 = vrot.lane.b32.xlu1 %v12473_v37, %s10091_s8  ;;  %v6146_v30 = vld [vmem:[#allocation3 + $0xb8] sm:$0xf]  ;;  %v12571_v10 = vld [vmem:[%s13341_s5] sm:$0x3] }
 0x314   : > { %v5443_v46 = vsel %vm10274_vm15, %v5438_v13, %v5442_v19  ;;  %v7537_v56 = vrot.slane %v7535_v49, 5  ;;  %v9516_v50 = vcombine.low %v12517_v29, %v12521_v60  ;;  %v12537_v5 = vsel %vm10238_vm14, %v6853_v48, %v6854_v54  ;;  %v12542_v60 = vpop.permute.xlu0 %6920 }
 0x315   : > { %v7543_v52 = vrot.slane %v7541_v25, 5  ;;  %v7547_v19 = vrot.slane %v7545_v38, 4  ;;  %v9419_v22 = vcombine.low %v5433_v58, %v5443_v46  ;;  %v9517_v27 = vcombine.low %v12529_v43, %v12537_v5  ;;  %v6148_v25 = vld [vmem:[#allocation3 + $0xc0] sm:$0xf]  ;;  %v12546_v58 = vpop.permute.xlu1 %5879 }
 0x316   : > { %v7538_v2 = vor.u32 %v7537_v56, %v7534_v45  ;;  %v7551_v3 = vshll.u32 %v7191_v61, 16  ;;  %v9437_v51 = vrot.slane %v5650_v40, 9  ;;  %v5808_v37 = vrot.slane %v5651_v36, 5  ;;  %7976 = vrot.lane.b32.xlu0 %v9580_v31, %s10100_s23  ;;  %v6147_v40 = vld [vmem:[#allocation3 + $0xbc] sm:$0x1] }
 0x317   : > { %v7548_v7 = vor.u32 %v7547_v19, %v7543_v52  ;;  %v6488_v13 = vshrl.u32 %v6145_v14, 16  ;;  %v5811_v49 = vrot.slane %v5652_v62, 5  ;;  %v6491_v54 = vshll.u32 %v6145_v14, 16  ;;  %7649 = vrot.lane.b32.xlu1 %v12477_v24, %s10099_s22  ;;  %v6149_v36 = vld [vmem:[#allocation3 + $0xc4] sm:$0xf] }
 0x318   : > { %v7539_v12 = vrot.slane %v7538_v2, 4  ;;  %v6497_v29 = vshll.u32 %v6146_v30, 16  ;;  %v7553_v61 = vrot.slane %v7551_v3, 5  ;;  %v5810_v38 = vrot.slane %v5808_v37, 4  ;;  %v6150_v19 = vld [vmem:[#allocation3 + $0xc8] sm:$0x1] }
 0x319   : > { %v7549_v48 = vrot.slane %v7548_v7, 4  ;;  %v6490_v46 = vrot.slane %v6488_v13, 4  ;;  %v12550_v31 = vsel %vm10238_vm14, %v9437_v51, %v5808_v37  ;;  %v6493_v43 = vrot.slane %v6491_v54, 5  ;;  %v7186_v2 = vld [vmem:[#allocation3 + $0xb4] sm:$0xf] }
 0x31a   : > { %v6499_v45 = vrot.slane %v6497_v29, 5  ;;  %v6501_v56 = vshrl.u32 %v6146_v30, 16  ;;  %v7544_v14 = vsel %vm10274_vm15, %v7539_v12, %v7543_v52  ;;  %v5812_v5 = vsel %vm10238_vm14, %v5810_v38, %v5811_v49  ;;  %7974 = vrot.lane.b32.xlu0 %v9579_v15, %s10100_s23  ;;  %v7187_v37 = vld [vmem:[#allocation3 + $0xb8] sm:$0xf]  ;;  %v12562_v52 = vpop.permute.xlu0 %7102  ;;  %v12566_v29 = vpop.permute.xlu1 %6060 }
 0x31b   : > { %v7554_v24 = vsel %vm10274_vm15, %v7549_v48, %v7553_v61  ;;  %v6512_v62 = vshrl.u32 %v6148_v25, 16  ;;  %v6494_v30 = vor.u32 %v6493_v43, %v6490_v46  ;;  %v6507_v51 = vshll.u32 %v6147_v40, 16  ;;  %5566 = vrot.lane.b32.xlu1 %v9419_v22, %s10091_s8 }
 0x31c   : > { %v9548_v3 = vcombine.low %v7544_v14, %v7554_v24  ;;  %v6503_v7 = vrot.slane %v6501_v56, 4  ;;  %v9453_v13 = vcombine.low %v12550_v31, %v5812_v5  ;;  %v6515_v49 = vshll.u32 %v6148_v25, 16  ;;  %v7188_v14 = vld [vmem:[#allocation3 + $0xbc] sm:$0x1] }
 0x31d   : > { %v6514_v12 = vrot.slane %v6512_v62, 4  ;;  %v6521_v54 = vshll.u32 %v6149_v36, 16  ;;  %v6495_v17 = vrot.slane %v6494_v30, 4  ;;  %v6525_v48 = vshrl.u32 %v6149_v36, 16  ;;  %v5105_v30 = vld [vmem:[#allocation3 + $0xb4] sm:$0xf] }
 0x31e   : > { %v6504_v15 = vor.u32 %v6503_v7, %v6499_v45  ;;  %v6531_v61 = vshll.u32 %v6150_v19, 16  ;;  %vm13453_vm8 = vcmask 1041408   ;;  %v6517_v22 = vrot.slane %v6515_v49, 5  ;;  %6932 = vrot.lane.b32.xlu0 %v9516_v50, %s10101_s28  ;;  %v12578_v24 = vpop.permute.xlu0 %7643  ;;  %v12581_v7 = vpop.permute.xlu1 %6601 }
 0x31f   : > { %9953 = vmatprep.subr.msk.bf16.mxu1 %vm13453_vm8, %v12571_v10  ;;  %v6523_v38 = vrot.slane %v6521_v54, 5  ;;  %v7508_v40 = vshrl.u32 %v7186_v2, 16  ;;  %v7511_v46 = vshll.u32 %v7186_v2, 16  ;;  %v6500_v25 = vsel %vm10274_vm15, %v6495_v17, %v6499_v45  ;;  %6934 = vrot.lane.b32.xlu1 %v9517_v27, %s10101_s28  ;;  %v10074_v54 = vld [vmem:[#allocation3 + $0xb4] sm:$0xff]   ;;  %vm13470_vm8 = vmmov %vm13457_vm3 }
 0x320   : > { %v6505_v31 = vrot.slane %v6504_v15, 4  ;;  %v6509_v43 = vrot.slane %v6507_v51, 5  ;;  %v6527_v56 = vrot.slane %v6525_v48, 4  ;;  %v6518_v36 = vor.u32 %v6517_v22, %v6514_v12  ;;  %v5106_v51 = vld [vmem:[#allocation3 + $0xb8] sm:$0xf]  ;;  %5059 = vst.msk [vmem:[#allocation5 + $0x78] sm:$0xff] %vm5043_vm7, %v10074_v54 }
 0x321   : > { %v7510_v5 = vrot.slane %v7508_v40, 4  ;;  %v7513_v19 = vrot.slane %v7511_v46, 5  ;;  %v7517_v62 = vshll.u32 %v7187_v37, 16  ;;  %v6533_v45 = vrot.slane %v6531_v61, 5 }
 0x322   : > { %v6510_v50 = vsel %vm10274_vm15, %v6505_v31, %v6509_v43  ;;  %v6528_v2 = vor.u32 %v6527_v56, %v6523_v38  ;;  %v7521_v49 = vshrl.u32 %v7187_v37, 16  ;;  %v6519_v17 = vrot.slane %v6518_v36, 4  ;;  %7655 = vrot.lane.b32.xlu0 %v9548_v3, %s10099_s22  ;;  %v6059_v46 = vpop.permute.xlu0 %6058  ;;  %v5107_v31 = vld [vmem:[#allocation3 + $0xbc] sm:$0x1]  ;;  %v12590_v36 = vpop.permute.xlu1 %7100 }
 0x323   : > { %v7514_v15 = vor.u32 %v7513_v19, %v7510_v5  ;;  %v7519_v48 = vrot.slane %v7517_v62, 5  ;;  %v7527_v16 = vshll.u32 %v7188_v14, 16  ;;  %v9484_v27 = vcombine.low %v6500_v25, %v6510_v50  ;;  %5891 = vrot.lane.b32.xlu1 %v9453_v13, %s10096_s13  ;;  %v6119_v19 = vld [vmem:[#allocation3 + $0x4c] sm:$0xf] }
 0x324   : > { %v6529_v12 = vrot.slane %v6528_v2, 4  ;;  %v7523_v22 = vrot.slane %v7521_v49, 4  ;;  %v5469_v40 = vshrl.u32 %v5105_v30, 16  ;;  %v6524_v37 = vsel %vm10274_vm15, %v6519_v17, %v6523_v38 }
 0x325   : > { %v7515_v61 = vrot.slane %v7514_v15, 4  ;;  %v5472_v43 = vshll.u32 %v5105_v30, 16  ;;  %v5478_v56 = vshll.u32 %v5106_v51, 16  ;;  %v5482_v5 = vshrl.u32 %v5106_v51, 16 }
 0x326   : > { %v6534_v3 = vsel %vm10274_vm15, %v6529_v12, %v6533_v45  ;;  %v7524_v25 = vor.u32 %v7523_v22, %v7519_v48  ;;  %v5471_v14 = vrot.slane %v5469_v40, 4  ;;  %v6275_v13 = vshll.u32 %v12434_v18, 16  ;;  %6611 = vrot.lane.b32.xlu0 %v9484_v27, %s10095_s12  ;;  %v6600_v17 = vpop.permute.xlu0 %6599  ;;  %v12597_v45 = vld [vmem:[#allocation3 + $0x40] sm:$0xf] }
 0x327   : > { %v9485_v62 = vcombine.low %v6524_v37, %v6534_v3  ;;  %v5474_v50 = vrot.slane %v5472_v43, 5  ;;  %v5480_v2 = vrot.slane %v5478_v56, 5  ;;  %v7529_v49 = vrot.slane %v7527_v16, 5  ;;  %6640 = vst.msk [vmem:[#allocation5 + $0x40] sm:$0xff] %vm6631_vm11, %v6600_v17  ;;  %v5561_v16 = vpop.permute.xlu1 %5560  ;;  %v13455_v56 = vld [vmem:[#allocation19_spill] sm:$0xff]  ;;  %v13456_v3 = vld [vmem:[#allocation20_spill] sm:$0xff] }
 0x328   : > { %v7525_v38 = vrot.slane %v7524_v25, 4  ;;  %v5484_v30 = vrot.slane %v5482_v5, 4  ;;  %v5488_v54 = vshll.u32 %v5107_v31, 16  ;;  %v12601_v51 = vrot.slane %v7301_v33, 5  ;;  %v12612_v31 = vld [vmem:[#allocation3 + $0x40] sm:$0xf] }
 0x329   : > { %6613 = vrot.lane.b32.xlu1 %v9485_v62, %s10095_s12  ;;  %v5475_v15 = vor.u32 %v5474_v50, %v5471_v14  ;;  %v12605_v12 = vrot.slane %v7305_v55, 4  ;;  %v6281_v22 = vshll.u32 %v6119_v19, 16  ;;  %v7520_v27 = vsel %vm10274_vm15, %v7515_v61, %v7519_v48  ;;  %6961 = vst.msk [vmem:[#allocation5 + $0x40] sm:$0xff] %vm6952_vm9, %v12542_v60  ;;  %v6662_v14 = vld [vmem:[#allocation3 + $0x44] sm:$0x1]  ;;  %v13459_v62 = vld [vmem:[#allocation9_spill] sm:$0xff] }
 0x32a   : > { %v7530_v40 = vsel %vm10274_vm15, %v7525_v38, %v7529_v49  ;;  %v5485_v37 = vor.u32 %v5484_v30, %v5480_v2  ;;  %v6285_v43 = vshrl.u32 %v6119_v19, 16  ;;  %5599 = vst.msk [vmem:[#allocation5 + $0x50] sm:$0xff] %vm5588_vm2, %v5561_v16  ;;  %v7294_v55 = vrot.slane %v7292_v42, 4  ;;  %7954 = vrot.lane.b32.xlu0 %v9569_v23, %s10100_s23  ;;  %v13460_v50 = vld [vmem:[#allocation14_spill] sm:$0xff]  ;;  %v5622_v38 = vld [vmem:[#allocation3 + $0x44] sm:$0x1]  ;;  %v12681_v16 = vpop.permute.xlu0 %7968 }
 0x32b   : > { %v9547_v6 = vcombine.low %v7520_v27, %v7530_v40  ;;  %v5476_v33 = vrot.slane %v5475_v15, 4  ;;  %v7297_v48 = vrot.slane %v7295_v41, 5  ;;  %7139 = vst.msk [vmem:[#allocation5 + $0x40] sm:$0xff] %vm7130_vm10, %v12371_v34  ;;  %v5490_v61 = vrot.slane %v5488_v54, 5  ;;  %v7161_v41 = vld [vmem:[#allocation3 + $0x50] sm:$0x1]  ;;  %v5559_v34 = vpop.permute.xlu1 %5558 }
 0x32c   : > { %5920 = vst.msk [vmem:[#allocation5 + $0x50] sm:$0xff] %vm13454_vm13, %v12511_v9  ;;  %v5486_v60 = vrot.slane %v5485_v37, 4  ;;  %v5245_v25 = vor.u32 %v13456_v3, %v13455_v56  ;;  %v6774_v42 = vrot.slane %v12597_v45, 5  ;;  %v5738_v8 = vrot.slane %v12612_v31, 5  ;;  %v13464_v30 = vld [vmem:[#allocation15_spill] sm:$0xff]  ;;  %vm13471_vm13 = vmmov %vm13469_vm0 }
 0x32d   : > { %7684 = vst.msk [vmem:[#allocation5 + $0x40] sm:$0xff] %vm7675_vm12, %v12578_v24  ;;  %7653 = vrot.lane.b32.xlu1 %v9547_v6, %s10099_s22  ;;  %v7308_v35 = vor.u32 %v12605_v12, %v12601_v51  ;;  %v6274_v32 = vrot.slane %v6272_v44, 4  ;;  %v6277_v23 = vrot.slane %v6275_v13, 5  ;;  %v5481_v9 = vsel %vm10274_vm15, %v5476_v33, %v5480_v2  ;;  %v5620_v13 = vld [vmem:[#allocation3 + $0x3c] sm:$0xe] }
 0x32e   : > { %6097 = vst.msk [vmem:[#allocation5 + $0x50] sm:$0xff] %vm13457_vm3, %v6059_v46  ;;  %v5491_v24 = vsel %vm10274_vm15, %v5486_v60, %v5490_v61  ;;  %v6660_v46 = vld [vmem:[#allocation3 + $0x3c] sm:$0xe]  ;;  %v12647_v5 = vrot.slane %v6281_v22, 5  ;;  %v6287_v19 = vrot.slane %v6285_v43, 4  ;;  %v13458_v44 = vsel %vm10274_vm15, %v13445_v26, %v11818_v59  ;;  %5869 = vrot.lane.b32.xlu0 %v13462_v63, %s10096_s13 }
 0x32f   : > { %8005 = vst.msk [vmem:[#allocation5 + $0x40] sm:$0xff] %vm7996_vm5, %v12480_v39  ;;  %v9421_v18 = vcombine.low %v5481_v9, %v5491_v24  ;;  %v9410_v39 = vcombine.low %v13458_v44, %v5227_v57  ;;  %v6260_v2 = vsel %vm10274_vm15, %v13460_v50, %v13459_v62  ;;  %v7298_v49 = vor.u32 %v7297_v48, %v7294_v55  ;;  %v12674_v17 = vld [vmem:[#allocation3 + $0x4c] sm:$0xf]  ;;  %v6120_v12 = vld [vmem:[#allocation3 + $0x50] sm:$0x1]  ;;  %v10060_v27 = vld [vmem:[#allocation3 + $0x3c] sm:$0xff]  }
 0x330   : > { %5598 = vst.msk [vmem:[#allocation5 + $0x48] sm:$0xff] %vm5588_vm2, %v5559_v34  ;;  %v6270_v59 = vsel %vm10274_vm15, %v13464_v30, %v13463_v20  ;;  %v5246_v26 = vrot.slane %v5245_v25, 4  ;;  %v6776_v57 = vrot.slane %v6774_v42, 4  ;;  %v7311_v54 = vshll.u32 %v7161_v41, 16  ;;  %v7704_v41 = vld [vmem:[#allocation3 + $0x48] sm:$0xe] }
 0x331   : > { %5919 = vst.msk [vmem:[#allocation5 + $0x48] sm:$0xff] %vm13461_vm1, %v12546_v58  ;;  %5570 = vrot.lane.b32.xlu1 %v9421_v18, %s10091_s8  ;;  %v13466_v58 = vld [vmem:[#allocation11_spill] sm:$0xff]  ;;  %v9490_v28 = vrot.slane %v6660_v46, 9  ;;  %v6777_v53 = vrot.slane %v6662_v14, 5  ;;  %v6278_v22 = vor.u32 %v6277_v23, %v6274_v32  ;;  %v13468_v40 = vor.u32 %v13452_v0, %v13451_v11  ;;  %v6663_v24 = vld [vmem:[#allocation3 + $0x48] sm:$0xe] }
 0x332   : > { %6096 = vst.msk [vmem:[#allocation5 + $0x48] sm:$0xff] %vm13465_vm6, %v12498_v1  ;;  %v13467_v15 = vshll.u32 %v13466_v58, 16  ;;  %v5740_v1 = vrot.slane %v5738_v8, 4  ;;  %v7309_v31 = vrot.slane %v7308_v35, 4  ;;  %v6288_v43 = vor.u32 %v6287_v19, %v12647_v5  ;;  %6046 = vrot.lane.b32.xlu0 %v10060_v27, %s10092_s9  ;;  %v7163_v35 = vld [vmem:[#allocation3 + $0x58] sm:$0xf]  ;;  %vm13474_vm6 = vmmov %vm13457_vm3 }
 0x333   : > { %6641 = vst.msk [vmem:[#allocation5 + $0x48] sm:$0xff] %vm6631_vm11, %v12581_v7  ;;  %v5236_v37 = vrot.slane %v13468_v40, 4  ;;  %v9427_v6 = vrot.slane %v5620_v13, 9  ;;  %v5741_v33 = vrot.slane %v5622_v38, 5  ;;  %v7299_v55 = vrot.slane %v7298_v49, 4 }
 0x334   : > { %v5250_v45 = vrot.slane %v13467_v15, 5  ;;  %6962 = vst.msk [vmem:[#allocation5 + $0x48] sm:$0xff] %vm6952_vm9, %v12513_v21  ;;  %v7818_v48 = vrot.slane %v12674_v17, 5  ;;  %v6778_v0 = vsel %vm10238_vm14, %v6776_v57, %v6777_v53  ;;  %v7313_v7 = vrot.slane %v7311_v54, 5  ;;  %v6664_v18 = vld [vmem:[#allocation3 + $0x4c] sm:$0xf] }
 0x335   : > { %7140 = vst.msk [vmem:[#allocation5 + $0x48] sm:$0xff] %vm7130_vm10, %v12590_v36  ;;  %v6291_v60 = vshll.u32 %v6120_v12, 16  ;;  %5548 = vrot.lane.b32.xlu1 %v9410_v39, %s10091_s8  ;;  %v9474_v21 = vcombine.low %v6260_v2, %v6270_v59  ;;  %v6775_v3 = vsel %vm10238_vm14, %v9490_v28, %v6774_v42  ;;  %v5739_v36 = vsel %vm10238_vm14, %v9427_v6, %v5738_v8  ;;  %v7706_v42 = vld [vmem:[#allocation3 + $0x50] sm:$0x1]  ;;  %v12715_v44 = vld [vmem:[#allocation3 + $0x58] sm:$0xf] }
 0x336   : > { %v5251_v11 = vsel %vm10274_vm15, %v5246_v26, %v5250_v45  ;;  %v8021_v61 = vld [vmem:[#allocation5 + $0x40] sm:$0xff]  ;;  %v6279_v25 = vrot.slane %v6278_v22, 4  ;;  %v5241_v32 = vsel %vm10274_vm15, %v5236_v37, %v13455_v56  ;;  %v5742_v23 = vsel %vm10238_vm14, %v5740_v1, %v5741_v33  ;;  %v12717_v56 = vpop.permute.xlu0 %5885  ;;  %v7162_v50 = vld [vmem:[#allocation3 + $0x54] sm:$0xf]  ;;  %v6665_v20 = vld [vmem:[#allocation3 + $0x50] sm:$0x1] }
 0x337   : > { %9794 = vmatprep.mubr.msk.bf16.mxu1 %vm8072_vm4, %v8021_v61  ;;  %v7314_v34 = vsel %vm10274_vm15, %v7309_v31, %v7313_v7  ;;  %v6289_v9 = vrot.slane %v6288_v43, 4  ;;  %v9411_v46 = vcombine.low %v5241_v32, %v5251_v11  ;;  %v9506_v8 = vcombine.low %v6775_v3, %v6778_v0  ;;  %6591 = vrot.lane.b32.xlu0 %v9474_v21, %s10095_s12  ;;  %v5078_v30 = vld [vmem:[#allocation3 + $0x48] sm:$0xf]  ;;  %v7707_v17 = vld [vmem:[#allocation3 + $0x54] sm:$0xe]  ;;  %v12753_v32 = vpop.permute.xlu1 %6926 }
 0x338   : > { %v7304_v14 = vsel %vm10274_vm15, %v7299_v55, %v12601_v51  ;;  %v7820_v19 = vrot.slane %v7818_v48, 4  ;;  %v6293_v39 = vrot.slane %v6291_v60, 5  ;;  %v9554_v62 = vrot.slane %v7704_v41, 9  ;;  %v5079_v58 = vld [vmem:[#allocation3 + $0x4c] sm:$0xf] }
 0x339   : > { %v7325_v2 = vshll.u32 %v7163_v35, 16  ;;  %v7329_v13 = vshrl.u32 %v7163_v35, 16  ;;  %5550 = vrot.lane.b32.xlu1 %v9411_v46, %s10091_s8  ;;  %v9443_v38 = vcombine.low %v5739_v36, %v5742_v23  ;;  %v12721_v49 = vcombine.low %v7304_v14, %v7314_v34  ;;  %v7709_v45 = vld [vmem:[#allocation3 + $0x5c] sm:$0x1]  ;;  %v12738_v12 = vld [vmem:[#allocation3 + $0x4c] sm:$0xf] }
 0x33a   : > { %v6284_v51 = vsel %vm10274_vm15, %v6279_v25, %v12647_v5  ;;  %v7821_v63 = vrot.slane %v7706_v42, 5  ;;  %v6294_v59 = vsel %vm10274_vm15, %v6289_v9, %v6293_v39  ;;  %v12730_v26 = vsel %vm10238_vm14, %v9554_v62, %v7818_v48  ;;  %v10061_v1 = vld [vmem:[#allocation3 + $0x48] sm:$0xff]   ;;  %v12743_v33 = vpop.permute.xlu0 %7966  ;;  %v6121_v21 = vld [vmem:[#allocation3 + $0x54] sm:$0xf]  ;;  %v6122_v35 = vld [vmem:[#allocation3 + $0x58] sm:$0xf] }
 0x33b   : > { %v9491_v57 = vrot.slane %v6663_v24, 9  ;;  %v6781_v54 = vrot.slane %v6664_v18, 5  ;;  %v7825_v5 = vrot.slane %v12715_v44, 5  ;;  %v7316_v28 = vshrl.u32 %v7162_v50, 16  ;;  %6912 = vrot.lane.b32.xlu0 %v9506_v8, %s10101_s28  ;;  %v10062_v31 = vld [vmem:[#allocation3 + $0x48] sm:$0xff]  }
 0x33c   : > { %v12734_v15 = vsel %vm10238_vm14, %v7820_v19, %v7821_v63  ;;  %v7319_v53 = vshll.u32 %v7162_v50, 16  ;;  %v12740_v22 = vrot.slane %v7325_v2, 5  ;;  %v7331_v27 = vrot.slane %v7329_v13, 4  ;;  %v12749_v61 = vld [vmem:[#allocation3 + $0x48] sm:$0xe] }
 0x33d   : > { %v5253_v40 = vshrl.u32 %v5078_v30, 16  ;;  %v5256_v37 = vshll.u32 %v5078_v30, 16  ;;  %5871 = vrot.lane.b32.xlu1 %v9443_v38, %s10096_s13  ;;  %v9475_v43 = vcombine.low %v6284_v51, %v6294_v59  ;;  %v6784_v6 = vrot.slane %v6665_v20, 5  ;;  %v7164_v23 = vld [vmem:[#allocation3 + $0x5c] sm:$0x1] }
 0x33e   : > { %v5262_v55 = vshll.u32 %v5079_v58, 16  ;;  %v5266_v48 = vshrl.u32 %v5079_v58, 16  ;;  %v9570_v11 = vcombine.low %v12730_v26, %v12734_v15  ;;  %v6782_v0 = vsel %vm10238_vm14, %v9491_v57, %v6781_v54  ;;  %v5082_v18 = vld [vmem:[#allocation3 + $0x58] sm:$0xf]  ;;  %v12768_v63 = vpop.permute.xlu0 %6924  ;;  %v5081_v20 = vld [vmem:[#allocation3 + $0x54] sm:$0xf] }
 0x33f   : > { %v9555_v7 = vrot.slane %v7707_v17, 9  ;;  %v7828_v60 = vrot.slane %v7709_v45, 5  ;;  %v6783_v3 = vrot.slane %v6781_v54, 4  ;;  %v7827_v36 = vrot.slane %v7825_v5, 4  ;;  %7090 = vrot.lane.b32.xlu0 %v10061_v1, %s10098_s21  ;;  %v5625_v30 = vld [vmem:[#allocation3 + $0x50] sm:$0x1] }
 0x340   : > { %v5745_v25 = vrot.slane %v12738_v12, 5  ;;  %v7318_v41 = vrot.slane %v7316_v28, 4  ;;  %v7321_v34 = vrot.slane %v7319_v53, 5  ;;  %v7332_v9 = vor.u32 %v7331_v27, %v12740_v22  ;;  %v5080_v58 = vld [vmem:[#allocation3 + $0x50] sm:$0x1]  ;;  %v12774_v28 = vpop.permute.xlu1 %5883 }
 0x341   : > { %v5255_v42 = vrot.slane %v5253_v40, 4  ;;  %v5258_v24 = vrot.slane %v5256_v37, 5  ;;  %6048 = vrot.lane.b32.xlu1 %v10062_v31, %s10092_s9  ;;  %v12757_v46 = vrot.slane %v5262_v55, 5  ;;  %v5268_v8 = vrot.slane %v5266_v48, 4  ;;  %v6123_v48 = vld [vmem:[#allocation3 + $0x5c] sm:$0x1] }
 0x342   : > { %v6296_v14 = vshrl.u32 %v6121_v21, 16  ;;  %v6299_v19 = vshll.u32 %v6121_v21, 16  ;;  %v7826_v44 = vsel %vm10238_vm14, %v9555_v7, %v7825_v5  ;;  %v9428_v39 = vrot.slane %v12749_v61, 9 }
 0x343   : > { %v6305_v62 = vshll.u32 %v6122_v35, 16  ;;  %v6309_v50 = vshrl.u32 %v6122_v35, 16  ;;  %v6785_v2 = vsel %vm10238_vm14, %v6783_v3, %v6784_v6  ;;  %v7829_v13 = vsel %vm10238_vm14, %v7827_v36, %v7828_v60  ;;  %7635 = vrot.lane.b32.xlu0 %v12721_v49, %s10099_s22  ;;  %v5083_v35 = vld [vmem:[#allocation3 + $0x5c] sm:$0x1] }
 0x344   : > { %v5747_v38 = vrot.slane %v5745_v25, 4  ;;  %v7335_v51 = vshll.u32 %v7164_v23, 16  ;;  %v7322_v59 = vor.u32 %v7321_v34, %v7318_v41  ;;  %v5259_v26 = vor.u32 %v5258_v24, %v5255_v42  ;;  %v10065_v42 = vld [vmem:[#allocation3 + $0x54] sm:$0xff]  }
 0x345   : > { %v5286_v57 = vshll.u32 %v5082_v18, 16  ;;  %v5290_v54 = vshrl.u32 %v5082_v18, 16  ;;  %6593 = vrot.lane.b32.xlu1 %v9475_v43, %s10095_s12  ;;  %v7333_v17 = vrot.slane %v7332_v9, 4  ;;  %v5269_v15 = vor.u32 %v5268_v8, %v12757_v46 }
 0x346   : > { %v6298_v45 = vrot.slane %v6296_v14, 4  ;;  %v6301_v5 = vrot.slane %v6299_v19, 5  ;;  %v12776_v53 = vrot.slane %v6305_v62, 5  ;;  %v6311_v27 = vrot.slane %v6309_v50, 4  ;;  %v7166_v62 = vld [vmem:[#allocation3 + $0x64] sm:$0xf] }
 0x347   : > { %v5277_v40 = vshrl.u32 %v5081_v20, 16  ;;  %v5280_v49 = vshll.u32 %v5081_v20, 16  ;;  %v9507_v37 = vcombine.low %v6782_v0, %v6785_v2  ;;  %v9571_v1 = vcombine.low %v7826_v44, %v7829_v13  ;;  %7956 = vrot.lane.b32.xlu0 %v9570_v11, %s10100_s23  ;;  %v12786_v36 = vpop.permute.xlu0 %7106  ;;  %v12800_v44 = vld [vmem:[#allocation3 + $0x58] sm:$0xf] }
 0x348   : > { %v5748_v31 = vrot.slane %v5625_v30, 5  ;;  %v7337_v6 = vrot.slane %v7335_v51, 5  ;;  %v7323_v43 = vrot.slane %v7322_v59, 4  ;;  %v5272_v55 = vshll.u32 %v5080_v58, 16  ;;  %v12789_v9 = vpop.permute.xlu1 %6064  ;;  %v6124_v58 = vld [vmem:[#allocation3 + $0x60] sm:$0xf] }
 0x349   : > { %v12779_v7 = vrot.slane %v5286_v57, 5  ;;  %v5292_v60 = vrot.slane %v5290_v54, 4  ;;  %6914 = vrot.lane.b32.xlu1 %v9507_v37, %s10101_s28  ;;  %v5260_v0 = vrot.slane %v5259_v26, 4  ;;  %v6302_v3 = vor.u32 %v6301_v5, %v6298_v45  ;;  %v7165_v26 = vld [vmem:[#allocation3 + $0x60] sm:$0xf] }
 0x34a   : > { %v5749_v61 = vsel %vm10238_vm14, %v5747_v38, %v5748_v31  ;;  %v7338_v21 = vsel %vm10274_vm15, %v7333_v17, %v7337_v6  ;;  %v5270_v41 = vrot.slane %v5269_v15, 4  ;;  %v6312_v11 = vor.u32 %v6311_v27, %v12776_v53  ;;  %v10066_v6 = vld [vmem:[#allocation3 + $0x54] sm:$0xff]  }
 0x34b   : > { %v5279_v23 = vrot.slane %v5277_v40, 4  ;;  %v5282_v34 = vrot.slane %v5280_v49, 5  ;;  %v6315_v24 = vshll.u32 %v6123_v48, 16  ;;  %7958 = vrot.lane.b32.xlu0 %v9571_v1, %s10100_s23  ;;  %v5746_v8 = vsel %vm10238_vm14, %v9428_v39, %v5745_v25  ;;  %v12806_v25 = vld [vmem:[#allocation3 + $0x58] sm:$0xf]  ;;  %v12808_v39 = vpop.permute.xlu0 %7647 }
 0x34c   : > { %v7328_v14 = vsel %vm10274_vm15, %v7323_v43, %v12740_v22  ;;  %v5274_v19 = vrot.slane %v5272_v55, 5  ;;  %v5293_v18 = vor.u32 %v5292_v60, %v12779_v7  ;;  %v9444_v50 = vcombine.low %v5746_v8, %v5749_v61  ;;  %v6125_v22 = vld [vmem:[#allocation3 + $0x64] sm:$0xf]  ;;  %v12812_v59 = vpop.permute.xlu1 %6605  ;;  %v6668_v48 = vld [vmem:[#allocation3 + $0x5c] sm:$0x1] }
 0x34d   : > { %7092 = vrot.lane.b32.xlu1 %v10065_v42, %s10098_s21  ;;  %v9539_v2 = vcombine.low %v7328_v14, %v7338_v21  ;;  %v5265_v12 = vsel %vm10274_vm15, %v5260_v0, %v12757_v46  ;;  %v5296_v13 = vshll.u32 %v5083_v35, 16  ;;  %v6303_v51 = vrot.slane %v6302_v3, 4 }
 0x34e   : > { %v5275_v38 = vsel %vm10274_vm15, %v5270_v41, %v5274_v19  ;;  %v6313_v20 = vrot.slane %v6312_v11, 4  ;;  %v5283_v30 = vor.u32 %v5282_v34, %v5279_v23  ;;  %v6317_v57 = vrot.slane %v6315_v24, 5  ;;  %v5628_v41 = vld [vmem:[#allocation3 + $0x5c] sm:$0x1]  ;;  %v6666_v34 = vld [vmem:[#allocation3 + $0x54] sm:$0xe] }
 0x34f   : > { %v6788_v54 = vrot.slane %v12800_v44, 5  ;;  %v7349_v17 = vshll.u32 %v7166_v62, 16  ;;  %v7353_v46 = vshrl.u32 %v7166_v62, 16  ;;  %5873 = vrot.lane.b32.xlu0 %v9444_v50, %s10096_s13  ;;  %v5294_v15 = vrot.slane %v5293_v18, 4  ;;  %v6063_v37 = vpop.permute.xlu0 %6062  ;;  %v5626_v19 = vld [vmem:[#allocation3 + $0x54] sm:$0xe] }
 0x350   : > { %v5752_v45 = vrot.slane %v12806_v25, 5  ;;  %v6329_v5 = vshll.u32 %v6125_v22, 16  ;;  %v6333_v27 = vshrl.u32 %v6125_v22, 16  ;;  %v9412_v40 = vcombine.low %v5265_v12, %v5275_v38  ;;  %v12820_v60 = vpop.permute.xlu1 %7104 }
 0x351   : > { %7637 = vrot.lane.b32.xlu1 %v9539_v2, %s10099_s22  ;;  %v5298_v49 = vrot.slane %v5296_v13, 5  ;;  %v7340_v1 = vshrl.u32 %v7165_v26, 16  ;;  %v7343_v31 = vshll.u32 %v7165_v26, 16  ;;  %v6318_v43 = vsel %vm10274_vm15, %v6313_v20, %v6317_v57  ;;  %v7167_v13 = vld [vmem:[#allocation3 + $0x68] sm:$0x1] }
 0x352   : > { %v5284_v55 = vrot.slane %v5283_v30, 4  ;;  %v6320_v61 = vshrl.u32 %v6124_v58, 16  ;;  %v6323_v21 = vshll.u32 %v6124_v58, 16  ;;  %v6308_v0 = vsel %vm10274_vm15, %v6303_v51, %v12776_v53 }
 0x353   : > { %v6790_v3 = vrot.slane %v6788_v54, 4  ;;  %v12827_v11 = vrot.slane %v7349_v17, 5  ;;  %v7355_v35 = vrot.slane %v7353_v46, 4  ;;  %6050 = vrot.lane.b32.xlu0 %v10066_v6, %s10092_s9  ;;  %v5299_v23 = vsel %vm10274_vm15, %v5294_v15, %v5298_v49  ;;  %v6604_v50 = vpop.permute.xlu0 %6603  ;;  %v6126_v17 = vld [vmem:[#allocation3 + $0x68] sm:$0x1] }
 0x354   : > { %v5754_v42 = vrot.slane %v5752_v45, 4  ;;  %v12834_v24 = vrot.slane %v6329_v5, 5  ;;  %v6335_v8 = vrot.slane %v6333_v27, 4  ;;  %v9476_v53 = vcombine.low %v6308_v0, %v6318_v43  ;;  %6642 = vst.msk [vmem:[#allocation5 + $0x50] sm:$0xff] %vm6631_vm11, %v6604_v50  ;;  %v5565_v51 = vpop.permute.xlu1 %5564  ;;  %v12855_v15 = vld [vmem:[#allocation3 + $0x64] sm:$0xf] }
 0x355   : > { %5552 = vrot.lane.b32.xlu1 %v9412_v40, %s10091_s8  ;;  %v6791_v14 = vrot.slane %v6668_v48, 5  ;;  %v7342_v18 = vrot.slane %v7340_v1, 4  ;;  %v7345_v62 = vrot.slane %v7343_v31, 5  ;;  %v5289_v2 = vsel %vm10274_vm15, %v5284_v55, %v12779_v7  ;;  %6963 = vst.msk [vmem:[#allocation5 + $0x50] sm:$0xff] %vm6952_vm9, %v12768_v63  ;;  %v7169_v40 = vld [vmem:[#allocation3 + $0x70] sm:$0xf] }
 0x356   : > { %v5755_v12 = vrot.slane %v5628_v41, 5  ;;  %v6322_v22 = vrot.slane %v6320_v61, 4  ;;  %v6325_v38 = vrot.slane %v6323_v21, 5  ;;  %v9413_v20 = vcombine.low %v5289_v2, %v5299_v23  ;;  %5601 = vst.msk [vmem:[#allocation5 + $0x60] sm:$0xff] %vm5588_vm2, %v5565_v51  ;;  %v7712_v21 = vld [vmem:[#allocation3 + $0x68] sm:$0x1] }
 0x357   : > { %v9492_v30 = vrot.slane %v6666_v34, 9  ;;  %v6792_v26 = vsel %vm10238_vm14, %v6790_v3, %v6791_v14  ;;  %v7356_v57 = vor.u32 %v7355_v35, %v12827_v11  ;;  %6595 = vrot.lane.b32.xlu0 %v9476_v53, %s10095_s12  ;;  %v9429_v7 = vrot.slane %v5626_v19, 9  ;;  %7141 = vst.msk [vmem:[#allocation5 + $0x50] sm:$0xff] %vm7130_vm10, %v12562_v52  ;;  %v12865_v52 = vld [vmem:[#allocation3 + $0x64] sm:$0xf] }
 0x358   : > { %v5756_v46 = vsel %vm10238_vm14, %v5754_v42, %v5755_v12  ;;  %v6336_v58 = vor.u32 %v6335_v8, %v12834_v24  ;;  %5922 = vst.msk [vmem:[#allocation5 + $0x60] sm:$0xff] %vm13469_vm0, %v12717_v56  ;;  %v7346_v5 = vor.u32 %v7345_v62, %v7342_v18  ;;  %v7359_v27 = vshll.u32 %v7167_v13, 16  ;;  %v6671_v41 = vld [vmem:[#allocation3 + $0x68] sm:$0x1]  ;;  %v10068_v42 = vld [vmem:[#allocation3 + $0x60] sm:$0xff]  }
 0x359   : > { %5554 = vrot.lane.b32.xlu1 %v9413_v20, %s10091_s8  ;;  %v6789_v63 = vsel %vm10238_vm14, %v9492_v30, %v6788_v54  ;;  %7686 = vst.msk [vmem:[#allocation5 + $0x50] sm:$0xff] %vm7675_vm12, %v12808_v39  ;;  %v5753_v49 = vsel %vm10238_vm14, %v9429_v7, %v5752_v45  ;;  %v6326_v44 = vor.u32 %v6325_v38, %v6322_v22  ;;  %v6339_v1 = vshll.u32 %v6126_v17, 16  ;;  %v7646_v54 = vpop.permute.xlu1 %7645  ;;  %v7710_v14 = vld [vmem:[#allocation3 + $0x60] sm:$0xe] }
 0x35a   : > { %6099 = vst.msk [vmem:[#allocation5 + $0x60] sm:$0xff] %vm13470_vm8, %v6063_v37  ;;  %v9508_v56 = vcombine.low %v6789_v63, %v6792_v26  ;;  %v9445_v31 = vcombine.low %v5753_v49, %v5756_v46  ;;  %v7357_v6 = vrot.slane %v7356_v57, 4  ;;  %v7832_v39 = vrot.slane %v12855_v15, 5  ;;  %v7168_v37 = vld [vmem:[#allocation3 + $0x6c] sm:$0xf]  ;;  %vm13475_vm8 = vmmov %vm13457_vm3 }
 0x35b   : > { %8007 = vst.msk [vmem:[#allocation5 + $0x50] sm:$0xff] %vm7996_vm5, %v12681_v16  ;;  %v6337_v43 = vrot.slane %v6336_v58, 4  ;;  %v6795_v25 = vrot.slane %v12865_v52, 5  ;;  %v7373_v45 = vshll.u32 %v7169_v40, 16  ;;  %v7377_v55 = vshrl.u32 %v7169_v40, 16  ;;  %v10067_v16 = vld [vmem:[#allocation3 + $0x60] sm:$0xff]  }
 0x35c   : > { %7685 = vst.msk [vmem:[#allocation5 + $0x48] sm:$0xff] %vm7675_vm12, %v7646_v54  ;;  %6916 = vrot.lane.b32.xlu0 %v9508_v56, %s10101_s28  ;;  %v7347_v48 = vrot.slane %v7346_v5, 4  ;;  %v7361_v61 = vrot.slane %v7359_v27, 5  ;;  %v6327_v0 = vrot.slane %v6326_v44, 4  ;;  %v6341_v3 = vrot.slane %v6339_v1, 5  ;;  %v10070_v44 = vld [vmem:[#allocation3 + $0x6c] sm:$0xff]  }
 0x35d   : > { %8006 = vst.msk [vmem:[#allocation5 + $0x48] sm:$0xff] %vm7996_vm5, %v12743_v33  ;;  %5875 = vrot.lane.b32.xlu1 %v9445_v31, %s10096_s13  ;;  %v5563_v35 = vpop.permute.xlu1 %5562  ;;  %v7364_v23 = vshrl.u32 %v7168_v37, 16  ;;  %v7367_v34 = vshll.u32 %v7168_v37, 16  ;;  %v7834_v53 = vrot.slane %v7832_v39, 4  ;;  %v6797_v19 = vrot.slane %v6795_v25, 4 }
 0x35e   : > { %v7362_v8 = vsel %vm10274_vm15, %v7357_v6, %v7361_v61  ;;  %5600 = vst.msk [vmem:[#allocation5 + $0x58] sm:$0xff] %vm5588_vm2, %v5563_v35  ;;  %v6342_v33 = vsel %vm10274_vm15, %v6337_v43, %v6341_v3  ;;  %v7375_v18 = vrot.slane %v7373_v45, 5  ;;  %v7379_v62 = vrot.slane %v7377_v55, 4  ;;  %v6669_v12 = vld [vmem:[#allocation3 + $0x60] sm:$0xe] }
 0x35f   : > { %5921 = vst.msk [vmem:[#allocation5 + $0x58] sm:$0xff] %vm13471_vm13, %v12774_v28  ;;  %v7352_v50 = vsel %vm10274_vm15, %v7347_v48, %v12827_v11  ;;  %v7835_v2 = vrot.slane %v7712_v21, 5  ;;  %v6798_v13 = vrot.slane %v6671_v41, 5  ;;  %v6332_v38 = vsel %vm10274_vm15, %v6327_v0, %v12834_v24  ;;  %v12897_v28 = vpop.permute.xlu0 %7972  ;;  %v7714_v58 = vld [vmem:[#allocation3 + $0x70] sm:$0xf]  ;;  %vm13476_vm13 = vmmov %vm13469_vm0 }
 0x360   : > { %7094 = vrot.lane.b32.xlu0 %v10067_v16, %s10098_s21  ;;  %6098 = vst.msk [vmem:[#allocation5 + $0x58] sm:$0xff] %vm13457_vm3, %v12566_v29  ;;  %v9540_v22 = vcombine.low %v7352_v50, %v7362_v8  ;;  %v7366_v51 = vrot.slane %v7364_v23, 4  ;;  %v7369_v20 = vrot.slane %v7367_v34, 5  ;;  %v9477_v30 = vcombine.low %v6332_v38, %v6342_v33  ;;  %v7170_v29 = vld [vmem:[#allocation3 + $0x74] sm:$0x1] }
 0x361   : > { %6052 = vrot.lane.b32.xlu1 %v10068_v42, %s10092_s9  ;;  %6643 = vst.msk [vmem:[#allocation5 + $0x58] sm:$0xff] %vm6631_vm11, %v12812_v59  ;;  %v9556_v11 = vrot.slane %v7710_v14, 9  ;;  %v7836_v26 = vsel %vm10238_vm14, %v7834_v53, %v7835_v2  ;;  %vm13472_vm1 = vcmask 1041408   ;;  %v9493_v17 = vrot.slane %v6669_v12, 9  ;;  %v7715_v1 = vld [vmem:[#allocation3 + $0x74] sm:$0x1]  ;;  %v6931_v45 = vpop.permute.xlu1 %6930 }
 0x362   : > { %6964 = vst.msk [vmem:[#allocation5 + $0x58] sm:$0xff] %vm6952_vm9, %v12753_v32  ;;  %v8823_v24 = vsel %vm13472_vm1, %v12571_v10, 0  ;;  %v6799_v59 = vsel %vm10238_vm14, %v6797_v19, %v6798_v13  ;;  %v7380_v7 = vor.u32 %v7379_v62, %v7375_v18  ;;  %v8023_v46 = vld [vmem:[#allocation5 + $0x50] sm:$0xff]  ;;  %v7370_v63 = vor.u32 %v7369_v20, %v7366_v51  ;;  %v8286_v38 = vld [vmem:[#allocation2 + $0xc] sm:$0xf]  ;;  %vm13478_vm1 = vmmov %vm13469_vm0 }
 0x363   : > { %7142 = vst.msk [vmem:[#allocation5 + $0x58] sm:$0xff] %vm7130_vm10, %v12820_v60  ;;  %v7833_v32 = vsel %vm10238_vm14, %v9556_v11, %v7832_v39  ;;  %v6796_v15 = vsel %vm10238_vm14, %v9493_v17, %v6795_v25  ;;  %v7383_v5 = vshll.u32 %v7170_v29, 16  ;;  %v5890_v60 = vpop.permute.xlu0 %5889  ;;  %v7839_v40 = vrot.slane %v7714_v58, 5  ;;  %v7713_v6 = vld [vmem:[#allocation3 + $0x6c] sm:$0xe] }
 0x364   : > { %v8022_v57 = vld [vmem:[#allocation5 + $0x48] sm:$0xff]  ;;  %7639 = vrot.lane.b32.xlu0 %v9540_v22, %s10099_s22  ;;  %v9572_v10 = vcombine.low %v7833_v32, %v7836_v26  ;;  %v9509_v27 = vcombine.low %v6796_v15, %v6799_v59  ;;  %v7381_v52 = vrot.slane %v7380_v7, 4  ;;  %v7371_v56 = vrot.slane %v7370_v63, 4  ;;  %v8288_v58 = vld [vmem:[#allocation2 + $0x14] sm:$0x1] }
 0x365   : > { %9795 = vmatmul.mubr.msk.bf16.vlgmr.msra.gmra.mrb[0].mxu1 %vm8072_vm4, %v8022_v57  ;;  %6597 = vrot.lane.b32.xlu1 %v9477_v30, %s10095_s12  ;;  %v7385_v49 = vrot.slane %v7383_v5, 5  ;;  %v7841_v31 = vrot.slane %v7839_v40, 4  ;;  %v7842_v43 = vrot.slane %v7715_v1, 5  ;;  %v9557_v55 = vrot.slane %v7713_v6, 9  ;;  %v5888_v0 = vpop.permute.xlu1 %5887  ;;  %v8289_v57 = vld [vmem:[#allocation2 + $0x18] sm:$0xf] }
 0x366   : > { %9798 = vmatprep.mubr.msk.bf16.mxu1 %vm8072_vm4, %v8023_v46  ;;  %9811 = vmatpush3.bf16.msra.mxu1 %v8823_v24  ;;  %v7376_v39 = vsel %vm10274_vm15, %v7371_v56, %v7375_v18  ;;  %v8338_v30 = vshll.u32 %v8286_v38, 16  ;;  %v8290_v24 = vld [vmem:[#allocation2 + $0x1c] sm:$0xf]  ;;  %v8362_v15 = vshll.u32 %v8289_v57, 16  ;;  %v8291_v1 = vld [vmem:[#allocation2 + $0x20] sm:$0x1] }
 0x367   : > { %v7386_v54 = vsel %vm10274_vm15, %v7381_v52, %v7385_v49  ;;  %v7971_v37 = vpop.permute.xlu0 %7970  ;;  %v7843_v16 = vsel %vm10238_vm14, %v7841_v31, %v7842_v43  ;;  %v7840_v48 = vsel %vm10238_vm14, %v9557_v55, %v7839_v40  ;;  %vm13473_vm14 = vmmov %vm13469_vm0  ;;  %v8368_v63 = vshll.u32 %v8290_v24, 16  ;;  %v8292_v52 = vld [vmem:[#allocation2 + $0x24] sm:$0xf]  ;;  %v8293_v40 = vld [vmem:[#allocation2 + $0x28] sm:$0xf] }
 0x368   : > { %7960 = vrot.lane.b32.xlu0 %v9572_v10, %s10100_s23  ;;  %v9541_v25 = vcombine.low %v7376_v39, %v7386_v54  ;;  %v9573_v61 = vcombine.low %v7840_v48, %v7843_v16  ;;  %v8340_v7 = vrot.slane %v8338_v30, 5  ;;  %v8359_v10 = vshrl.u32 %v8289_v57, 16  ;;  %v8295_v54 = vld [vmem:[#allocation2 + $0x30] sm:$0xf]  ;;  %v8296_v43 = vld [vmem:[#allocation2 + $0x34] sm:$0xf] }
 0x369   : > { %6918 = vrot.lane.b32.xlu1 %v9509_v27, %s10101_s28  ;;  %v8372_v5 = vshrl.u32 %v8290_v24, 16  ;;  %v8364_v6 = vrot.slane %v8362_v15, 5  ;;  %v12976_v39 = vrot.slane %v8368_v63, 5  ;;  %v8386_v55 = vshll.u32 %v8292_v52, 16  ;;  %v8297_v24 = vld [vmem:[#allocation2 + $0x38] sm:$0x1] }
 0x36a   : > { %v8361_v31 = vrot.slane %v8359_v10, 4  ;;  %v8392_v16 = vshll.u32 %v8293_v40, 16  ;;  %v8396_v48 = vshrl.u32 %v8293_v40, 16  ;;  %v8301_v15 = vld [vmem:[#allocation2 + $0x48] sm:$0xf]  ;;  %v13479_v63 = vld [vmem:[#allocation7_spill] sm:$0xff] }
 0x36b   : > { %v6929_v21 = vpop.permute.xlu0 %6928 }
 0x36d   : > { %7096 = vrot.lane.b32.xlu1 %v10070_v44, %s10098_s21  ;;  %v8354_v44 = vshll.u32 %v8288_v58, 16  ;;  %s9640_s21 = sshll.u32 %s13503_s25, 8 }
 0x36e   : > { %s13212_s25 = scalar_lea.vmem %s13343_s7, %s9640_s21 }
 0x371   : > { %7641 = vrot.lane.b32.xlu1 %v9541_v25, %s10099_s22 }
 0x375   : > { %7962 = vrot.lane.b32.xlu1 %v9573_v61, %s10100_s23 }
 0x378   : > { %v7111_v3 = vpop.permute.xlu0 %7110 }
 0x379   : > { %v12932_v41 = vpop.permute.xlu1 %6068 }
 0x37c   : > { %v7652_v35 = vpop.permute.xlu0 %7651 }
 0x37d   : > { %v6610_v23 = vpop.permute.xlu1 %6609 }
 0x380   : > { %v6067_v34 = vpop.permute.xlu0 %6066 }
 0x381   : > { %v7109_v42 = vpop.permute.xlu1 %7108 }
 0x384   : > { %v6608_v8 = vpop.permute.xlu0 %6607 }
 0x385   : > { %6644 = vst.msk [vmem:[#allocation5 + $0x60] sm:$0xff] %vm6631_vm11, %v6608_v8  ;;  %v5569_v53 = vpop.permute.xlu1 %5568 }
 0x386   : > { %6965 = vst.msk [vmem:[#allocation5 + $0x60] sm:$0xff] %vm6952_vm9, %v6929_v21  ;;  %v8407_v21 = vshrl.u32 %v8295_v54, 16 }
 0x387   : > { %5603 = vst.msk [vmem:[#allocation5 + $0x70] sm:$0xff] %vm5588_vm2, %v5569_v53  ;;  %v8356_v53 = vrot.slane %v8354_v44, 5 }
 0x388   : > { %7143 = vst.msk [vmem:[#allocation5 + $0x60] sm:$0xff] %vm7130_vm10, %v12786_v36  ;;  %v7977_v4 = vpop.permute.xlu0 %7976 }
 0x389   : > { %5924 = vst.msk [vmem:[#allocation5 + $0x70] sm:$0xff] %vm13473_vm14, %v5890_v60  ;;  %v7650_v33 = vpop.permute.xlu1 %7649  ;;  %vm13480_vm14 = vmmov %vm13457_vm3 }
 0x38a   : > { %7688 = vst.msk [vmem:[#allocation5 + $0x60] sm:$0xff] %vm7675_vm12, %v7652_v35  ;;  %7687 = vst.msk [vmem:[#allocation5 + $0x58] sm:$0xff] %vm7675_vm12, %v7650_v33  ;;  %v8378_v35 = vshll.u32 %v8291_v1, 16  ;;  %v8426_v1 = vshll.u32 %v8297_v24, 16 }
 0x38b   : > { %6101 = vst.msk [vmem:[#allocation5 + $0x70] sm:$0xff] %vm13474_vm6, %v6067_v34  ;;  %v12946_v19 = vpop.f32.mrb[32].mxu0  ;;  %v8420_v34 = vshrl.u32 %v8296_v43, 16  ;;  %vm13482_vm6 = vmmov %vm13469_vm0 }
 0x38c   : > { %8009 = vst.msk [vmem:[#allocation5 + $0x60] sm:$0xff] %vm7996_vm5, %v12897_v28  ;;  %8008 = vst.msk [vmem:[#allocation5 + $0x58] sm:$0xff] %vm7996_vm5, %v7971_v37  ;;  %v7975_v14 = vpop.permute.xlu0 %7974  ;;  %v12948_v36 = vpop.f32.mrb[33].mxu0  ;;  %v8287_v28 = vld [vmem:[#allocation2 + $0x10] sm:$0xf]  ;;  %v8374_v37 = vrot.slane %v8372_v5, 4 }
 0x38d   : > { %v5567_v18 = vpop.permute.xlu1 %5566  ;;  %v12951_v62 = vpop.f32.mrb[34].mxu0  ;;  %v8344_v11 = vshll.u32 %v8287_v28, 16  ;;  %v8348_v26 = vshrl.u32 %v8287_v28, 16  ;;  %v8398_v28 = vrot.slane %v8396_v48, 4  ;;  %v12993_v57 = vrot.slane %v8378_v35, 5 }
 0x38e   : > { %5602 = vst.msk [vmem:[#allocation5 + $0x68] sm:$0xff] %vm5588_vm2, %v5567_v18  ;;  %v12954_v50 = vpop.f32.mrb[35].mxu0  ;;  %v8375_v33 = vor.u32 %v8374_v37, %v12976_v39  ;;  %v8302_v48 = vld [vmem:[#allocation2 + $0x4c] sm:$0xf] }
 0x38f   : > { %5923 = vst.msk [vmem:[#allocation5 + $0x68] sm:$0xff] %vm13469_vm0, %v5888_v0  ;;  %v12967_v46 = vrot.slane %v8344_v11, 5  ;;  %v8350_v32 = vrot.slane %v8348_v26, 4  ;;  %v8410_v0 = vshll.u32 %v8295_v54, 16  ;;  %vm13483_vm0 = vmmov %vm13457_vm3 }
 0x390   : > { %6100 = vst.msk [vmem:[#allocation5 + $0x68] sm:$0xff] %vm13475_vm8, %v12789_v9  ;;  %v6933_v2 = vpop.permute.xlu0 %6932  ;;  %v8335_v9 = vshrl.u32 %v8286_v38, 16  ;;  %v12983_v38 = vrot.slane %v8392_v16, 5  ;;  %vm13484_vm8 = vcmask 31744  }
 0x391   : > { %6645 = vst.msk [vmem:[#allocation5 + $0x68] sm:$0xff] %vm6631_vm11, %v6610_v23  ;;  %v12959_v12 = vpop.permute.xlu1 %6934  ;;  %v8351_v49 = vor.u32 %v8350_v32, %v12967_v46  ;;  %v8416_v23 = vshll.u32 %v8296_v43, 16  ;;  %v8412_v30 = vrot.slane %v8410_v0, 5  ;;  %v8300_v43 = vld [vmem:[#allocation2 + $0x44] sm:$0x1] }
 0x392   : > { %6966 = vst.msk [vmem:[#allocation5 + $0x68] sm:$0xff] %vm6952_vm9, %v6931_v45  ;;  %v8337_v59 = vrot.slane %v8335_v9, 4  ;;  %v8383_v45 = vshrl.u32 %v8292_v52, 16  ;;  %v8409_v9 = vrot.slane %v8407_v21, 4  ;;  %v8399_v52 = vor.u32 %v8398_v28, %v12983_v38  ;;  %v8303_v28 = vld [vmem:[#allocation2 + $0x50] sm:$0x1] }
 0x393   : > { %v8024_v13 = vld [vmem:[#allocation5 + $0x58] sm:$0xff]  ;;  %7144 = vst.msk [vmem:[#allocation5 + $0x68] sm:$0xff] %vm7130_vm10, %v7109_v42  ;;  %v8025_v22 = vld [vmem:[#allocation5 + $0x60] sm:$0xff]  ;;  %v8298_v42 = vld [vmem:[#allocation2 + $0x3c] sm:$0xf]  ;;  %v8352_v8 = vrot.slane %v8351_v49, 4 }
 0x394   : > { %9799 = vmatmul.mubr.msk.bf16.gmra.mrb[4].mxu1 %vm8072_vm4, %v8024_v13  ;;  %v7656_v51 = vpop.permute.xlu0 %7655  ;;  %v8341_v56 = vor.u32 %v8340_v7, %v8337_v59  ;;  %v8385_v13 = vrot.slane %v8383_v45, 4  ;;  %v8431_v11 = vshrl.u32 %v8298_v42, 16  ;;  %v8434_v26 = vshll.u32 %v8298_v42, 16  ;;  %v13477_v7 = vld [vmem:[#allocation6_spill] sm:$0xff] }
 0x395   : > { %9802 = vmatprep.mubr.msk.bf16.mxu1 %vm8072_vm4, %v8025_v22  ;;  %v5892_v20 = vpop.permute.xlu1 %5891  ;;  %v8388_v22 = vrot.slane %v8386_v55, 5  ;;  %v8422_v59 = vrot.slane %v8420_v34, 4  ;;  %v8357_v32 = vsel %vm10274_vm15, %v8352_v8, %v8356_v53  ;;  %v8413_v44 = vor.u32 %v8412_v30, %v8409_v9  ;;  %v8304_v34 = vld [vmem:[#allocation2 + $0x54] sm:$0xf] }
 0x396   : > { %v8433_v54 = vrot.slane %v8431_v11, 4  ;;  %v8400_v35 = vrot.slane %v8399_v52, 4  ;;  %v8428_v53 = vrot.slane %v8426_v1, 5  ;;  %v8482_v9 = vshll.u32 %v8304_v34, 16  ;;  %v8310_v52 = vld [vmem:[#allocation2 + $0x6c] sm:$0xf] }
 0x397   : > { %v8414_v8 = vrot.slane %v8413_v44, 4 }
 0x398   : > { %v6612_v29 = vpop.permute.xlu0 %6611 }
 0x399   : > { %6646 = vst.msk [vmem:[#allocation5 + $0x70] sm:$0xff] %vm6631_vm11, %v6612_v29 }
 0x39a   : > { %6967 = vst.msk [vmem:[#allocation5 + $0x70] sm:$0xff] %vm6952_vm9, %v6933_v2 }
 0x39b   : > { %v6614_v17 = vpop.permute.xlu1 %6613  ;;  %7145 = vst.msk [vmem:[#allocation5 + $0x70] sm:$0xff] %vm7130_vm10, %v7111_v3  ;;  %v8342_v3 = vrot.slane %v8341_v56, 4  ;;  %v13481_v56 = vld [vmem:[#allocation8_spill] sm:$0xff] }
 0x39c   : > { %7690 = vst.msk [vmem:[#allocation5 + $0x70] sm:$0xff] %vm7675_vm12, %v7656_v51  ;;  %v7955_v27 = vpop.permute.xlu0 %7954 }
 0x39d   : > { %8011 = vst.msk [vmem:[#allocation5 + $0x70] sm:$0xff] %vm7996_vm5, %v7977_v4  ;;  %8000 = vst.msk [vmem:[#allocation5 + $0x18] sm:$0xff] %vm7996_vm5, %v7955_v27  ;;  %v8365_v4 = vor.u32 %v8364_v6, %v8361_v31  ;;  %v8347_v29 = vsel %vm10274_vm15, %v8342_v3, %v12967_v46  ;;  %v8376_v27 = vrot.slane %v8375_v33, 4  ;;  %v8436_v31 = vrot.slane %v8434_v26, 5  ;;  %v8305_v33 = vld [vmem:[#allocation2 + $0x58] sm:$0xf] }
 0x39e   : > { %v9605_v6 = vcombine.low %v8347_v29, %v8357_v32  ;;  %v8488_v29 = vshll.u32 %v8305_v33, 16 }
 0x39f   : > { %v7654_v60 = vpop.permute.xlu1 %7653  ;;  %v8366_v58 = vrot.slane %v8365_v4, 4  ;;  %v8381_v0 = vsel %vm10274_vm15, %v8376_v27, %v12993_v57  ;;  %v8450_v4 = vshll.u32 %v8300_v43, 16  ;;  %v8492_v57 = vshrl.u32 %v8305_v33, 16  ;;  %v8314_v33 = vld [vmem:[#allocation2 + $0x7c] sm:$0xf] }
 0x3a0   : > { %7689 = vst.msk [vmem:[#allocation5 + $0x68] sm:$0xff] %vm7675_vm12, %v7654_v60  ;;  %v5870_v25 = vpop.permute.xlu0 %5869  ;;  %v8389_v60 = vor.u32 %v8388_v22, %v8385_v13  ;;  %v8468_v13 = vshrl.u32 %v8302_v48, 16 }
 0x3a1   : > { %8010 = vst.msk [vmem:[#allocation5 + $0x68] sm:$0xff] %vm7996_vm5, %v7975_v14  ;;  %v8299_v14 = vld [vmem:[#allocation2 + $0x40] sm:$0xf]  ;;  %v8371_v45 = vsel %vm10274_vm15, %v8366_v58, %v12976_v39  ;;  %v8437_v39 = vor.u32 %v8436_v31, %v8433_v54  ;;  %v13036_v32 = vrot.slane %v8450_v4, 5  ;;  %v8494_v44 = vrot.slane %v8492_v57, 4 }
 0x3a2   : > { %v8440_v10 = vshll.u32 %v8299_v14, 16  ;;  %v8444_v46 = vshrl.u32 %v8299_v14, 16  ;;  %v8390_v3 = vrot.slane %v8389_v60, 4  ;;  %v9606_v26 = vcombine.low %v8371_v45, %v8381_v0  ;;  %v8307_v58 = vld [vmem:[#allocation2 + $0x60] sm:$0xf] }
 0x3a3   : > { %v5571_v61 = vpop.permute.xlu1 %5570  ;;  %v8484_v60 = vrot.slane %v8482_v9, 5  ;;  %v8503_v1 = vshrl.u32 %v8307_v58, 16  ;;  %v8506_v54 = vshll.u32 %v8307_v58, 16  ;;  %v8313_v4 = vld [vmem:[#allocation2 + $0x78] sm:$0xf] }
 0x3a4   : > { %5604 = vst.msk [vmem:[#allocation5 + $0x78] sm:$0xff] %vm5588_vm2, %v5571_v61  ;;  %v6047_v18 = vpop.permute.xlu0 %6046  ;;  %v8016_v2 = vld [vmem:[#allocation5 + $0x18] sm:$0xff]  ;;  %v13016_v55 = vrot.slane %v8440_v10, 5  ;;  %v8446_v16 = vrot.slane %v8444_v46, 4  ;;  %v8458_v61 = vshll.u32 %v8301_v15, 16  ;;  %v8470_v46 = vrot.slane %v8468_v13, 4 }
 0x3a5   : > { %5925 = vst.msk [vmem:[#allocation5 + $0x78] sm:$0xff] %vm13476_vm13, %v5892_v20  ;;  %9783 = vmatmul.mubr.msk.bf16.gmra.mrb[36].mxu0 %vm8072_vm4, %v8016_v2  ;;  %v8294_v20 = vld [vmem:[#allocation2 + $0x2c] sm:$0x1]  ;;  %v8464_v2 = vshll.u32 %v8302_v48, 16  ;;  %v8311_v48 = vld [vmem:[#allocation2 + $0x70] sm:$0xf]  ;;  %vm13485_vm13 = vmmov %vm13484_vm8 }
 0x3a6   : > { %6102 = vst.msk [vmem:[#allocation5 + $0x78] sm:$0xff] %vm13457_vm3, %v12932_v41  ;;  %v8402_v40 = vshll.u32 %v8294_v20, 16  ;;  %v8447_v22 = vor.u32 %v8446_v16, %v13016_v55  ;;  %v8479_v20 = vshrl.u32 %v8304_v34, 16  ;;  %v8309_v34 = vld [vmem:[#allocation2 + $0x68] sm:$0x1]  ;;  %v8536_v13 = vshll.u32 %v8311_v48, 16  ;;  %vm13486_vm3 = vmmov %vm13484_vm8 }
 0x3a7   : > { %6647 = vst.msk [vmem:[#allocation5 + $0x78] sm:$0xff] %vm6631_vm11, %v6614_v17  ;;  %v5549_v51 = vpop.permute.xlu1 %5548  ;;  %v12995_v17 = vrot.slane %v8416_v23, 5  ;;  %v13042_v10 = vrot.slane %v8464_v2, 5 }
 0x3a8   : > { %6968 = vst.msk [vmem:[#allocation5 + $0x78] sm:$0xff] %vm6952_vm9, %v12959_v12  ;;  %v8026_v41 = vld [vmem:[#allocation5 + $0x68] sm:$0xff]  ;;  %v8027_v12 = vld [vmem:[#allocation5 + $0x70] sm:$0xff]  ;;  %v8404_v23 = vrot.slane %v8402_v40, 5 }
 0x3a9   : > { %5593 = vst.msk [vmem:[#allocation5 + $0x20] sm:$0xff] %vm5588_vm2, %v5549_v51  ;;  %9803 = vmatmul.mubr.msk.bf16.gmra.mrb[8].mxu1 %vm8072_vm4, %v8026_v41  ;;  %v6592_v5 = vpop.permute.xlu0 %6591  ;;  %v8423_v37 = vor.u32 %v8422_v59, %v12995_v17  ;;  %v8460_v51 = vrot.slane %v8458_v61, 5  ;;  %v8395_v41 = vsel %vm10274_vm15, %v8390_v3, %v12983_v38  ;;  %v8471_v16 = vor.u32 %v8470_v46, %v13042_v10 }
 0x3aa   : > { %7146 = vst.msk [vmem:[#allocation5 + $0x78] sm:$0xff] %vm7130_vm10, %v13477_v7  ;;  %9806 = vmatprep.mubr.msk.bf16.mxu1 %vm8072_vm4, %v8027_v12  ;;  %v8405_v59 = vsel %vm10274_vm15, %v8400_v35, %v8404_v23  ;;  %v8419_v7 = vsel %vm10274_vm15, %v8414_v8, %v12995_v17  ;;  %v13034_v12 = vrot.slane %v8437_v39, 4  ;;  %v8481_v17 = vrot.slane %v8479_v20, 4 }
 0x3ab   : > { %5914 = vst.msk [vmem:[#allocation5 + $0x20] sm:$0xff] %vm13478_vm1, %v5870_v25  ;;  %v5551_v49 = vpop.permute.xlu1 %5550  ;;  %v8455_v25 = vshrl.u32 %v8301_v15, 16  ;;  %v8424_v14 = vrot.slane %v8423_v37, 4  ;;  %v8474_v15 = vshll.u32 %v8303_v28, 16  ;;  %v8527_v61 = vshrl.u32 %v8310_v52, 16  ;;  %vm13487_vm1 = vmmov %vm13486_vm3 }
 0x3ac   : > { %7691 = vst.msk [vmem:[#allocation5 + $0x78] sm:$0xff] %vm7675_vm12, %v13479_v63  ;;  %v8308_v63 = vld [vmem:[#allocation2 + $0x64] sm:$0xf]  ;;  %v8443_v45 = vsel %vm10274_vm15, %v13034_v12, %v13016_v55  ;;  %v8485_v8 = vor.u32 %v8484_v60, %v8481_v17  ;;  %v8505_v55 = vrot.slane %v8503_v1, 4  ;;  %v8508_v39 = vrot.slane %v8506_v54, 5 }
 0x3ad   : > { %6091 = vst.msk [vmem:[#allocation5 + $0x20] sm:$0xff] %vm13480_vm14, %v6047_v18  ;;  %v6913_v21 = vpop.permute.xlu0 %6912  ;;  %v8457_v18 = vrot.slane %v8455_v25, 4  ;;  %v8429_v38 = vsel %vm10274_vm15, %v8424_v14, %v8428_v53  ;;  %v8512_v43 = vshll.u32 %v8308_v63, 16  ;;  %v8516_v25 = vshrl.u32 %v8308_v63, 16  ;;  %v8316_v60 = vld [vmem:[#allocation2 + $0x84] sm:$0xf]  ;;  %vm13488_vm14 = vmmov %vm13487_vm1 }
 0x3ae   : > { %8012 = vst.msk [vmem:[#allocation5 + $0x78] sm:$0xff] %vm7996_vm5, %v13481_v56  ;;  %v8306_v56 = vld [vmem:[#allocation2 + $0x5c] sm:$0x1]  ;;  %v13047_v37 = vcombine.low %v8419_v7, %v8429_v38  ;;  %v13060_v35 = vrot.slane %v8474_v15, 5  ;;  %v8472_v28 = vrot.slane %v8471_v16, 4  ;;  %v8529_v20 = vrot.slane %v8527_v61, 4 }
 0x3af   : > { %6636 = vst.msk [vmem:[#allocation5 + $0x20] sm:$0xff] %vm6631_vm11, %v6592_v5  ;;  %v5872_v42 = vpop.permute.xlu1 %5871  ;;  %v8448_v5 = vrot.slane %v8447_v22, 4  ;;  %v8461_v27 = vor.u32 %v8460_v51, %v8457_v18  ;;  %v8498_v23 = vshll.u32 %v8306_v56, 16  ;;  %v13065_v18 = vrot.slane %v8512_v43, 5  ;;  %v8312_v38 = vld [vmem:[#allocation2 + $0x74] sm:$0x1] }
 0x3b0   : > { %5594 = vst.msk [vmem:[#allocation5 + $0x28] sm:$0xff] %vm5588_vm2, %v5551_v49  ;;  %v13044_v49 = vrot.slane %v8488_v29, 5  ;;  %v8518_v2 = vrot.slane %v8516_v25, 4  ;;  %v8540_v22 = vshrl.u32 %v8311_v48, 16  ;;  %v8522_v51 = vshll.u32 %v8309_v34, 16 }
 0x3b1   : > { %6957 = vst.msk [vmem:[#allocation5 + $0x20] sm:$0xff] %vm6952_vm9, %v6913_v21  ;;  %v7091_v30 = vpop.permute.xlu0 %7090  ;;  %v8530_v21 = vshll.u32 %v8310_v52, 16  ;;  %v8453_v0 = vsel %vm10274_vm15, %v8448_v5, %v13036_v32  ;;  %v13058_v3 = vrot.slane %v8461_v27, 4  ;;  %v8564_v29 = vshrl.u32 %v8314_v33, 16  ;;  %v8317_v1 = vld [vmem:[#allocation2 + $0x88] sm:$0xf] }
 0x3b2   : > { %5915 = vst.msk [vmem:[#allocation5 + $0x28] sm:$0xff] %vm13482_vm6, %v5872_v42  ;;  %v8495_v53 = vor.u32 %v8494_v44, %v13044_v49  ;;  %v8509_v7 = vor.u32 %v8508_v39, %v8505_v55  ;;  %v9609_v32 = vcombine.low %v8443_v45, %v8453_v0  ;;  %v8519_v58 = vor.u32 %v8518_v2, %v13065_v18  ;;  %v8315_v45 = vld [vmem:[#allocation2 + $0x80] sm:$0x1] }
 0x3b3   : > { %7135 = vst.msk [vmem:[#allocation5 + $0x20] sm:$0xff] %vm7130_vm10, %v7091_v30  ;;  %v6049_v24 = vpop.permute.xlu1 %6048  ;;  %v8532_v9 = vrot.slane %v8530_v21, 5  ;;  %v8551_v30 = vshrl.u32 %v8313_v4, 16  ;;  %v13070_v46 = vrot.slane %v8536_v13, 5  ;;  %v8542_v15 = vrot.slane %v8540_v22, 4 }
 0x3b4   : > { %6092 = vst.msk [vmem:[#allocation5 + $0x28] sm:$0xff] %vm13483_vm0, %v6049_v24  ;;  %v8496_v24 = vrot.slane %v8495_v53, 4  ;;  %v8467_v63 = vsel %vm10274_vm15, %v13058_v3, %v13042_v10  ;;  %v8477_v5 = vsel %vm10274_vm15, %v8472_v28, %v13060_v35  ;;  %v13080_v27 = vrot.slane %v8522_v51, 5 }
 0x3b5   : > { %v8028_v11 = vld [vmem:[#allocation5 + $0x78] sm:$0xff]  ;;  %v7636_v40 = vpop.permute.xlu0 %7635  ;;  %v8533_v17 = vor.u32 %v8532_v9, %v8529_v20  ;;  %v8553_v52 = vrot.slane %v8551_v30, 4  ;;  %v8566_v44 = vrot.slane %v8564_v29, 4  ;;  %v13089_v43 = vrot.slane %v8509_v7, 4  ;;  %v8322_v20 = vld [vmem:[#allocation2 + $0x9c] sm:$0xf] }
 0x3b6   : > { %9807 = vmatmul.mubr.msk.bf16.gmra.mrb[12].mxu1 %vm8072_vm4, %v8028_v11  ;;  %7680 = vst.msk [vmem:[#allocation5 + $0x20] sm:$0xff] %vm7675_vm12, %v7636_v40  ;;  %v8554_v11 = vshll.u32 %v8313_v4, 16  ;;  %v8546_v25 = vshll.u32 %v8312_v38, 16  ;;  %v8520_v48 = vrot.slane %v8519_v58, 4  ;;  %v8543_v61 = vor.u32 %v8542_v15, %v13070_v46 }
 0x3b7   : > { %9812 = vmatprep.mubr.msk.bf16.mxu1 %vm13484_vm8, %v9605_v6  ;;  %v6594_v31 = vpop.permute.xlu1 %6593  ;;  %v9607_v6 = vcombine.low %v8395_v41, %v8405_v59  ;;  %v8560_v41 = vshll.u32 %v8314_v33, 16  ;;  %v8500_v59 = vrot.slane %v8498_v23, 5  ;;  %v8575_v21 = vshrl.u32 %v8316_v60, 16  ;;  %v8318_v33 = vld [vmem:[#allocation2 + $0x8c] sm:$0x1]  ;;  %vm13489_vm8 = vmmov %vm13487_vm1 }
 0x3b8   : > { %6637 = vst.msk [vmem:[#allocation5 + $0x28] sm:$0xff] %vm6631_vm11, %v6594_v31  ;;  %v8556_v40 = vrot.slane %v8554_v11, 5  ;;  %v8578_v0 = vshll.u32 %v8316_v60, 16  ;;  %v8588_v3 = vshrl.u32 %v8317_v1, 16  ;;  %v13098_v35 = vrot.slane %v8533_v17, 4 }
 0x3b9   : > { %v7957_v42 = vpop.permute.xlu0 %7956  ;;  %v13082_v56 = vrot.slane %v8560_v41, 5  ;;  %v8570_v34 = vshll.u32 %v8315_v45, 16  ;;  %v9610_v53 = vcombine.low %v8467_v63, %v8477_v5  ;;  %v8515_v39 = vsel %vm10274_vm15, %v13089_v43, %v13065_v18  ;;  %v8323_v18 = vld [vmem:[#allocation2 + $0xa0] sm:$0xf] }
 0x3ba   : > { %8001 = vst.msk [vmem:[#allocation5 + $0x20] sm:$0xff] %vm7996_vm5, %v7957_v42  ;;  %v8557_v23 = vor.u32 %v8556_v40, %v8553_v52  ;;  %v8319_v42 = vld [vmem:[#allocation2 + $0x90] sm:$0xf]  ;;  %v8548_v4 = vrot.slane %v8546_v25, 5  ;;  %v8525_v13 = vsel %vm10274_vm15, %v8520_v48, %v13080_v27  ;;  %v8544_v22 = vrot.slane %v8543_v61, 4 }
 0x3bb   : > { %v6915_v14 = vpop.permute.xlu1 %6914  ;;  %v8577_v28 = vrot.slane %v8575_v21, 4  ;;  %v8580_v51 = vrot.slane %v8578_v0, 5  ;;  %v8590_v30 = vrot.slane %v8588_v3, 4  ;;  %v8599_v11 = vshrl.u32 %v8319_v42, 16  ;;  %v8324_v25 = vld [vmem:[#allocation2 + $0xa4] sm:$0x1] }
 0x3bc   : > { %6958 = vst.msk [vmem:[#allocation5 + $0x28] sm:$0xff] %vm6952_vm9, %v6915_v14  ;;  %v8320_v14 = vld [vmem:[#allocation2 + $0x94] sm:$0xf]  ;;  %v8602_v41 = vshll.u32 %v8319_v42, 16  ;;  %v8539_v29 = vsel %vm10274_vm15, %v13098_v35, %v13070_v46  ;;  %v8626_v58 = vshll.u32 %v8322_v20, 16  ;;  %v8549_v15 = vsel %vm10274_vm15, %v8544_v22, %v8548_v4 }
 0x3bd   : > { %v7959_v57 = vpop.permute.xlu0 %7958  ;;  %v8608_v7 = vshll.u32 %v8320_v14, 16  ;;  %v8594_v63 = vshll.u32 %v8318_v33, 16  ;;  %v8632_v46 = vshll.u32 %v8323_v18, 16  ;;  %v8636_v5 = vshrl.u32 %v8323_v18, 16  ;;  %v8328_v33 = vld [vmem:[#allocation2 + $0xb4] sm:$0xf] }
 0x3be   : > { %9813 = vmatmul.mubr.msk.bf16.vlgmr.msra.gmra.mrb[16].mxu1 %vm13485_vm13, %v9606_v26  ;;  %v8486_v26 = vrot.slane %v8485_v8, 4  ;;  %vm13490_vm13 = vmmov %vm13487_vm1  ;;  %v8581_v17 = vor.u32 %v8580_v51, %v8577_v28  ;;  %v8601_v52 = vrot.slane %v8599_v11, 4  ;;  %v8604_v40 = vrot.slane %v8602_v41, 5 }
 0x3bf   : > { %9816 = vmatprep.mubr.msk.bf16.mxu1 %vm13486_vm3, %v9607_v6  ;;  %v7093_v12 = vpop.permute.xlu1 %7092  ;;  %v8501_v6 = vsel %vm10274_vm15, %v8496_v24, %v8500_v59  ;;  %v8572_v24 = vrot.slane %v8570_v34, 5  ;;  %v9613_v61 = vcombine.low %v8539_v29, %v8549_v15  ;;  %v8596_v21 = vrot.slane %v8594_v63, 5  ;;  %v8326_v34 = vld [vmem:[#allocation2 + $0xac] sm:$0xf]  ;;  %vm13492_vm3 = vmmov %vm13487_vm1 }
 0x3c0   : > { %7136 = vst.msk [vmem:[#allocation5 + $0x28] sm:$0xff] %vm7130_vm10, %v7093_v12  ;;  %v8491_v10 = vsel %vm10274_vm15, %v8486_v26, %v13044_v49  ;;  %v8584_v49 = vshll.u32 %v8317_v1, 16  ;;  %v8612_v12 = vshrl.u32 %v8320_v14, 16  ;;  %v13133_v0 = vrot.slane %v8632_v46, 5  ;;  %v8329_v14 = vld [vmem:[#allocation2 + $0xb8] sm:$0xf] }
 0x3c1   : > { %v5874_v54 = vpop.permute.xlu0 %5873  ;;  %v8017_v31 = vld [vmem:[#allocation5 + $0x20] sm:$0xff]  ;;  %v9611_v55 = vcombine.low %v8491_v10, %v8501_v6  ;;  %v13130_v6 = vrot.slane %v8608_v7, 5  ;;  %v8582_v3 = vrot.slane %v8581_v17, 4  ;;  %v8656_v28 = vshll.u32 %v8326_v34, 16 }
 0x3c2   : > { %9786 = vmatprep.mubr.msk.bf16.mxu0 %vm8072_vm4, %v8017_v31  ;;  %v13109_v9 = vrot.slane %v8584_v49, 5  ;;  %v8321_v31 = vld [vmem:[#allocation2 + $0x98] sm:$0x1]  ;;  %v8614_v43 = vrot.slane %v8612_v12, 4  ;;  %v8638_v49 = vrot.slane %v8636_v5, 4  ;;  %v8660_v51 = vshrl.u32 %v8326_v34, 16 }
 0x3c3   : > { %v7638_v16 = vpop.permute.xlu1 %7637  ;;  %v8671_v18 = vshrl.u32 %v8328_v33, 16  ;;  %v8674_v29 = vshll.u32 %v8328_v33, 16  ;;  %v8327_v5 = vld [vmem:[#allocation2 + $0xb0] sm:$0x1] }
 0x3c4   : > { %7681 = vst.msk [vmem:[#allocation5 + $0x28] sm:$0xff] %vm7675_vm12, %v7638_v16  ;;  %v8591_v60 = vor.u32 %v8590_v30, %v13109_v9  ;;  %v8628_v16 = vrot.slane %v8626_v58, 5  ;;  %v8662_v63 = vrot.slane %v8660_v51, 4 }
 0x3c5   : > { %8002 = vst.msk [vmem:[#allocation5 + $0x28] sm:$0xff] %vm7996_vm5, %v7959_v57  ;;  %v6051_v8 = vpop.permute.xlu0 %6050  ;;  %v8558_v57 = vrot.slane %v8557_v23, 4  ;;  %v8605_v23 = vor.u32 %v8604_v40, %v8601_v52  ;;  %v8673_v17 = vrot.slane %v8671_v18, 4 }
 0x3c6   : > { %9817 = vmatmul.mubr.msk.bf16.gmra.mrb[20].mxu1 %vm13487_vm1, %v13047_v37  ;;  %v8567_v37 = vor.u32 %v8566_v44, %v13082_v56  ;;  %v9612_v44 = vcombine.low %v8515_v39, %v8525_v13  ;;  %v8592_v35 = vrot.slane %v8591_v60, 4  ;;  %v8642_v39 = vshll.u32 %v8324_v25, 16  ;;  %vm13493_vm1 = vmmov %vm13483_vm0 }
 0x3c7   : > { %9820 = vmatprep.mubr.msk.bf16.mxu1 %vm13488_vm14, %v9609_v32  ;;  %v5553_v2 = vpop.permute.xlu1 %5552  ;;  %v8623_v32 = vshrl.u32 %v8322_v20, 16  ;;  %v8563_v1 = vsel %vm10274_vm15, %v8558_v57, %v13082_v56  ;;  %v8325_v56 = vld [vmem:[#allocation2 + $0xa8] sm:$0xf]  ;;  %v8639_v13 = vor.u32 %v8638_v49, %v13133_v0  ;;  %vm13494_vm14 = vmmov %vm13492_vm3  ;;  %v8587_v20 = vsel %vm10274_vm15, %v8582_v3, %v13109_v9 }
 0x3c8   : > { %5595 = vst.msk [vmem:[#allocation5 + $0x30] sm:$0xff] %vm5588_vm2, %v5553_v2  ;;  %v8568_v26 = vrot.slane %v8567_v37, 4  ;;  %v8618_v37 = vshll.u32 %v8321_v31, 16  ;;  %v8647_v4 = vshrl.u32 %v8325_v56, 16  ;;  %v8650_v22 = vshll.u32 %v8325_v56, 16 }
 0x3c9   : > { %5916 = vst.msk [vmem:[#allocation5 + $0x30] sm:$0xff] %vm13482_vm6, %v5874_v54  ;;  %v6596_v59 = vpop.permute.xlu0 %6595  ;;  %v8625_v45 = vrot.slane %v8623_v32, 4  ;;  %v8597_v30 = vsel %vm10274_vm15, %v8592_v35, %v8596_v21  ;;  %v8606_v11 = vrot.slane %v8605_v23, 4  ;;  %v8680_v57 = vshll.u32 %v8329_v14, 16 }
 0x3ca   : > { %6093 = vst.msk [vmem:[#allocation5 + $0x30] sm:$0xff] %vm13483_vm0, %v6051_v8  ;;  %v8573_v54 = vsel %vm10274_vm15, %v8568_v26, %v8572_v24  ;;  %v8620_v41 = vrot.slane %v8618_v37, 5  ;;  %v8684_v26 = vshrl.u32 %v8329_v14, 16  ;;  %v8644_v12 = vrot.slane %v8642_v39, 5  ;;  %vm13500_vm0 = vmmov %vm13492_vm3 }
 0x3cb   : > { %6638 = vst.msk [vmem:[#allocation5 + $0x30] sm:$0xff] %vm6631_vm11, %v6596_v59  ;;  %v5555_v38 = vpop.permute.xlu1 %5554  ;;  %v9614_v42 = vcombine.low %v8563_v1, %v8573_v54  ;;  %v8649_v32 = vrot.slane %v8647_v4, 4  ;;  %v8652_v15 = vrot.slane %v8650_v22, 5  ;;  %v8658_v9 = vrot.slane %v8656_v28, 5  ;;  %v8333_v22 = vld [vmem:[#allocation2 + $0xc8] sm:$0x1] }
 0x3cc   : > { %5596 = vst.msk [vmem:[#allocation5 + $0x38] sm:$0xff] %vm5588_vm2, %v5555_v38  ;;  %v8018_v27 = vld [vmem:[#allocation5 + $0x28] sm:$0xff]  ;;  %vm13491_vm2 = vmmov %vm13482_vm6  ;;  %v8640_v38 = vrot.slane %v8639_v13, 4  ;;  %v9615_v46 = vcombine.low %v8587_v20, %v8597_v30  ;;  %v8676_v60 = vrot.slane %v8674_v29, 5  ;;  %v8682_v52 = vrot.slane %v8680_v57, 5 }
 0x3cd   : > { %9787 = vmatmul.mubr.msk.bf16.gmra.mrb[40].mxu0 %vm8072_vm4, %v8018_v27  ;;  %v8331_v27 = vld [vmem:[#allocation2 + $0xc0] sm:$0xf]  ;;  %v8686_v40 = vrot.slane %v8684_v26, 4  ;;  %v8611_v54 = vsel %vm10274_vm15, %v8606_v11, %v13130_v6  ;;  %vm13496_vm6 = vmmov %vm13492_vm3  ;;  %v8714_v18 = vshll.u32 %v8333_v22, 16 }
 0x3ce   : > { %9821 = vmatmul.mubr.msk.bf16.gmra.mrb[24].mxu1 %vm13489_vm8, %v9610_v53  ;;  %v6917_v10 = vpop.permute.xlu0 %6916  ;;  %v8615_v53 = vor.u32 %v8614_v43, %v13130_v6  ;;  %v8330_v43 = vld [vmem:[#allocation2 + $0xbc] sm:$0x1]  ;;  %v8695_v6 = vshrl.u32 %v8331_v27, 16  ;;  %v8698_v21 = vshll.u32 %v8331_v27, 16  ;;  %v8677_v56 = vor.u32 %v8676_v60, %v8673_v17  ;;  %v13188_v17 = vld [vmem:[%s13340_s4] ss:$0 sm:$0xff] }
 0x3cf   : > { %9824 = vmatprep.mubr.msk.bf16.mxu1 %vm13490_vm13, %v9611_v55  ;;  %6959 = vst.msk [vmem:[#allocation5 + $0x30] sm:$0xff] %vm6952_vm9, %v6917_v10  ;;  %v5876_v48 = vpop.permute.xlu1 %5875  ;;  %v8629_v55 = vor.u32 %v8628_v16, %v8625_v45  ;;  %v8645_v45 = vsel %vm10274_vm15, %v8640_v38, %v8644_v12  ;;  %v8653_v16 = vor.u32 %v8652_v15, %v8649_v32  ;;  %v8690_v35 = vshll.u32 %v8330_v43, 16 }
 0x3d0   : > { %5917 = vst.msk [vmem:[#allocation5 + $0x38] sm:$0xff] %vm13491_vm2, %v5876_v48  ;;  %v8616_v59 = vrot.slane %v8615_v53, 4  ;;  %v8663_v48 = vor.u32 %v8662_v63, %v8658_v9  ;;  %v8687_v3 = vor.u32 %v8686_v40, %v8682_v52  ;;  %v8700_v39 = vrot.slane %v8698_v21, 5 }
 0x3d1   : > { %v8630_v7 = vrot.slane %v8629_v55, 4  ;;  %v8697_v55 = vrot.slane %v8695_v6, 4  ;;  %v8678_v14 = vrot.slane %v8677_v56, 4  ;;  %v8692_v13 = vrot.slane %v8690_v35, 5 }
 0x3d2   : > { %v7095_v8 = vpop.permute.xlu0 %7094  ;;  %v8621_v31 = vsel %vm10274_vm15, %v8616_v59, %v8620_v41  ;;  %v8716_v32 = vrot.slane %v8714_v18, 5  ;;  %v8171_v47 = vadd.f32 %v12951_v62, %v13188_v17  ;;  %v8163_v60 = vadd.f32 %v13188_v17, %v12954_v50 }
 0x3d3   : > { %7137 = vst.msk [vmem:[#allocation5 + $0x30] sm:$0xff] %vm7130_vm10, %v7095_v8  ;;  %v6053_v2 = vpop.permute.xlu1 %6052  ;;  %v8635_v10 = vsel %vm10274_vm15, %v8630_v7, %v13133_v0  ;;  %v9616_v23 = vcombine.low %v8611_v54, %v8621_v31  ;;  %v8664_v8 = vrot.slane %v8663_v48, 4  ;;  %v8701_v11 = vor.u32 %v8700_v39, %v8697_v55 }
 0x3d4   : > { %6094 = vst.msk [vmem:[#allocation5 + $0x38] sm:$0xff] %vm13493_vm1, %v6053_v2  ;;  %v9617_v34 = vcombine.low %v8635_v10, %v8645_v45  ;;  %v8688_v2 = vrot.slane %v8687_v3, 4  ;;  %v8683_v29 = vsel %vm10274_vm15, %v8678_v14, %v8682_v52  ;;  %v13197_v52 = vld [vmem:[%s13342_s6] ss:$0 sm:$0xff]  ;;  %v8168_v40 = vadd.f32 %v12946_v19, %v13188_v17 }
 0x3d5   : > { %v8702_v7 = vrot.slane %v8701_v11, 4  ;;  %v9861_v62 = vadd.f32 %v13197_v52, %v8171_v47  ;;  %v9864_v50 = vadd.f32 %v13197_v52, %v8163_v60 }
 0x3d6   : > { %9825 = vmatmul.mubr.msk.bf16.gmra.mrb[28].mxu1 %vm13492_vm3, %v9612_v44  ;;  %v7640_v24 = vpop.permute.xlu0 %7639  ;;  %v8332_v44 = vld [vmem:[#allocation2 + $0xc4] sm:$0xf]  ;;  %v8693_v57 = vsel %vm10274_vm15, %v8688_v2, %v8692_v13 }
 0x3d7   : > { %9828 = vmatprep.mubr.msk.bf16.mxu1 %vm13494_vm14, %v9613_v61  ;;  %7682 = vst.msk [vmem:[#allocation5 + $0x30] sm:$0xff] %vm7675_vm12, %v7640_v24  ;;  %v6598_v58 = vpop.permute.xlu1 %6597  ;;  %v8666_v61 = vshll.u32 %v8327_v5, 16  ;;  %v8704_v49 = vshll.u32 %v8332_v44, 16  ;;  %v8708_v0 = vshrl.u32 %v8332_v44, 16  ;;  %v9619_v59 = vcombine.low %v8683_v29, %v8693_v57 }
 0x3d8   : > { %6639 = vst.msk [vmem:[#allocation5 + $0x38] sm:$0xff] %vm6631_vm11, %v6598_v58  ;;  %vm13495_vm11 = vmmov %vm13492_vm3  ;;  %v8160_v44 = vadd.f32 %v13188_v17, %v12948_v36 }
 0x3d9   : > { %v8668_v53 = vrot.slane %v8666_v61, 5  ;;  %v8706_v4 = vrot.slane %v8704_v49, 5  ;;  %v8710_v33 = vrot.slane %v8708_v0, 4 }
 0x3da   : > { %v7961_v1 = vpop.permute.xlu0 %7960 }
 0x3db   : > { %8003 = vst.msk [vmem:[#allocation5 + $0x30] sm:$0xff] %vm7996_vm5, %v7961_v1  ;;  %v6919_v25 = vpop.permute.xlu1 %6918  ;;  %v8669_v30 = vsel %vm10274_vm15, %v8664_v8, %v8668_v53  ;;  %v8711_v41 = vor.u32 %v8710_v33, %v8706_v4  ;;  %v8707_v58 = vsel %vm10274_vm15, %v8702_v7, %v8706_v4 }
 0x3dc   : > { %6960 = vst.msk [vmem:[#allocation5 + $0x38] sm:$0xff] %vm6952_vm9, %v6919_v25  ;;  %vm13497_vm9 = vmmov %vm13492_vm3 }
 0x3dd   : > { %v8712_v12 = vrot.slane %v8711_v41, 4 }
 0x3de   : > { %9829 = vmatmul.mubr.msk.bf16.gmra.mrb[0].mxu1 %vm13495_vm11, %v9614_v42  ;;  %v8654_v42 = vrot.slane %v8653_v16, 4 }
 0x3df   : > { %9832 = vmatprep.mubr.msk.bf16.mxu1 %vm13496_vm6, %v9615_v46  ;;  %v7097_v37 = vpop.permute.xlu1 %7096  ;;  %v8717_v38 = vsel %vm10274_vm15, %v8712_v12, %v8716_v32 }
 0x3e0   : > { %7138 = vst.msk [vmem:[#allocation5 + $0x38] sm:$0xff] %vm7130_vm10, %v7097_v37  ;;  %v8659_v20 = vsel %vm10274_vm15, %v8654_v42, %v8658_v9  ;;  %vm13498_vm10 = vmmov %vm13492_vm3  ;;  %v9620_v9 = vcombine.low %v8707_v58, %v8717_v38 }
 0x3e1   : > { %v9618_v24 = vcombine.low %v8659_v20, %v8669_v30 }
 0x3e2   : > { %v8019_v28 = vld [vmem:[#allocation5 + $0x30] sm:$0xff] }
 0x3e3   : > { %v7642_v51 = vpop.permute.xlu1 %7641  ;;  %9790 = vmatprep.mubr.msk.bf16.mxu0 %vm8072_vm4, %v8019_v28 }
 0x3e4   : > { %7683 = vst.msk [vmem:[#allocation5 + $0x38] sm:$0xff] %vm7675_vm12, %v7642_v51  ;;  %vm13499_vm12 = vmmov %vm13492_vm3 }
 0x3e6   : > { %9833 = vmatmul.mubr.msk.bf16.gmra.mrb[4].mxu1 %vm13497_vm9, %v9616_v23 }
 0x3e7   : > { %9836 = vmatprep.mubr.msk.bf16.mxu1 %vm13498_vm10, %v9617_v34  ;;  %v7963_v26 = vpop.permute.xlu1 %7962 }
 0x3e8   : > { %8004 = vst.msk [vmem:[#allocation5 + $0x38] sm:$0xff] %vm7996_vm5, %v7963_v26  ;;  %vm13501_vm5 = vmmov %vm13500_vm0 }
 0x3ee   : > { %9837 = vmatmul.mubr.msk.bf16.gmra.mrb[8].mxu1 %vm13499_vm12, %v9618_v24 }
 0x3ef   : > { %9840 = vmatprep.mubr.msk.bf16.mxu1 %vm13500_vm0, %v9619_v59  ;;  %v8020_v15 = vld [vmem:[#allocation5 + $0x38] sm:$0xff] }
 0x3f0   : > { %9791 = vmatmul.mubr.msk.bf16.gmra.mrb[44].mxu0 %vm8072_vm4, %v8020_v15 }
 0x3f6   : > { %9841 = vmatmul.mubr.msk.bf16.gmra.mrb[12].mxu1 %vm13501_vm5, %v9620_v9 }
 0x478   : > { %v9784_v63 = vpop.f32.mrb[36].mxu0 }
 0x479   : > { %v8175_v46 = vpop.f32.mrb[37].mxu0  ;;  %v8184_v25 = vadd.f32 %v9784_v63, %v13188_v17 }
 0x47a   : > { %v9785_v5 = vpop.f32.mrb[38].mxu0  ;;  %v8176_v19 = vadd.f32 %v13188_v17, %v8175_v46 }
 0x47b   : > { %v8178_v27 = vpop.f32.mrb[39].mxu0  ;;  %v8187_v6 = vadd.f32 %v9785_v5, %v13188_v17  ;;  %v9867_v35 = vadd.f32 %v13197_v52, %v8184_v25 }
 0x47c   : > { %v8179_v0 = vadd.f32 %v13188_v17, %v8178_v27  ;;  %v9870_v37 = vadd.f32 %v13197_v52, %v8176_v19 }
 0x47d   : > { %v9873_v8 = vadd.f32 %v13197_v52, %v8187_v6 }
 0x47e   : > { %v9876_v39 = vadd.f32 %v13197_v52, %v8179_v0 }
 0x491   : > { %v9814_v1 = vpop.f32.mrb[16].mxu1 }
 0x492   : > { %v9855_v54 = vadd.f32 %v9814_v1, %v8168_v40  ;;  %v8859_v31 = vpop.f32.mrb[17].mxu1 }
 0x493   : > { %v9858_v10 = vadd.f32 %v8859_v31, %v8160_v44  ;;  %v9815_v43 = vpop.f32.mrb[18].mxu1  ;;  %v13261_v31 = vadd.f32 %v13197_v52, %v13188_v17 }
 0x494   : > { %v9856_v45 = vadd.f32 %v9855_v54, %v13197_v52  ;;  %v9862_v16 = vadd.f32 %v9861_v62, %v9815_v43  ;;  %v8862_v48 = vpop.f32.mrb[19].mxu1 }
 0x495   : > { %v9859_v36 = vadd.f32 %v9858_v10, %v13197_v52  ;;  %v9865_v61 = vadd.f32 %v9864_v50, %v8862_v48 }
 0x496   : > { %v9020_v21 = vmax.f32 %v9856_v45, 0.0  ;;  %v9021_v49 = vmax.f32 %v9862_v16, 0.0 }
 0x497   : > { %v9018_v56 = vmax.f32 %v9859_v36, 0.0  ;;  %v9019_v3 = vmax.f32 %v9865_v61, 0.0 }
 0x498   : > { %9052 = vst.msk [vmem:[%s13212_s25 + $0x10] sm:$0xff] %vm5043_vm7, %v9020_v21  ;;  %9053 = vst.msk [vmem:[%s13212_s25 + $0x18] sm:$0xff] %vm5043_vm7, %v9021_v49 }
 0x499   : > { %9050 = vst.msk [vmem:[%s13212_s25] sm:$0xff] %vm5043_vm7, %v9018_v56  ;;  %9051 = vst.msk [vmem:[%s13212_s25 + $0x8] sm:$0xff] %vm5043_vm7, %v9019_v3  ;;  %v9818_v23 = vpop.f32.mrb[20].mxu1 }
 0x49a   : > { %v9868_v34 = vadd.f32 %v9867_v35, %v9818_v23  ;;  %v8875_v42 = vpop.f32.mrb[21].mxu1 }
 0x49b   : > { %v9871_v53 = vadd.f32 %v9870_v37, %v8875_v42  ;;  %v9819_v55 = vpop.f32.mrb[22].mxu1 }
 0x49c   : > { %v9024_v4 = vmax.f32 %v9868_v34, 0.0  ;;  %v9874_v33 = vadd.f32 %v9873_v8, %v9819_v55  ;;  %v8878_v14 = vpop.f32.mrb[23].mxu1 }
 0x49d   : > { %v9022_v2 = vmax.f32 %v9871_v53, 0.0  ;;  %v9877_v13 = vadd.f32 %v9876_v39, %v8878_v14 }
 0x49e   : > { %9056 = vst.msk [vmem:[%s13212_s25 + $0x30] sm:$0xff] %vm5043_vm7, %v9024_v4  ;;  %v9025_v22 = vmax.f32 %v9874_v33, 0.0 }
 0x49f   : > { %9054 = vst.msk [vmem:[%s13212_s25 + $0x20] sm:$0xff] %vm5043_vm7, %v9022_v2  ;;  %v9023_v28 = vmax.f32 %v9877_v13, 0.0 }
 0x4a0   : > { %9057 = vst.msk [vmem:[%s13212_s25 + $0x38] sm:$0xff] %vm5043_vm7, %v9025_v22  ;;  %v9788_v30 = vpop.f32.mrb[40].mxu0 }
 0x4a1   : > { %9055 = vst.msk [vmem:[%s13212_s25 + $0x28] sm:$0xff] %vm5043_vm7, %v9023_v28  ;;  %v9822_v51 = vpop.f32.mrb[24].mxu1  ;;  %v8200_v41 = vadd.f32 %v9788_v30, %v13188_v17  ;;  %v8191_v18 = vpop.f32.mrb[41].mxu0 }
 0x4a2   : > { %v8891_v20 = vpop.f32.mrb[25].mxu1  ;;  %v8192_v57 = vadd.f32 %v13188_v17, %v8191_v18  ;;  %v9789_v26 = vpop.f32.mrb[42].mxu0 }
 0x4a3   : > { %v9823_v11 = vpop.f32.mrb[26].mxu1  ;;  %v9879_v24 = vadd.f32 %v13197_v52, %v8200_v41  ;;  %v8203_v59 = vadd.f32 %v9789_v26, %v13188_v17  ;;  %v8194_v7 = vpop.f32.mrb[43].mxu0 }
 0x4a4   : > { %v8894_v29 = vpop.f32.mrb[27].mxu1  ;;  %v9882_v12 = vadd.f32 %v13197_v52, %v8192_v57  ;;  %v8195_v32 = vadd.f32 %v13188_v17, %v8194_v7 }
 0x4a5   : > { %v9880_v58 = vadd.f32 %v9879_v24, %v9822_v51  ;;  %v9885_v38 = vadd.f32 %v13197_v52, %v8203_v59 }
 0x4a6   : > { %v9883_v15 = vadd.f32 %v9882_v12, %v8891_v20  ;;  %v9888_v9 = vadd.f32 %v13197_v52, %v8195_v32 }
 0x4a7   : > { %v9028_v46 = vmax.f32 %v9880_v58, 0.0  ;;  %v9886_v5 = vadd.f32 %v9885_v38, %v9823_v11 }
 0x4a8   : > { %v9026_v47 = vmax.f32 %v9883_v15, 0.0  ;;  %v9889_v60 = vadd.f32 %v9888_v9, %v8894_v29 }
 0x4a9   : > { %v13245_v63 = vpop.f32.mrb[28].mxu1  ;;  %9060 = vst.msk [vmem:[%s13212_s25 + $0x50] sm:$0xff] %vm5043_vm7, %v9028_v46  ;;  %v9029_v44 = vmax.f32 %v9886_v5, 0.0 }
 0x4aa   : > { %v13247_v27 = vpop.f32.mrb[29].mxu1  ;;  %9058 = vst.msk [vmem:[%s13212_s25 + $0x40] sm:$0xff] %vm5043_vm7, %v9026_v47  ;;  %v9027_v54 = vmax.f32 %v9889_v60, 0.0 }
 0x4ab   : > { %v13249_v40 = vpop.f32.mrb[30].mxu1  ;;  %9061 = vst.msk [vmem:[%s13212_s25 + $0x58] sm:$0xff] %vm5043_vm7, %v9029_v44 }
 0x4ac   : > { %v13253_v1 = vpop.f32.mrb[31].mxu1  ;;  %9059 = vst.msk [vmem:[%s13212_s25 + $0x48] sm:$0xff] %vm5043_vm7, %v9027_v54 }
 0x4b1   : > { %v9830_v62 = vpop.f32.mrb[0].mxu1 }
 0x4b2   : > { %v9903_v10 = vadd.f32 %v13261_v31, %v9830_v62  ;;  %v8923_v43 = vpop.f32.mrb[1].mxu1 }
 0x4b3   : > { %v9905_v50 = vadd.f32 %v13261_v31, %v8923_v43  ;;  %v9831_v25 = vpop.f32.mrb[2].mxu1 }
 0x4b4   : > { %v9036_v45 = vmax.f32 %v9903_v10, 0.0  ;;  %v9907_v16 = vadd.f32 %v13261_v31, %v9831_v25  ;;  %v8926_v48 = vpop.f32.mrb[3].mxu1 }
 0x4b5   : > { %v9034_v19 = vmax.f32 %v9905_v50, 0.0  ;;  %v9909_v36 = vadd.f32 %v13261_v31, %v8926_v48 }
 0x4b6   : > { %9068 = vst.msk [vmem:[%s13212_s25 + $0x90] sm:$0xff] %vm5043_vm7, %v9036_v45  ;;  %v9037_v61 = vmax.f32 %v9907_v16, 0.0 }
 0x4b7   : > { %9066 = vst.msk [vmem:[%s13212_s25 + $0x80] sm:$0xff] %vm5043_vm7, %v9034_v19  ;;  %v9035_v6 = vmax.f32 %v9909_v36, 0.0 }
 0x4b8   : > { %9069 = vst.msk [vmem:[%s13212_s25 + $0x98] sm:$0xff] %vm5043_vm7, %v9037_v61 }
 0x4b9   : > { %9067 = vst.msk [vmem:[%s13212_s25 + $0x88] sm:$0xff] %vm5043_vm7, %v9035_v6  ;;  %v9834_v21 = vpop.f32.mrb[4].mxu1 }
 0x4ba   : > { %v9911_v49 = vadd.f32 %v13261_v31, %v9834_v21  ;;  %v8939_v0 = vpop.f32.mrb[5].mxu1 }
 0x4bb   : > { %v9913_v56 = vadd.f32 %v13261_v31, %v8939_v0  ;;  %v9835_v3 = vpop.f32.mrb[6].mxu1 }
 0x4bc   : > { %v9040_v35 = vmax.f32 %v9911_v49, 0.0  ;;  %v9915_v23 = vadd.f32 %v13261_v31, %v9835_v3  ;;  %v8942_v37 = vpop.f32.mrb[7].mxu1 }
 0x4bd   : > { %v9038_v34 = vmax.f32 %v9913_v56, 0.0  ;;  %v9917_v42 = vadd.f32 %v13261_v31, %v8942_v37 }
 0x4be   : > { %9072 = vst.msk [vmem:[%s13212_s25 + $0xb0] sm:$0xff] %vm5043_vm7, %v9040_v35  ;;  %v9041_v8 = vmax.f32 %v9915_v23, 0.0 }
 0x4bf   : > { %9070 = vst.msk [vmem:[%s13212_s25 + $0xa0] sm:$0xff] %vm5043_vm7, %v9038_v34  ;;  %v9039_v53 = vmax.f32 %v9917_v42, 0.0 }
 0x4c0   : > { %9073 = vst.msk [vmem:[%s13212_s25 + $0xb8] sm:$0xff] %vm5043_vm7, %v9041_v8 }
 0x4c1   : > { %9071 = vst.msk [vmem:[%s13212_s25 + $0xa8] sm:$0xff] %vm5043_vm7, %v9039_v53  ;;  %v9838_v55 = vpop.f32.mrb[8].mxu1 }
 0x4c2   : > { %v9919_v39 = vadd.f32 %v13261_v31, %v9838_v55  ;;  %v8955_v4 = vpop.f32.mrb[9].mxu1 }
 0x4c3   : > { %v9921_v33 = vadd.f32 %v13261_v31, %v8955_v4  ;;  %v9839_v14 = vpop.f32.mrb[10].mxu1  ;;  %v9792_v30 = vpop.f32.mrb[44].mxu0 }
 0x4c4   : > { %v9044_v2 = vmax.f32 %v9919_v39, 0.0  ;;  %v9923_v13 = vadd.f32 %v13261_v31, %v9839_v14  ;;  %v8958_v22 = vpop.f32.mrb[11].mxu1  ;;  %v8216_v41 = vadd.f32 %v9792_v30, %v13188_v17  ;;  %v8207_v18 = vpop.f32.mrb[45].mxu0 }
 0x4c5   : > { %v9042_v28 = vmax.f32 %v9921_v33, 0.0  ;;  %v9925_v51 = vadd.f32 %v13261_v31, %v8958_v22  ;;  %v8208_v29 = vadd.f32 %v13188_v17, %v8207_v18  ;;  %v9793_v57 = vpop.f32.mrb[46].mxu0 }
 0x4c6   : > { %9076 = vst.msk [vmem:[%s13212_s25 + $0xd0] sm:$0xff] %vm5043_vm7, %v9044_v2  ;;  %v9045_v20 = vmax.f32 %v9923_v13, 0.0  ;;  %v9891_v26 = vadd.f32 %v13197_v52, %v8216_v41  ;;  %v8219_v24 = vadd.f32 %v9793_v57, %v13188_v17  ;;  %v8210_v59 = vpop.f32.mrb[47].mxu0 }
 0x4c7   : > { %9074 = vst.msk [vmem:[%s13212_s25 + $0xc0] sm:$0xff] %vm5043_vm7, %v9042_v28  ;;  %v9043_v11 = vmax.f32 %v9925_v51, 0.0  ;;  %v9894_v12 = vadd.f32 %v13197_v52, %v8208_v29  ;;  %v8211_v32 = vadd.f32 %v13188_v17, %v8210_v59 }
 0x4c8   : > { %9077 = vst.msk [vmem:[%s13212_s25 + $0xd8] sm:$0xff] %vm5043_vm7, %v9045_v20  ;;  %v9892_v15 = vadd.f32 %v9891_v26, %v13245_v63  ;;  %v9897_v9 = vadd.f32 %v13197_v52, %v8219_v24 }
 0x4c9   : > { %9075 = vst.msk [vmem:[%s13212_s25 + $0xc8] sm:$0xff] %vm5043_vm7, %v9043_v11  ;;  %v9842_v7 = vpop.f32.mrb[12].mxu1  ;;  %v9895_v47 = vadd.f32 %v9894_v12, %v13247_v27  ;;  %v9900_v60 = vadd.f32 %v13197_v52, %v8211_v32 }
 0x4ca   : > { %v9927_v58 = vadd.f32 %v13261_v31, %v9842_v7  ;;  %v8971_v38 = vpop.f32.mrb[13].mxu1  ;;  %v9032_v62 = vmax.f32 %v9892_v15, 0.0  ;;  %v9898_v63 = vadd.f32 %v9897_v9, %v13249_v40 }
 0x4cb   : > { %v9929_v46 = vadd.f32 %v13261_v31, %v8971_v38  ;;  %v9843_v5 = vpop.f32.mrb[14].mxu1  ;;  %v9030_v50 = vmax.f32 %v9895_v47, 0.0  ;;  %v9901_v27 = vadd.f32 %v9900_v60, %v13253_v1 }
 0x4cc   : > { %v9048_v44 = vmax.f32 %v9927_v58, 0.0  ;;  %v9931_v17 = vadd.f32 %v13261_v31, %v9843_v5  ;;  %v8974_v54 = vpop.f32.mrb[15].mxu1  ;;  %9064 = vst.msk [vmem:[%s13212_s25 + $0x70] sm:$0xff] %vm5043_vm7, %v9032_v62  ;;  %v9033_v25 = vmax.f32 %v9898_v63, 0.0 }
 0x4cd   : > { %v9046_v10 = vmax.f32 %v9929_v46, 0.0  ;;  %v9933_v43 = vadd.f32 %v13261_v31, %v8974_v54  ;;  %9062 = vst.msk [vmem:[%s13212_s25 + $0x60] sm:$0xff] %vm5043_vm7, %v9030_v50  ;;  %v9031_v16 = vmax.f32 %v9901_v27, 0.0 }
 0x4ce   : > { %9080 = vst.msk [vmem:[%s13212_s25 + $0xf0] sm:$0xff] %vm5043_vm7, %v9048_v44  ;;  %v9049_v52 = vmax.f32 %v9931_v17, 0.0  ;;  %9065 = vst.msk [vmem:[%s13212_s25 + $0x78] sm:$0xff] %vm5043_vm7, %v9033_v25 }
 0x4cf   : > { %9078 = vst.msk [vmem:[%s13212_s25 + $0xe0] sm:$0xff] %vm5043_vm7, %v9046_v10  ;;  %v9047_v45 = vmax.f32 %v9933_v43, 0.0  ;;  %9063 = vst.msk [vmem:[%s13212_s25 + $0x68] sm:$0xff] %vm5043_vm7, %v9031_v16 }
 0x4d0   : > { %9081 = vst.msk [vmem:[%s13212_s25 + $0xf8] sm:$0xff] %vm5043_vm7, %v9049_v52 }
 0x4d1   : > { %9079 = vst.msk [vmem:[%s13212_s25 + $0xe8] sm:$0xff] %vm5043_vm7, %v9047_v45 }
 0x4d2 PF: > { %s17_s24 = sadd.s32 1, %s10087_s24  }
 0x4d3   : > { %p14_p4 = scmp.ge.s32.totalorder %s17_s24, 4  }
 0x4d5   :  { %16 = sbr.rel (!%p14_p4) target bundleno = 1 (0x1), region = 84 }

</bundles_post_ra>
